<compile_context>
chip_gen: v7x
topology: tpu7x:2x2x1
jax: 0.10.0
libtpu: 0.0.40
codegen_flags: <defaults>
</compile_context>

<pallas_src>
import jax
import jax.numpy as jnp
from jax.experimental import pallas as pl
from jax.experimental.pallas import tpu as pltpu


# ---------------------------------------------------------------------------
# In-kernel helpers (operate on traced values; all ops are iota/compare/where,
# 2-D dots, elementwise and lane-axis reductions — robust Mosaic lowerings).
# ---------------------------------------------------------------------------
def _one_hot_shift(lin, lout, stride, k):
    """(lin, lout) f32 matrix S with S[l, j] = 1 iff l == stride*j + k."""
    r = jax.lax.broadcasted_iota(jnp.int32, (lin, lout), 0)
    c = jax.lax.broadcasted_iota(jnp.int32, (lin, lout), 1)
    return jnp.where(r == stride * c + k, 1.0, 0.0).astype(jnp.float32)


def _conv_layer(xs, w, bias, k_size, stride, relu):
    """Per-sample Conv1d.  xs: list of (Cin, Lin); w: (Cout, K*Cin) packed so
    that w[:, k*Cin:(k+1)*Cin] == W[:, :, k]; bias: (Cout, 1)."""
    cin, lin = xs[0].shape
    cout = w.shape[0]
    lout = (lin - k_size) // stride + 1
    sels = None
    if not (k_size == 1 and stride == 1):
        sels = [_one_hot_shift(lin, lout, stride, k) for k in range(k_size)]
    outs = []
    for x in xs:
        if sels is None:                       # 1x1 conv: plain channel mix
            acc = jnp.dot(w, x, preferred_element_type=jnp.float32)
        else:
            acc = jnp.zeros((cout, lout), jnp.float32)
            for k in range(k_size):
                xk = jnp.dot(x, sels[k], preferred_element_type=jnp.float32)
                acc = acc + jnp.dot(w[:, k * cin:(k + 1) * cin], xk,
                                    preferred_element_type=jnp.float32)
        acc = acc + bias
        if relu:
            acc = jnp.maximum(acc, 0.0)
        outs.append(acc)
    return outs


def _maxpool3(xs, stride):
    """Per-sample MaxPool1d(kernel_size=3, stride=stride)."""
    _, lin = xs[0].shape
    lout = (lin - 3) // stride + 1
    sels = [_one_hot_shift(lin, lout, stride, k) for k in range(3)]
    outs = []
    for x in xs:
        taps = [jnp.dot(x, s, preferred_element_type=jnp.float32) for s in sels]
        outs.append(jnp.maximum(jnp.maximum(taps[0], taps[1]), taps[2]))
    return outs


def _batchnorm(xs, gamma, beta, eps=1e-5):
    """Training-mode BatchNorm1d over the whole batch (biased variance)."""
    n = len(xs) * xs[0].shape[1]
    total = xs[0].sum(axis=1, keepdims=True)
    for x in xs[1:]:
        total = total + x.sum(axis=1, keepdims=True)
    mean = total * (1.0 / n)
    ssq = ((xs[0] - mean) ** 2).sum(axis=1, keepdims=True)
    for x in xs[1:]:
        ssq = ssq + ((x - mean) ** 2).sum(axis=1, keepdims=True)
    inv = jax.lax.rsqrt(ssq * (1.0 / n) + eps)
    return [(x - mean) * inv * gamma + beta for x in xs]


# ---------------------------------------------------------------------------
# The single fused kernel
# ---------------------------------------------------------------------------
def _fused_forward_kernel(
        cols1_ref, w1_ref, b1_ref, g1_ref, be1_ref,
        w2_ref, b2_ref, g2_ref, be2_ref,
        w3_ref, b3_ref, w4_ref, b4_ref, w5_ref, b5_ref,
        fc1w_ref, fc1b_ref, fc2w_ref, fc2b_ref,
        out_ref):
    batch = out_ref.shape[0]

    # conv1 (Cin=1, k=5, s=2): taps pre-extracted in the wrapper -> one matmul.
    w1 = w1_ref[...]                                    # (4, 5)
    b1 = b1_ref[...]                                    # (4, 1)
    xs = [jnp.dot(w1, cols1_ref[b], preferred_element_type=jnp.float32) + b1
          for b in range(batch)]                        # each (4, 510)

    xs = _batchnorm(xs, g1_ref[...], be1_ref[...])      # BatchNorm1d(4)
    xs = _maxpool3(xs, stride=2)                        # (4, 254)

    xs = _conv_layer(xs, w2_ref[...], b2_ref[...], 5, 2, False)   # (8, 125)
    xs = _batchnorm(xs, g2_ref[...], be2_ref[...])                # BatchNorm1d(8)
    xs = _maxpool3(xs, stride=2)                                  # (8, 62)

    xs = _conv_layer(xs, w3_ref[...], b3_ref[...], 3, 2, True)    # (8, 30)
    xs = _conv_layer(xs, w4_ref[...], b4_ref[...], 1, 1, True)    # (16, 30)
    xs = _conv_layer(xs, w5_ref[...], b5_ref[...], 1, 1, True)    # (16, 30)
    xs = _maxpool3(xs, stride=1)                                  # (16, 28)

    # Head: flatten (channel-major) + Linear(448,64)+ReLU + Linear(64,nout).
    # The flatten is folded into a per-channel sum of (1,28)@(28,64) matmuls.
    fc1b = fc1b_ref[...]                                # (1, 64)
    fc2w = fc2w_ref[...]                                # (64, nout)
    fc2b = fc2b_ref[...]                                # (1, nout)
    for b in range(batch):
        y = xs[b]                                       # (16, 28)
        h = fc1b
        for c in range(y.shape[0]):
            h = h + jnp.dot(y[c:c + 1, :], fc1w_ref[c],
                            preferred_element_type=jnp.float32)
        h = jnp.maximum(h, 0.0)
        o = jnp.dot(h, fc2w, preferred_element_type=jnp.float32) + fc2b
        out_ref[b:b + 1, :] = o


# ---------------------------------------------------------------------------
# Wrapper: weight repacking + conv1 tap extraction + one pallas_call
# ---------------------------------------------------------------------------
def aco_alexnet_forward(x, p):
    x = x.astype(jnp.float32)
    batch, length = x.shape                 # length must be 1024 -> 448 flat feats
    l1 = (length - 5) // 2 + 1              # 510

    # conv1 tap extraction (Cin == 1): five stride-2 slices of the raw input,
    # ~20 KB total — cheap input-side preprocessing, keeps the kernel gather-free.
    taps = [jax.lax.slice(x, (0, k), (batch, k + 2 * (l1 - 1) + 1), (1, 2))
            for k in range(5)]
    cols1 = jnp.stack(taps, axis=1)         # (B, 5, 510)

    col = lambda v: v.reshape(-1, 1)
    # pack conv weights as (Cout, K*Cin) with w[:, k*Cin:(k+1)*Cin] == W[:,:,k]
    pack = lambda w: jnp.transpose(w, (0, 2, 1)).reshape(w.shape[0], -1)
    nout = p["fc2_w"].shape[1]

    args = (
        cols1,
        p["w1"].reshape(4, 5), col(p["b1"]), col(p["bn1_g"]), col(p["bn1_b"]),
        pack(p["w2"]), col(p["b2"]), col(p["bn2_g"]), col(p["bn2_b"]),
        pack(p["w3"]), col(p["b3"]),
        p["w4"].reshape(16, 8), col(p["b4"]),
        p["w5"].reshape(16, 16), col(p["b5"]),
        p["fc1_w"].reshape(16, 28, 64), p["fc1_b"].reshape(1, 64),
        p["fc2_w"], p["fc2_b"].reshape(1, nout),
    )

    vmem = pl.BlockSpec(memory_space=pltpu.MemorySpace.VMEM)
    return pl.pallas_call(
        _fused_forward_kernel,
        out_shape=jax.ShapeDtypeStruct((batch, nout), jnp.float32),
        in_specs=[vmem] * len(args),
        out_specs=vmem,
    )(*args)


# ---------------------------------------------------------------------------
# Parameters (deterministic, PyTorch-like uniform(-1/sqrt(fan_in), ...))
# ---------------------------------------------------------------------------
def init_params(key, fc_outputs):
    ks = jax.random.split(key, 14)

    def u(k, shape, fan_in):
        bound = 1.0 / (fan_in ** 0.5)
        return jax.random.uniform(k, shape, jnp.float32, -bound, bound)

    p = {}
    p["w1"] = u(ks[0], (4, 1, 5), 1 * 5);    p["b1"] = u(ks[1], (4,), 1 * 5)
    p["bn1_g"] = jnp.ones((4,), jnp.float32); p["bn1_b"] = jnp.zeros((4,), jnp.float32)
    p["w2"] = u(ks[2], (8, 4, 5), 4 * 5);    p["b2"] = u(ks[3], (8,), 4 * 5)
    p["bn2_g"] = jnp.ones((8,), jnp.float32); p["bn2_b"] = jnp.zeros((8,), jnp.float32)
    p["w3"] = u(ks[4], (8, 8, 3), 8 * 3);    p["b3"] = u(ks[5], (8,), 8 * 3)
    p["w4"] = u(ks[6], (16, 8, 1), 8);       p["b4"] = u(ks[7], (16,), 8)
    p["w5"] = u(ks[8], (16, 16, 1), 16);     p["b5"] = u(ks[9], (16,), 16)
    p["fc1_w"] = u(ks[10], (448, 64), 448);  p["fc1_b"] = u(ks[11], (1, 64), 448)
    p["fc2_w"] = u(ks[12], (64, fc_outputs), 64)
    p["fc2_b"] = u(ks[13], (1, fc_outputs), 64)
    return p


if __name__ == "__main__":
    FC_OUTPUTS = 10
    key = jax.random.PRNGKey(0)
    k_x, k_p = jax.random.split(key)
    # Input length 1024 is required so the flattened conv features == 448
    # (fc1's in_features), exactly as the PyTorch module implies.
    x = jax.random.normal(k_x, (2, 1024), jnp.float32)
    params = init_params(k_p, FC_OUTPUTS)

    fwd = jax.jit(aco_alexnet_forward)
    out = jax.block_until_ready(fwd(x, params))
    assert out.shape == (2, FC_OUTPUTS), out.shape
    print("KERNEL_OK")
</pallas_src>

<mosaic_0001>
module attributes {stable_mosaic.version = 11 : i64} {
  func.func @_fused_forward_kernel(%arg0: memref<2x5x510xf32, #tpu.memory_space<vmem>>, %arg1: memref<4x5xf32, #tpu.memory_space<vmem>>, %arg2: memref<4x1xf32, #tpu.memory_space<vmem>>, %arg3: memref<4x1xf32, #tpu.memory_space<vmem>>, %arg4: memref<4x1xf32, #tpu.memory_space<vmem>>, %arg5: memref<8x20xf32, #tpu.memory_space<vmem>>, %arg6: memref<8x1xf32, #tpu.memory_space<vmem>>, %arg7: memref<8x1xf32, #tpu.memory_space<vmem>>, %arg8: memref<8x1xf32, #tpu.memory_space<vmem>>, %arg9: memref<8x24xf32, #tpu.memory_space<vmem>>, %arg10: memref<8x1xf32, #tpu.memory_space<vmem>>, %arg11: memref<16x8xf32, #tpu.memory_space<vmem>>, %arg12: memref<16x1xf32, #tpu.memory_space<vmem>>, %arg13: memref<16x16xf32, #tpu.memory_space<vmem>>, %arg14: memref<16x1xf32, #tpu.memory_space<vmem>>, %arg15: memref<16x28x64xf32, #tpu.memory_space<vmem>>, %arg16: memref<1x64xf32, #tpu.memory_space<vmem>>, %arg17: memref<64x10xf32, #tpu.memory_space<vmem>>, %arg18: memref<1x10xf32, #tpu.memory_space<vmem>>, %arg19: memref<2x10xf32, #tpu.memory_space<vmem>>) attributes {dimension_semantics = [], scalar_prefetch = 0 : i64, scratch_operands = 0 : i64, tpu.core_type = #tpu.core_type<tc>} {
    %c0 = arith.constant 0 : index
    %c0_0 = arith.constant 0 : index
    %0 = vector.load %arg1[%c0, %c0_0] : memref<4x5xf32, #tpu.memory_space<vmem>>, vector<4x5xf32>
    %c0_1 = arith.constant 0 : index
    %c0_2 = arith.constant 0 : index
    %1 = vector.load %arg2[%c0_1, %c0_2] : memref<4x1xf32, #tpu.memory_space<vmem>>, vector<4x1xf32>
    %c0_3 = arith.constant 0 : index
    %c0_4 = arith.constant 0 : index
    %c0_5 = arith.constant 0 : index
    %2 = vector.load %arg0[%c0_3, %c0_4, %c0_5] : memref<2x5x510xf32, #tpu.memory_space<vmem>>, vector<1x5x510xf32>
    %3 = vector.shape_cast %2 : vector<1x5x510xf32> to vector<5x510xf32>
    %cst = arith.constant dense<0.000000e+00> : vector<4x510xf32>
    %4 = tpu.matmul %0, %3, %cst {dimension_numbers = #tpu.dot_dimension_numbers<[1], [0], [0], [1], [0, 0, 1, 1], [], []>} : vector<4x5xf32>, vector<5x510xf32>, vector<4x510xf32> -> vector<4x510xf32>
    %5 = vector.broadcast %1 : vector<4x1xf32> to vector<4x510xf32>
    %6 = arith.addf %4, %5 : vector<4x510xf32>
    %c1 = arith.constant 1 : index
    %c0_6 = arith.constant 0 : index
    %c0_7 = arith.constant 0 : index
    %7 = vector.load %arg0[%c1, %c0_6, %c0_7] : memref<2x5x510xf32, #tpu.memory_space<vmem>>, vector<1x5x510xf32>
    %8 = vector.shape_cast %7 : vector<1x5x510xf32> to vector<5x510xf32>
    %cst_8 = arith.constant dense<0.000000e+00> : vector<4x510xf32>
    %9 = tpu.matmul %0, %8, %cst_8 {dimension_numbers = #tpu.dot_dimension_numbers<[1], [0], [0], [1], [0, 0, 1, 1], [], []>} : vector<4x5xf32>, vector<5x510xf32>, vector<4x510xf32> -> vector<4x510xf32>
    %10 = vector.broadcast %1 : vector<4x1xf32> to vector<4x510xf32>
    %11 = arith.addf %9, %10 : vector<4x510xf32>
    %c0_9 = arith.constant 0 : index
    %c0_10 = arith.constant 0 : index
    %12 = vector.load %arg3[%c0_9, %c0_10] : memref<4x1xf32, #tpu.memory_space<vmem>>, vector<4x1xf32>
    %c0_11 = arith.constant 0 : index
    %c0_12 = arith.constant 0 : index
    %13 = vector.load %arg4[%c0_11, %c0_12] : memref<4x1xf32, #tpu.memory_space<vmem>>, vector<4x1xf32>
    %cst_13 = arith.constant dense<0.000000e+00> : vector<4xf32>
    %14 = vector.multi_reduction <add>, %6, %cst_13 [1] : vector<4x510xf32> to vector<4xf32>
    %15 = vector.shape_cast %14 : vector<4xf32> to vector<4x1xf32>
    %cst_14 = arith.constant dense<0.000000e+00> : vector<4xf32>
    %16 = vector.multi_reduction <add>, %11, %cst_14 [1] : vector<4x510xf32> to vector<4xf32>
    %17 = vector.shape_cast %16 : vector<4xf32> to vector<4x1xf32>
    %18 = arith.addf %15, %17 : vector<4x1xf32>
    %cst_15 = arith.constant 9.80392214E-4 : f32
    %19 = vector.broadcast %cst_15 : f32 to vector<4x1xf32>
    %20 = arith.mulf %18, %19 : vector<4x1xf32>
    %21 = vector.broadcast %20 : vector<4x1xf32> to vector<4x510xf32>
    %22 = arith.subf %6, %21 : vector<4x510xf32>
    %23 = arith.mulf %22, %22 : vector<4x510xf32>
    %cst_16 = arith.constant dense<0.000000e+00> : vector<4xf32>
    %24 = vector.multi_reduction <add>, %23, %cst_16 [1] : vector<4x510xf32> to vector<4xf32>
    %25 = vector.shape_cast %24 : vector<4xf32> to vector<4x1xf32>
    %26 = vector.broadcast %20 : vector<4x1xf32> to vector<4x510xf32>
    %27 = arith.subf %11, %26 : vector<4x510xf32>
    %28 = arith.mulf %27, %27 : vector<4x510xf32>
    %cst_17 = arith.constant dense<0.000000e+00> : vector<4xf32>
    %29 = vector.multi_reduction <add>, %28, %cst_17 [1] : vector<4x510xf32> to vector<4xf32>
    %30 = vector.shape_cast %29 : vector<4xf32> to vector<4x1xf32>
    %31 = arith.addf %25, %30 : vector<4x1xf32>
    %cst_18 = arith.constant 9.80392214E-4 : f32
    %32 = vector.broadcast %cst_18 : f32 to vector<4x1xf32>
    %33 = arith.mulf %31, %32 : vector<4x1xf32>
    %cst_19 = arith.constant 9.99999974E-6 : f32
    %34 = vector.broadcast %cst_19 : f32 to vector<4x1xf32>
    %35 = arith.addf %33, %34 : vector<4x1xf32>
    %36 = math.rsqrt %35 : vector<4x1xf32>
    %37 = vector.broadcast %20 : vector<4x1xf32> to vector<4x510xf32>
    %38 = arith.subf %6, %37 : vector<4x510xf32>
    %39 = vector.broadcast %36 : vector<4x1xf32> to vector<4x510xf32>
    %40 = arith.mulf %38, %39 : vector<4x510xf32>
    %41 = vector.broadcast %12 : vector<4x1xf32> to vector<4x510xf32>
    %42 = arith.mulf %40, %41 : vector<4x510xf32>
    %43 = vector.broadcast %13 : vector<4x1xf32> to vector<4x510xf32>
    %44 = arith.addf %42, %43 : vector<4x510xf32>
    %45 = vector.broadcast %20 : vector<4x1xf32> to vector<4x510xf32>
    %46 = arith.subf %11, %45 : vector<4x510xf32>
    %47 = vector.broadcast %36 : vector<4x1xf32> to vector<4x510xf32>
    %48 = arith.mulf %46, %47 : vector<4x510xf32>
    %49 = vector.broadcast %12 : vector<4x1xf32> to vector<4x510xf32>
    %50 = arith.mulf %48, %49 : vector<4x510xf32>
    %51 = vector.broadcast %13 : vector<4x1xf32> to vector<4x510xf32>
    %52 = arith.addf %50, %51 : vector<4x510xf32>
    %53 = tpu.iota {dimensions = array<i32: 0>} : vector<510x254xi32>
    %54 = tpu.iota {dimensions = array<i32: 1>} : vector<510x254xi32>
    %c2_i32 = arith.constant 2 : i32
    %55 = vector.broadcast %c2_i32 : i32 to vector<510x254xi32>
    %56 = arith.muli %55, %54 : vector<510x254xi32>
    %c0_i32 = arith.constant 0 : i32
    %57 = vector.broadcast %c0_i32 : i32 to vector<510x254xi32>
    %58 = arith.addi %56, %57 : vector<510x254xi32>
    %59 = arith.cmpi eq, %53, %58 : vector<510x254xi32>
    %cst_20 = arith.constant 1.000000e+00 : f32
    %cst_21 = arith.constant 0.000000e+00 : f32
    %60 = vector.broadcast %cst_20 : f32 to vector<510x254xf32>
    %61 = vector.broadcast %cst_21 : f32 to vector<510x254xf32>
    %62 = arith.select %59, %60, %61 : vector<510x254xi1>, vector<510x254xf32>
    %63 = tpu.iota {dimensions = array<i32: 0>} : vector<510x254xi32>
    %64 = tpu.iota {dimensions = array<i32: 1>} : vector<510x254xi32>
    %c2_i32_22 = arith.constant 2 : i32
    %65 = vector.broadcast %c2_i32_22 : i32 to vector<510x254xi32>
    %66 = arith.muli %65, %64 : vector<510x254xi32>
    %c1_i32 = arith.constant 1 : i32
    %67 = vector.broadcast %c1_i32 : i32 to vector<510x254xi32>
    %68 = arith.addi %66, %67 : vector<510x254xi32>
    %69 = arith.cmpi eq, %63, %68 : vector<510x254xi32>
    %cst_23 = arith.constant 1.000000e+00 : f32
    %cst_24 = arith.constant 0.000000e+00 : f32
    %70 = vector.broadcast %cst_23 : f32 to vector<510x254xf32>
    %71 = vector.broadcast %cst_24 : f32 to vector<510x254xf32>
    %72 = arith.select %69, %70, %71 : vector<510x254xi1>, vector<510x254xf32>
    %73 = tpu.iota {dimensions = array<i32: 0>} : vector<510x254xi32>
    %74 = tpu.iota {dimensions = array<i32: 1>} : vector<510x254xi32>
    %c2_i32_25 = arith.constant 2 : i32
    %75 = vector.broadcast %c2_i32_25 : i32 to vector<510x254xi32>
    %76 = arith.muli %75, %74 : vector<510x254xi32>
    %c2_i32_26 = arith.constant 2 : i32
    %77 = vector.broadcast %c2_i32_26 : i32 to vector<510x254xi32>
    %78 = arith.addi %76, %77 : vector<510x254xi32>
    %79 = arith.cmpi eq, %73, %78 : vector<510x254xi32>
    %cst_27 = arith.constant 1.000000e+00 : f32
    %cst_28 = arith.constant 0.000000e+00 : f32
    %80 = vector.broadcast %cst_27 : f32 to vector<510x254xf32>
    %81 = vector.broadcast %cst_28 : f32 to vector<510x254xf32>
    %82 = arith.select %79, %80, %81 : vector<510x254xi1>, vector<510x254xf32>
    %cst_29 = arith.constant dense<0.000000e+00> : vector<4x254xf32>
    %83 = tpu.matmul %44, %62, %cst_29 {dimension_numbers = #tpu.dot_dimension_numbers<[1], [0], [0], [1], [0, 0, 1, 1], [], []>} : vector<4x510xf32>, vector<510x254xf32>, vector<4x254xf32> -> vector<4x254xf32>
    %cst_30 = arith.constant dense<0.000000e+00> : vector<4x254xf32>
    %84 = tpu.matmul %44, %72, %cst_30 {dimension_numbers = #tpu.dot_dimension_numbers<[1], [0], [0], [1], [0, 0, 1, 1], [], []>} : vector<4x510xf32>, vector<510x254xf32>, vector<4x254xf32> -> vector<4x254xf32>
    %cst_31 = arith.constant dense<0.000000e+00> : vector<4x254xf32>
    %85 = tpu.matmul %44, %82, %cst_31 {dimension_numbers = #tpu.dot_dimension_numbers<[1], [0], [0], [1], [0, 0, 1, 1], [], []>} : vector<4x510xf32>, vector<510x254xf32>, vector<4x254xf32> -> vector<4x254xf32>
    %86 = arith.maximumf %83, %84 : vector<4x254xf32>
    %87 = arith.maximumf %86, %85 : vector<4x254xf32>
    %cst_32 = arith.constant dense<0.000000e+00> : vector<4x254xf32>
    %88 = tpu.matmul %52, %62, %cst_32 {dimension_numbers = #tpu.dot_dimension_numbers<[1], [0], [0], [1], [0, 0, 1, 1], [], []>} : vector<4x510xf32>, vector<510x254xf32>, vector<4x254xf32> -> vector<4x254xf32>
    %cst_33 = arith.constant dense<0.000000e+00> : vector<4x254xf32>
    %89 = tpu.matmul %52, %72, %cst_33 {dimension_numbers = #tpu.dot_dimension_numbers<[1], [0], [0], [1], [0, 0, 1, 1], [], []>} : vector<4x510xf32>, vector<510x254xf32>, vector<4x254xf32> -> vector<4x254xf32>
    %cst_34 = arith.constant dense<0.000000e+00> : vector<4x254xf32>
    %90 = tpu.matmul %52, %82, %cst_34 {dimension_numbers = #tpu.dot_dimension_numbers<[1], [0], [0], [1], [0, 0, 1, 1], [], []>} : vector<4x510xf32>, vector<510x254xf32>, vector<4x254xf32> -> vector<4x254xf32>
    %91 = arith.maximumf %88, %89 : vector<4x254xf32>
    %92 = arith.maximumf %91, %90 : vector<4x254xf32>
    %c0_35 = arith.constant 0 : index
    %c0_36 = arith.constant 0 : index
    %93 = vector.load %arg5[%c0_35, %c0_36] : memref<8x20xf32, #tpu.memory_space<vmem>>, vector<8x20xf32>
    %c0_37 = arith.constant 0 : index
    %c0_38 = arith.constant 0 : index
    %94 = vector.load %arg6[%c0_37, %c0_38] : memref<8x1xf32, #tpu.memory_space<vmem>>, vector<8x1xf32>
    %95 = tpu.iota {dimensions = array<i32: 0>} : vector<254x125xi32>
    %96 = tpu.iota {dimensions = array<i32: 1>} : vector<254x125xi32>
    %c2_i32_39 = arith.constant 2 : i32
    %97 = vector.broadcast %c2_i32_39 : i32 to vector<254x125xi32>
    %98 = arith.muli %97, %96 : vector<254x125xi32>
    %c0_i32_40 = arith.constant 0 : i32
    %99 = vector.broadcast %c0_i32_40 : i32 to vector<254x125xi32>
    %100 = arith.addi %98, %99 : vector<254x125xi32>
    %101 = arith.cmpi eq, %95, %100 : vector<254x125xi32>
    %cst_41 = arith.constant 1.000000e+00 : f32
    %cst_42 = arith.constant 0.000000e+00 : f32
    %102 = vector.broadcast %cst_41 : f32 to vector<254x125xf32>
    %103 = vector.broadcast %cst_42 : f32 to vector<254x125xf32>
    %104 = arith.select %101, %102, %103 : vector<254x125xi1>, vector<254x125xf32>
    %105 = tpu.iota {dimensions = array<i32: 0>} : vector<254x125xi32>
    %106 = tpu.iota {dimensions = array<i32: 1>} : vector<254x125xi32>
    %c2_i32_43 = arith.constant 2 : i32
    %107 = vector.broadcast %c2_i32_43 : i32 to vector<254x125xi32>
    %108 = arith.muli %107, %106 : vector<254x125xi32>
    %c1_i32_44 = arith.constant 1 : i32
    %109 = vector.broadcast %c1_i32_44 : i32 to vector<254x125xi32>
    %110 = arith.addi %108, %109 : vector<254x125xi32>
    %111 = arith.cmpi eq, %105, %110 : vector<254x125xi32>
    %cst_45 = arith.constant 1.000000e+00 : f32
    %cst_46 = arith.constant 0.000000e+00 : f32
    %112 = vector.broadcast %cst_45 : f32 to vector<254x125xf32>
    %113 = vector.broadcast %cst_46 : f32 to vector<254x125xf32>
    %114 = arith.select %111, %112, %113 : vector<254x125xi1>, vector<254x125xf32>
    %115 = tpu.iota {dimensions = array<i32: 0>} : vector<254x125xi32>
    %116 = tpu.iota {dimensions = array<i32: 1>} : vector<254x125xi32>
    %c2_i32_47 = arith.constant 2 : i32
    %117 = vector.broadcast %c2_i32_47 : i32 to vector<254x125xi32>
    %118 = arith.muli %117, %116 : vector<254x125xi32>
    %c2_i32_48 = arith.constant 2 : i32
    %119 = vector.broadcast %c2_i32_48 : i32 to vector<254x125xi32>
    %120 = arith.addi %118, %119 : vector<254x125xi32>
    %121 = arith.cmpi eq, %115, %120 : vector<254x125xi32>
    %cst_49 = arith.constant 1.000000e+00 : f32
    %cst_50 = arith.constant 0.000000e+00 : f32
    %122 = vector.broadcast %cst_49 : f32 to vector<254x125xf32>
    %123 = vector.broadcast %cst_50 : f32 to vector<254x125xf32>
    %124 = arith.select %121, %122, %123 : vector<254x125xi1>, vector<254x125xf32>
    %125 = tpu.iota {dimensions = array<i32: 0>} : vector<254x125xi32>
    %126 = tpu.iota {dimensions = array<i32: 1>} : vector<254x125xi32>
    %c2_i32_51 = arith.constant 2 : i32
    %127 = vector.broadcast %c2_i32_51 : i32 to vector<254x125xi32>
    %128 = arith.muli %127, %126 : vector<254x125xi32>
    %c3_i32 = arith.constant 3 : i32
    %129 = vector.broadcast %c3_i32 : i32 to vector<254x125xi32>
    %130 = arith.addi %128, %129 : vector<254x125xi32>
    %131 = arith.cmpi eq, %125, %130 : vector<254x125xi32>
    %cst_52 = arith.constant 1.000000e+00 : f32
    %cst_53 = arith.constant 0.000000e+00 : f32
    %132 = vector.broadcast %cst_52 : f32 to vector<254x125xf32>
    %133 = vector.broadcast %cst_53 : f32 to vector<254x125xf32>
    %134 = arith.select %131, %132, %133 : vector<254x125xi1>, vector<254x125xf32>
    %135 = tpu.iota {dimensions = array<i32: 0>} : vector<254x125xi32>
    %136 = tpu.iota {dimensions = array<i32: 1>} : vector<254x125xi32>
    %c2_i32_54 = arith.constant 2 : i32
    %137 = vector.broadcast %c2_i32_54 : i32 to vector<254x125xi32>
    %138 = arith.muli %137, %136 : vector<254x125xi32>
    %c4_i32 = arith.constant 4 : i32
    %139 = vector.broadcast %c4_i32 : i32 to vector<254x125xi32>
    %140 = arith.addi %138, %139 : vector<254x125xi32>
    %141 = arith.cmpi eq, %135, %140 : vector<254x125xi32>
    %cst_55 = arith.constant 1.000000e+00 : f32
    %cst_56 = arith.constant 0.000000e+00 : f32
    %142 = vector.broadcast %cst_55 : f32 to vector<254x125xf32>
    %143 = vector.broadcast %cst_56 : f32 to vector<254x125xf32>
    %144 = arith.select %141, %142, %143 : vector<254x125xi1>, vector<254x125xf32>
    %cst_57 = arith.constant 0.000000e+00 : f32
    %145 = vector.broadcast %cst_57 : f32 to vector<8x125xf32>
    %cst_58 = arith.constant dense<0.000000e+00> : vector<4x125xf32>
    %146 = tpu.matmul %87, %104, %cst_58 {dimension_numbers = #tpu.dot_dimension_numbers<[1], [0], [0], [1], [0, 0, 1, 1], [], []>} : vector<4x254xf32>, vector<254x125xf32>, vector<4x125xf32> -> vector<4x125xf32>
    %147 = vector.extract_strided_slice %93 {offsets = [0, 0], sizes = [8, 4], strides = [1, 1]} : vector<8x20xf32> to vector<8x4xf32>
    %cst_59 = arith.constant dense<0.000000e+00> : vector<8x125xf32>
    %148 = tpu.matmul %147, %146, %cst_59 {dimension_numbers = #tpu.dot_dimension_numbers<[1], [0], [0], [1], [0, 0, 1, 1], [], []>} : vector<8x4xf32>, vector<4x125xf32>, vector<8x125xf32> -> vector<8x125xf32>
    %149 = arith.addf %145, %148 : vector<8x125xf32>
    %cst_60 = arith.constant dense<0.000000e+00> : vector<4x125xf32>
    %150 = tpu.matmul %87, %114, %cst_60 {dimension_numbers = #tpu.dot_dimension_numbers<[1], [0], [0], [1], [0, 0, 1, 1], [], []>} : vector<4x254xf32>, vector<254x125xf32>, vector<4x125xf32> -> vector<4x125xf32>
    %151 = vector.extract_strided_slice %93 {offsets = [0, 4], sizes = [8, 4], strides = [1, 1]} : vector<8x20xf32> to vector<8x4xf32>
    %cst_61 = arith.constant dense<0.000000e+00> : vector<8x125xf32>
    %152 = tpu.matmul %151, %150, %cst_61 {dimension_numbers = #tpu.dot_dimension_numbers<[1], [0], [0], [1], [0, 0, 1, 1], [], []>} : vector<8x4xf32>, vector<4x125xf32>, vector<8x125xf32> -> vector<8x125xf32>
    %153 = arith.addf %149, %152 : vector<8x125xf32>
    %cst_62 = arith.constant dense<0.000000e+00> : vector<4x125xf32>
    %154 = tpu.matmul %87, %124, %cst_62 {dimension_numbers = #tpu.dot_dimension_numbers<[1], [0], [0], [1], [0, 0, 1, 1], [], []>} : vector<4x254xf32>, vector<254x125xf32>, vector<4x125xf32> -> vector<4x125xf32>
    %155 = vector.extract_strided_slice %93 {offsets = [0, 8], sizes = [8, 4], strides = [1, 1]} : vector<8x20xf32> to vector<8x4xf32>
    %cst_63 = arith.constant dense<0.000000e+00> : vector<8x125xf32>
    %156 = tpu.matmul %155, %154, %cst_63 {dimension_numbers = #tpu.dot_dimension_numbers<[1], [0], [0], [1], [0, 0, 1, 1], [], []>} : vector<8x4xf32>, vector<4x125xf32>, vector<8x125xf32> -> vector<8x125xf32>
    %157 = arith.addf %153, %156 : vector<8x125xf32>
    %cst_64 = arith.constant dense<0.000000e+00> : vector<4x125xf32>
    %158 = tpu.matmul %87, %134, %cst_64 {dimension_numbers = #tpu.dot_dimension_numbers<[1], [0], [0], [1], [0, 0, 1, 1], [], []>} : vector<4x254xf32>, vector<254x125xf32>, vector<4x125xf32> -> vector<4x125xf32>
    %159 = vector.extract_strided_slice %93 {offsets = [0, 12], sizes = [8, 4], strides = [1, 1]} : vector<8x20xf32> to vector<8x4xf32>
    %cst_65 = arith.constant dense<0.000000e+00> : vector<8x125xf32>
    %160 = tpu.matmul %159, %158, %cst_65 {dimension_numbers = #tpu.dot_dimension_numbers<[1], [0], [0], [1], [0, 0, 1, 1], [], []>} : vector<8x4xf32>, vector<4x125xf32>, vector<8x125xf32> -> vector<8x125xf32>
    %161 = arith.addf %157, %160 : vector<8x125xf32>
    %cst_66 = arith.constant dense<0.000000e+00> : vector<4x125xf32>
    %162 = tpu.matmul %87, %144, %cst_66 {dimension_numbers = #tpu.dot_dimension_numbers<[1], [0], [0], [1], [0, 0, 1, 1], [], []>} : vector<4x254xf32>, vector<254x125xf32>, vector<4x125xf32> -> vector<4x125xf32>
    %163 = vector.extract_strided_slice %93 {offsets = [0, 16], sizes = [8, 4], strides = [1, 1]} : vector<8x20xf32> to vector<8x4xf32>
    %cst_67 = arith.constant dense<0.000000e+00> : vector<8x125xf32>
    %164 = tpu.matmul %163, %162, %cst_67 {dimension_numbers = #tpu.dot_dimension_numbers<[1], [0], [0], [1], [0, 0, 1, 1], [], []>} : vector<8x4xf32>, vector<4x125xf32>, vector<8x125xf32> -> vector<8x125xf32>
    %165 = arith.addf %161, %164 : vector<8x125xf32>
    %166 = vector.broadcast %94 : vector<8x1xf32> to vector<8x125xf32>
    %167 = arith.addf %165, %166 : vector<8x125xf32>
    %cst_68 = arith.constant 0.000000e+00 : f32
    %168 = vector.broadcast %cst_68 : f32 to vector<8x125xf32>
    %cst_69 = arith.constant dense<0.000000e+00> : vector<4x125xf32>
    %169 = tpu.matmul %92, %104, %cst_69 {dimension_numbers = #tpu.dot_dimension_numbers<[1], [0], [0], [1], [0, 0, 1, 1], [], []>} : vector<4x254xf32>, vector<254x125xf32>, vector<4x125xf32> -> vector<4x125xf32>
    %170 = vector.extract_strided_slice %93 {offsets = [0, 0], sizes = [8, 4], strides = [1, 1]} : vector<8x20xf32> to vector<8x4xf32>
    %cst_70 = arith.constant dense<0.000000e+00> : vector<8x125xf32>
    %171 = tpu.matmul %170, %169, %cst_70 {dimension_numbers = #tpu.dot_dimension_numbers<[1], [0], [0], [1], [0, 0, 1, 1], [], []>} : vector<8x4xf32>, vector<4x125xf32>, vector<8x125xf32> -> vector<8x125xf32>
    %172 = arith.addf %168, %171 : vector<8x125xf32>
    %cst_71 = arith.constant dense<0.000000e+00> : vector<4x125xf32>
    %173 = tpu.matmul %92, %114, %cst_71 {dimension_numbers = #tpu.dot_dimension_numbers<[1], [0], [0], [1], [0, 0, 1, 1], [], []>} : vector<4x254xf32>, vector<254x125xf32>, vector<4x125xf32> -> vector<4x125xf32>
    %174 = vector.extract_strided_slice %93 {offsets = [0, 4], sizes = [8, 4], strides = [1, 1]} : vector<8x20xf32> to vector<8x4xf32>
    %cst_72 = arith.constant dense<0.000000e+00> : vector<8x125xf32>
    %175 = tpu.matmul %174, %173, %cst_72 {dimension_numbers = #tpu.dot_dimension_numbers<[1], [0], [0], [1], [0, 0, 1, 1], [], []>} : vector<8x4xf32>, vector<4x125xf32>, vector<8x125xf32> -> vector<8x125xf32>
    %176 = arith.addf %172, %175 : vector<8x125xf32>
    %cst_73 = arith.constant dense<0.000000e+00> : vector<4x125xf32>
    %177 = tpu.matmul %92, %124, %cst_73 {dimension_numbers = #tpu.dot_dimension_numbers<[1], [0], [0], [1], [0, 0, 1, 1], [], []>} : vector<4x254xf32>, vector<254x125xf32>, vector<4x125xf32> -> vector<4x125xf32>
    %178 = vector.extract_strided_slice %93 {offsets = [0, 8], sizes = [8, 4], strides = [1, 1]} : vector<8x20xf32> to vector<8x4xf32>
    %cst_74 = arith.constant dense<0.000000e+00> : vector<8x125xf32>
    %179 = tpu.matmul %178, %177, %cst_74 {dimension_numbers = #tpu.dot_dimension_numbers<[1], [0], [0], [1], [0, 0, 1, 1], [], []>} : vector<8x4xf32>, vector<4x125xf32>, vector<8x125xf32> -> vector<8x125xf32>
    %180 = arith.addf %176, %179 : vector<8x125xf32>
    %cst_75 = arith.constant dense<0.000000e+00> : vector<4x125xf32>
    %181 = tpu.matmul %92, %134, %cst_75 {dimension_numbers = #tpu.dot_dimension_numbers<[1], [0], [0], [1], [0, 0, 1, 1], [], []>} : vector<4x254xf32>, vector<254x125xf32>, vector<4x125xf32> -> vector<4x125xf32>
    %182 = vector.extract_strided_slice %93 {offsets = [0, 12], sizes = [8, 4], strides = [1, 1]} : vector<8x20xf32> to vector<8x4xf32>
    %cst_76 = arith.constant dense<0.000000e+00> : vector<8x125xf32>
    %183 = tpu.matmul %182, %181, %cst_76 {dimension_numbers = #tpu.dot_dimension_numbers<[1], [0], [0], [1], [0, 0, 1, 1], [], []>} : vector<8x4xf32>, vector<4x125xf32>, vector<8x125xf32> -> vector<8x125xf32>
    %184 = arith.addf %180, %183 : vector<8x125xf32>
    %cst_77 = arith.constant dense<0.000000e+00> : vector<4x125xf32>
    %185 = tpu.matmul %92, %144, %cst_77 {dimension_numbers = #tpu.dot_dimension_numbers<[1], [0], [0], [1], [0, 0, 1, 1], [], []>} : vector<4x254xf32>, vector<254x125xf32>, vector<4x125xf32> -> vector<4x125xf32>
    %186 = vector.extract_strided_slice %93 {offsets = [0, 16], sizes = [8, 4], strides = [1, 1]} : vector<8x20xf32> to vector<8x4xf32>
    %cst_78 = arith.constant dense<0.000000e+00> : vector<8x125xf32>
    %187 = tpu.matmul %186, %185, %cst_78 {dimension_numbers = #tpu.dot_dimension_numbers<[1], [0], [0], [1], [0, 0, 1, 1], [], []>} : vector<8x4xf32>, vector<4x125xf32>, vector<8x125xf32> -> vector<8x125xf32>
    %188 = arith.addf %184, %187 : vector<8x125xf32>
    %189 = vector.broadcast %94 : vector<8x1xf32> to vector<8x125xf32>
    %190 = arith.addf %188, %189 : vector<8x125xf32>
    %c0_79 = arith.constant 0 : index
    %c0_80 = arith.constant 0 : index
    %191 = vector.load %arg7[%c0_79, %c0_80] : memref<8x1xf32, #tpu.memory_space<vmem>>, vector<8x1xf32>
    %c0_81 = arith.constant 0 : index
    %c0_82 = arith.constant 0 : index
    %192 = vector.load %arg8[%c0_81, %c0_82] : memref<8x1xf32, #tpu.memory_space<vmem>>, vector<8x1xf32>
    %cst_83 = arith.constant dense<0.000000e+00> : vector<8xf32>
    %193 = vector.multi_reduction <add>, %167, %cst_83 [1] : vector<8x125xf32> to vector<8xf32>
    %194 = vector.shape_cast %193 : vector<8xf32> to vector<8x1xf32>
    %cst_84 = arith.constant dense<0.000000e+00> : vector<8xf32>
    %195 = vector.multi_reduction <add>, %190, %cst_84 [1] : vector<8x125xf32> to vector<8xf32>
    %196 = vector.shape_cast %195 : vector<8xf32> to vector<8x1xf32>
    %197 = arith.addf %194, %196 : vector<8x1xf32>
    %cst_85 = arith.constant 4.000000e-03 : f32
    %198 = vector.broadcast %cst_85 : f32 to vector<8x1xf32>
    %199 = arith.mulf %197, %198 : vector<8x1xf32>
    %200 = vector.broadcast %199 : vector<8x1xf32> to vector<8x125xf32>
    %201 = arith.subf %167, %200 : vector<8x125xf32>
    %202 = arith.mulf %201, %201 : vector<8x125xf32>
    %cst_86 = arith.constant dense<0.000000e+00> : vector<8xf32>
    %203 = vector.multi_reduction <add>, %202, %cst_86 [1] : vector<8x125xf32> to vector<8xf32>
    %204 = vector.shape_cast %203 : vector<8xf32> to vector<8x1xf32>
    %205 = vector.broadcast %199 : vector<8x1xf32> to vector<8x125xf32>
    %206 = arith.subf %190, %205 : vector<8x125xf32>
    %207 = arith.mulf %206, %206 : vector<8x125xf32>
    %cst_87 = arith.constant dense<0.000000e+00> : vector<8xf32>
    %208 = vector.multi_reduction <add>, %207, %cst_87 [1] : vector<8x125xf32> to vector<8xf32>
    %209 = vector.shape_cast %208 : vector<8xf32> to vector<8x1xf32>
    %210 = arith.addf %204, %209 : vector<8x1xf32>
    %cst_88 = arith.constant 4.000000e-03 : f32
    %211 = vector.broadcast %cst_88 : f32 to vector<8x1xf32>
    %212 = arith.mulf %210, %211 : vector<8x1xf32>
    %cst_89 = arith.constant 9.99999974E-6 : f32
    %213 = vector.broadcast %cst_89 : f32 to vector<8x1xf32>
    %214 = arith.addf %212, %213 : vector<8x1xf32>
    %215 = math.rsqrt %214 : vector<8x1xf32>
    %216 = vector.broadcast %199 : vector<8x1xf32> to vector<8x125xf32>
    %217 = arith.subf %167, %216 : vector<8x125xf32>
    %218 = vector.broadcast %215 : vector<8x1xf32> to vector<8x125xf32>
    %219 = arith.mulf %217, %218 : vector<8x125xf32>
    %220 = vector.broadcast %191 : vector<8x1xf32> to vector<8x125xf32>
    %221 = arith.mulf %219, %220 : vector<8x125xf32>
    %222 = vector.broadcast %192 : vector<8x1xf32> to vector<8x125xf32>
    %223 = arith.addf %221, %222 : vector<8x125xf32>
    %224 = vector.broadcast %199 : vector<8x1xf32> to vector<8x125xf32>
    %225 = arith.subf %190, %224 : vector<8x125xf32>
    %226 = vector.broadcast %215 : vector<8x1xf32> to vector<8x125xf32>
    %227 = arith.mulf %225, %226 : vector<8x125xf32>
    %228 = vector.broadcast %191 : vector<8x1xf32> to vector<8x125xf32>
    %229 = arith.mulf %227, %228 : vector<8x125xf32>
    %230 = vector.broadcast %192 : vector<8x1xf32> to vector<8x125xf32>
    %231 = arith.addf %229, %230 : vector<8x125xf32>
    %232 = tpu.iota {dimensions = array<i32: 0>} : vector<125x62xi32>
    %233 = tpu.iota {dimensions = array<i32: 1>} : vector<125x62xi32>
    %c2_i32_90 = arith.constant 2 : i32
    %234 = vector.broadcast %c2_i32_90 : i32 to vector<125x62xi32>
    %235 = arith.muli %234, %233 : vector<125x62xi32>
    %c0_i32_91 = arith.constant 0 : i32
    %236 = vector.broadcast %c0_i32_91 : i32 to vector<125x62xi32>
    %237 = arith.addi %235, %236 : vector<125x62xi32>
    %238 = arith.cmpi eq, %232, %237 : vector<125x62xi32>
    %cst_92 = arith.constant 1.000000e+00 : f32
    %cst_93 = arith.constant 0.000000e+00 : f32
    %239 = vector.broadcast %cst_92 : f32 to vector<125x62xf32>
    %240 = vector.broadcast %cst_93 : f32 to vector<125x62xf32>
    %241 = arith.select %238, %239, %240 : vector<125x62xi1>, vector<125x62xf32>
    %242 = tpu.iota {dimensions = array<i32: 0>} : vector<125x62xi32>
    %243 = tpu.iota {dimensions = array<i32: 1>} : vector<125x62xi32>
    %c2_i32_94 = arith.constant 2 : i32
    %244 = vector.broadcast %c2_i32_94 : i32 to vector<125x62xi32>
    %245 = arith.muli %244, %243 : vector<125x62xi32>
    %c1_i32_95 = arith.constant 1 : i32
    %246 = vector.broadcast %c1_i32_95 : i32 to vector<125x62xi32>
    %247 = arith.addi %245, %246 : vector<125x62xi32>
    %248 = arith.cmpi eq, %242, %247 : vector<125x62xi32>
    %cst_96 = arith.constant 1.000000e+00 : f32
    %cst_97 = arith.constant 0.000000e+00 : f32
    %249 = vector.broadcast %cst_96 : f32 to vector<125x62xf32>
    %250 = vector.broadcast %cst_97 : f32 to vector<125x62xf32>
    %251 = arith.select %248, %249, %250 : vector<125x62xi1>, vector<125x62xf32>
    %252 = tpu.iota {dimensions = array<i32: 0>} : vector<125x62xi32>
    %253 = tpu.iota {dimensions = array<i32: 1>} : vector<125x62xi32>
    %c2_i32_98 = arith.constant 2 : i32
    %254 = vector.broadcast %c2_i32_98 : i32 to vector<125x62xi32>
    %255 = arith.muli %254, %253 : vector<125x62xi32>
    %c2_i32_99 = arith.constant 2 : i32
    %256 = vector.broadcast %c2_i32_99 : i32 to vector<125x62xi32>
    %257 = arith.addi %255, %256 : vector<125x62xi32>
    %258 = arith.cmpi eq, %252, %257 : vector<125x62xi32>
    %cst_100 = arith.constant 1.000000e+00 : f32
    %cst_101 = arith.constant 0.000000e+00 : f32
    %259 = vector.broadcast %cst_100 : f32 to vector<125x62xf32>
    %260 = vector.broadcast %cst_101 : f32 to vector<125x62xf32>
    %261 = arith.select %258, %259, %260 : vector<125x62xi1>, vector<125x62xf32>
    %cst_102 = arith.constant dense<0.000000e+00> : vector<8x62xf32>
    %262 = tpu.matmul %223, %241, %cst_102 {dimension_numbers = #tpu.dot_dimension_numbers<[1], [0], [0], [1], [0, 0, 1, 1], [], []>} : vector<8x125xf32>, vector<125x62xf32>, vector<8x62xf32> -> vector<8x62xf32>
    %cst_103 = arith.constant dense<0.000000e+00> : vector<8x62xf32>
    %263 = tpu.matmul %223, %251, %cst_103 {dimension_numbers = #tpu.dot_dimension_numbers<[1], [0], [0], [1], [0, 0, 1, 1], [], []>} : vector<8x125xf32>, vector<125x62xf32>, vector<8x62xf32> -> vector<8x62xf32>
    %cst_104 = arith.constant dense<0.000000e+00> : vector<8x62xf32>
    %264 = tpu.matmul %223, %261, %cst_104 {dimension_numbers = #tpu.dot_dimension_numbers<[1], [0], [0], [1], [0, 0, 1, 1], [], []>} : vector<8x125xf32>, vector<125x62xf32>, vector<8x62xf32> -> vector<8x62xf32>
    %265 = arith.maximumf %262, %263 : vector<8x62xf32>
    %266 = arith.maximumf %265, %264 : vector<8x62xf32>
    %cst_105 = arith.constant dense<0.000000e+00> : vector<8x62xf32>
    %267 = tpu.matmul %231, %241, %cst_105 {dimension_numbers = #tpu.dot_dimension_numbers<[1], [0], [0], [1], [0, 0, 1, 1], [], []>} : vector<8x125xf32>, vector<125x62xf32>, vector<8x62xf32> -> vector<8x62xf32>
    %cst_106 = arith.constant dense<0.000000e+00> : vector<8x62xf32>
    %268 = tpu.matmul %231, %251, %cst_106 {dimension_numbers = #tpu.dot_dimension_numbers<[1], [0], [0], [1], [0, 0, 1, 1], [], []>} : vector<8x125xf32>, vector<125x62xf32>, vector<8x62xf32> -> vector<8x62xf32>
    %cst_107 = arith.constant dense<0.000000e+00> : vector<8x62xf32>
    %269 = tpu.matmul %231, %261, %cst_107 {dimension_numbers = #tpu.dot_dimension_numbers<[1], [0], [0], [1], [0, 0, 1, 1], [], []>} : vector<8x125xf32>, vector<125x62xf32>, vector<8x62xf32> -> vector<8x62xf32>
    %270 = arith.maximumf %267, %268 : vector<8x62xf32>
    %271 = arith.maximumf %270, %269 : vector<8x62xf32>
    %c0_108 = arith.constant 0 : index
    %c0_109 = arith.constant 0 : index
    %272 = vector.load %arg9[%c0_108, %c0_109] : memref<8x24xf32, #tpu.memory_space<vmem>>, vector<8x24xf32>
    %c0_110 = arith.constant 0 : index
    %c0_111 = arith.constant 0 : index
    %273 = vector.load %arg10[%c0_110, %c0_111] : memref<8x1xf32, #tpu.memory_space<vmem>>, vector<8x1xf32>
    %274 = tpu.iota {dimensions = array<i32: 0>} : vector<62x30xi32>
    %275 = tpu.iota {dimensions = array<i32: 1>} : vector<62x30xi32>
    %c2_i32_112 = arith.constant 2 : i32
    %276 = vector.broadcast %c2_i32_112 : i32 to vector<62x30xi32>
    %277 = arith.muli %276, %275 : vector<62x30xi32>
    %c0_i32_113 = arith.constant 0 : i32
    %278 = vector.broadcast %c0_i32_113 : i32 to vector<62x30xi32>
    %279 = arith.addi %277, %278 : vector<62x30xi32>
    %280 = arith.cmpi eq, %274, %279 : vector<62x30xi32>
    %cst_114 = arith.constant 1.000000e+00 : f32
    %cst_115 = arith.constant 0.000000e+00 : f32
    %281 = vector.broadcast %cst_114 : f32 to vector<62x30xf32>
    %282 = vector.broadcast %cst_115 : f32 to vector<62x30xf32>
    %283 = arith.select %280, %281, %282 : vector<62x30xi1>, vector<62x30xf32>
    %284 = tpu.iota {dimensions = array<i32: 0>} : vector<62x30xi32>
    %285 = tpu.iota {dimensions = array<i32: 1>} : vector<62x30xi32>
    %c2_i32_116 = arith.constant 2 : i32
    %286 = vector.broadcast %c2_i32_116 : i32 to vector<62x30xi32>
    %287 = arith.muli %286, %285 : vector<62x30xi32>
    %c1_i32_117 = arith.constant 1 : i32
    %288 = vector.broadcast %c1_i32_117 : i32 to vector<62x30xi32>
    %289 = arith.addi %287, %288 : vector<62x30xi32>
    %290 = arith.cmpi eq, %284, %289 : vector<62x30xi32>
    %cst_118 = arith.constant 1.000000e+00 : f32
    %cst_119 = arith.constant 0.000000e+00 : f32
    %291 = vector.broadcast %cst_118 : f32 to vector<62x30xf32>
    %292 = vector.broadcast %cst_119 : f32 to vector<62x30xf32>
    %293 = arith.select %290, %291, %292 : vector<62x30xi1>, vector<62x30xf32>
    %294 = tpu.iota {dimensions = array<i32: 0>} : vector<62x30xi32>
    %295 = tpu.iota {dimensions = array<i32: 1>} : vector<62x30xi32>
    %c2_i32_120 = arith.constant 2 : i32
    %296 = vector.broadcast %c2_i32_120 : i32 to vector<62x30xi32>
    %297 = arith.muli %296, %295 : vector<62x30xi32>
    %c2_i32_121 = arith.constant 2 : i32
    %298 = vector.broadcast %c2_i32_121 : i32 to vector<62x30xi32>
    %299 = arith.addi %297, %298 : vector<62x30xi32>
    %300 = arith.cmpi eq, %294, %299 : vector<62x30xi32>
    %cst_122 = arith.constant 1.000000e+00 : f32
    %cst_123 = arith.constant 0.000000e+00 : f32
    %301 = vector.broadcast %cst_122 : f32 to vector<62x30xf32>
    %302 = vector.broadcast %cst_123 : f32 to vector<62x30xf32>
    %303 = arith.select %300, %301, %302 : vector<62x30xi1>, vector<62x30xf32>
    %cst_124 = arith.constant 0.000000e+00 : f32
    %304 = vector.broadcast %cst_124 : f32 to vector<8x30xf32>
    %cst_125 = arith.constant dense<0.000000e+00> : vector<8x30xf32>
    %305 = tpu.matmul %266, %283, %cst_125 {dimension_numbers = #tpu.dot_dimension_numbers<[1], [0], [0], [1], [0, 0, 1, 1], [], []>} : vector<8x62xf32>, vector<62x30xf32>, vector<8x30xf32> -> vector<8x30xf32>
    %306 = vector.extract_strided_slice %272 {offsets = [0, 0], sizes = [8, 8], strides = [1, 1]} : vector<8x24xf32> to vector<8x8xf32>
    %cst_126 = arith.constant dense<0.000000e+00> : vector<8x30xf32>
    %307 = tpu.matmul %306, %305, %cst_126 {dimension_numbers = #tpu.dot_dimension_numbers<[1], [0], [0], [1], [0, 0, 1, 1], [], []>} : vector<8x8xf32>, vector<8x30xf32>, vector<8x30xf32> -> vector<8x30xf32>
    %308 = arith.addf %304, %307 : vector<8x30xf32>
    %cst_127 = arith.constant dense<0.000000e+00> : vector<8x30xf32>
    %309 = tpu.matmul %266, %293, %cst_127 {dimension_numbers = #tpu.dot_dimension_numbers<[1], [0], [0], [1], [0, 0, 1, 1], [], []>} : vector<8x62xf32>, vector<62x30xf32>, vector<8x30xf32> -> vector<8x30xf32>
    %310 = vector.extract_strided_slice %272 {offsets = [0, 8], sizes = [8, 8], strides = [1, 1]} : vector<8x24xf32> to vector<8x8xf32>
    %cst_128 = arith.constant dense<0.000000e+00> : vector<8x30xf32>
    %311 = tpu.matmul %310, %309, %cst_128 {dimension_numbers = #tpu.dot_dimension_numbers<[1], [0], [0], [1], [0, 0, 1, 1], [], []>} : vector<8x8xf32>, vector<8x30xf32>, vector<8x30xf32> -> vector<8x30xf32>
    %312 = arith.addf %308, %311 : vector<8x30xf32>
    %cst_129 = arith.constant dense<0.000000e+00> : vector<8x30xf32>
    %313 = tpu.matmul %266, %303, %cst_129 {dimension_numbers = #tpu.dot_dimension_numbers<[1], [0], [0], [1], [0, 0, 1, 1], [], []>} : vector<8x62xf32>, vector<62x30xf32>, vector<8x30xf32> -> vector<8x30xf32>
    %314 = vector.extract_strided_slice %272 {offsets = [0, 16], sizes = [8, 8], strides = [1, 1]} : vector<8x24xf32> to vector<8x8xf32>
    %cst_130 = arith.constant dense<0.000000e+00> : vector<8x30xf32>
    %315 = tpu.matmul %314, %313, %cst_130 {dimension_numbers = #tpu.dot_dimension_numbers<[1], [0], [0], [1], [0, 0, 1, 1], [], []>} : vector<8x8xf32>, vector<8x30xf32>, vector<8x30xf32> -> vector<8x30xf32>
    %316 = arith.addf %312, %315 : vector<8x30xf32>
    %317 = vector.broadcast %273 : vector<8x1xf32> to vector<8x30xf32>
    %318 = arith.addf %316, %317 : vector<8x30xf32>
    %cst_131 = arith.constant 0.000000e+00 : f32
    %319 = vector.broadcast %cst_131 : f32 to vector<8x30xf32>
    %320 = arith.maximumf %318, %319 : vector<8x30xf32>
    %cst_132 = arith.constant 0.000000e+00 : f32
    %321 = vector.broadcast %cst_132 : f32 to vector<8x30xf32>
    %cst_133 = arith.constant dense<0.000000e+00> : vector<8x30xf32>
    %322 = tpu.matmul %271, %283, %cst_133 {dimension_numbers = #tpu.dot_dimension_numbers<[1], [0], [0], [1], [0, 0, 1, 1], [], []>} : vector<8x62xf32>, vector<62x30xf32>, vector<8x30xf32> -> vector<8x30xf32>
    %323 = vector.extract_strided_slice %272 {offsets = [0, 0], sizes = [8, 8], strides = [1, 1]} : vector<8x24xf32> to vector<8x8xf32>
    %cst_134 = arith.constant dense<0.000000e+00> : vector<8x30xf32>
    %324 = tpu.matmul %323, %322, %cst_134 {dimension_numbers = #tpu.dot_dimension_numbers<[1], [0], [0], [1], [0, 0, 1, 1], [], []>} : vector<8x8xf32>, vector<8x30xf32>, vector<8x30xf32> -> vector<8x30xf32>
    %325 = arith.addf %321, %324 : vector<8x30xf32>
    %cst_135 = arith.constant dense<0.000000e+00> : vector<8x30xf32>
    %326 = tpu.matmul %271, %293, %cst_135 {dimension_numbers = #tpu.dot_dimension_numbers<[1], [0], [0], [1], [0, 0, 1, 1], [], []>} : vector<8x62xf32>, vector<62x30xf32>, vector<8x30xf32> -> vector<8x30xf32>
    %327 = vector.extract_strided_slice %272 {offsets = [0, 8], sizes = [8, 8], strides = [1, 1]} : vector<8x24xf32> to vector<8x8xf32>
    %cst_136 = arith.constant dense<0.000000e+00> : vector<8x30xf32>
    %328 = tpu.matmul %327, %326, %cst_136 {dimension_numbers = #tpu.dot_dimension_numbers<[1], [0], [0], [1], [0, 0, 1, 1], [], []>} : vector<8x8xf32>, vector<8x30xf32>, vector<8x30xf32> -> vector<8x30xf32>
    %329 = arith.addf %325, %328 : vector<8x30xf32>
    %cst_137 = arith.constant dense<0.000000e+00> : vector<8x30xf32>
    %330 = tpu.matmul %271, %303, %cst_137 {dimension_numbers = #tpu.dot_dimension_numbers<[1], [0], [0], [1], [0, 0, 1, 1], [], []>} : vector<8x62xf32>, vector<62x30xf32>, vector<8x30xf32> -> vector<8x30xf32>
    %331 = vector.extract_strided_slice %272 {offsets = [0, 16], sizes = [8, 8], strides = [1, 1]} : vector<8x24xf32> to vector<8x8xf32>
    %cst_138 = arith.constant dense<0.000000e+00> : vector<8x30xf32>
    %332 = tpu.matmul %331, %330, %cst_138 {dimension_numbers = #tpu.dot_dimension_numbers<[1], [0], [0], [1], [0, 0, 1, 1], [], []>} : vector<8x8xf32>, vector<8x30xf32>, vector<8x30xf32> -> vector<8x30xf32>
    %333 = arith.addf %329, %332 : vector<8x30xf32>
    %334 = vector.broadcast %273 : vector<8x1xf32> to vector<8x30xf32>
    %335 = arith.addf %333, %334 : vector<8x30xf32>
    %cst_139 = arith.constant 0.000000e+00 : f32
    %336 = vector.broadcast %cst_139 : f32 to vector<8x30xf32>
    %337 = arith.maximumf %335, %336 : vector<8x30xf32>
    %c0_140 = arith.constant 0 : index
    %c0_141 = arith.constant 0 : index
    %338 = vector.load %arg11[%c0_140, %c0_141] : memref<16x8xf32, #tpu.memory_space<vmem>>, vector<16x8xf32>
    %c0_142 = arith.constant 0 : index
    %c0_143 = arith.constant 0 : index
    %339 = vector.load %arg12[%c0_142, %c0_143] : memref<16x1xf32, #tpu.memory_space<vmem>>, vector<16x1xf32>
    %cst_144 = arith.constant dense<0.000000e+00> : vector<16x30xf32>
    %340 = tpu.matmul %338, %320, %cst_144 {dimension_numbers = #tpu.dot_dimension_numbers<[1], [0], [0], [1], [0, 0, 1, 1], [], []>} : vector<16x8xf32>, vector<8x30xf32>, vector<16x30xf32> -> vector<16x30xf32>
    %341 = vector.broadcast %339 : vector<16x1xf32> to vector<16x30xf32>
    %342 = arith.addf %340, %341 : vector<16x30xf32>
    %cst_145 = arith.constant 0.000000e+00 : f32
    %343 = vector.broadcast %cst_145 : f32 to vector<16x30xf32>
    %344 = arith.maximumf %342, %343 : vector<16x30xf32>
    %cst_146 = arith.constant dense<0.000000e+00> : vector<16x30xf32>
    %345 = tpu.matmul %338, %337, %cst_146 {dimension_numbers = #tpu.dot_dimension_numbers<[1], [0], [0], [1], [0, 0, 1, 1], [], []>} : vector<16x8xf32>, vector<8x30xf32>, vector<16x30xf32> -> vector<16x30xf32>
    %346 = vector.broadcast %339 : vector<16x1xf32> to vector<16x30xf32>
    %347 = arith.addf %345, %346 : vector<16x30xf32>
    %cst_147 = arith.constant 0.000000e+00 : f32
    %348 = vector.broadcast %cst_147 : f32 to vector<16x30xf32>
    %349 = arith.maximumf %347, %348 : vector<16x30xf32>
    %c0_148 = arith.constant 0 : index
    %c0_149 = arith.constant 0 : index
    %350 = vector.load %arg13[%c0_148, %c0_149] : memref<16x16xf32, #tpu.memory_space<vmem>>, vector<16x16xf32>
    %c0_150 = arith.constant 0 : index
    %c0_151 = arith.constant 0 : index
    %351 = vector.load %arg14[%c0_150, %c0_151] : memref<16x1xf32, #tpu.memory_space<vmem>>, vector<16x1xf32>
    %cst_152 = arith.constant dense<0.000000e+00> : vector<16x30xf32>
    %352 = tpu.matmul %350, %344, %cst_152 {dimension_numbers = #tpu.dot_dimension_numbers<[1], [0], [0], [1], [0, 0, 1, 1], [], []>} : vector<16x16xf32>, vector<16x30xf32>, vector<16x30xf32> -> vector<16x30xf32>
    %353 = vector.broadcast %351 : vector<16x1xf32> to vector<16x30xf32>
    %354 = arith.addf %352, %353 : vector<16x30xf32>
    %cst_153 = arith.constant 0.000000e+00 : f32
    %355 = vector.broadcast %cst_153 : f32 to vector<16x30xf32>
    %356 = arith.maximumf %354, %355 : vector<16x30xf32>
    %cst_154 = arith.constant dense<0.000000e+00> : vector<16x30xf32>
    %357 = tpu.matmul %350, %349, %cst_154 {dimension_numbers = #tpu.dot_dimension_numbers<[1], [0], [0], [1], [0, 0, 1, 1], [], []>} : vector<16x16xf32>, vector<16x30xf32>, vector<16x30xf32> -> vector<16x30xf32>
    %358 = vector.broadcast %351 : vector<16x1xf32> to vector<16x30xf32>
    %359 = arith.addf %357, %358 : vector<16x30xf32>
    %cst_155 = arith.constant 0.000000e+00 : f32
    %360 = vector.broadcast %cst_155 : f32 to vector<16x30xf32>
    %361 = arith.maximumf %359, %360 : vector<16x30xf32>
    %362 = tpu.iota {dimensions = array<i32: 0>} : vector<30x28xi32>
    %363 = tpu.iota {dimensions = array<i32: 1>} : vector<30x28xi32>
    %c1_i32_156 = arith.constant 1 : i32
    %364 = vector.broadcast %c1_i32_156 : i32 to vector<30x28xi32>
    %365 = arith.muli %364, %363 : vector<30x28xi32>
    %c0_i32_157 = arith.constant 0 : i32
    %366 = vector.broadcast %c0_i32_157 : i32 to vector<30x28xi32>
    %367 = arith.addi %365, %366 : vector<30x28xi32>
    %368 = arith.cmpi eq, %362, %367 : vector<30x28xi32>
    %cst_158 = arith.constant 1.000000e+00 : f32
    %cst_159 = arith.constant 0.000000e+00 : f32
    %369 = vector.broadcast %cst_158 : f32 to vector<30x28xf32>
    %370 = vector.broadcast %cst_159 : f32 to vector<30x28xf32>
    %371 = arith.select %368, %369, %370 : vector<30x28xi1>, vector<30x28xf32>
    %372 = tpu.iota {dimensions = array<i32: 0>} : vector<30x28xi32>
    %373 = tpu.iota {dimensions = array<i32: 1>} : vector<30x28xi32>
    %c1_i32_160 = arith.constant 1 : i32
    %374 = vector.broadcast %c1_i32_160 : i32 to vector<30x28xi32>
    %375 = arith.muli %374, %373 : vector<30x28xi32>
    %c1_i32_161 = arith.constant 1 : i32
    %376 = vector.broadcast %c1_i32_161 : i32 to vector<30x28xi32>
    %377 = arith.addi %375, %376 : vector<30x28xi32>
    %378 = arith.cmpi eq, %372, %377 : vector<30x28xi32>
    %cst_162 = arith.constant 1.000000e+00 : f32
    %cst_163 = arith.constant 0.000000e+00 : f32
    %379 = vector.broadcast %cst_162 : f32 to vector<30x28xf32>
    %380 = vector.broadcast %cst_163 : f32 to vector<30x28xf32>
    %381 = arith.select %378, %379, %380 : vector<30x28xi1>, vector<30x28xf32>
    %382 = tpu.iota {dimensions = array<i32: 0>} : vector<30x28xi32>
    %383 = tpu.iota {dimensions = array<i32: 1>} : vector<30x28xi32>
    %c1_i32_164 = arith.constant 1 : i32
    %384 = vector.broadcast %c1_i32_164 : i32 to vector<30x28xi32>
    %385 = arith.muli %384, %383 : vector<30x28xi32>
    %c2_i32_165 = arith.constant 2 : i32
    %386 = vector.broadcast %c2_i32_165 : i32 to vector<30x28xi32>
    %387 = arith.addi %385, %386 : vector<30x28xi32>
    %388 = arith.cmpi eq, %382, %387 : vector<30x28xi32>
    %cst_166 = arith.constant 1.000000e+00 : f32
    %cst_167 = arith.constant 0.000000e+00 : f32
    %389 = vector.broadcast %cst_166 : f32 to vector<30x28xf32>
    %390 = vector.broadcast %cst_167 : f32 to vector<30x28xf32>
    %391 = arith.select %388, %389, %390 : vector<30x28xi1>, vector<30x28xf32>
    %cst_168 = arith.constant dense<0.000000e+00> : vector<16x28xf32>
    %392 = tpu.matmul %356, %371, %cst_168 {dimension_numbers = #tpu.dot_dimension_numbers<[1], [0], [0], [1], [0, 0, 1, 1], [], []>} : vector<16x30xf32>, vector<30x28xf32>, vector<16x28xf32> -> vector<16x28xf32>
    %cst_169 = arith.constant dense<0.000000e+00> : vector<16x28xf32>
    %393 = tpu.matmul %356, %381, %cst_169 {dimension_numbers = #tpu.dot_dimension_numbers<[1], [0], [0], [1], [0, 0, 1, 1], [], []>} : vector<16x30xf32>, vector<30x28xf32>, vector<16x28xf32> -> vector<16x28xf32>
    %cst_170 = arith.constant dense<0.000000e+00> : vector<16x28xf32>
    %394 = tpu.matmul %356, %391, %cst_170 {dimension_numbers = #tpu.dot_dimension_numbers<[1], [0], [0], [1], [0, 0, 1, 1], [], []>} : vector<16x30xf32>, vector<30x28xf32>, vector<16x28xf32> -> vector<16x28xf32>
    %395 = arith.maximumf %392, %393 : vector<16x28xf32>
    %396 = arith.maximumf %395, %394 : vector<16x28xf32>
    %cst_171 = arith.constant dense<0.000000e+00> : vector<16x28xf32>
    %397 = tpu.matmul %361, %371, %cst_171 {dimension_numbers = #tpu.dot_dimension_numbers<[1], [0], [0], [1], [0, 0, 1, 1], [], []>} : vector<16x30xf32>, vector<30x28xf32>, vector<16x28xf32> -> vector<16x28xf32>
    %cst_172 = arith.constant dense<0.000000e+00> : vector<16x28xf32>
    %398 = tpu.matmul %361, %381, %cst_172 {dimension_numbers = #tpu.dot_dimension_numbers<[1], [0], [0], [1], [0, 0, 1, 1], [], []>} : vector<16x30xf32>, vector<30x28xf32>, vector<16x28xf32> -> vector<16x28xf32>
    %cst_173 = arith.constant dense<0.000000e+00> : vector<16x28xf32>
    %399 = tpu.matmul %361, %391, %cst_173 {dimension_numbers = #tpu.dot_dimension_numbers<[1], [0], [0], [1], [0, 0, 1, 1], [], []>} : vector<16x30xf32>, vector<30x28xf32>, vector<16x28xf32> -> vector<16x28xf32>
    %400 = arith.maximumf %397, %398 : vector<16x28xf32>
    %401 = arith.maximumf %400, %399 : vector<16x28xf32>
    %c0_174 = arith.constant 0 : index
    %c0_175 = arith.constant 0 : index
    %402 = vector.load %arg16[%c0_174, %c0_175] : memref<1x64xf32, #tpu.memory_space<vmem>>, vector<1x64xf32>
    %c0_176 = arith.constant 0 : index
    %c0_177 = arith.constant 0 : index
    %403 = vector.load %arg17[%c0_176, %c0_177] : memref<64x10xf32, #tpu.memory_space<vmem>>, vector<64x10xf32>
    %c0_178 = arith.constant 0 : index
    %c0_179 = arith.constant 0 : index
    %404 = vector.load %arg18[%c0_178, %c0_179] : memref<1x10xf32, #tpu.memory_space<vmem>>, vector<1x10xf32>
    %405 = vector.extract_strided_slice %396 {offsets = [0, 0], sizes = [1, 28], strides = [1, 1]} : vector<16x28xf32> to vector<1x28xf32>
    %c0_180 = arith.constant 0 : index
    %c0_181 = arith.constant 0 : index
    %c0_182 = arith.constant 0 : index
    %406 = vector.load %arg15[%c0_180, %c0_181, %c0_182] : memref<16x28x64xf32, #tpu.memory_space<vmem>>, vector<1x28x64xf32>
    %407 = vector.shape_cast %406 : vector<1x28x64xf32> to vector<28x64xf32>
    %cst_183 = arith.constant dense<0.000000e+00> : vector<1x64xf32>
    %408 = tpu.matmul %405, %407, %cst_183 {dimension_numbers = #tpu.dot_dimension_numbers<[1], [0], [0], [1], [0, 0, 1, 1], [], []>} : vector<1x28xf32>, vector<28x64xf32>, vector<1x64xf32> -> vector<1x64xf32>
    %409 = arith.addf %402, %408 : vector<1x64xf32>
    %410 = vector.extract_strided_slice %396 {offsets = [1, 0], sizes = [1, 28], strides = [1, 1]} : vector<16x28xf32> to vector<1x28xf32>
    %c1_184 = arith.constant 1 : index
    %c0_185 = arith.constant 0 : index
    %c0_186 = arith.constant 0 : index
    %411 = vector.load %arg15[%c1_184, %c0_185, %c0_186] : memref<16x28x64xf32, #tpu.memory_space<vmem>>, vector<1x28x64xf32>
    %412 = vector.shape_cast %411 : vector<1x28x64xf32> to vector<28x64xf32>
    %cst_187 = arith.constant dense<0.000000e+00> : vector<1x64xf32>
    %413 = tpu.matmul %410, %412, %cst_187 {dimension_numbers = #tpu.dot_dimension_numbers<[1], [0], [0], [1], [0, 0, 1, 1], [], []>} : vector<1x28xf32>, vector<28x64xf32>, vector<1x64xf32> -> vector<1x64xf32>
    %414 = arith.addf %409, %413 : vector<1x64xf32>
    %415 = vector.extract_strided_slice %396 {offsets = [2, 0], sizes = [1, 28], strides = [1, 1]} : vector<16x28xf32> to vector<1x28xf32>
    %c2 = arith.constant 2 : index
    %c0_188 = arith.constant 0 : index
    %c0_189 = arith.constant 0 : index
    %416 = vector.load %arg15[%c2, %c0_188, %c0_189] : memref<16x28x64xf32, #tpu.memory_space<vmem>>, vector<1x28x64xf32>
    %417 = vector.shape_cast %416 : vector<1x28x64xf32> to vector<28x64xf32>
    %cst_190 = arith.constant dense<0.000000e+00> : vector<1x64xf32>
    %418 = tpu.matmul %415, %417, %cst_190 {dimension_numbers = #tpu.dot_dimension_numbers<[1], [0], [0], [1], [0, 0, 1, 1], [], []>} : vector<1x28xf32>, vector<28x64xf32>, vector<1x64xf32> -> vector<1x64xf32>
    %419 = arith.addf %414, %418 : vector<1x64xf32>
    %420 = vector.extract_strided_slice %396 {offsets = [3, 0], sizes = [1, 28], strides = [1, 1]} : vector<16x28xf32> to vector<1x28xf32>
    %c3 = arith.constant 3 : index
    %c0_191 = arith.constant 0 : index
    %c0_192 = arith.constant 0 : index
    %421 = vector.load %arg15[%c3, %c0_191, %c0_192] : memref<16x28x64xf32, #tpu.memory_space<vmem>>, vector<1x28x64xf32>
    %422 = vector.shape_cast %421 : vector<1x28x64xf32> to vector<28x64xf32>
    %cst_193 = arith.constant dense<0.000000e+00> : vector<1x64xf32>
    %423 = tpu.matmul %420, %422, %cst_193 {dimension_numbers = #tpu.dot_dimension_numbers<[1], [0], [0], [1], [0, 0, 1, 1], [], []>} : vector<1x28xf32>, vector<28x64xf32>, vector<1x64xf32> -> vector<1x64xf32>
    %424 = arith.addf %419, %423 : vector<1x64xf32>
    %425 = vector.extract_strided_slice %396 {offsets = [4, 0], sizes = [1, 28], strides = [1, 1]} : vector<16x28xf32> to vector<1x28xf32>
    %c4 = arith.constant 4 : index
    %c0_194 = arith.constant 0 : index
    %c0_195 = arith.constant 0 : index
    %426 = vector.load %arg15[%c4, %c0_194, %c0_195] : memref<16x28x64xf32, #tpu.memory_space<vmem>>, vector<1x28x64xf32>
    %427 = vector.shape_cast %426 : vector<1x28x64xf32> to vector<28x64xf32>
    %cst_196 = arith.constant dense<0.000000e+00> : vector<1x64xf32>
    %428 = tpu.matmul %425, %427, %cst_196 {dimension_numbers = #tpu.dot_dimension_numbers<[1], [0], [0], [1], [0, 0, 1, 1], [], []>} : vector<1x28xf32>, vector<28x64xf32>, vector<1x64xf32> -> vector<1x64xf32>
    %429 = arith.addf %424, %428 : vector<1x64xf32>
    %430 = vector.extract_strided_slice %396 {offsets = [5, 0], sizes = [1, 28], strides = [1, 1]} : vector<16x28xf32> to vector<1x28xf32>
    %c5 = arith.constant 5 : index
    %c0_197 = arith.constant 0 : index
    %c0_198 = arith.constant 0 : index
    %431 = vector.load %arg15[%c5, %c0_197, %c0_198] : memref<16x28x64xf32, #tpu.memory_space<vmem>>, vector<1x28x64xf32>
    %432 = vector.shape_cast %431 : vector<1x28x64xf32> to vector<28x64xf32>
    %cst_199 = arith.constant dense<0.000000e+00> : vector<1x64xf32>
    %433 = tpu.matmul %430, %432, %cst_199 {dimension_numbers = #tpu.dot_dimension_numbers<[1], [0], [0], [1], [0, 0, 1, 1], [], []>} : vector<1x28xf32>, vector<28x64xf32>, vector<1x64xf32> -> vector<1x64xf32>
    %434 = arith.addf %429, %433 : vector<1x64xf32>
    %435 = vector.extract_strided_slice %396 {offsets = [6, 0], sizes = [1, 28], strides = [1, 1]} : vector<16x28xf32> to vector<1x28xf32>
    %c6 = arith.constant 6 : index
    %c0_200 = arith.constant 0 : index
    %c0_201 = arith.constant 0 : index
    %436 = vector.load %arg15[%c6, %c0_200, %c0_201] : memref<16x28x64xf32, #tpu.memory_space<vmem>>, vector<1x28x64xf32>
    %437 = vector.shape_cast %436 : vector<1x28x64xf32> to vector<28x64xf32>
    %cst_202 = arith.constant dense<0.000000e+00> : vector<1x64xf32>
    %438 = tpu.matmul %435, %437, %cst_202 {dimension_numbers = #tpu.dot_dimension_numbers<[1], [0], [0], [1], [0, 0, 1, 1], [], []>} : vector<1x28xf32>, vector<28x64xf32>, vector<1x64xf32> -> vector<1x64xf32>
    %439 = arith.addf %434, %438 : vector<1x64xf32>
    %440 = vector.extract_strided_slice %396 {offsets = [7, 0], sizes = [1, 28], strides = [1, 1]} : vector<16x28xf32> to vector<1x28xf32>
    %c7 = arith.constant 7 : index
    %c0_203 = arith.constant 0 : index
    %c0_204 = arith.constant 0 : index
    %441 = vector.load %arg15[%c7, %c0_203, %c0_204] : memref<16x28x64xf32, #tpu.memory_space<vmem>>, vector<1x28x64xf32>
    %442 = vector.shape_cast %441 : vector<1x28x64xf32> to vector<28x64xf32>
    %cst_205 = arith.constant dense<0.000000e+00> : vector<1x64xf32>
    %443 = tpu.matmul %440, %442, %cst_205 {dimension_numbers = #tpu.dot_dimension_numbers<[1], [0], [0], [1], [0, 0, 1, 1], [], []>} : vector<1x28xf32>, vector<28x64xf32>, vector<1x64xf32> -> vector<1x64xf32>
    %444 = arith.addf %439, %443 : vector<1x64xf32>
    %445 = vector.extract_strided_slice %396 {offsets = [8, 0], sizes = [1, 28], strides = [1, 1]} : vector<16x28xf32> to vector<1x28xf32>
    %c8 = arith.constant 8 : index
    %c0_206 = arith.constant 0 : index
    %c0_207 = arith.constant 0 : index
    %446 = vector.load %arg15[%c8, %c0_206, %c0_207] : memref<16x28x64xf32, #tpu.memory_space<vmem>>, vector<1x28x64xf32>
    %447 = vector.shape_cast %446 : vector<1x28x64xf32> to vector<28x64xf32>
    %cst_208 = arith.constant dense<0.000000e+00> : vector<1x64xf32>
    %448 = tpu.matmul %445, %447, %cst_208 {dimension_numbers = #tpu.dot_dimension_numbers<[1], [0], [0], [1], [0, 0, 1, 1], [], []>} : vector<1x28xf32>, vector<28x64xf32>, vector<1x64xf32> -> vector<1x64xf32>
    %449 = arith.addf %444, %448 : vector<1x64xf32>
    %450 = vector.extract_strided_slice %396 {offsets = [9, 0], sizes = [1, 28], strides = [1, 1]} : vector<16x28xf32> to vector<1x28xf32>
    %c9 = arith.constant 9 : index
    %c0_209 = arith.constant 0 : index
    %c0_210 = arith.constant 0 : index
    %451 = vector.load %arg15[%c9, %c0_209, %c0_210] : memref<16x28x64xf32, #tpu.memory_space<vmem>>, vector<1x28x64xf32>
    %452 = vector.shape_cast %451 : vector<1x28x64xf32> to vector<28x64xf32>
    %cst_211 = arith.constant dense<0.000000e+00> : vector<1x64xf32>
    %453 = tpu.matmul %450, %452, %cst_211 {dimension_numbers = #tpu.dot_dimension_numbers<[1], [0], [0], [1], [0, 0, 1, 1], [], []>} : vector<1x28xf32>, vector<28x64xf32>, vector<1x64xf32> -> vector<1x64xf32>
    %454 = arith.addf %449, %453 : vector<1x64xf32>
    %455 = vector.extract_strided_slice %396 {offsets = [10, 0], sizes = [1, 28], strides = [1, 1]} : vector<16x28xf32> to vector<1x28xf32>
    %c10 = arith.constant 10 : index
    %c0_212 = arith.constant 0 : index
    %c0_213 = arith.constant 0 : index
    %456 = vector.load %arg15[%c10, %c0_212, %c0_213] : memref<16x28x64xf32, #tpu.memory_space<vmem>>, vector<1x28x64xf32>
    %457 = vector.shape_cast %456 : vector<1x28x64xf32> to vector<28x64xf32>
    %cst_214 = arith.constant dense<0.000000e+00> : vector<1x64xf32>
    %458 = tpu.matmul %455, %457, %cst_214 {dimension_numbers = #tpu.dot_dimension_numbers<[1], [0], [0], [1], [0, 0, 1, 1], [], []>} : vector<1x28xf32>, vector<28x64xf32>, vector<1x64xf32> -> vector<1x64xf32>
    %459 = arith.addf %454, %458 : vector<1x64xf32>
    %460 = vector.extract_strided_slice %396 {offsets = [11, 0], sizes = [1, 28], strides = [1, 1]} : vector<16x28xf32> to vector<1x28xf32>
    %c11 = arith.constant 11 : index
    %c0_215 = arith.constant 0 : index
    %c0_216 = arith.constant 0 : index
    %461 = vector.load %arg15[%c11, %c0_215, %c0_216] : memref<16x28x64xf32, #tpu.memory_space<vmem>>, vector<1x28x64xf32>
    %462 = vector.shape_cast %461 : vector<1x28x64xf32> to vector<28x64xf32>
    %cst_217 = arith.constant dense<0.000000e+00> : vector<1x64xf32>
    %463 = tpu.matmul %460, %462, %cst_217 {dimension_numbers = #tpu.dot_dimension_numbers<[1], [0], [0], [1], [0, 0, 1, 1], [], []>} : vector<1x28xf32>, vector<28x64xf32>, vector<1x64xf32> -> vector<1x64xf32>
    %464 = arith.addf %459, %463 : vector<1x64xf32>
    %465 = vector.extract_strided_slice %396 {offsets = [12, 0], sizes = [1, 28], strides = [1, 1]} : vector<16x28xf32> to vector<1x28xf32>
    %c12 = arith.constant 12 : index
    %c0_218 = arith.constant 0 : index
    %c0_219 = arith.constant 0 : index
    %466 = vector.load %arg15[%c12, %c0_218, %c0_219] : memref<16x28x64xf32, #tpu.memory_space<vmem>>, vector<1x28x64xf32>
    %467 = vector.shape_cast %466 : vector<1x28x64xf32> to vector<28x64xf32>
    %cst_220 = arith.constant dense<0.000000e+00> : vector<1x64xf32>
    %468 = tpu.matmul %465, %467, %cst_220 {dimension_numbers = #tpu.dot_dimension_numbers<[1], [0], [0], [1], [0, 0, 1, 1], [], []>} : vector<1x28xf32>, vector<28x64xf32>, vector<1x64xf32> -> vector<1x64xf32>
    %469 = arith.addf %464, %468 : vector<1x64xf32>
    %470 = vector.extract_strided_slice %396 {offsets = [13, 0], sizes = [1, 28], strides = [1, 1]} : vector<16x28xf32> to vector<1x28xf32>
    %c13 = arith.constant 13 : index
    %c0_221 = arith.constant 0 : index
    %c0_222 = arith.constant 0 : index
    %471 = vector.load %arg15[%c13, %c0_221, %c0_222] : memref<16x28x64xf32, #tpu.memory_space<vmem>>, vector<1x28x64xf32>
    %472 = vector.shape_cast %471 : vector<1x28x64xf32> to vector<28x64xf32>
    %cst_223 = arith.constant dense<0.000000e+00> : vector<1x64xf32>
    %473 = tpu.matmul %470, %472, %cst_223 {dimension_numbers = #tpu.dot_dimension_numbers<[1], [0], [0], [1], [0, 0, 1, 1], [], []>} : vector<1x28xf32>, vector<28x64xf32>, vector<1x64xf32> -> vector<1x64xf32>
    %474 = arith.addf %469, %473 : vector<1x64xf32>
    %475 = vector.extract_strided_slice %396 {offsets = [14, 0], sizes = [1, 28], strides = [1, 1]} : vector<16x28xf32> to vector<1x28xf32>
    %c14 = arith.constant 14 : index
    %c0_224 = arith.constant 0 : index
    %c0_225 = arith.constant 0 : index
    %476 = vector.load %arg15[%c14, %c0_224, %c0_225] : memref<16x28x64xf32, #tpu.memory_space<vmem>>, vector<1x28x64xf32>
    %477 = vector.shape_cast %476 : vector<1x28x64xf32> to vector<28x64xf32>
    %cst_226 = arith.constant dense<0.000000e+00> : vector<1x64xf32>
    %478 = tpu.matmul %475, %477, %cst_226 {dimension_numbers = #tpu.dot_dimension_numbers<[1], [0], [0], [1], [0, 0, 1, 1], [], []>} : vector<1x28xf32>, vector<28x64xf32>, vector<1x64xf32> -> vector<1x64xf32>
    %479 = arith.addf %474, %478 : vector<1x64xf32>
    %480 = vector.extract_strided_slice %396 {offsets = [15, 0], sizes = [1, 28], strides = [1, 1]} : vector<16x28xf32> to vector<1x28xf32>
    %c15 = arith.constant 15 : index
    %c0_227 = arith.constant 0 : index
    %c0_228 = arith.constant 0 : index
    %481 = vector.load %arg15[%c15, %c0_227, %c0_228] : memref<16x28x64xf32, #tpu.memory_space<vmem>>, vector<1x28x64xf32>
    %482 = vector.shape_cast %481 : vector<1x28x64xf32> to vector<28x64xf32>
    %cst_229 = arith.constant dense<0.000000e+00> : vector<1x64xf32>
    %483 = tpu.matmul %480, %482, %cst_229 {dimension_numbers = #tpu.dot_dimension_numbers<[1], [0], [0], [1], [0, 0, 1, 1], [], []>} : vector<1x28xf32>, vector<28x64xf32>, vector<1x64xf32> -> vector<1x64xf32>
    %484 = arith.addf %479, %483 : vector<1x64xf32>
    %cst_230 = arith.constant 0.000000e+00 : f32
    %485 = vector.broadcast %cst_230 : f32 to vector<1x64xf32>
    %486 = arith.maximumf %484, %485 : vector<1x64xf32>
    %cst_231 = arith.constant dense<0.000000e+00> : vector<1x10xf32>
    %487 = tpu.matmul %486, %403, %cst_231 {dimension_numbers = #tpu.dot_dimension_numbers<[1], [0], [0], [1], [0, 0, 1, 1], [], []>} : vector<1x64xf32>, vector<64x10xf32>, vector<1x10xf32> -> vector<1x10xf32>
    %488 = arith.addf %487, %404 : vector<1x10xf32>
    %c0_232 = arith.constant 0 : index
    %c0_233 = arith.constant 0 : index
    %489 = vector.load %arg19[%c0_232, %c0_233] : memref<2x10xf32, #tpu.memory_space<vmem>>, vector<1x10xf32>
    tpu.vector_store %arg19[%c0_232, %c0_233], %488 {strides = array<i32>} : memref<2x10xf32, #tpu.memory_space<vmem>>, vector<1x10xf32>,
    %490 = vector.extract_strided_slice %401 {offsets = [0, 0], sizes = [1, 28], strides = [1, 1]} : vector<16x28xf32> to vector<1x28xf32>
    %c0_234 = arith.constant 0 : index
    %c0_235 = arith.constant 0 : index
    %c0_236 = arith.constant 0 : index
    %491 = vector.load %arg15[%c0_234, %c0_235, %c0_236] : memref<16x28x64xf32, #tpu.memory_space<vmem>>, vector<1x28x64xf32>
    %492 = vector.shape_cast %491 : vector<1x28x64xf32> to vector<28x64xf32>
    %cst_237 = arith.constant dense<0.000000e+00> : vector<1x64xf32>
    %493 = tpu.matmul %490, %492, %cst_237 {dimension_numbers = #tpu.dot_dimension_numbers<[1], [0], [0], [1], [0, 0, 1, 1], [], []>} : vector<1x28xf32>, vector<28x64xf32>, vector<1x64xf32> -> vector<1x64xf32>
    %494 = arith.addf %402, %493 : vector<1x64xf32>
    %495 = vector.extract_strided_slice %401 {offsets = [1, 0], sizes = [1, 28], strides = [1, 1]} : vector<16x28xf32> to vector<1x28xf32>
    %c1_238 = arith.constant 1 : index
    %c0_239 = arith.constant 0 : index
    %c0_240 = arith.constant 0 : index
    %496 = vector.load %arg15[%c1_238, %c0_239, %c0_240] : memref<16x28x64xf32, #tpu.memory_space<vmem>>, vector<1x28x64xf32>
    %497 = vector.shape_cast %496 : vector<1x28x64xf32> to vector<28x64xf32>
    %cst_241 = arith.constant dense<0.000000e+00> : vector<1x64xf32>
    %498 = tpu.matmul %495, %497, %cst_241 {dimension_numbers = #tpu.dot_dimension_numbers<[1], [0], [0], [1], [0, 0, 1, 1], [], []>} : vector<1x28xf32>, vector<28x64xf32>, vector<1x64xf32> -> vector<1x64xf32>
    %499 = arith.addf %494, %498 : vector<1x64xf32>
    %500 = vector.extract_strided_slice %401 {offsets = [2, 0], sizes = [1, 28], strides = [1, 1]} : vector<16x28xf32> to vector<1x28xf32>
    %c2_242 = arith.constant 2 : index
    %c0_243 = arith.constant 0 : index
    %c0_244 = arith.constant 0 : index
    %501 = vector.load %arg15[%c2_242, %c0_243, %c0_244] : memref<16x28x64xf32, #tpu.memory_space<vmem>>, vector<1x28x64xf32>
    %502 = vector.shape_cast %501 : vector<1x28x64xf32> to vector<28x64xf32>
    %cst_245 = arith.constant dense<0.000000e+00> : vector<1x64xf32>
    %503 = tpu.matmul %500, %502, %cst_245 {dimension_numbers = #tpu.dot_dimension_numbers<[1], [0], [0], [1], [0, 0, 1, 1], [], []>} : vector<1x28xf32>, vector<28x64xf32>, vector<1x64xf32> -> vector<1x64xf32>
    %504 = arith.addf %499, %503 : vector<1x64xf32>
    %505 = vector.extract_strided_slice %401 {offsets = [3, 0], sizes = [1, 28], strides = [1, 1]} : vector<16x28xf32> to vector<1x28xf32>
    %c3_246 = arith.constant 3 : index
    %c0_247 = arith.constant 0 : index
    %c0_248 = arith.constant 0 : index
    %506 = vector.load %arg15[%c3_246, %c0_247, %c0_248] : memref<16x28x64xf32, #tpu.memory_space<vmem>>, vector<1x28x64xf32>
    %507 = vector.shape_cast %506 : vector<1x28x64xf32> to vector<28x64xf32>
    %cst_249 = arith.constant dense<0.000000e+00> : vector<1x64xf32>
    %508 = tpu.matmul %505, %507, %cst_249 {dimension_numbers = #tpu.dot_dimension_numbers<[1], [0], [0], [1], [0, 0, 1, 1], [], []>} : vector<1x28xf32>, vector<28x64xf32>, vector<1x64xf32> -> vector<1x64xf32>
    %509 = arith.addf %504, %508 : vector<1x64xf32>
    %510 = vector.extract_strided_slice %401 {offsets = [4, 0], sizes = [1, 28], strides = [1, 1]} : vector<16x28xf32> to vector<1x28xf32>
    %c4_250 = arith.constant 4 : index
    %c0_251 = arith.constant 0 : index
    %c0_252 = arith.constant 0 : index
    %511 = vector.load %arg15[%c4_250, %c0_251, %c0_252] : memref<16x28x64xf32, #tpu.memory_space<vmem>>, vector<1x28x64xf32>
    %512 = vector.shape_cast %511 : vector<1x28x64xf32> to vector<28x64xf32>
    %cst_253 = arith.constant dense<0.000000e+00> : vector<1x64xf32>
    %513 = tpu.matmul %510, %512, %cst_253 {dimension_numbers = #tpu.dot_dimension_numbers<[1], [0], [0], [1], [0, 0, 1, 1], [], []>} : vector<1x28xf32>, vector<28x64xf32>, vector<1x64xf32> -> vector<1x64xf32>
    %514 = arith.addf %509, %513 : vector<1x64xf32>
    %515 = vector.extract_strided_slice %401 {offsets = [5, 0], sizes = [1, 28], strides = [1, 1]} : vector<16x28xf32> to vector<1x28xf32>
    %c5_254 = arith.constant 5 : index
    %c0_255 = arith.constant 0 : index
    %c0_256 = arith.constant 0 : index
    %516 = vector.load %arg15[%c5_254, %c0_255, %c0_256] : memref<16x28x64xf32, #tpu.memory_space<vmem>>, vector<1x28x64xf32>
    %517 = vector.shape_cast %516 : vector<1x28x64xf32> to vector<28x64xf32>
    %cst_257 = arith.constant dense<0.000000e+00> : vector<1x64xf32>
    %518 = tpu.matmul %515, %517, %cst_257 {dimension_numbers = #tpu.dot_dimension_numbers<[1], [0], [0], [1], [0, 0, 1, 1], [], []>} : vector<1x28xf32>, vector<28x64xf32>, vector<1x64xf32> -> vector<1x64xf32>
    %519 = arith.addf %514, %518 : vector<1x64xf32>
    %520 = vector.extract_strided_slice %401 {offsets = [6, 0], sizes = [1, 28], strides = [1, 1]} : vector<16x28xf32> to vector<1x28xf32>
    %c6_258 = arith.constant 6 : index
    %c0_259 = arith.constant 0 : index
    %c0_260 = arith.constant 0 : index
    %521 = vector.load %arg15[%c6_258, %c0_259, %c0_260] : memref<16x28x64xf32, #tpu.memory_space<vmem>>, vector<1x28x64xf32>
    %522 = vector.shape_cast %521 : vector<1x28x64xf32> to vector<28x64xf32>
    %cst_261 = arith.constant dense<0.000000e+00> : vector<1x64xf32>
    %523 = tpu.matmul %520, %522, %cst_261 {dimension_numbers = #tpu.dot_dimension_numbers<[1], [0], [0], [1], [0, 0, 1, 1], [], []>} : vector<1x28xf32>, vector<28x64xf32>, vector<1x64xf32> -> vector<1x64xf32>
    %524 = arith.addf %519, %523 : vector<1x64xf32>
    %525 = vector.extract_strided_slice %401 {offsets = [7, 0], sizes = [1, 28], strides = [1, 1]} : vector<16x28xf32> to vector<1x28xf32>
    %c7_262 = arith.constant 7 : index
    %c0_263 = arith.constant 0 : index
    %c0_264 = arith.constant 0 : index
    %526 = vector.load %arg15[%c7_262, %c0_263, %c0_264] : memref<16x28x64xf32, #tpu.memory_space<vmem>>, vector<1x28x64xf32>
    %527 = vector.shape_cast %526 : vector<1x28x64xf32> to vector<28x64xf32>
    %cst_265 = arith.constant dense<0.000000e+00> : vector<1x64xf32>
    %528 = tpu.matmul %525, %527, %cst_265 {dimension_numbers = #tpu.dot_dimension_numbers<[1], [0], [0], [1], [0, 0, 1, 1], [], []>} : vector<1x28xf32>, vector<28x64xf32>, vector<1x64xf32> -> vector<1x64xf32>
    %529 = arith.addf %524, %528 : vector<1x64xf32>
    %530 = vector.extract_strided_slice %401 {offsets = [8, 0], sizes = [1, 28], strides = [1, 1]} : vector<16x28xf32> to vector<1x28xf32>
    %c8_266 = arith.constant 8 : index
    %c0_267 = arith.constant 0 : index
    %c0_268 = arith.constant 0 : index
    %531 = vector.load %arg15[%c8_266, %c0_267, %c0_268] : memref<16x28x64xf32, #tpu.memory_space<vmem>>, vector<1x28x64xf32>
    %532 = vector.shape_cast %531 : vector<1x28x64xf32> to vector<28x64xf32>
    %cst_269 = arith.constant dense<0.000000e+00> : vector<1x64xf32>
    %533 = tpu.matmul %530, %532, %cst_269 {dimension_numbers = #tpu.dot_dimension_numbers<[1], [0], [0], [1], [0, 0, 1, 1], [], []>} : vector<1x28xf32>, vector<28x64xf32>, vector<1x64xf32> -> vector<1x64xf32>
    %534 = arith.addf %529, %533 : vector<1x64xf32>
    %535 = vector.extract_strided_slice %401 {offsets = [9, 0], sizes = [1, 28], strides = [1, 1]} : vector<16x28xf32> to vector<1x28xf32>
    %c9_270 = arith.constant 9 : index
    %c0_271 = arith.constant 0 : index
    %c0_272 = arith.constant 0 : index
    %536 = vector.load %arg15[%c9_270, %c0_271, %c0_272] : memref<16x28x64xf32, #tpu.memory_space<vmem>>, vector<1x28x64xf32>
    %537 = vector.shape_cast %536 : vector<1x28x64xf32> to vector<28x64xf32>
    %cst_273 = arith.constant dense<0.000000e+00> : vector<1x64xf32>
    %538 = tpu.matmul %535, %537, %cst_273 {dimension_numbers = #tpu.dot_dimension_numbers<[1], [0], [0], [1], [0, 0, 1, 1], [], []>} : vector<1x28xf32>, vector<28x64xf32>, vector<1x64xf32> -> vector<1x64xf32>
    %539 = arith.addf %534, %538 : vector<1x64xf32>
    %540 = vector.extract_strided_slice %401 {offsets = [10, 0], sizes = [1, 28], strides = [1, 1]} : vector<16x28xf32> to vector<1x28xf32>
    %c10_274 = arith.constant 10 : index
    %c0_275 = arith.constant 0 : index
    %c0_276 = arith.constant 0 : index
    %541 = vector.load %arg15[%c10_274, %c0_275, %c0_276] : memref<16x28x64xf32, #tpu.memory_space<vmem>>, vector<1x28x64xf32>
    %542 = vector.shape_cast %541 : vector<1x28x64xf32> to vector<28x64xf32>
    %cst_277 = arith.constant dense<0.000000e+00> : vector<1x64xf32>
    %543 = tpu.matmul %540, %542, %cst_277 {dimension_numbers = #tpu.dot_dimension_numbers<[1], [0], [0], [1], [0, 0, 1, 1], [], []>} : vector<1x28xf32>, vector<28x64xf32>, vector<1x64xf32> -> vector<1x64xf32>
    %544 = arith.addf %539, %543 : vector<1x64xf32>
    %545 = vector.extract_strided_slice %401 {offsets = [11, 0], sizes = [1, 28], strides = [1, 1]} : vector<16x28xf32> to vector<1x28xf32>
    %c11_278 = arith.constant 11 : index
    %c0_279 = arith.constant 0 : index
    %c0_280 = arith.constant 0 : index
    %546 = vector.load %arg15[%c11_278, %c0_279, %c0_280] : memref<16x28x64xf32, #tpu.memory_space<vmem>>, vector<1x28x64xf32>
    %547 = vector.shape_cast %546 : vector<1x28x64xf32> to vector<28x64xf32>
    %cst_281 = arith.constant dense<0.000000e+00> : vector<1x64xf32>
    %548 = tpu.matmul %545, %547, %cst_281 {dimension_numbers = #tpu.dot_dimension_numbers<[1], [0], [0], [1], [0, 0, 1, 1], [], []>} : vector<1x28xf32>, vector<28x64xf32>, vector<1x64xf32> -> vector<1x64xf32>
    %549 = arith.addf %544, %548 : vector<1x64xf32>
    %550 = vector.extract_strided_slice %401 {offsets = [12, 0], sizes = [1, 28], strides = [1, 1]} : vector<16x28xf32> to vector<1x28xf32>
    %c12_282 = arith.constant 12 : index
    %c0_283 = arith.constant 0 : index
    %c0_284 = arith.constant 0 : index
    %551 = vector.load %arg15[%c12_282, %c0_283, %c0_284] : memref<16x28x64xf32, #tpu.memory_space<vmem>>, vector<1x28x64xf32>
    %552 = vector.shape_cast %551 : vector<1x28x64xf32> to vector<28x64xf32>
    %cst_285 = arith.constant dense<0.000000e+00> : vector<1x64xf32>
    %553 = tpu.matmul %550, %552, %cst_285 {dimension_numbers = #tpu.dot_dimension_numbers<[1], [0], [0], [1], [0, 0, 1, 1], [], []>} : vector<1x28xf32>, vector<28x64xf32>, vector<1x64xf32> -> vector<1x64xf32>
    %554 = arith.addf %549, %553 : vector<1x64xf32>
    %555 = vector.extract_strided_slice %401 {offsets = [13, 0], sizes = [1, 28], strides = [1, 1]} : vector<16x28xf32> to vector<1x28xf32>
    %c13_286 = arith.constant 13 : index
    %c0_287 = arith.constant 0 : index
    %c0_288 = arith.constant 0 : index
    %556 = vector.load %arg15[%c13_286, %c0_287, %c0_288] : memref<16x28x64xf32, #tpu.memory_space<vmem>>, vector<1x28x64xf32>
    %557 = vector.shape_cast %556 : vector<1x28x64xf32> to vector<28x64xf32>
    %cst_289 = arith.constant dense<0.000000e+00> : vector<1x64xf32>
    %558 = tpu.matmul %555, %557, %cst_289 {dimension_numbers = #tpu.dot_dimension_numbers<[1], [0], [0], [1], [0, 0, 1, 1], [], []>} : vector<1x28xf32>, vector<28x64xf32>, vector<1x64xf32> -> vector<1x64xf32>
    %559 = arith.addf %554, %558 : vector<1x64xf32>
    %560 = vector.extract_strided_slice %401 {offsets = [14, 0], sizes = [1, 28], strides = [1, 1]} : vector<16x28xf32> to vector<1x28xf32>
    %c14_290 = arith.constant 14 : index
    %c0_291 = arith.constant 0 : index
    %c0_292 = arith.constant 0 : index
    %561 = vector.load %arg15[%c14_290, %c0_291, %c0_292] : memref<16x28x64xf32, #tpu.memory_space<vmem>>, vector<1x28x64xf32>
    %562 = vector.shape_cast %561 : vector<1x28x64xf32> to vector<28x64xf32>
    %cst_293 = arith.constant dense<0.000000e+00> : vector<1x64xf32>
    %563 = tpu.matmul %560, %562, %cst_293 {dimension_numbers = #tpu.dot_dimension_numbers<[1], [0], [0], [1], [0, 0, 1, 1], [], []>} : vector<1x28xf32>, vector<28x64xf32>, vector<1x64xf32> -> vector<1x64xf32>
    %564 = arith.addf %559, %563 : vector<1x64xf32>
    %565 = vector.extract_strided_slice %401 {offsets = [15, 0], sizes = [1, 28], strides = [1, 1]} : vector<16x28xf32> to vector<1x28xf32>
    %c15_294 = arith.constant 15 : index
    %c0_295 = arith.constant 0 : index
    %c0_296 = arith.constant 0 : index
    %566 = vector.load %arg15[%c15_294, %c0_295, %c0_296] : memref<16x28x64xf32, #tpu.memory_space<vmem>>, vector<1x28x64xf32>
    %567 = vector.shape_cast %566 : vector<1x28x64xf32> to vector<28x64xf32>
    %cst_297 = arith.constant dense<0.000000e+00> : vector<1x64xf32>
    %568 = tpu.matmul %565, %567, %cst_297 {dimension_numbers = #tpu.dot_dimension_numbers<[1], [0], [0], [1], [0, 0, 1, 1], [], []>} : vector<1x28xf32>, vector<28x64xf32>, vector<1x64xf32> -> vector<1x64xf32>
    %569 = arith.addf %564, %568 : vector<1x64xf32>
    %cst_298 = arith.constant 0.000000e+00 : f32
    %570 = vector.broadcast %cst_298 : f32 to vector<1x64xf32>
    %571 = arith.maximumf %569, %570 : vector<1x64xf32>
    %cst_299 = arith.constant dense<0.000000e+00> : vector<1x10xf32>
    %572 = tpu.matmul %571, %403, %cst_299 {dimension_numbers = #tpu.dot_dimension_numbers<[1], [0], [0], [1], [0, 0, 1, 1], [], []>} : vector<1x64xf32>, vector<64x10xf32>, vector<1x10xf32> -> vector<1x10xf32>
    %573 = arith.addf %572, %404 : vector<1x10xf32>
    %c1_300 = arith.constant 1 : index
    %c0_301 = arith.constant 0 : index
    %574 = vector.load %arg19[%c1_300, %c0_301] : memref<2x10xf32, #tpu.memory_space<vmem>>, vector<1x10xf32>
    tpu.vector_store %arg19[%c1_300, %c0_301], %573 {strides = array<i32>} : memref<2x10xf32, #tpu.memory_space<vmem>>, vector<1x10xf32>,
    return
  }
}

</mosaic_0001>

<bundles_post_ra>
// kernel: aco_alexnet_forward.1
= control target key start
LH: loop header
LB: loop body
LE: loop exit
PB: predicated region body
PF: predicated region fallthrough
CT: control target
= control target key end

     0   :  { %s19434_s0 = inlined_call_operand.vmem [shape: f32[2,5,510], index: 0, kind: input, shape index: {}]   ;;  %s19435_s1 = inlined_call_operand.vmem [shape: f32[4,5], index: 1, kind: input, shape index: {}]   ;;  %s19436_s2 = inlined_call_operand.vmem [shape: f32[4,1], index: 2, kind: input, shape index: {}]   ;;  %s19437_s3 = inlined_call_operand.vmem [shape: f32[4,1], index: 3, kind: input, shape index: {}]   ;;  %s19438_s4 = inlined_call_operand.vmem [shape: f32[4,1], index: 4, kind: input, shape index: {}]   ;;  %s19439_s5 = inlined_call_operand.vmem [shape: f32[8,20], index: 5, kind: input, shape index: {}]   ;;  %s19440_s6 = inlined_call_operand.vmem [shape: f32[8,1], index: 6, kind: input, shape index: {}]   ;;  %s19441_s7 = inlined_call_operand.vmem [shape: f32[8,1], index: 7, kind: input, shape index: {}]   ;;  %s19442_s8 = inlined_call_operand.vmem [shape: f32[8,1], index: 8, kind: input, shape index: {}]   ;;  %s19443_s9 = inlined_call_operand.vmem [shape: f32[8,24], index: 9, kind: input, shape index: {}]   ;;  %s19444_s10 = inlined_call_operand.vmem [shape: f32[8,1], index: 10, kind: input, shape index: {}]   ;;  %s19445_s11 = inlined_call_operand.vmem [shape: f32[16,8], index: 11, kind: input, shape index: {}]   ;;  %s19446_s12 = inlined_call_operand.vmem [shape: f32[16,1], index: 12, kind: input, shape index: {}]   ;;  %s19447_s13 = inlined_call_operand.vmem [shape: f32[16,16], index: 13, kind: input, shape index: {}]   ;;  %s19448_s14 = inlined_call_operand.vmem [shape: f32[16,1], index: 14, kind: input, shape index: {}]   ;;  %s19449_s15 = inlined_call_operand.vmem [shape: f32[16,28,64], index: 15, kind: input, shape index: {}]   ;;  %s19450_s16 = inlined_call_operand.vmem [shape: f32[1,64], index: 16, kind: input, shape index: {}]   ;;  %s19451_s17 = inlined_call_operand.vmem [shape: f32[64,10], index: 17, kind: input, shape index: {}]   ;;  %s19452_s18 = inlined_call_operand.vmem [shape: f32[1,10], index: 18, kind: input, shape index: {}]   ;;  %s19453_s19 = inlined_call_operand.hbm [shape: f32[2,10], index: 19, kind: output, shape index: {}]  }
   0x1   :  { %20091 = sst [smem:[#allocation197_spill]] %s19434_s0 }
   0x2   :  { %20092 = sst [smem:[#allocation198_spill]] %s19435_s1 }
   0x3   :  { %20093 = sst [smem:[#allocation199_spill]] %s19436_s2 }
   0x4   :  { %20094 = sst [smem:[#allocation200_spill]] %s19437_s3 }
   0x5   :  { %s20095_s20 = sld [smem:[#allocation197_spill]]  ;;  %vm19455_vm0 = vcmask 1044480   ;;  %s20096_s26 = sld [smem:[#allocation198_spill]]  ;;  %v19490_v5 = vmov 0.0   ;;  %vm74_vm1 = vcmask 39936  }
   0x6   :  { %155 = vmatprep.mubr.f32.mxu0 %v19490_v5  ;;  %226 = vmatprep.mubr.f32.mxu1 %v19490_v5 }
   0xb   :  { %v66_v0 = vld [vmem:[%s20095_s20 + $0x8] sm:$0x1f]  ;;  %v68_v1 = vld [vmem:[%s20095_s20 + $0x18] sm:$0x1f]  ;;  %v65_v2 = vld [vmem:[%s20095_s20] sm:$0x1f] }
   0xc   :  { %8832 = vmatprep.subr.msk.mxu0 %vm19455_vm0, %v66_v0  ;;  %8835 = vmatprep.subr.msk.mxu1 %vm19455_vm0, %v68_v1  ;;  %v67_v3 = vld [vmem:[%s20095_s20 + $0x10] sm:$0x1f]  ;;  %v63_v4 = vld [vmem:[%s20096_s26] sm:$0xf]  ;;  %v8839_v6 = vld [vmem:[%s20095_s20 + $0x28] sm:$0x1f] }
   0xd   :  { %8833 = vmatpush1.msk.msra.mxu0 %vm19455_vm0, %v65_v2  ;;  %v8841_v7 = vld [vmem:[%s20095_s20 + $0x38] sm:$0x1f]  ;;  %8836 = vmatpush1.msk.msra.mxu1 %vm19455_vm0, %v67_v3  ;;  %v8838_v8 = vld [vmem:[%s20095_s20 + $0x20] sm:$0x1f]  ;;  %v8840_v9 = vld [vmem:[%s20095_s20 + $0x30] sm:$0x1f] }
   0xe   :  { %8834 = vmatmul.mubr.msk.f32.vlgmr.msra.gmra.mrb[0].mxu0 %vm74_vm1, %v63_v4  ;;  %8837 = vmatmul.mubr.msk.f32.vlgmr.msra.gmra.mrb[0].mxu1 %vm74_vm1, %v63_v4 }
   0xf   :  { %24 = vsyncpa [#allocation3], 0  ;;  %8842 = vmatprep.subr.msk.mxu0 %vm19455_vm0, %v8839_v6  ;;  %8845 = vmatprep.subr.msk.mxu1 %vm19455_vm0, %v8841_v7  ;;  %s20097_s24 = sld [smem:[#allocation199_spill]]  ;;  %v13786_v11 = vmov 0   ;;  %vm19457_vm2 = vcmask 1043456   ;;  %vm19456_vm3 = vcmask 1027072   ;;  %v488_v44 = vlaneseq }
  0x10   :  { %8843 = vmatpush1.msk.msra.mxu0 %vm19455_vm0, %v8838_v8  ;;  %314 = vmatprep.mubr.f32.mxu0 %v19490_v5  ;;  %s20098_s3 = sld [smem:[#allocation200_spill]]  ;;  %v20106_v54 = vmov 0  ;;  %v20111_v58 = vmov 0  ;;  %v19529_v60 = vmov 1.0|1.0   ;;  %v20116_v61 = vmov 0 }
  0x11   :  { %8846 = vmatpush1.msk.msra.mxu1 %vm19455_vm0, %v8840_v9  ;;  %385 = vmatprep.mubr.f32.mxu1 %v19490_v5  ;;  %v13978_v45 = vshrl.u32 %v488_v44, 7  ;;  %v13980_v46 = vand.u32 127, %v488_v44  ;;  %v20119_v62 = vmov 0  ;;  %v20122_v63 = vmov 0  ;;  %s13788_s29 = smov 124   ;;  %s13789_s0 = smov 116  }
  0x12   :  { %8844 = vmatmul.mubr.msk.f32.vlgmr.msra.gmra.mrb[2].mxu0 %vm74_vm1, %v63_v4  ;;  %8847 = vmatmul.mubr.msk.f32.vlgmr.msra.gmra.mrb[2].mxu1 %vm74_vm1, %v63_v4  ;;  %v20126_v2 = vmov 0  ;;  %v20129_v3 = vmov 0  ;;  %v20132_v4 = vmov 0  ;;  %v20134_v6 = vmov 0  ;;  %s13790_s30 = smov 112   ;;  %s13793_s2 = smov 120  }
  0x13   :  { %13754 = vset.pattern.permute.xlu0 %v13786_v11  ;;  %13755 = vset.pattern.permute.xlu1 %v13786_v11  ;;  %20099 = vst [vmem:[#allocation5_spill] sm:$0xff] %v13978_v45  ;;  %20100 = vst [vmem:[#allocation6_spill] sm:$0xff] %v13980_v46  ;;  %v13983_v47 = vadd.s32 8, %v13978_v45  ;;  %v555_v48 = vadd.s32 128, %v13980_v46  ;;  %v13987_v49 = vmul.u32 2, %v13980_v46  ;;  %v13990_v50 = vadd.s32 16, %v13978_v45 }
  0x14   :  { %v13993_v51 = vadd.s32 24, %v13978_v45  ;;  %v14013_v55 = vadd.s32 32, %v13978_v45  ;;  %v14016_v56 = vadd.s32 40, %v13978_v45  ;;  %v14079_v0 = vadd.s32 48, %v13978_v45 }
  0x15   :  { %v64_v10 = vld [vmem:[%s20097_s24] sm:$0xf]  ;;  %20101 = vst [vmem:[#allocation7_spill] sm:$0xff] %v13983_v47  ;;  %20102 = vst [vmem:[#allocation8_spill] sm:$0xff] %v13987_v49  ;;  %v13995_v52 = vmul.u32 2, %v555_v48  ;;  %vm558_vm4 = vcmp.eq.s32.totalorder %v13978_v45, %v13987_v49  ;;  %vm560_vm5 = vcmp.eq.s32.totalorder %v13983_v47, %v13987_v49  ;;  %v14002_v53 = vadd.s32 1, %v13987_v49 }
  0x16   :  { %71 = vperm.xlu0 %13754, %v64_v10   ;;  %v392_v43 = vld [vmem:[%s20098_s3] sm:$0xf]  ;;  %20103 = vst [vmem:[#allocation9_spill] sm:$0xff] %v13990_v50  ;;  %20104 = vst [vmem:[#allocation10_spill] sm:$0xff] %v13993_v51  ;;  %vm562_vm7 = vcmp.eq.s32.totalorder %v13990_v50, %v13987_v49  ;;  %vm564_vm8 = vcmp.eq.s32.totalorder %v13993_v51, %v13987_v49  ;;  %v14082_v1 = vadd.s32 56, %v13978_v45  ;;  %v14132_v7 = vadd.s32 64, %v13978_v45 }
  0x17   :  { %20105 = vst [vmem:[#allocation11_spill] sm:$0xff] %v14002_v53  ;;  %vm14004_vm6 = vmpackc.low %vm560_vm5, %vm558_vm4  ;;  %vm559_vm9 = vcmp.eq.s32.totalorder %v13978_v45, %v13995_v52  ;;  %vm561_vm10 = vcmp.eq.s32.totalorder %v13983_v47, %v13995_v52  ;;  %v14023_v57 = vadd.s32 1, %v13995_v52  ;;  %vm816_vm11 = vcmp.eq.s32.totalorder %v13978_v45, %v14002_v53 }
  0x18   :  { %v20107_v54 = vsel %vm14004_vm6, 4294967295, %v20106_v54  ;;  %20109 = vst [vmem:[#allocation13_spill] sm:$0xff] %v14013_v55  ;;  %20110 = vst [vmem:[#allocation14_spill] sm:$0xff] %v14016_v56  ;;  %vm818_vm14 = vcmp.eq.s32.totalorder %v13983_v47, %v14002_v53  ;;  %vm563_vm15 = vcmp.eq.s32.totalorder %v13990_v50, %v13995_v52  ;;  %vm565_vm1 = vcmp.eq.s32.totalorder %v13993_v51, %v13995_v52 }
  0x19   :  { %20108 = vst [vmem:[#allocation12_spill] sm:$0xff] %v20107_v54  ;;  %vm14027_vm12 = vmpackc.low %vm564_vm8, %vm562_vm7  ;;  %vm817_vm4 = vcmp.eq.s32.totalorder %v13978_v45, %v14023_v57  ;;  %vm819_vm5 = vcmp.eq.s32.totalorder %v13983_v47, %v14023_v57  ;;  %vm821_vm8 = vcmp.eq.s32.totalorder %v13990_v50, %v14023_v57  ;;  %v14135_v8 = vadd.s32 72, %v13978_v45 }
  0x1a   :  { %v20112_v58 = vsel %vm14027_vm12, 4294967295, %v20111_v58  ;;  %vm14031_vm13 = vmpackc.low %vm561_vm10, %vm559_vm9  ;;  %vm823_vm9 = vcmp.eq.s32.totalorder %v13993_v51, %v14023_v57  ;;  %20124 = vst [vmem:[#allocation18_spill] sm:$0xff] %v14079_v0  ;;  %v20139_v9 = vmov 0  ;;  %v20142_v10 = vmov 0 }
  0x1b   :  { %20113 = vst [vmem:[#allocation15_spill] sm:$0xff] %v20112_v58  ;;  %12015 = vmatprep.subr.msk.bf16.mxu0 %vm14031_vm13, %v19529_v60  ;;  %vm14048_vm7 = vmpackc.low %vm818_vm14, %vm816_vm11  ;;  %vm820_vm11 = vcmp.eq.s32.totalorder %v13990_v50, %v14002_v53  ;;  %vm822_vm14 = vcmp.eq.s32.totalorder %v13993_v51, %v14002_v53  ;;  %v20145_v11 = vmov 0  ;;  %v20203_v44 = vmov 0 }
  0x1c   :  { %v20117_v61 = vsel %vm14048_vm7, 4294967295, %v20116_v61  ;;  %vm14056_vm10 = vmpackc.low %vm819_vm5, %vm817_vm4  ;;  %12017 = vmatpush1.bf16.msk.msra.mxu0 %vm14004_vm6, %v19529_v60  ;;  %vm567_vm4 = vcmp.eq.s32.totalorder %v14013_v55, %v13995_v52  ;;  %vm569_vm5 = vcmp.eq.s32.totalorder %v14016_v56, %v13995_v52  ;;  %20125 = vst [vmem:[#allocation19_spill] sm:$0xff] %v14082_v1  ;;  %v14394_v48 = vadd.s32 144, %v13978_v45 }
  0x1d   :  { %20118 = vst [vmem:[#allocation16_spill] sm:$0xff] %v20117_v61  ;;  %v20120_v62 = vsel %vm14056_vm10, 4294967295, %v20119_v62  ;;  %12145 = vmatprep.subr.msk.bf16.mxu1 %vm14056_vm10, %v19529_v60  ;;  %vm14070_vm0 = vmpackc.low %vm565_vm1, %vm563_vm15  ;;  %vm825_vm1 = vcmp.eq.s32.totalorder %v14013_v55, %v14023_v57  ;;  %vm831_vm10 = vcmp.eq.s32.totalorder %v14082_v1, %v14023_v57  ;;  %v14397_v5 = vadd.s32 152, %v13978_v45 }
  0x1e   :  { %20121 = vst [vmem:[#allocation17_spill] sm:$0xff] %v20120_v62  ;;  %v20123_v63 = vsel %vm14070_vm0, 4294967295, %v20122_v63  ;;  %12147 = vmatpush1.bf16.msk.msra.mxu1 %vm14048_vm7, %v19529_v60  ;;  %12019 = vmatprep.subr.msk.bf16.mxu0 %vm14070_vm0, %v19529_v60  ;;  %vm14090_vm15 = vmpackc.low %vm823_vm9, %vm821_vm8  ;;  %vm566_vm8 = vcmp.eq.s32.totalorder %v14013_v55, %v13987_v49  ;;  %vm568_vm9 = vcmp.eq.s32.totalorder %v14016_v56, %v13987_v49  ;;  %v20209_v46 = vmov 0 }
  0x1f   :  { %v20127_v2 = vsel %vm14090_vm15, 4294967295, %v20126_v2  ;;  %12149 = vmatprep.subr.msk.bf16.mxu1 %vm14090_vm15, %v19529_v60  ;;  %vm14112_vm7 = vmpackc.low %vm569_vm5, %vm567_vm4  ;;  %vm571_vm4 = vcmp.eq.s32.totalorder %v14079_v0, %v13995_v52  ;;  %vm573_vm5 = vcmp.eq.s32.totalorder %v14082_v1, %v13995_v52  ;;  %20137 = vst [vmem:[#allocation23_spill] sm:$0xff] %v14132_v7  ;;  %v20594_v59 = vmov 0 }
  0x20   :  { %20128 = vst [vmem:[#allocation20_spill] sm:$0xff] %v20127_v2  ;;  %12021 = vmatpush1.bf16.msk.msra.mxu0 %vm14027_vm12, %v19529_v60  ;;  %v20133_v4 = vsel %vm14112_vm7, 4294967295, %v20132_v4  ;;  %20138 = vst [vmem:[#allocation24_spill] sm:$0xff] %v14135_v8 }
  0x21   :  { %12023 = vmatprep.subr.msk.bf16.mxu0 %vm14112_vm7, %v19529_v60  ;;  %20206 = vst [vmem:[#allocation49_spill] sm:$0xff] %v14394_v48  ;;  %20207 = vst [vmem:[#allocation50_spill] sm:$0xff] %v14397_v5 }
  0x95   :  { %v72_v12 = vpop.permute.xlu0 %71 }
  0xe1   :  { %v157_v13 = vpop.f32.mrb[0].mxu0  ;;  %v228_v14 = vpop.f32.mrb[0].mxu1 }
  0xe2   :  { %v13943_v15 = vadd.f32 %v157_v13, %v72_v12  ;;  %v159_v16 = vpop.f32.mrb[1].mxu0  ;;  %v13945_v17 = vadd.f32 %v228_v14, %v72_v12  ;;  %v230_v18 = vpop.f32.mrb[1].mxu1  ;;  %v14182_v13 = vadd.s32 80, %v13978_v45  ;;  %v14185_v14 = vadd.s32 88, %v13978_v45 }
  0xe3   :  { %v13947_v19 = vadd.f32 %v159_v16, %v72_v12  ;;  %v13955_v23 = vadd.f32 %v230_v18, %v72_v12  ;;  %v20153_v16 = vmov 0  ;;  %v20158_v18 = vmov 0 }
  0xe4   :  { %v395_v20 = vsel %vm19457_vm2, %v13943_v15, 0.0  ;;  %v398_v22 = vsel %vm19457_vm2, %v13945_v17, 0.0  ;;  %20150 = vst [vmem:[#allocation28_spill] sm:$0xff] %v14182_v13  ;;  %20151 = vst [vmem:[#allocation29_spill] sm:$0xff] %v14185_v14 }
  0xe5   :  { %v396_v21 = vsel %vm19457_vm2, %v13947_v19, 0.0  ;;  %v316_v24 = vpop.f32.mrb[2].mxu0  ;;  %v387_v25 = vpop.f32.mrb[2].mxu1  ;;  %v401_v36 = vsel %vm19456_vm3, %v13955_v23, 0.0 }
  0xe6   :  { %v397_v26 = vadd.f32 %v396_v21, %v395_v20  ;;  %v13957_v27 = vadd.f32 %v316_v24, %v72_v12  ;;  %v318_v28 = vpop.f32.mrb[3].mxu0  ;;  %v389_v29 = vpop.f32.mrb[3].mxu1  ;;  %v13959_v30 = vadd.f32 %v387_v25, %v72_v12  ;;  %v20161_v20 = vmov 0 }
  0xe7   :  { %v13961_v31 = vadd.f32 %v318_v28, %v72_v12  ;;  %v13967_v35 = vadd.f32 %v389_v29, %v72_v12  ;;  %v20147_v12 = vmov 0  ;;  %v20163_v21 = vmov 0 }
  0xe8   :  { %v405_v32 = vsel %vm19457_vm2, %v13957_v27, 0.0  ;;  %v399_v33 = vadd.f32 %v398_v22, %v397_v26  ;;  %v408_v39 = vsel %vm19457_vm2, %v13959_v30, 0.0  ;;  %v14244_v22 = vadd.s32 96, %v13978_v45 }
  0xe9   :  { %v406_v34 = vsel %vm19457_vm2, %v13961_v31, 0.0  ;;  %v410_v41 = vsel %vm19456_vm3, %v13967_v35, 0.0  ;;  %vm827_vm3 = vcmp.eq.s32.totalorder %v14016_v56, %v14023_v57  ;;  %vm14101_vm2 = vmpackc.low %vm822_vm14, %vm820_vm11  ;;  %vm824_vm11 = vcmp.eq.s32.totalorder %v14013_v55, %v14002_v53 }
  0xea   :  { %v407_v37 = vadd.f32 %v406_v34, %v405_v32  ;;  %v402_v38 = vadd.f32 %v401_v36, %v399_v33  ;;  %v20130_v3 = vsel %vm14101_vm2, 4294967295, %v20129_v3  ;;  %vm826_vm14 = vcmp.eq.s32.totalorder %v14016_v56, %v14002_v53  ;;  %vm14123_vm15 = vmpackc.low %vm827_vm3, %vm825_vm1  ;;  %12151 = vmatpush1.bf16.msk.msra.mxu1 %vm14101_vm2, %v19529_v60  ;;  %20166 = vst [vmem:[#allocation33_spill] sm:$0xff] %v14244_v22 }
  0xeb   :  { %20131 = vst [vmem:[#allocation21_spill] sm:$0xff] %v20130_v3  ;;  %v20135_v6 = vsel %vm14123_vm15, 4294967295, %v20134_v6  ;;  %vm14140_vm3 = vmpackc.low %vm568_vm9, %vm566_vm8  ;;  %vm829_vm1 = vcmp.eq.s32.totalorder %v14079_v0, %v14023_v57  ;;  %12153 = vmatprep.subr.msk.bf16.mxu1 %vm14123_vm15, %v19529_v60  ;;  %vm19468_vm9 = vcmp.eq.s32.totalorder %v14082_v1, %v13987_v49  ;;  %vm20157_vm15 = vcmp.eq.s32.totalorder %v14082_v1, %v14002_v53 }
  0xec   :  { %403 = vadd.xlane.f32.xlu0 %v402_v38  ;;  %v409_v40 = vadd.f32 %v408_v39, %v407_v37  ;;  %20136 = vst [vmem:[#allocation22_spill] sm:$0xff] %v20135_v6  ;;  %v20140_v9 = vsel %vm14140_vm3, 4294967295, %v20139_v9  ;;  %vm14151_vm7 = vmpackc.low %vm826_vm14, %vm824_vm11  ;;  %12025 = vmatpush1.bf16.msk.msra.mxu0 %vm14140_vm3, %v19529_v60  ;;  %vm833_vm14 = vcmp.eq.s32.totalorder %v14132_v7, %v14023_v57  ;;  %v14247_v24 = vadd.s32 104, %v13978_v45 }
  0xed   :  { %20141 = vst [vmem:[#allocation25_spill] sm:$0xff] %v20140_v9  ;;  %v20143_v10 = vsel %vm14151_vm7, 4294967295, %v20142_v10  ;;  %vm14162_vm2 = vmpackc.low %vm573_vm5, %vm571_vm4  ;;  %vm575_vm4 = vcmp.eq.s32.totalorder %v14132_v7, %v13995_v52  ;;  %vm577_vm5 = vcmp.eq.s32.totalorder %v14135_v8, %v13995_v52  ;;  %vm835_vm11 = vcmp.eq.s32.totalorder %v14135_v8, %v14023_v57 }
  0xee   :  { %v411_v42 = vadd.f32 %v410_v41, %v409_v40  ;;  %20144 = vst [vmem:[#allocation26_spill] sm:$0xff] %v20143_v10  ;;  %v20146_v11 = vsel %vm14162_vm2, 4294967295, %v20145_v11  ;;  %12027 = vmatprep.subr.msk.bf16.mxu0 %vm14162_vm2, %v19529_v60  ;;  %vm14173_vm8 = vmpackc.low %vm831_vm10, %vm829_vm1  ;;  %12155 = vmatpush1.bf16.msk.msra.mxu1 %vm14151_vm7, %v19529_v60  ;;  %vm20152_vm10 = vcmp.eq.s32.totalorder %v14079_v0, %v13987_v49  ;;  %v20168_v25 = vmov 0 }
  0xef   :  { %v20148_v12 = vsel %vm14173_vm8, 4294967295, %v20147_v12  ;;  %vm14196_vm1 = vmpackc.low %vm19468_vm9, %vm20152_vm10  ;;  %12157 = vmatprep.subr.msk.bf16.mxu1 %vm14173_vm8, %v19529_v60  ;;  %vm20156_vm7 = vcmp.eq.s32.totalorder %v14079_v0, %v14002_v53  ;;  %vm574_vm9 = vcmp.eq.s32.totalorder %v14132_v7, %v13987_v49  ;;  %vm576_vm2 = vcmp.eq.s32.totalorder %v14135_v8, %v13987_v49  ;;  %20167 = vst [vmem:[#allocation34_spill] sm:$0xff] %v14247_v24 }
  0xf0   :  { %412 = vadd.xlane.f32.xlu1 %v411_v42  ;;  %20149 = vst [vmem:[#allocation27_spill] sm:$0xff] %v20148_v12  ;;  %v20154_v16 = vsel %vm14196_vm1, 4294967295, %v20153_v16  ;;  %vm14213_vm10 = vmpackc.low %vm20157_vm15, %vm20156_vm7  ;;  %12029 = vmatpush1.bf16.msk.msra.mxu0 %vm14196_vm1, %v19529_v60  ;;  %vm832_vm7 = vcmp.eq.s32.totalorder %v14132_v7, %v14002_v53  ;;  %vm834_vm15 = vcmp.eq.s32.totalorder %v14135_v8, %v14002_v53  ;;  %v20171_v26 = vmov 0 }
  0xf1   :  { %20155 = vst [vmem:[#allocation30_spill] sm:$0xff] %v20154_v16  ;;  %v20159_v18 = vsel %vm14213_vm10, 4294967295, %v20158_v18  ;;  %vm14224_vm8 = vmpackc.low %vm577_vm5, %vm575_vm4  ;;  %vm579_vm4 = vcmp.eq.s32.totalorder %v14182_v13, %v13995_v52  ;;  %vm581_vm5 = vcmp.eq.s32.totalorder %v14185_v14, %v13995_v52  ;;  %v20174_v28 = vmov 0 }
  0xf2   :  { %20160 = vst [vmem:[#allocation31_spill] sm:$0xff] %v20159_v18  ;;  %v20162_v20 = vsel %vm14224_vm8, 4294967295, %v20161_v20  ;;  %12031 = vmatprep.subr.msk.bf16.mxu0 %vm14224_vm8, %v19529_v60  ;;  %vm14235_vm3 = vmpackc.low %vm835_vm11, %vm833_vm14  ;;  %12159 = vmatpush1.bf16.msk.msra.mxu1 %vm14213_vm10, %v19529_v60  ;;  %vm837_vm14 = vcmp.eq.s32.totalorder %v14182_v13, %v14023_v57  ;;  %vm839_vm8 = vcmp.eq.s32.totalorder %v14185_v14, %v14023_v57  ;;  %v20176_v29 = vmov 0 }
  0xf3   :  { %v20164_v21 = vsel %vm14235_vm3, 4294967295, %v20163_v21  ;;  %vm14252_vm11 = vmpackc.low %vm576_vm2, %vm574_vm9  ;;  %12161 = vmatprep.subr.msk.bf16.mxu1 %vm14235_vm3, %v19529_v60  ;;  %vm578_vm2 = vcmp.eq.s32.totalorder %v14182_v13, %v13987_v49  ;;  %vm580_vm9 = vcmp.eq.s32.totalorder %v14185_v14, %v13987_v49  ;;  %v14294_v32 = vadd.s32 112, %v13978_v45 }
  0xf4   :  { %20165 = vst [vmem:[#allocation32_spill] sm:$0xff] %v20164_v21  ;;  %v20169_v25 = vsel %vm14252_vm11, 4294967295, %v20168_v25  ;;  %vm14263_vm1 = vmpackc.low %vm834_vm15, %vm832_vm7  ;;  %12033 = vmatpush1.bf16.msk.msra.mxu0 %vm14252_vm11, %v19529_v60  ;;  %vm836_vm7 = vcmp.eq.s32.totalorder %v14182_v13, %v14002_v53  ;;  %vm838_vm15 = vcmp.eq.s32.totalorder %v14185_v14, %v14002_v53  ;;  %v14297_v33 = vadd.s32 120, %v13978_v45 }
  0xf5   :  { %20170 = vst [vmem:[#allocation35_spill] sm:$0xff] %v20169_v25  ;;  %v20172_v26 = vsel %vm14263_vm1, 4294967295, %v20171_v26  ;;  %vm14274_vm10 = vmpackc.low %vm581_vm5, %vm579_vm4  ;;  %vm583_vm4 = vcmp.eq.s32.totalorder %v14244_v22, %v13995_v52  ;;  %vm585_vm5 = vcmp.eq.s32.totalorder %v14247_v24, %v13995_v52  ;;  %v20181_v34 = vmov 0 }
  0xf6   :  { %20173 = vst [vmem:[#allocation36_spill] sm:$0xff] %v20172_v26  ;;  %v20175_v28 = vsel %vm14274_vm10, 4294967295, %v20174_v28  ;;  %12035 = vmatprep.subr.msk.bf16.mxu0 %vm14274_vm10, %v19529_v60  ;;  %vm14285_vm3 = vmpackc.low %vm839_vm8, %vm837_vm14  ;;  %12163 = vmatpush1.bf16.msk.msra.mxu1 %vm14263_vm1, %v19529_v60  ;;  %vm841_vm14 = vcmp.eq.s32.totalorder %v14244_v22, %v14023_v57  ;;  %vm843_vm10 = vcmp.eq.s32.totalorder %v14247_v24, %v14023_v57  ;;  %v20184_v36 = vmov 0 }
  0xf7   :  { %v20177_v29 = vsel %vm14285_vm3, 4294967295, %v20176_v29  ;;  %20179 = vst [vmem:[#allocation38_spill] sm:$0xff] %v14294_v32  ;;  %20180 = vst [vmem:[#allocation39_spill] sm:$0xff] %v14297_v33  ;;  %12165 = vmatprep.subr.msk.bf16.mxu1 %vm14285_vm3, %v19529_v60  ;;  %v20187_v37 = vmov 0  ;;  %v20189_v38 = vmov 0  ;;  %v14344_v39 = vadd.s32 128, %v13978_v45 }
  0xf8   :  { %20178 = vst [vmem:[#allocation37_spill] sm:$0xff] %v20177_v29  ;;  %vm14302_vm8 = vmpackc.low %vm580_vm9, %vm578_vm2  ;;  %vm582_vm2 = vcmp.eq.s32.totalorder %v14244_v22, %v13987_v49  ;;  %vm584_vm9 = vcmp.eq.s32.totalorder %v14247_v24, %v13987_v49  ;;  %v14347_v40 = vadd.s32 136, %v13978_v45  ;;  %v20194_v41 = vmov 0 }
  0xf9   :  { %v20182_v34 = vsel %vm14302_vm8, 4294967295, %v20181_v34  ;;  %vm14313_vm11 = vmpackc.low %vm838_vm15, %vm836_vm7  ;;  %12037 = vmatpush1.bf16.msk.msra.mxu0 %vm14302_vm8, %v19529_v60  ;;  %vm840_vm7 = vcmp.eq.s32.totalorder %v14244_v22, %v14002_v53  ;;  %vm842_vm15 = vcmp.eq.s32.totalorder %v14247_v24, %v14002_v53  ;;  %20192 = vst [vmem:[#allocation43_spill] sm:$0xff] %v14344_v39  ;;  %v20197_v42 = vmov 0 }
  0xfa   :  { %20183 = vst [vmem:[#allocation40_spill] sm:$0xff] %v20182_v34  ;;  %v20185_v36 = vsel %vm14313_vm11, 4294967295, %v20184_v36  ;;  %vm14324_vm1 = vmpackc.low %vm585_vm5, %vm583_vm4  ;;  %vm587_vm4 = vcmp.eq.s32.totalorder %v14294_v32, %v13995_v52  ;;  %vm589_vm5 = vcmp.eq.s32.totalorder %v14297_v33, %v13995_v52  ;;  %12167 = vmatpush1.bf16.msk.msra.mxu1 %vm14313_vm11, %v19529_v60  ;;  %v20226_v29 = vmov 0 }
  0xfb   :  { %20186 = vst [vmem:[#allocation41_spill] sm:$0xff] %v20185_v36  ;;  %v20188_v37 = vsel %vm14324_vm1, 4294967295, %v20187_v37  ;;  %12039 = vmatprep.subr.msk.bf16.mxu0 %vm14324_vm1, %v19529_v60  ;;  %vm14335_vm3 = vmpackc.low %vm843_vm10, %vm841_vm14  ;;  %vm845_vm14 = vcmp.eq.s32.totalorder %v14294_v32, %v14023_v57  ;;  %vm847_vm1 = vcmp.eq.s32.totalorder %v14297_v33, %v14023_v57  ;;  %v20223_v36 = vmov 0 }
  0xfc   :  { %v20190_v38 = vsel %vm14335_vm3, 4294967295, %v20189_v38  ;;  %20193 = vst [vmem:[#allocation44_spill] sm:$0xff] %v14347_v40  ;;  %vm14352_vm10 = vmpackc.low %vm584_vm9, %vm582_vm2  ;;  %12169 = vmatprep.subr.msk.bf16.mxu1 %vm14335_vm3, %v19529_v60  ;;  %vm19499_vm9 = vcmp.eq.s32.totalorder %v14297_v33, %v13987_v49  ;;  %vm20213_vm3 = vcmp.eq.s32.totalorder %v14297_v33, %v14002_v53  ;;  %v20232_v26 = vmov 0 }
  0xfd   :  { %20191 = vst [vmem:[#allocation42_spill] sm:$0xff] %v20190_v38  ;;  %v20195_v41 = vsel %vm14352_vm10, 4294967295, %v20194_v41  ;;  %vm14363_vm8 = vmpackc.low %vm842_vm15, %vm840_vm7  ;;  %12041 = vmatpush1.bf16.msk.msra.mxu0 %vm14352_vm10, %v19529_v60  ;;  %vm849_vm15 = vcmp.eq.s32.totalorder %v14344_v39, %v14023_v57  ;;  %vm851_vm7 = vcmp.eq.s32.totalorder %v14347_v40, %v14023_v57  ;;  %v20220_v38 = vmov 0 }
  0xfe   :  { %20196 = vst [vmem:[#allocation45_spill] sm:$0xff] %v20195_v41  ;;  %v20198_v42 = vsel %vm14363_vm8, 4294967295, %v20197_v42  ;;  %vm14374_vm11 = vmpackc.low %vm589_vm5, %vm587_vm4  ;;  %vm591_vm4 = vcmp.eq.s32.totalorder %v14344_v39, %v13995_v52  ;;  %vm593_vm5 = vcmp.eq.s32.totalorder %v14347_v40, %v13995_v52  ;;  %12171 = vmatpush1.bf16.msk.msra.mxu1 %vm14363_vm8, %v19529_v60  ;;  %vm20212_vm8 = vcmp.eq.s32.totalorder %v14294_v32, %v14002_v53 }
  0xff   :  { %20199 = vst [vmem:[#allocation46_spill] sm:$0xff] %v20198_v42  ;;  %12043 = vmatprep.subr.msk.bf16.mxu0 %vm14374_vm11, %v19529_v60  ;;  %vm14385_vm2 = vmpackc.low %vm847_vm1, %vm845_vm14  ;;  %vm20208_vm1 = vcmp.eq.s32.totalorder %v14294_v32, %v13987_v49  ;;  %v20214_v42 = vmov 0 }
 0x100   :  { %v20204_v44 = vsel %vm14385_vm2, 4294967295, %v20203_v44  ;;  %vm14408_vm14 = vmpackc.low %vm19499_vm9, %vm20208_vm1  ;;  %12173 = vmatprep.subr.msk.bf16.mxu1 %vm14385_vm2, %v19529_v60  ;;  %vm590_vm9 = vcmp.eq.s32.totalorder %v14344_v39, %v13987_v49 }
 0x101   :  { %460 = vperm.xlu1 %13755, %v392_v43   ;;  %v20200_v43 = vmov 0  ;;  %20205 = vst [vmem:[#allocation48_spill] sm:$0xff] %v20204_v44  ;;  %v20210_v46 = vsel %vm14408_vm14, 4294967295, %v20209_v46  ;;  %vm14425_vm1 = vmpackc.low %vm20213_vm3, %vm20212_vm8  ;;  %12045 = vmatpush1.bf16.msk.msra.mxu0 %vm14408_vm14, %v19529_v60  ;;  %v20217_v44 = vmov 0  ;;  %vm848_vm3 = vcmp.eq.s32.totalorder %v14344_v39, %v14002_v53 }
 0x102   :  { %v20201_v43 = vsel %vm14374_vm11, 4294967295, %v20200_v43  ;;  %20211 = vst [vmem:[#allocation51_spill] sm:$0xff] %v20210_v46  ;;  %v20215_v42 = vsel %vm14425_vm1, 4294967295, %v20214_v42  ;;  %vm592_vm11 = vcmp.eq.s32.totalorder %v14347_v40, %v13987_v49  ;;  %vm14436_vm2 = vmpackc.low %vm593_vm5, %vm591_vm4  ;;  %vm850_vm8 = vcmp.eq.s32.totalorder %v14347_v40, %v14002_v53  ;;  %12175 = vmatpush1.bf16.msk.msra.mxu1 %vm14425_vm1, %v19529_v60 }
 0x103   :  { %20202 = vst [vmem:[#allocation47_spill] sm:$0xff] %v20201_v43  ;;  %20216 = vst [vmem:[#allocation52_spill] sm:$0xff] %v20215_v42  ;;  %v20218_v44 = vsel %vm14436_vm2, 4294967295, %v20217_v44  ;;  %12047 = vmatprep.subr.msk.bf16.mxu0 %vm14436_vm2, %v19529_v60  ;;  %vm595_vm4 = vcmp.eq.s32.totalorder %v14394_v48, %v13995_v52  ;;  %vm597_vm5 = vcmp.eq.s32.totalorder %v14397_v5, %v13995_v52  ;;  %v20229_v42 = vmov 0 }
 0x104   :  { %20219 = vst [vmem:[#allocation53_spill] sm:$0xff] %v20218_v44  ;;  %vm14447_vm10 = vmpackc.low %vm851_vm7, %vm849_vm15  ;;  %vm853_vm7 = vcmp.eq.s32.totalorder %v14394_v48, %v14023_v57  ;;  %vm855_vm15 = vcmp.eq.s32.totalorder %v14397_v5, %v14023_v57 }
 0x105   :  { %v20221_v38 = vsel %vm14447_vm10, 4294967295, %v20220_v38  ;;  %vm14458_vm14 = vmpackc.low %vm592_vm11, %vm590_vm9  ;;  %12177 = vmatprep.subr.msk.bf16.mxu1 %vm14447_vm10, %v19529_v60 }
 0x106   :  { %20222 = vst [vmem:[#allocation54_spill] sm:$0xff] %v20221_v38  ;;  %v20224_v36 = vsel %vm14458_vm14, 4294967295, %v20223_v36  ;;  %vm14469_vm2 = vmpackc.low %vm850_vm8, %vm848_vm3  ;;  %12049 = vmatpush1.bf16.msk.msra.mxu0 %vm14458_vm14, %v19529_v60  ;;  %vm20235_vm3 = vcmask 1043456  }
 0x107   :  { %20225 = vst [vmem:[#allocation55_spill] sm:$0xff] %v20224_v36  ;;  %v20227_v29 = vsel %vm14469_vm2, 4294967295, %v20226_v29  ;;  %vm14476_vm11 = vmpackc.low %vm597_vm5, %vm595_vm4  ;;  %12179 = vmatpush1.bf16.msk.msra.mxu1 %vm14469_vm2, %v19529_v60 }
 0x108   :  { %20228 = vst [vmem:[#allocation56_spill] sm:$0xff] %v20227_v29  ;;  %v20230_v42 = vsel %vm14476_vm11, 4294967295, %v20229_v42  ;;  %12051 = vmatprep.subr.msk.bf16.mxu0 %vm14476_vm11, %v19529_v60  ;;  %vm14483_vm9 = vmpackc.low %vm855_vm15, %vm853_vm7  ;;  %vm20240_vm15 = vcmask 1027072  }
 0x109   :  { %20231 = vst [vmem:[#allocation57_spill] sm:$0xff] %v20230_v42  ;;  %v20233_v26 = vsel %vm14483_vm9, 4294967295, %v20232_v26  ;;  %12181 = vmatprep.subr.msk.bf16.mxu1 %vm14483_vm9, %v19529_v60  ;;  %vm20236_vm8 = vmmov %vm20235_vm3 }
 0x10a   :  { %20234 = vst [vmem:[#allocation58_spill] sm:$0xff] %v20233_v26  ;;  %vm20237_vm4 = vmmov %vm20235_vm3 }
 0x10b   :  { %vm20238_vm5 = vmmov %vm20235_vm3 }
 0x10c   :  { %vm20239_vm7 = vmmov %vm20235_vm3 }
 0x179   :  { %v404_v38 = vpop.xlane.xlu0 %403 }
 0x17d   :  { %v413_v21 = vpop.xlane.xlu1 %412 }
 0x17e   :  { %v414_v18 = vadd.f32 %v413_v21, %v404_v38 }
 0x180   :  { %v415_v12 = vmul.f32 0.0009803922, %v414_v18 }
 0x182   :  { %v14494_v10 = vsub.f32 %v13943_v15, %v415_v12  ;;  %v14497_v6 = vsub.f32 %v13947_v19, %v415_v12  ;;  %v14500_v3 = vsub.f32 %v13945_v17, %v415_v12  ;;  %v14503_v29 = vsub.f32 %v13955_v23, %v415_v12 }
 0x183   :  { %v14506_v2 = vsub.f32 %v13957_v27, %v415_v12  ;;  %v14509_v60 = vsub.f32 %v13961_v31, %v415_v12  ;;  %v14512_v18 = vsub.f32 %v13959_v30, %v415_v12  ;;  %v14521_v23 = vsub.f32 %v13967_v35, %v415_v12 }
 0x184   :  { %v420_v15 = vmul.f32 %v14494_v10, %v14494_v10  ;;  %v421_v19 = vmul.f32 %v14497_v6, %v14497_v6  ;;  %v422_v17 = vmul.f32 %v14500_v3, %v14500_v3  ;;  %v423_v30 = vmul.f32 %v14503_v29, %v14503_v29 }
 0x185   :  { %v437_v27 = vmul.f32 %v14506_v2, %v14506_v2  ;;  %v438_v31 = vmul.f32 %v14509_v60, %v14509_v60  ;;  %v439_v26 = vmul.f32 %v14512_v18, %v14512_v18  ;;  %v440_v46 = vmul.f32 %v14521_v23, %v14521_v23 }
 0x186   :  { %v424_v21 = vsel %vm20235_vm3, %v420_v15, 0.0  ;;  %v425_v38 = vsel %vm20236_vm8, %v421_v19, 0.0  ;;  %v427_v62 = vsel %vm20239_vm7, %v422_v17, 0.0  ;;  %v429_v44 = vsel %vm20240_vm15, %v423_v30, 0.0  ;;  %vm20241_vm8 = vmmov %vm20240_vm15 }
 0x187   :  { %v426_v61 = vadd.f32 %v425_v38, %v424_v21  ;;  %v441_v35 = vsel %vm20237_vm4, %v437_v27, 0.0  ;;  %v442_v12 = vsel %vm20238_vm5, %v438_v31, 0.0  ;;  %v444_v15 = vsel %vm20235_vm3, %v439_v26, 0.0 }
 0x188   :  { %v443_v42 = vadd.f32 %v442_v12, %v441_v35  ;;  %v446_v21 = vsel %vm20241_vm8, %v440_v46, 0.0  ;;  %vm594_vm4 = vcmp.eq.s32.totalorder %v14394_v48, %v13987_v49  ;;  %vm596_vm5 = vcmp.eq.s32.totalorder %v14397_v5, %v13987_v49  ;;  %v2216_v35 = vld [vmem:[%s19439_s5] sm:$0xff] }
 0x189   :  { %v428_v36 = vadd.f32 %v427_v62, %v426_v61  ;;  %vm852_vm7 = vcmp.eq.s32.totalorder %v14394_v48, %v14002_v53  ;;  %vm854_vm15 = vcmp.eq.s32.totalorder %v14397_v5, %v14002_v53  ;;  %vm14549_vm3 = vmpackc.low %vm596_vm5, %vm594_vm4  ;;  %v20242_v61 = vmov 0 }
 0x18a   :  { %v445_v43 = vadd.f32 %v444_v15, %v443_v42  ;;  %v20243_v61 = vsel %vm14549_vm3, 4294967295, %v20242_v61  ;;  %v14554_v46 = vadd.s32 160, %v13978_v45  ;;  %v14557_v62 = vadd.s32 168, %v13978_v45  ;;  %vm14562_vm8 = vmpackc.low %vm854_vm15, %vm852_vm7 }
 0x18b   :  { %v430_v19 = vadd.f32 %v429_v44, %v428_v36  ;;  %20244 = vst [vmem:[#allocation59_spill] sm:$0xff] %v20243_v61  ;;  %v20247_v26 = vmov 1.0|1.0   ;;  %v20248_v36 = vmov 0  ;;  %v20251_v42 = vmov 0 }
 0x18c   :  { %v447_v38 = vadd.f32 %v446_v21, %v445_v43  ;;  %20245 = vst [vmem:[#allocation60_spill] sm:$0xff] %v14554_v46  ;;  %20246 = vst [vmem:[#allocation61_spill] sm:$0xff] %v14557_v62  ;;  %12053 = vmatpush1.bf16.msk.msra.mxu0 %vm14549_vm3, %v20247_v26  ;;  %v20249_v36 = vsel %vm14562_vm8, 4294967295, %v20248_v36  ;;  %12183 = vmatpush1.bf16.msk.msra.mxu1 %vm14562_vm8, %v20247_v26  ;;  %vm599_vm4 = vcmp.eq.s32.totalorder %v14554_v46, %v13995_v52  ;;  %v393_v43 = vld [vmem:[%s19438_s4] sm:$0xf]  ;;  %v20254_v44 = vmov 0 }
 0x18d   :  { %431 = vadd.xlane.f32.xlu1 %v430_v19  ;;  %20250 = vst [vmem:[#allocation62_spill] sm:$0xff] %v20249_v36  ;;  %vm601_vm5 = vcmp.eq.s32.totalorder %v14557_v62, %v13995_v52  ;;  %vm857_vm9 = vcmp.eq.s32.totalorder %v14554_v46, %v14023_v57  ;;  %vm859_vm2 = vcmp.eq.s32.totalorder %v14557_v62, %v14023_v57  ;;  %v20257_v17 = vmov 0 }
 0x18e   :  { %vm14577_vm7 = vmpackc.low %vm601_vm5, %vm599_vm4  ;;  %vm598_vm8 = vcmp.eq.s32.totalorder %v14554_v46, %v13987_v49  ;;  %vm600_vm4 = vcmp.eq.s32.totalorder %v14557_v62, %v13987_v49  ;;  %vm856_vm5 = vcmp.eq.s32.totalorder %v14554_v46, %v14002_v53  ;;  %vm858_vm10 = vcmp.eq.s32.totalorder %v14557_v62, %v14002_v53 }
 0x18f   :  { %v20252_v42 = vsel %vm14577_vm7, 4294967295, %v20251_v42  ;;  %12055 = vmatprep.subr.msk.bf16.mxu0 %vm14577_vm7, %v20247_v26  ;;  %vm14587_vm15 = vmpackc.low %vm859_vm2, %vm857_vm9  ;;  %v14607_v27 = vadd.s32 176, %v13978_v45  ;;  %v14610_v31 = vadd.s32 184, %v13978_v45  ;;  %v20262_v30 = vmov 0 }
 0x190   :  { %20253 = vst [vmem:[#allocation63_spill] sm:$0xff] %v20252_v42  ;;  %v20255_v44 = vsel %vm14587_vm15, 4294967295, %v20254_v44  ;;  %12185 = vmatprep.subr.msk.bf16.mxu1 %vm14587_vm15, %v20247_v26  ;;  %vm14602_vm2 = vmpackc.low %vm600_vm4, %vm598_vm8  ;;  %v20265_v12 = vmov 0  ;;  %v20268_v15 = vmov 0  ;;  %v14653_v19 = vadd.s32 192, %v13978_v45 }
 0x191   :  { %448 = vadd.xlane.f32.xlu1 %v447_v38  ;;  %20256 = vst [vmem:[#allocation64_spill] sm:$0xff] %v20255_v44  ;;  %v20258_v17 = vsel %vm14602_vm2, 4294967295, %v20257_v17  ;;  %20260 = vst [vmem:[#allocation66_spill] sm:$0xff] %v14607_v27  ;;  %12057 = vmatpush1.bf16.msk.msra.mxu0 %vm14602_vm2, %v20247_v26  ;;  %vm603_vm8 = vcmp.eq.s32.totalorder %v14607_v27, %v13995_v52  ;;  %vm605_vm4 = vcmp.eq.s32.totalorder %v14610_v31, %v13995_v52  ;;  %v20273_v38 = vmov 0 }
 0x192   :  { %20259 = vst [vmem:[#allocation65_spill] sm:$0xff] %v20258_v17  ;;  %20261 = vst [vmem:[#allocation67_spill] sm:$0xff] %v14610_v31  ;;  %vm861_vm15 = vcmp.eq.s32.totalorder %v14607_v27, %v14023_v57  ;;  %vm604_vm1 = vcmp.eq.s32.totalorder %v14610_v31, %v13987_v49  ;;  %vm860_vm2 = vcmp.eq.s32.totalorder %v14607_v27, %v14002_v53  ;;  %v14656_v21 = vadd.s32 200, %v13978_v45 }
 0x193   :  { %vm14615_vm9 = vmpackc.low %vm858_vm10, %vm856_vm5  ;;  %vm863_vm5 = vcmp.eq.s32.totalorder %v14610_v31, %v14023_v57  ;;  %20271 = vst [vmem:[#allocation71_spill] sm:$0xff] %v14653_v19  ;;  %v14706_v44 = vadd.s32 216, %v13978_v45  ;;  %v20287_v36 = vmov 0  ;;  %v20348_v62 = vmov 0 }
 0x194   :  { %v20263_v30 = vsel %vm14615_vm9, 4294967295, %v20262_v30  ;;  %12187 = vmatpush1.bf16.msk.msra.mxu1 %vm14615_vm9, %v20247_v26  ;;  %vm14631_vm10 = vmpackc.low %vm605_vm4, %vm603_vm8  ;;  %vm602_vm9 = vcmp.eq.s32.totalorder %v14607_v27, %v13987_v49  ;;  %vm862_vm4 = vcmp.eq.s32.totalorder %v14610_v31, %v14002_v53  ;;  %20272 = vst [vmem:[#allocation72_spill] sm:$0xff] %v14656_v21 }
 0x195   :  { %20264 = vst [vmem:[#allocation68_spill] sm:$0xff] %v20263_v30  ;;  %v20266_v12 = vsel %vm14631_vm10, 4294967295, %v20265_v12  ;;  %12059 = vmatprep.subr.msk.bf16.mxu0 %vm14631_vm10, %v20247_v26  ;;  %vm14646_vm8 = vmpackc.low %vm863_vm5, %vm861_vm15  ;;  %vm607_vm5 = vcmp.eq.s32.totalorder %v14653_v19, %v13995_v52  ;;  %v20280_v30 = vmov 0  ;;  %vm864_vm10 = vcmp.eq.s32.totalorder %v14653_v19, %v14002_v53 }
 0x196   :  { %20267 = vst [vmem:[#allocation69_spill] sm:$0xff] %v20266_v12  ;;  %v20269_v15 = vsel %vm14646_vm8, 4294967295, %v20268_v15  ;;  %12189 = vmatprep.subr.msk.bf16.mxu1 %vm14646_vm8, %v20247_v26  ;;  %vm14661_vm7 = vmpackc.low %vm604_vm1, %vm602_vm9  ;;  %vm609_vm8 = vcmp.eq.s32.totalorder %v14656_v21, %v13995_v52  ;;  %vm865_vm1 = vcmp.eq.s32.totalorder %v14653_v19, %v14023_v57  ;;  %vm867_vm9 = vcmp.eq.s32.totalorder %v14656_v21, %v14023_v57 }
 0x197   :  { %20270 = vst [vmem:[#allocation70_spill] sm:$0xff] %v20269_v15  ;;  %v20274_v38 = vsel %vm14661_vm7, 4294967295, %v20273_v38  ;;  %12061 = vmatpush1.bf16.msk.msra.mxu0 %vm14661_vm7, %v20247_v26  ;;  %vm14668_vm15 = vmpackc.low %vm862_vm4, %vm860_vm2  ;;  %v14679_v15 = vadd.s32 208, %v13978_v45  ;;  %vm606_vm4 = vcmp.eq.s32.totalorder %v14653_v19, %v13987_v49  ;;  %vm608_vm7 = vcmp.eq.s32.totalorder %v14656_v21, %v13987_v49 }
 0x198   :  { %20275 = vst [vmem:[#allocation73_spill] sm:$0xff] %v20274_v38  ;;  %12191 = vmatpush1.bf16.msk.msra.mxu1 %vm14668_vm15, %v20247_v26  ;;  %vm14684_vm2 = vmpackc.low %vm609_vm8, %vm607_vm5  ;;  %vm866_vm5 = vcmp.eq.s32.totalorder %v14656_v21, %v14002_v53  ;;  %v14749_v38 = vadd.s32 232, %v13978_v45  ;;  %v14928_v19 = vadd.s32 272, %v13978_v45 }
 0x199   :  { %20279 = vst [vmem:[#allocation75_spill] sm:$0xff] %v14679_v15  ;;  %v20281_v30 = vsel %vm14684_vm2, 4294967295, %v20280_v30  ;;  %12063 = vmatprep.subr.msk.bf16.mxu0 %vm14684_vm2, %v20247_v26  ;;  %vm14699_vm8 = vmpackc.low %vm867_vm9, %vm865_vm1  ;;  %vm868_vm1 = vcmp.eq.s32.totalorder %v14679_v15, %v14002_v53 }
 0x19a   :  { %20282 = vst [vmem:[#allocation76_spill] sm:$0xff] %v20281_v30  ;;  %20286 = vst [vmem:[#allocation78_spill] sm:$0xff] %v14706_v44  ;;  %12193 = vmatprep.subr.msk.bf16.mxu1 %vm14699_vm8, %v20247_v26  ;;  %v20290_v30 = vmov 0 }
 0x19b   :  { %vm14713_vm3 = vmpackc.low %vm608_vm7, %vm606_vm4  ;;  %vm871_vm7 = vcmp.eq.s32.totalorder %v14706_v44, %v14023_v57  ;;  %vm610_vm4 = vcmp.eq.s32.totalorder %v14679_v15, %v13987_v49  ;;  %20297 = vst [vmem:[#allocation83_spill] sm:$0xff] %v14749_v38 }
 0x19c   :  { %v20288_v36 = vsel %vm14713_vm3, 4294967295, %v20287_v36  ;;  %12065 = vmatpush1.bf16.msk.msra.mxu0 %vm14713_vm3, %v20247_v26  ;;  %vm14722_vm9 = vmpackc.low %vm866_vm5, %vm864_vm10  ;;  %vm612_vm5 = vcmp.eq.s32.totalorder %v14706_v44, %v13987_v49  ;;  %vm870_vm3 = vcmp.eq.s32.totalorder %v14706_v44, %v14002_v53 }
 0x19d   :  { %20289 = vst [vmem:[#allocation79_spill] sm:$0xff] %v20288_v36  ;;  %v20291_v30 = vsel %vm14722_vm9, 4294967295, %v20290_v30  ;;  %12195 = vmatpush1.bf16.msk.msra.mxu1 %vm14722_vm9, %v20247_v26  ;;  %v20294_v36 = vmov 0  ;;  %vm14766_vm2 = vmpackc.low %vm612_vm5, %vm610_vm4 }
 0x19e   :  { %20292 = vst [vmem:[#allocation80_spill] sm:$0xff] %v20291_v30  ;;  %v20299_v30 = vmov 0  ;;  %vm14780_vm4 = vmpackc.low %vm870_vm3, %vm868_vm1 }
 0x1a2   :  { %469 = vperm.xlu1 %13755, %v393_v43   ;;  %v20276_v43 = vmov 0 }
 0x1a3   :  { %v20277_v43 = vsel %vm14668_vm15, 4294967295, %v20276_v43  ;;  %vm611_vm15 = vcmp.eq.s32.totalorder %v14679_v15, %v13995_v52 }
 0x1a4   :  { %20278 = vst [vmem:[#allocation74_spill] sm:$0xff] %v20277_v43  ;;  %v20283_v43 = vmov 0 }
 0x1a5   :  { %v20284_v43 = vsel %vm14699_vm8, 4294967295, %v20283_v43  ;;  %vm613_vm8 = vcmp.eq.s32.totalorder %v14706_v44, %v13995_v52  ;;  %v20302_v44 = vmov 0 }
 0x1a6   :  { %2498 = vrot.lane.b32.xlu1 %v2216_v35, %s13788_s29  ;;  %20285 = vst [vmem:[#allocation77_spill] sm:$0xff] %v20284_v43  ;;  %v14733_v43 = vadd.s32 224, %v13978_v45  ;;  %vm14738_vm10 = vmpackc.low %vm613_vm8, %vm611_vm15  ;;  %vm20298_vm15 = vcmp.eq.s32.totalorder %v14679_v15, %v14023_v57  ;;  %v20303_v44 = vsel %vm14766_vm2, 4294967295, %v20302_v44  ;;  %v14809_v15 = vadd.s32 248, %v13978_v45 }
 0x1a7   :  { %v20295_v36 = vsel %vm14738_vm10, 4294967295, %v20294_v36  ;;  %12067 = vmatprep.subr.msk.bf16.mxu0 %vm14738_vm10, %v20247_v26  ;;  %vm14757_vm8 = vmpackc.low %vm871_vm7, %vm20298_vm15  ;;  %20304 = vst [vmem:[#allocation85_spill] sm:$0xff] %v20303_v44  ;;  %vm617_vm10 = vcmp.eq.s32.totalorder %v14749_v38, %v13995_v52  ;;  %vm616_vm7 = vcmp.eq.s32.totalorder %v14749_v38, %v13987_v49  ;;  %v20309_v44 = vmov 0 }
 0x1a8   :  { %20293 = vst [vmem:[#allocation81_spill] sm:$0xff] %v14733_v43  ;;  %20296 = vst [vmem:[#allocation82_spill] sm:$0xff] %v20295_v36  ;;  %v20300_v30 = vsel %vm14757_vm8, 4294967295, %v20299_v30  ;;  %vm615_vm9 = vcmp.eq.s32.totalorder %v14733_v43, %v13995_v52  ;;  %12197 = vmatprep.subr.msk.bf16.mxu1 %vm14757_vm8, %v20247_v26  ;;  %12069 = vmatpush1.bf16.msk.msra.mxu0 %vm14766_vm2, %v20247_v26  ;;  %vm614_vm5 = vcmp.eq.s32.totalorder %v14733_v43, %v13987_v49 }
 0x1a9   :  { %20301 = vst [vmem:[#allocation84_spill] sm:$0xff] %v20300_v30  ;;  %v20305_v30 = vmov 0  ;;  %v14789_v36 = vadd.s32 240, %v13978_v45  ;;  %12199 = vmatpush1.bf16.msk.msra.mxu1 %vm14780_vm4, %v20247_v26  ;;  %vm14800_vm3 = vmpackc.low %vm617_vm10, %vm615_vm9  ;;  %vm872_vm1 = vcmp.eq.s32.totalorder %v14733_v43, %v14002_v53  ;;  %vm874_vm15 = vcmp.eq.s32.totalorder %v14749_v38, %v14002_v53 }
 0x1aa   :  { %2875 = vrot.lane.b32.xlu1 %v2216_v35, %s13789_s0  ;;  %v20306_v30 = vsel %vm14780_vm4, 4294967295, %v20305_v30  ;;  %v20310_v44 = vsel %vm14800_vm3, 4294967295, %v20309_v44  ;;  %20312 = vst [vmem:[#allocation89_spill] sm:$0xff] %v14809_v15  ;;  %12071 = vmatprep.subr.msk.bf16.mxu0 %vm14800_vm3, %v20247_v26  ;;  %vm20313_vm4 = vcmp.eq.s32.totalorder %v14733_v43, %v14023_v57  ;;  %vm20314_vm9 = vcmp.eq.s32.totalorder %v14749_v38, %v14023_v57  ;;  %vm14829_vm2 = vmpackc.low %vm616_vm7, %vm614_vm5 }
 0x1ab   :  { %20307 = vst [vmem:[#allocation86_spill] sm:$0xff] %v20306_v30  ;;  %20308 = vst [vmem:[#allocation87_spill] sm:$0xff] %v14789_v36  ;;  %v20315_v30 = vmov 0  ;;  %vm619_vm8 = vcmp.eq.s32.totalorder %v14789_v36, %v13995_v52  ;;  %vm621_vm3 = vcmp.eq.s32.totalorder %v14809_v15, %v13995_v52  ;;  %vm19615_vm5 = vcmp.eq.s32.totalorder %v14809_v15, %v13987_v49 }
 0x1ac   :  { %20311 = vst [vmem:[#allocation88_spill] sm:$0xff] %v20310_v44  ;;  %vm14820_vm10 = vmpackc.low %vm20314_vm9, %vm20313_vm4  ;;  %v20318_v44 = vmov 0  ;;  %vm877_vm4 = vcmp.eq.s32.totalorder %v14789_v36, %v14023_v57  ;;  %vm879_vm9 = vcmp.eq.s32.totalorder %v14809_v15, %v14023_v57  ;;  %12073 = vmatpush1.bf16.msk.msra.mxu0 %vm14829_vm2, %v20247_v26  ;;  %v14872_v38 = vadd.s32 264, %v13978_v45 }
 0x1ad   :  { %v20316_v30 = vsel %vm14820_vm10, 4294967295, %v20315_v30  ;;  %12201 = vmatprep.subr.msk.bf16.mxu1 %vm14820_vm10, %v20247_v26  ;;  %v20319_v44 = vsel %vm14829_vm2, 4294967295, %v20318_v44  ;;  %vm14842_vm11 = vmpackc.low %vm874_vm15, %vm872_vm1  ;;  %vm19617_vm15 = vcmp.eq.s32.totalorder %v14789_v36, %v14002_v53  ;;  %vm19619_vm1 = vcmp.eq.s32.totalorder %v14809_v15, %v14002_v53 }
 0x1ae   :  { %3026 = vrot.lane.b32.xlu1 %v2216_v35, %s13790_s30  ;;  %v2217_v35 = vld [vmem:[%s19440_s6] sm:$0xff]  ;;  %20317 = vst [vmem:[#allocation90_spill] sm:$0xff] %v20316_v30  ;;  %20320 = vst [vmem:[#allocation91_spill] sm:$0xff] %v20319_v44  ;;  %v20321_v30 = vmov 0  ;;  %12203 = vmatpush1.bf16.msk.msra.mxu1 %vm14842_vm11, %v20247_v26  ;;  %v20327_v44 = vmov 0  ;;  %v20341_v15 = vmov 0 }
 0x1af   :  { %v20322_v30 = vsel %vm14842_vm11, 4294967295, %v20321_v30  ;;  %vm14853_vm10 = vmpackc.low %vm621_vm3, %vm619_vm8  ;;  %20330 = vst [vmem:[#allocation95_spill] sm:$0xff] %v14872_v38  ;;  %vm20331_vm8 = vcmp.eq.s32.totalorder %v14789_v36, %v13987_v49  ;;  %v14925_v36 = vpop.permute.xlu1 %460 }
 0x1b0   :  { %20323 = vst [vmem:[#allocation92_spill] sm:$0xff] %v20322_v30  ;;  %12075 = vmatprep.subr.msk.bf16.mxu0 %vm14853_vm10, %v20247_v26  ;;  %vm14864_vm7 = vmpackc.low %vm879_vm9, %vm877_vm4  ;;  %v14869_v30 = vadd.s32 256, %v13978_v45 }
 0x1b1   :  { %v20328_v44 = vsel %vm14864_vm7, 4294967295, %v20327_v44  ;;  %12205 = vmatprep.subr.msk.bf16.mxu1 %vm14864_vm7, %v20247_v26  ;;  %vm14883_vm3 = vmpackc.low %vm19615_vm5, %vm20331_vm8  ;;  %vm625_vm8 = vcmp.eq.s32.totalorder %v14872_v38, %v13995_v52  ;;  %vm883_vm7 = vcmp.eq.s32.totalorder %v14872_v38, %v14023_v57 }
 0x1b2   :  { %3106 = vperm.xlu1 %13755, %v2217_v35   ;;  %v20324_v35 = vmov 0  ;;  %20329 = vst [vmem:[#allocation94_spill] sm:$0xff] %v20328_v44  ;;  %12077 = vmatpush1.bf16.msk.msra.mxu0 %vm14883_vm3, %v20247_v26  ;;  %vm14896_vm4 = vmpackc.low %vm19619_vm1, %vm19617_vm15  ;;  %v20335_v44 = vmov 0  ;;  %vm623_vm9 = vcmp.eq.s32.totalorder %v14869_v30, %v13995_v52  ;;  %vm881_vm5 = vcmp.eq.s32.totalorder %v14869_v30, %v14023_v57 }
 0x1b3   :  { %v20325_v35 = vsel %vm14853_vm10, 4294967295, %v20324_v35  ;;  %v20336_v44 = vsel %vm14896_vm4, 4294967295, %v20335_v44  ;;  %12207 = vmatpush1.bf16.msk.msra.mxu1 %vm14896_vm4, %v20247_v26  ;;  %vm14911_vm15 = vmpackc.low %vm625_vm8, %vm623_vm9  ;;  %vm882_vm8 = vcmp.eq.s32.totalorder %v14872_v38, %v14002_v53  ;;  %vm627_vm4 = vcmp.eq.s32.totalorder %v14928_v19, %v13995_v52 }
 0x1b4   :  { %20326 = vst [vmem:[#allocation93_spill] sm:$0xff] %v20325_v35  ;;  %v20332_v35 = vmov 0  ;;  %20337 = vst [vmem:[#allocation97_spill] sm:$0xff] %v20336_v44  ;;  %12079 = vmatprep.subr.msk.bf16.mxu0 %vm14911_vm15, %v20247_v26  ;;  %vm20344_vm9 = vcmp.eq.s32.totalorder %v14872_v38, %v13987_v49  ;;  %v20358_v38 = vmov 0 }
 0x1b5   :  { %v20333_v35 = vsel %vm14883_vm3, 4294967295, %v20332_v35  ;;  %vm14918_vm1 = vmpackc.low %vm883_vm7, %vm881_vm5  ;;  %vm622_vm7 = vcmp.eq.s32.totalorder %v14869_v30, %v13987_v49  ;;  %vm20347_vm5 = vcmp.eq.s32.totalorder %v14869_v30, %v14002_v53  ;;  %vm20367_vm3 = vcmp.eq.s32.totalorder %v14928_v19, %v14002_v53 }
 0x1b6   :  { %20334 = vst [vmem:[#allocation96_spill] sm:$0xff] %v20333_v35  ;;  %v20338_v35 = vmov 0  ;;  %v20342_v15 = vsel %vm14918_vm1, 4294967295, %v20341_v15  ;;  %12209 = vmatprep.subr.msk.bf16.mxu1 %vm14918_vm1, %v20247_v26  ;;  %vm14978_vm1 = vmpackc.low %vm20344_vm9, %vm622_vm7 }
 0x1b7   :  { %v20339_v35 = vsel %vm14911_vm15, 4294967295, %v20338_v35  ;;  %20343 = vst [vmem:[#allocation99_spill] sm:$0xff] %v20342_v15  ;;  %vm14997_vm7 = vmpackc.low %vm882_vm8, %vm20347_vm5  ;;  %vm20356_vm5 = vcmp.eq.s32.totalorder %v14928_v19, %v14023_v57 }
 0x1b8   :  { %20340 = vst [vmem:[#allocation98_spill] sm:$0xff] %v20339_v35  ;;  %v14931_v35 = vadd.s32 280, %v13978_v45  ;;  %v20349_v62 = vsel %vm14997_vm7, 4294967295, %v20348_v62 }
 0x1b9   :  { %20350 = vst [vmem:[#allocation100_spill] sm:$0xff] %v20349_v62  ;;  %v15123_v62 = vadd.s32 328, %v13978_v45 }
 0x1ba   :  { %vm629_vm11 = vcmp.eq.s32.totalorder %v14931_v35, %v13995_v52 }
 0x1bb   :  { %vm15011_vm15 = vmpackc.low %vm629_vm11, %vm627_vm4  ;;  %vm20357_vm11 = vcmp.eq.s32.totalorder %v14931_v35, %v14023_v57  ;;  %20386 = vst [vmem:[#allocation112_spill] sm:$0xff] %v15123_v62 }
 0x1bc   :  { %vm15031_vm4 = vmpackc.low %vm20357_vm11, %vm20356_vm5  ;;  %vm20362_vm5 = vcmp.eq.s32.totalorder %v14928_v19, %v13987_v49  ;;  %vm20363_vm11 = vcmp.eq.s32.totalorder %v14931_v35, %v13987_v49 }
 0x1bd   :  { %v20359_v38 = vsel %vm15031_vm4, 4294967295, %v20358_v38  ;;  %vm15053_vm8 = vmpackc.low %vm20363_vm11, %vm20362_vm5  ;;  %vm20368_vm5 = vcmp.eq.s32.totalorder %v14931_v35, %v14002_v53 }
 0x1be   :  { %20360 = vst [vmem:[#allocation104_spill] sm:$0xff] %v20359_v38  ;;  %vm15072_vm11 = vmpackc.low %vm20368_vm5, %vm20367_vm3 }
 0x21a   :  { %v432_v44 = vpop.xlane.xlu1 %431 }
 0x21e   :  { %v449_v43 = vpop.xlane.xlu1 %448 }
 0x21f   :  { %v450_v12 = vadd.f32 %v449_v43, %v432_v44 }
 0x221   :  { %v451_v17 = vmul.f32 0.0009803922, %v450_v12  ;;  %v14955_v12 = vadd.s32 296, %v13978_v45 }
 0x223   :  { %v452_v21 = vadd.f32 1e-05, %v451_v17  ;;  %v14952_v17 = vadd.s32 288, %v13978_v45  ;;  %vm20375_vm5 = vcmp.eq.s32.totalorder %v14955_v12, %v13995_v52 }
 0x225   :  { %13756 = vrsqrt.f32 %v452_v21  ;;  %vm20374_vm3 = vcmp.eq.s32.totalorder %v14952_v17, %v13995_v52  ;;  %vm20388_vm9 = vcmp.eq.s32.totalorder %v14952_v17, %v13987_v49 }
 0x226   :  { %vm15091_vm2 = vmpackc.low %vm20375_vm5, %vm20374_vm3 }
 0x22f   :  { %v13757_v44 = vpop.eup %13756 }
 0x230   :  { %v455_v21 = vmul.f32 %v13757_v44, %v14497_v6  ;;  %v454_v43 = vmul.f32 %v13757_v44, %v14494_v10  ;;  %v457_v15 = vmul.f32 %v13757_v44, %v14503_v29  ;;  %v456_v42 = vmul.f32 %v13757_v44, %v14500_v3  ;;  %v470_v3 = vpop.permute.xlu1 %469 }
 0x231   :  { %v477_v61 = vmul.f32 %v13757_v44, %v14509_v60  ;;  %v476_v31 = vmul.f32 %v13757_v44, %v14506_v2  ;;  %v20345_v60 = vmov 0 }
 0x232   :  { %v464_v27 = vmul.f32 %v14925_v36, %v455_v21  ;;  %v463_v6 = vmul.f32 %v14925_v36, %v454_v43  ;;  %v465_v10 = vmul.f32 %v14925_v36, %v456_v42  ;;  %v20346_v60 = vsel %vm14978_vm1, 4294967295, %v20345_v60 }
 0x233   :  { %v466_v2 = vmul.f32 %v14925_v36, %v457_v15  ;;  %v481_v29 = vmul.f32 %v477_v61, %v14925_v36  ;;  %v480_v42 = vmul.f32 %v476_v31, %v14925_v36  ;;  %v15016_v31 = vadd.s32 304, %v13978_v45 }
 0x234   :  { %v14987_v21 = vadd.f32 %v470_v3, %v464_v27  ;;  %v14989_v43 = vadd.f32 %v470_v3, %v463_v6  ;;  %v15003_v61 = vadd.f32 %v470_v3, %v465_v10  ;;  %v20351_v27 = vmov 0 }
 0x235   :  { %v20352_v27 = vsel %vm15011_vm15, 4294967295, %v20351_v27  ;;  %20354 = vst [vmem:[#allocation102_spill] sm:$0xff] %v15016_v31  ;;  %v15018_v15 = vadd.f32 %v481_v29, %v470_v3  ;;  %v15020_v6 = vadd.f32 %v480_v42, %v470_v3  ;;  %v479_v10 = vmul.f32 %v13757_v44, %v14521_v23 }
 0x236   :  { %20353 = vst [vmem:[#allocation101_spill] sm:$0xff] %v20352_v27  ;;  %1405 = vmatprep.mubr.f32.mxu0 %v14987_v21  ;;  %1553 = vmatprep.mubr.f32.mxu1 %v14987_v21  ;;  %v15040_v23 = vadd.s32 312, %v13978_v45  ;;  %v478_v29 = vmul.f32 %v13757_v44, %v14512_v18  ;;  %v15045_v42 = vadd.f32 %v470_v3, %v466_v2  ;;  %v20369_v44 = vmov 0 }
 0x237   :  { %20355 = vst [vmem:[#allocation103_spill] sm:$0xff] %v15020_v6  ;;  %1406 = vmatmul.mubr.f32.vlgmr.msra.gmra.mrb[4].mxu0 %v14989_v43  ;;  %1554 = vmatmul.mubr.f32.vlgmr.msra.gmra.mrb[4].mxu1 %v14989_v43  ;;  %v20364_v6 = vmov 0  ;;  %v483_v18 = vmul.f32 %v479_v10, %v14925_v36  ;;  %v20370_v44 = vsel %vm15072_vm11, 4294967295, %v20369_v44  ;;  %v20376_v10 = vmov 0 }
 0x238   :  { %20361 = vst [vmem:[#allocation105_spill] sm:$0xff] %v15040_v23  ;;  %v20365_v6 = vsel %vm15053_vm8, 4294967295, %v20364_v6  ;;  %12081 = vmatpush1.bf16.msk.msra.mxu0 %vm14978_vm1, %v20247_v26  ;;  %12211 = vmatpush1.bf16.msk.msra.mxu1 %vm14997_vm7, %v20247_v26  ;;  %20371 = vst [vmem:[#allocation107_spill] sm:$0xff] %v20370_v44  ;;  %v482_v2 = vmul.f32 %v478_v29, %v14925_v36  ;;  %vm20372_vm7 = vcmask 1031168   ;;  %v20377_v10 = vsel %vm15091_vm2, 4294967295, %v20376_v10 }
 0x239   :  { %20366 = vst [vmem:[#allocation106_spill] sm:$0xff] %v20365_v6  ;;  %8976 = vmatprep.mubr.msk.f32.mxu0 %vm20372_vm7, %v15045_v42  ;;  %vm20373_vm10 = vmmov %vm20372_vm7  ;;  %v15099_v36 = vadd.f32 %v483_v18, %v470_v3  ;;  %12083 = vmatprep.subr.msk.bf16.mxu0 %vm15011_vm15, %v20247_v26  ;;  %vm20381_vm7 = vcmp.eq.s32.totalorder %v14955_v12, %v14023_v57  ;;  %v20382_v29 = vmov 0  ;;  %v15120_v18 = vadd.s32 320, %v13978_v45 }
 0x23a   :  { %9105 = vmatprep.mubr.msk.f32.mxu1 %vm20373_vm10, %v15045_v42  ;;  %20378 = vst [vmem:[#allocation108_spill] sm:$0xff] %v20377_v10  ;;  %12213 = vmatprep.subr.msk.bf16.mxu1 %vm15031_vm4, %v20247_v26  ;;  %vm20380_vm10 = vcmp.eq.s32.totalorder %v14952_v17, %v14023_v57  ;;  %vm637_vm5 = vcmp.eq.s32.totalorder %v15040_v23, %v13995_v52  ;;  %v20390_v27 = vmov 0  ;;  %v20402_v44 = vmov 0 }
 0x23b   :  { %20379 = vst [vmem:[#allocation109_spill] sm:$0xff] %v15099_v36  ;;  %vm15113_vm3 = vmpackc.low %vm20381_vm7, %vm20380_vm10  ;;  %v15125_v38 = vadd.f32 %v482_v2, %v470_v3  ;;  %vm20389_vm10 = vcmp.eq.s32.totalorder %v14955_v12, %v13987_v49  ;;  %vm893_vm1 = vcmp.eq.s32.totalorder %v15016_v31, %v14023_v57  ;;  %vm895_vm4 = vcmp.eq.s32.totalorder %v15040_v23, %v14023_v57 }
 0x23c   :  { %v20383_v29 = vsel %vm15113_vm3, 4294967295, %v20382_v29  ;;  %20385 = vst [vmem:[#allocation111_spill] sm:$0xff] %v15120_v18  ;;  %vm15133_vm7 = vmpackc.low %vm20389_vm10, %vm20388_vm9  ;;  %12085 = vmatpush1.bf16.msk.msra.mxu0 %vm15053_vm8, %v20247_v26  ;;  %12215 = vmatpush1.bf16.msk.msra.mxu1 %vm15072_vm11, %v20247_v26  ;;  %vm20393_vm9 = vcmp.eq.s32.totalorder %v14952_v17, %v14002_v53  ;;  %vm20394_vm10 = vcmp.eq.s32.totalorder %v14955_v12, %v14002_v53  ;;  %v20395_v3 = vmov 0 }
 0x23d   :  { %20384 = vst [vmem:[#allocation110_spill] sm:$0xff] %v20383_v29  ;;  %20387 = vst [vmem:[#allocation113_spill] sm:$0xff] %v15125_v38  ;;  %v20391_v27 = vsel %vm15133_vm7, 4294967295, %v20390_v27  ;;  %vm634_vm14 = vcmp.eq.s32.totalorder %v15016_v31, %v13987_v49  ;;  %vm636_vm8 = vcmp.eq.s32.totalorder %v15040_v23, %v13987_v49  ;;  %12087 = vmatprep.subr.msk.bf16.mxu0 %vm15091_vm2, %v20247_v26  ;;  %12217 = vmatprep.subr.msk.bf16.mxu1 %vm15113_vm3, %v20247_v26  ;;  %v20399_v2 = vmov 0 }
 0x23e   :  { %20392 = vst [vmem:[#allocation114_spill] sm:$0xff] %v20391_v27  ;;  %vm15153_vm15 = vmpackc.low %vm20394_vm10, %vm20393_vm9  ;;  %vm20398_vm9 = vcmp.eq.s32.totalorder %v15016_v31, %v13995_v52  ;;  %vm892_vm11 = vcmp.eq.s32.totalorder %v15016_v31, %v14002_v53  ;;  %vm894_vm12 = vcmp.eq.s32.totalorder %v15040_v23, %v14002_v53  ;;  %vm639_vm3 = vcmp.eq.s32.totalorder %v15120_v18, %v13995_v52 }
 0x23f   :  { %v20396_v3 = vsel %vm15153_vm15, 4294967295, %v20395_v3  ;;  %vm15170_vm10 = vmpackc.low %vm637_vm5, %vm20398_vm9  ;;  %vm641_vm2 = vcmp.eq.s32.totalorder %v15123_v62, %v13995_v52  ;;  %v15187_v29 = vadd.s32 336, %v13978_v45  ;;  %v15190_v38 = vadd.s32 344, %v13978_v45 }
 0x240   :  { %20397 = vst [vmem:[#allocation115_spill] sm:$0xff] %v20396_v3  ;;  %v20400_v2 = vsel %vm15170_vm10, 4294967295, %v20399_v2  ;;  %vm15178_vm0 = vmpackc.low %vm895_vm4, %vm893_vm1  ;;  %v20407_v10 = vmov 0  ;;  %vm897_vm1 = vcmp.eq.s32.totalorder %v15120_v18, %v14023_v57  ;;  %vm899_vm4 = vcmp.eq.s32.totalorder %v15123_v62, %v14023_v57  ;;  %12089 = vmatpush1.bf16.msk.msra.mxu0 %vm15133_vm7, %v20247_v26  ;;  %12219 = vmatpush1.bf16.msk.msra.mxu1 %vm15153_vm15, %v20247_v26 }
 0x241   :  { %20401 = vst [vmem:[#allocation116_spill] sm:$0xff] %v20400_v2  ;;  %v20403_v44 = vsel %vm15178_vm0, 4294967295, %v20402_v44  ;;  %20405 = vst [vmem:[#allocation118_spill] sm:$0xff] %v15187_v29  ;;  %v20410_v6 = vmov 0  ;;  %12091 = vmatprep.subr.msk.bf16.mxu0 %vm15170_vm10, %v20247_v26  ;;  %12221 = vmatprep.subr.msk.bf16.mxu1 %vm15178_vm0, %v20247_v26  ;;  %v20413_v3 = vmov 0  ;;  %v20416_v27 = vmov 0 }
 0x242   :  { %20404 = vst [vmem:[#allocation117_spill] sm:$0xff] %v20403_v44  ;;  %20406 = vst [vmem:[#allocation119_spill] sm:$0xff] %v15190_v38  ;;  %vm643_vm10 = vcmp.eq.s32.totalorder %v15187_v29, %v13995_v52  ;;  %vm645_vm0 = vcmp.eq.s32.totalorder %v15190_v38, %v13995_v52  ;;  %v15237_v44 = vadd.s32 352, %v13978_v45  ;;  %v15240_v2 = vadd.s32 360, %v13978_v45 }
 0x243   :  { %vm15192_vm5 = vmpackc.low %vm636_vm8, %vm634_vm14  ;;  %vm638_vm14 = vcmp.eq.s32.totalorder %v15120_v18, %v13987_v49  ;;  %vm640_vm8 = vcmp.eq.s32.totalorder %v15123_v62, %v13987_v49  ;;  %v20537_v23 = vmov 0  ;;  %v20573_v36 = vmov 0 }
 0x244   :  { %v20408_v10 = vsel %vm15192_vm5, 4294967295, %v20407_v10  ;;  %vm15206_vm9 = vmpackc.low %vm894_vm12, %vm892_vm11  ;;  %vm896_vm12 = vcmp.eq.s32.totalorder %v15120_v18, %v14002_v53  ;;  %vm898_vm11 = vcmp.eq.s32.totalorder %v15123_v62, %v14002_v53  ;;  %20419 = vst [vmem:[#allocation124_spill] sm:$0xff] %v15237_v44  ;;  %v20421_v18 = vmov 0  ;;  %12093 = vmatpush1.bf16.msk.msra.mxu0 %vm15192_vm5, %v20247_v26 }
 0x245   :  { %20409 = vst [vmem:[#allocation120_spill] sm:$0xff] %v20408_v10  ;;  %v20411_v6 = vsel %vm15206_vm9, 4294967295, %v20410_v6  ;;  %vm15220_vm7 = vmpackc.low %vm641_vm2, %vm639_vm3  ;;  %vm901_vm3 = vcmp.eq.s32.totalorder %v15187_v29, %v14023_v57  ;;  %12223 = vmatpush1.bf16.msk.msra.mxu1 %vm15206_vm9, %v20247_v26  ;;  %v20424_v62 = vmov 0  ;;  %v20430_v10 = vmov 0 }
 0x246   :  { %20412 = vst [vmem:[#allocation121_spill] sm:$0xff] %v20411_v6  ;;  %v20414_v3 = vsel %vm15220_vm7, 4294967295, %v20413_v3  ;;  %vm15228_vm15 = vmpackc.low %vm899_vm4, %vm897_vm1  ;;  %vm903_vm1 = vcmp.eq.s32.totalorder %v15190_v38, %v14023_v57  ;;  %12095 = vmatprep.subr.msk.bf16.mxu0 %vm15220_vm7, %v20247_v26  ;;  %v20427_v6 = vmov 0  ;;  %vm647_vm7 = vcmp.eq.s32.totalorder %v15237_v44, %v13995_v52 }
 0x247   :  { %20415 = vst [vmem:[#allocation122_spill] sm:$0xff] %v20414_v3  ;;  %v20417_v27 = vsel %vm15228_vm15, 4294967295, %v20416_v27  ;;  %20420 = vst [vmem:[#allocation125_spill] sm:$0xff] %v15240_v2  ;;  %12225 = vmatprep.subr.msk.bf16.mxu1 %vm15228_vm15, %v20247_v26  ;;  %vm649_vm15 = vcmp.eq.s32.totalorder %v15240_v2, %v13995_v52  ;;  %v15290_v3 = vadd.s32 376, %v13978_v45 }
 0x248   :  { %20418 = vst [vmem:[#allocation123_spill] sm:$0xff] %v20417_v27  ;;  %vm15242_vm2 = vmpackc.low %vm640_vm8, %vm638_vm14  ;;  %vm642_vm14 = vcmp.eq.s32.totalorder %v15187_v29, %v13987_v49  ;;  %vm644_vm8 = vcmp.eq.s32.totalorder %v15190_v38, %v13987_v49  ;;  %v15287_v27 = vadd.s32 368, %v13978_v45 }
 0x249   :  { %v20422_v18 = vsel %vm15242_vm2, 4294967295, %v20421_v18  ;;  %vm15256_vm4 = vmpackc.low %vm898_vm11, %vm896_vm12  ;;  %vm900_vm12 = vcmp.eq.s32.totalorder %v15187_v29, %v14002_v53  ;;  %vm902_vm11 = vcmp.eq.s32.totalorder %v15190_v38, %v14002_v53  ;;  %20434 = vst [vmem:[#allocation131_spill] sm:$0xff] %v15290_v3  ;;  %v20435_v29 = vmov 0  ;;  %12097 = vmatpush1.bf16.msk.msra.mxu0 %vm15242_vm2, %v20247_v26 }
 0x24a   :  { %20423 = vst [vmem:[#allocation126_spill] sm:$0xff] %v20422_v18  ;;  %v20425_v62 = vsel %vm15256_vm4, 4294967295, %v20424_v62  ;;  %vm15270_vm5 = vmpackc.low %vm645_vm0, %vm643_vm10  ;;  %vm905_vm10 = vcmp.eq.s32.totalorder %v15237_v44, %v14023_v57  ;;  %12227 = vmatpush1.bf16.msk.msra.mxu1 %vm15256_vm4, %v20247_v26  ;;  %v20438_v38 = vmov 0  ;;  %v20444_v18 = vmov 0 }
 0x24b   :  { %20426 = vst [vmem:[#allocation127_spill] sm:$0xff] %v20425_v62  ;;  %v20428_v6 = vsel %vm15270_vm5, 4294967295, %v20427_v6  ;;  %vm15278_vm9 = vmpackc.low %vm903_vm1, %vm901_vm3  ;;  %vm907_vm3 = vcmp.eq.s32.totalorder %v15240_v2, %v14023_v57  ;;  %12099 = vmatprep.subr.msk.bf16.mxu0 %vm15270_vm5, %v20247_v26  ;;  %v20441_v62 = vmov 0  ;;  %vm651_vm5 = vcmp.eq.s32.totalorder %v15287_v27, %v13995_v52 }
 0x24c   :  { %20429 = vst [vmem:[#allocation128_spill] sm:$0xff] %v20428_v6  ;;  %v20431_v10 = vsel %vm15278_vm9, 4294967295, %v20430_v10  ;;  %20433 = vst [vmem:[#allocation130_spill] sm:$0xff] %v15287_v27  ;;  %12229 = vmatprep.subr.msk.bf16.mxu1 %vm15278_vm9, %v20247_v26  ;;  %vm653_vm9 = vcmp.eq.s32.totalorder %v15290_v3, %v13995_v52  ;;  %v15340_v6 = vadd.s32 392, %v13978_v45 }
 0x24d   :  { %20432 = vst [vmem:[#allocation129_spill] sm:$0xff] %v20431_v10  ;;  %vm15292_vm0 = vmpackc.low %vm644_vm8, %vm642_vm14  ;;  %vm646_vm14 = vcmp.eq.s32.totalorder %v15237_v44, %v13987_v49  ;;  %vm648_vm8 = vcmp.eq.s32.totalorder %v15240_v2, %v13987_v49  ;;  %v15337_v10 = vadd.s32 384, %v13978_v45 }
 0x24e   :  { %v20436_v29 = vsel %vm15292_vm0, 4294967295, %v20435_v29  ;;  %vm15306_vm1 = vmpackc.low %vm902_vm11, %vm900_vm12  ;;  %vm904_vm12 = vcmp.eq.s32.totalorder %v15237_v44, %v14002_v53  ;;  %vm906_vm11 = vcmp.eq.s32.totalorder %v15240_v2, %v14002_v53  ;;  %20448 = vst [vmem:[#allocation137_spill] sm:$0xff] %v15340_v6  ;;  %v20449_v44 = vmov 0  ;;  %12101 = vmatpush1.bf16.msk.msra.mxu0 %vm15292_vm0, %v20247_v26 }
 0x24f   :  { %20437 = vst [vmem:[#allocation132_spill] sm:$0xff] %v20436_v29  ;;  %v20439_v38 = vsel %vm15306_vm1, 4294967295, %v20438_v38  ;;  %vm15320_vm2 = vmpackc.low %vm649_vm15, %vm647_vm7  ;;  %vm909_vm7 = vcmp.eq.s32.totalorder %v15287_v27, %v14023_v57  ;;  %12231 = vmatpush1.bf16.msk.msra.mxu1 %vm15306_vm1, %v20247_v26  ;;  %v20452_v2 = vmov 0  ;;  %v20458_v29 = vmov 0 }
 0x250   :  { %20440 = vst [vmem:[#allocation133_spill] sm:$0xff] %v20439_v38  ;;  %v20442_v62 = vsel %vm15320_vm2, 4294967295, %v20441_v62  ;;  %vm15328_vm4 = vmpackc.low %vm907_vm3, %vm905_vm10  ;;  %vm911_vm10 = vcmp.eq.s32.totalorder %v15290_v3, %v14023_v57  ;;  %12103 = vmatprep.subr.msk.bf16.mxu0 %vm15320_vm2, %v20247_v26  ;;  %v20455_v38 = vmov 0  ;;  %vm655_vm2 = vcmp.eq.s32.totalorder %v15337_v10, %v13995_v52 }
 0x251   :  { %20443 = vst [vmem:[#allocation134_spill] sm:$0xff] %v20442_v62  ;;  %v20445_v18 = vsel %vm15328_vm4, 4294967295, %v20444_v18  ;;  %20447 = vst [vmem:[#allocation136_spill] sm:$0xff] %v15337_v10  ;;  %12233 = vmatprep.subr.msk.bf16.mxu1 %vm15328_vm4, %v20247_v26  ;;  %vm657_vm4 = vcmp.eq.s32.totalorder %v15340_v6, %v13995_v52  ;;  %v15390_v62 = vadd.s32 408, %v13978_v45 }
 0x252   :  { %20446 = vst [vmem:[#allocation135_spill] sm:$0xff] %v20445_v18  ;;  %vm15342_vm15 = vmpackc.low %vm648_vm8, %vm646_vm14  ;;  %vm650_vm14 = vcmp.eq.s32.totalorder %v15287_v27, %v13987_v49  ;;  %vm652_vm8 = vcmp.eq.s32.totalorder %v15290_v3, %v13987_v49  ;;  %v15387_v18 = vadd.s32 400, %v13978_v45 }
 0x253   :  { %v20450_v44 = vsel %vm15342_vm15, 4294967295, %v20449_v44  ;;  %vm15356_vm3 = vmpackc.low %vm906_vm11, %vm904_vm12  ;;  %vm908_vm12 = vcmp.eq.s32.totalorder %v15287_v27, %v14002_v53  ;;  %vm910_vm11 = vcmp.eq.s32.totalorder %v15290_v3, %v14002_v53  ;;  %20462 = vst [vmem:[#allocation143_spill] sm:$0xff] %v15390_v62  ;;  %v20463_v27 = vmov 0  ;;  %12105 = vmatpush1.bf16.msk.msra.mxu0 %vm15342_vm15, %v20247_v26 }
 0x254   :  { %20451 = vst [vmem:[#allocation138_spill] sm:$0xff] %v20450_v44  ;;  %v20453_v2 = vsel %vm15356_vm3, 4294967295, %v20452_v2  ;;  %vm15370_vm0 = vmpackc.low %vm653_vm9, %vm651_vm5  ;;  %vm913_vm9 = vcmp.eq.s32.totalorder %v15337_v10, %v14023_v57  ;;  %12235 = vmatpush1.bf16.msk.msra.mxu1 %vm15356_vm3, %v20247_v26  ;;  %v20466_v3 = vmov 0  ;;  %v20472_v44 = vmov 0 }
 0x255   :  { %20454 = vst [vmem:[#allocation139_spill] sm:$0xff] %v20453_v2  ;;  %v20456_v38 = vsel %vm15370_vm0, 4294967295, %v20455_v38  ;;  %vm15378_vm1 = vmpackc.low %vm911_vm10, %vm909_vm7  ;;  %vm915_vm7 = vcmp.eq.s32.totalorder %v15340_v6, %v14023_v57  ;;  %12107 = vmatprep.subr.msk.bf16.mxu0 %vm15370_vm0, %v20247_v26  ;;  %v20469_v2 = vmov 0  ;;  %vm659_vm0 = vcmp.eq.s32.totalorder %v15387_v18, %v13995_v52 }
 0x256   :  { %20457 = vst [vmem:[#allocation140_spill] sm:$0xff] %v20456_v38  ;;  %v20459_v29 = vsel %vm15378_vm1, 4294967295, %v20458_v29  ;;  %20461 = vst [vmem:[#allocation142_spill] sm:$0xff] %v15387_v18  ;;  %12237 = vmatprep.subr.msk.bf16.mxu1 %vm15378_vm1, %v20247_v26  ;;  %vm661_vm1 = vcmp.eq.s32.totalorder %v15390_v62, %v13995_v52  ;;  %v15440_v38 = vadd.s32 424, %v13978_v45 }
 0x257   :  { %20460 = vst [vmem:[#allocation141_spill] sm:$0xff] %v20459_v29  ;;  %vm15392_vm5 = vmpackc.low %vm652_vm8, %vm650_vm14  ;;  %vm654_vm14 = vcmp.eq.s32.totalorder %v15337_v10, %v13987_v49  ;;  %vm656_vm8 = vcmp.eq.s32.totalorder %v15340_v6, %v13987_v49  ;;  %v15437_v29 = vadd.s32 416, %v13978_v45 }
 0x258   :  { %v20464_v27 = vsel %vm15392_vm5, 4294967295, %v20463_v27  ;;  %vm15406_vm10 = vmpackc.low %vm910_vm11, %vm908_vm12  ;;  %vm912_vm12 = vcmp.eq.s32.totalorder %v15337_v10, %v14002_v53  ;;  %vm914_vm11 = vcmp.eq.s32.totalorder %v15340_v6, %v14002_v53  ;;  %20476 = vst [vmem:[#allocation149_spill] sm:$0xff] %v15440_v38  ;;  %v20477_v10 = vmov 0  ;;  %12109 = vmatpush1.bf16.msk.msra.mxu0 %vm15392_vm5, %v20247_v26 }
 0x259   :  { %20465 = vst [vmem:[#allocation144_spill] sm:$0xff] %v20464_v27  ;;  %v20467_v3 = vsel %vm15406_vm10, 4294967295, %v20466_v3  ;;  %vm15420_vm15 = vmpackc.low %vm657_vm4, %vm655_vm2  ;;  %vm917_vm4 = vcmp.eq.s32.totalorder %v15387_v18, %v14023_v57  ;;  %12239 = vmatpush1.bf16.msk.msra.mxu1 %vm15406_vm10, %v20247_v26  ;;  %v20480_v6 = vmov 0  ;;  %v20486_v27 = vmov 0 }
 0x25a   :  { %20468 = vst [vmem:[#allocation145_spill] sm:$0xff] %v20467_v3  ;;  %v20470_v2 = vsel %vm15420_vm15, 4294967295, %v20469_v2  ;;  %vm15428_vm3 = vmpackc.low %vm915_vm7, %vm913_vm9  ;;  %vm919_vm9 = vcmp.eq.s32.totalorder %v15390_v62, %v14023_v57  ;;  %12111 = vmatprep.subr.msk.bf16.mxu0 %vm15420_vm15, %v20247_v26  ;;  %v20483_v3 = vmov 0  ;;  %vm663_vm15 = vcmp.eq.s32.totalorder %v15437_v29, %v13995_v52 }
 0x25b   :  { %20471 = vst [vmem:[#allocation146_spill] sm:$0xff] %v20470_v2  ;;  %v20473_v44 = vsel %vm15428_vm3, 4294967295, %v20472_v44  ;;  %20475 = vst [vmem:[#allocation148_spill] sm:$0xff] %v15437_v29  ;;  %12241 = vmatprep.subr.msk.bf16.mxu1 %vm15428_vm3, %v20247_v26  ;;  %vm665_vm3 = vcmp.eq.s32.totalorder %v15440_v38, %v13995_v52  ;;  %v15490_v2 = vadd.s32 440, %v13978_v45 }
 0x25c   :  { %20474 = vst [vmem:[#allocation147_spill] sm:$0xff] %v20473_v44  ;;  %vm15442_vm2 = vmpackc.low %vm656_vm8, %vm654_vm14  ;;  %vm658_vm14 = vcmp.eq.s32.totalorder %v15387_v18, %v13987_v49  ;;  %vm660_vm8 = vcmp.eq.s32.totalorder %v15390_v62, %v13987_v49  ;;  %v15487_v44 = vadd.s32 432, %v13978_v45 }
 0x25d   :  { %v20478_v10 = vsel %vm15442_vm2, 4294967295, %v20477_v10  ;;  %vm15456_vm7 = vmpackc.low %vm914_vm11, %vm912_vm12  ;;  %vm916_vm12 = vcmp.eq.s32.totalorder %v15387_v18, %v14002_v53  ;;  %vm918_vm11 = vcmp.eq.s32.totalorder %v15390_v62, %v14002_v53  ;;  %20490 = vst [vmem:[#allocation155_spill] sm:$0xff] %v15490_v2  ;;  %v20491_v18 = vmov 0  ;;  %12113 = vmatpush1.bf16.msk.msra.mxu0 %vm15442_vm2, %v20247_v26 }
 0x25e   :  { %20479 = vst [vmem:[#allocation150_spill] sm:$0xff] %v20478_v10  ;;  %v20481_v6 = vsel %vm15456_vm7, 4294967295, %v20480_v6  ;;  %vm15470_vm5 = vmpackc.low %vm661_vm1, %vm659_vm0  ;;  %vm921_vm1 = vcmp.eq.s32.totalorder %v15437_v29, %v14023_v57  ;;  %12243 = vmatpush1.bf16.msk.msra.mxu1 %vm15456_vm7, %v20247_v26  ;;  %v20494_v62 = vmov 0  ;;  %v20500_v10 = vmov 0 }
 0x25f   :  { %20482 = vst [vmem:[#allocation151_spill] sm:$0xff] %v20481_v6  ;;  %v20484_v3 = vsel %vm15470_vm5, 4294967295, %v20483_v3  ;;  %vm15478_vm10 = vmpackc.low %vm919_vm9, %vm917_vm4  ;;  %vm923_vm4 = vcmp.eq.s32.totalorder %v15440_v38, %v14023_v57  ;;  %12115 = vmatprep.subr.msk.bf16.mxu0 %vm15470_vm5, %v20247_v26  ;;  %v20497_v6 = vmov 0  ;;  %vm667_vm5 = vcmp.eq.s32.totalorder %v15487_v44, %v13995_v52 }
 0x260   :  { %20485 = vst [vmem:[#allocation152_spill] sm:$0xff] %v20484_v3  ;;  %v20487_v27 = vsel %vm15478_vm10, 4294967295, %v20486_v27  ;;  %20489 = vst [vmem:[#allocation154_spill] sm:$0xff] %v15487_v44  ;;  %12245 = vmatprep.subr.msk.bf16.mxu1 %vm15478_vm10, %v20247_v26  ;;  %vm669_vm10 = vcmp.eq.s32.totalorder %v15490_v2, %v13995_v52  ;;  %v15540_v3 = vadd.s32 456, %v13978_v45 }
 0x261   :  { %20488 = vst [vmem:[#allocation153_spill] sm:$0xff] %v20487_v27  ;;  %vm15492_vm0 = vmpackc.low %vm660_vm8, %vm658_vm14  ;;  %vm662_vm14 = vcmp.eq.s32.totalorder %v15437_v29, %v13987_v49  ;;  %vm664_vm8 = vcmp.eq.s32.totalorder %v15440_v38, %v13987_v49  ;;  %v15537_v27 = vadd.s32 448, %v13978_v45 }
 0x262   :  { %v20492_v18 = vsel %vm15492_vm0, 4294967295, %v20491_v18  ;;  %vm15506_vm9 = vmpackc.low %vm918_vm11, %vm916_vm12  ;;  %vm920_vm12 = vcmp.eq.s32.totalorder %v15437_v29, %v14002_v53  ;;  %vm922_vm11 = vcmp.eq.s32.totalorder %v15440_v38, %v14002_v53  ;;  %20504 = vst [vmem:[#allocation161_spill] sm:$0xff] %v15540_v3  ;;  %v20505_v29 = vmov 0  ;;  %12117 = vmatpush1.bf16.msk.msra.mxu0 %vm15492_vm0, %v20247_v26 }
 0x263   :  { %20493 = vst [vmem:[#allocation156_spill] sm:$0xff] %v20492_v18  ;;  %v20495_v62 = vsel %vm15506_vm9, 4294967295, %v20494_v62  ;;  %vm15520_vm2 = vmpackc.low %vm665_vm3, %vm663_vm15  ;;  %vm925_vm3 = vcmp.eq.s32.totalorder %v15487_v44, %v14023_v57  ;;  %12247 = vmatpush1.bf16.msk.msra.mxu1 %vm15506_vm9, %v20247_v26  ;;  %v20508_v38 = vmov 0  ;;  %v20514_v18 = vmov 0 }
 0x264   :  { %20496 = vst [vmem:[#allocation157_spill] sm:$0xff] %v20495_v62  ;;  %v20498_v6 = vsel %vm15520_vm2, 4294967295, %v20497_v6  ;;  %vm15528_vm7 = vmpackc.low %vm923_vm4, %vm921_vm1  ;;  %vm927_vm1 = vcmp.eq.s32.totalorder %v15490_v2, %v14023_v57  ;;  %12119 = vmatprep.subr.msk.bf16.mxu0 %vm15520_vm2, %v20247_v26  ;;  %v20511_v62 = vmov 0  ;;  %vm671_vm2 = vcmp.eq.s32.totalorder %v15537_v27, %v13995_v52 }
 0x265   :  { %20499 = vst [vmem:[#allocation158_spill] sm:$0xff] %v20498_v6  ;;  %v20501_v10 = vsel %vm15528_vm7, 4294967295, %v20500_v10  ;;  %20503 = vst [vmem:[#allocation160_spill] sm:$0xff] %v15537_v27  ;;  %12249 = vmatprep.subr.msk.bf16.mxu1 %vm15528_vm7, %v20247_v26  ;;  %vm673_vm7 = vcmp.eq.s32.totalorder %v15540_v3, %v13995_v52  ;;  %v15590_v6 = vadd.s32 472, %v13978_v45 }
 0x266   :  { %20502 = vst [vmem:[#allocation159_spill] sm:$0xff] %v20501_v10  ;;  %vm15542_vm15 = vmpackc.low %vm664_vm8, %vm662_vm14  ;;  %vm666_vm14 = vcmp.eq.s32.totalorder %v15487_v44, %v13987_v49  ;;  %vm668_vm8 = vcmp.eq.s32.totalorder %v15490_v2, %v13987_v49  ;;  %v15587_v10 = vadd.s32 464, %v13978_v45 }
 0x267   :  { %v20506_v29 = vsel %vm15542_vm15, 4294967295, %v20505_v29  ;;  %vm15556_vm4 = vmpackc.low %vm922_vm11, %vm920_vm12  ;;  %vm924_vm12 = vcmp.eq.s32.totalorder %v15487_v44, %v14002_v53  ;;  %vm926_vm11 = vcmp.eq.s32.totalorder %v15490_v2, %v14002_v53  ;;  %20518 = vst [vmem:[#allocation167_spill] sm:$0xff] %v15590_v6  ;;  %v20519_v44 = vmov 0  ;;  %12121 = vmatpush1.bf16.msk.msra.mxu0 %vm15542_vm15, %v20247_v26 }
 0x268   :  { %20507 = vst [vmem:[#allocation162_spill] sm:$0xff] %v20506_v29  ;;  %v20509_v38 = vsel %vm15556_vm4, 4294967295, %v20508_v38  ;;  %vm15570_vm0 = vmpackc.low %vm669_vm10, %vm667_vm5  ;;  %vm929_vm10 = vcmp.eq.s32.totalorder %v15537_v27, %v14023_v57  ;;  %12251 = vmatpush1.bf16.msk.msra.mxu1 %vm15556_vm4, %v20247_v26  ;;  %v20522_v2 = vmov 0  ;;  %v20528_v29 = vmov 0 }
 0x269   :  { %20510 = vst [vmem:[#allocation163_spill] sm:$0xff] %v20509_v38  ;;  %v20512_v62 = vsel %vm15570_vm0, 4294967295, %v20511_v62  ;;  %vm15578_vm9 = vmpackc.low %vm927_vm1, %vm925_vm3  ;;  %vm931_vm3 = vcmp.eq.s32.totalorder %v15540_v3, %v14023_v57  ;;  %12123 = vmatprep.subr.msk.bf16.mxu0 %vm15570_vm0, %v20247_v26  ;;  %v20525_v38 = vmov 0  ;;  %vm675_vm0 = vcmp.eq.s32.totalorder %v15587_v10, %v13995_v52 }
 0x26a   :  { %20513 = vst [vmem:[#allocation164_spill] sm:$0xff] %v20512_v62  ;;  %v20515_v18 = vsel %vm15578_vm9, 4294967295, %v20514_v18  ;;  %20517 = vst [vmem:[#allocation166_spill] sm:$0xff] %v15587_v10  ;;  %12253 = vmatprep.subr.msk.bf16.mxu1 %vm15578_vm9, %v20247_v26  ;;  %vm677_vm9 = vcmp.eq.s32.totalorder %v15590_v6, %v13995_v52  ;;  %v15640_v62 = vadd.s32 488, %v13978_v45 }
 0x26b   :  { %20516 = vst [vmem:[#allocation165_spill] sm:$0xff] %v20515_v18  ;;  %vm15592_vm5 = vmpackc.low %vm668_vm8, %vm666_vm14  ;;  %vm670_vm14 = vcmp.eq.s32.totalorder %v15537_v27, %v13987_v49  ;;  %vm672_vm8 = vcmp.eq.s32.totalorder %v15540_v3, %v13987_v49  ;;  %v15637_v18 = vadd.s32 480, %v13978_v45 }
 0x26c   :  { %v20520_v44 = vsel %vm15592_vm5, 4294967295, %v20519_v44  ;;  %vm15606_vm1 = vmpackc.low %vm926_vm11, %vm924_vm12  ;;  %vm928_vm12 = vcmp.eq.s32.totalorder %v15537_v27, %v14002_v53  ;;  %vm930_vm11 = vcmp.eq.s32.totalorder %v15540_v3, %v14002_v53  ;;  %20532 = vst [vmem:[#allocation173_spill] sm:$0xff] %v15640_v62  ;;  %v20533_v27 = vmov 0  ;;  %12125 = vmatpush1.bf16.msk.msra.mxu0 %vm15592_vm5, %v20247_v26 }
 0x26d   :  { %20521 = vst [vmem:[#allocation168_spill] sm:$0xff] %v20520_v44  ;;  %v20523_v2 = vsel %vm15606_vm1, 4294967295, %v20522_v2  ;;  %vm15620_vm15 = vmpackc.low %vm673_vm7, %vm671_vm2  ;;  %vm933_vm7 = vcmp.eq.s32.totalorder %v15587_v10, %v14023_v57  ;;  %v15651_v3 = vadd.s32 504, %v13978_v45  ;;  %12255 = vmatpush1.bf16.msk.msra.mxu1 %vm15606_vm1, %v20247_v26  ;;  %vm934_vm1 = vcmp.eq.s32.totalorder %v15590_v6, %v14002_v53 }
 0x26e   :  { %20524 = vst [vmem:[#allocation169_spill] sm:$0xff] %v20523_v2  ;;  %v20526_v38 = vsel %vm15620_vm15, 4294967295, %v20525_v38  ;;  %vm15628_vm4 = vmpackc.low %vm931_vm3, %vm929_vm10  ;;  %vm935_vm10 = vcmp.eq.s32.totalorder %v15590_v6, %v14023_v57  ;;  %12127 = vmatprep.subr.msk.bf16.mxu0 %vm15620_vm15, %v20247_v26  ;;  %v20540_v2 = vmov 0  ;;  %v20543_v44 = vmov 0 }
 0x26f   :  { %20527 = vst [vmem:[#allocation170_spill] sm:$0xff] %v20526_v38  ;;  %v20529_v29 = vsel %vm15628_vm4, 4294967295, %v20528_v29  ;;  %20531 = vst [vmem:[#allocation172_spill] sm:$0xff] %v15637_v18  ;;  %12257 = vmatprep.subr.msk.bf16.mxu1 %vm15628_vm4, %v20247_v26  ;;  %v15685_v38 = vadd.s32 496, %v13978_v45  ;;  %vm679_vm4 = vcmp.eq.s32.totalorder %v15637_v18, %v13995_v52  ;;  %vm942_vm5 = vcmp.eq.s32.totalorder %v15651_v3, %v14002_v53 }
 0x270   :  { %20530 = vst [vmem:[#allocation171_spill] sm:$0xff] %v20529_v29  ;;  %vm15642_vm2 = vmpackc.low %vm672_vm8, %vm670_vm14  ;;  %vm674_vm14 = vcmp.eq.s32.totalorder %v15587_v10, %v13987_v49  ;;  %vm676_vm8 = vcmp.eq.s32.totalorder %v15590_v6, %v13987_v49  ;;  %v20546_v29 = vmov 0  ;;  %v20549_v6 = vmov 0 }
 0x271   :  { %v20534_v27 = vsel %vm15642_vm2, 4294967295, %v20533_v27  ;;  %20536 = vst [vmem:[#allocation175_spill] sm:$0xff] %v15651_v3  ;;  %vm15659_vm3 = vmpackc.low %vm930_vm11, %vm928_vm12  ;;  %vm932_vm11 = vcmp.eq.s32.totalorder %v15587_v10, %v14002_v53  ;;  %12129 = vmatpush1.bf16.msk.msra.mxu0 %vm15642_vm2, %v20247_v26 }
 0x272   :  { %20535 = vst [vmem:[#allocation174_spill] sm:$0xff] %v20534_v27  ;;  %v20538_v23 = vsel %vm15659_vm3, 4294967295, %v20537_v23  ;;  %vm15676_vm12 = vmpackc.low %vm677_vm9, %vm675_vm0  ;;  %vm681_vm0 = vcmp.eq.s32.totalorder %v15640_v62, %v13995_v52  ;;  %12259 = vmatpush1.bf16.msk.msra.mxu1 %vm15659_vm3, %v20247_v26  ;;  %vm684_vm3 = vcmp.eq.s32.totalorder %v15651_v3, %v13987_v49 }
 0x273   :  { %20539 = vst [vmem:[#allocation176_spill] sm:$0xff] %v20538_v23  ;;  %v20541_v2 = vsel %vm15676_vm12, 4294967295, %v20540_v2  ;;  %vm15687_vm15 = vmpackc.low %vm935_vm10, %vm933_vm7  ;;  %vm943_vm10 = vcmp.eq.s32.totalorder %v15651_v3, %v14023_v57  ;;  %vm680_vm7 = vcmp.eq.s32.totalorder %v15640_v62, %v13987_v49  ;;  %12131 = vmatprep.subr.msk.bf16.mxu0 %vm15676_vm12, %v20247_v26  ;;  %v20552_v23 = vmov 0 }
 0x274   :  { %20542 = vst [vmem:[#allocation177_spill] sm:$0xff] %v20541_v2  ;;  %v20544_v44 = vsel %vm15687_vm15, 4294967295, %v20543_v44  ;;  %vm15695_vm9 = vmpackc.low %vm676_vm8, %vm674_vm14  ;;  %vm678_vm8 = vcmp.eq.s32.totalorder %v15637_v18, %v13987_v49  ;;  %12261 = vmatprep.subr.msk.bf16.mxu1 %vm15687_vm15, %v20247_v26  ;;  %vm20555_vm12 = vcmp.eq.s32.totalorder %v15637_v18, %v14023_v57  ;;  %vm20556_vm15 = vcmp.eq.s32.totalorder %v15640_v62, %v14023_v57 }
 0x275   :  { %20545 = vst [vmem:[#allocation178_spill] sm:$0xff] %v20544_v44  ;;  %v20547_v29 = vsel %vm15695_vm9, 4294967295, %v20546_v29  ;;  %vm15713_vm14 = vmpackc.low %vm934_vm1, %vm932_vm11  ;;  %vm936_vm1 = vcmp.eq.s32.totalorder %v15637_v18, %v14002_v53  ;;  %vm938_vm11 = vcmp.eq.s32.totalorder %v15640_v62, %v14002_v53  ;;  %v20557_v44 = vmov 0  ;;  %12133 = vmatpush1.bf16.msk.msra.mxu0 %vm15695_vm9, %v20247_v26  ;;  %v20901_v18 = vld [vmem:[#allocation20_spill] sm:$0xff] }
 0x276   :  { %20548 = vst [vmem:[#allocation179_spill] sm:$0xff] %v20547_v29  ;;  %v20550_v6 = vsel %vm15713_vm14, 4294967295, %v20549_v6  ;;  %vm15727_vm6 = vmpackc.low %vm681_vm0, %vm679_vm4  ;;  %v20560_v2 = vmov 0.0   ;;  %vm20561_vm0 = vcmp.eq.s32.totalorder %v15651_v3, %v13995_v52  ;;  %v15763_v62 = vadd.s32 2, %v13995_v52  ;;  %12263 = vmatpush1.bf16.msk.msra.mxu1 %vm15713_vm14, %v20247_v26 }
 0x277   :  { %20551 = vst [vmem:[#allocation180_spill] sm:$0xff] %v20550_v6  ;;  %v20553_v23 = vsel %vm15727_vm6, 4294967295, %v20552_v23  ;;  %vm15743_vm4 = vmpackc.low %vm20556_vm15, %vm20555_vm12  ;;  %v813_v27 = vsel %vm20561_vm0, 1.0, %v20560_v2  ;;  %v1071_v10 = vsel %vm943_vm10, 1.0, %v20560_v2  ;;  %vm941_vm15 = vcmp.eq.s32.totalorder %v15685_v38, %v14023_v57  ;;  %12135 = vmatprep.subr.msk.bf16.mxu0 %vm15727_vm6, %v20247_v26  ;;  %v20897_v6 = vld [vmem:[#allocation113_spill] sm:$0xff] }
 0x278   :  { %20554 = vst [vmem:[#allocation181_spill] sm:$0xff] %v20553_v23  ;;  %v20558_v44 = vsel %vm15743_vm4, 4294967295, %v20557_v44  ;;  %vm15756_vm2 = vmpackc.low %vm680_vm7, %vm678_vm8  ;;  %v20564_v3 = vmov 0  ;;  %12265 = vmatprep.subr.msk.bf16.mxu1 %vm15743_vm4, %v20247_v26  ;;  %v19831_v57 = vmov 1.0   ;;  %vm20567_vm10 = vcmp.eq.s32.totalorder %v15685_v38, %v13995_v52 }
 0x279   :  { %20559 = vst [vmem:[#allocation182_spill] sm:$0xff] %v20558_v44  ;;  %vm15771_vm12 = vmpackc.low %vm938_vm11, %vm936_vm1  ;;  %v15784_v29 = vpack.c.bf16 %v813_v27, %v19831_v57  ;;  %vm20568_vm8 = vcmask 1045504   ;;  %v15795_v31 = vpack.c.bf16 %v1071_v10, %v19831_v57  ;;  %v812_v23 = vsel %vm684_vm3, 1.0, %v20560_v2  ;;  %12137 = vmatpush1.bf16.msk.msra.mxu0 %vm15756_vm2, %v20247_v26  ;;  %v20919_v10 = vld [vmem:[#allocation32_spill] sm:$0xff] }
 0x27a   :  { %v20565_v3 = vsel %vm15771_vm12, 4294967295, %v20564_v3  ;;  %vm15790_vm1 = vmpackc.low %vm20568_vm8, %vm20567_vm10  ;;  %v1070_v44 = vsel %vm942_vm5, 1.0, %v20560_v2  ;;  %vm940_vm7 = vcmp.eq.s32.totalorder %v15685_v38, %v14002_v53  ;;  %v15807_v52 = vadd.s32 2, %v13987_v49  ;;  %12267 = vmatpush1.bf16.msk.msra.mxu1 %vm15771_vm12, %v20247_v26 }
 0x27b   :  { %20566 = vst [vmem:[#allocation183_spill] sm:$0xff] %v20565_v3  ;;  %20571 = vst [vmem:[#allocation184_spill] sm:$0xff] %v15795_v31  ;;  %vm1075_vm10 = vcmp.eq.s32.totalorder %v13978_v45, %v15763_v62  ;;  %v15820_v27 = vpack.c.bf16 %v812_v23, %v19831_v57  ;;  %vm20577_vm5 = vcmp.eq.s32.totalorder %v15685_v38, %v13987_v49  ;;  %12140 = vmatprep.subr.msk.bf16.mxu0 %vm15790_vm1, %v15784_v29  ;;  %v20583_v23 = vmov 0  ;;  %v20790_v3 = vld [vmem:[#allocation131_spill] sm:$0xff] }
 0x27c   :  { %vm20572_vm11 = vmmov %vm20568_vm8  ;;  %20576 = vst [vmem:[#allocation186_spill] sm:$0xff] %v15807_v52  ;;  %vm1077_vm8 = vcmp.eq.s32.totalorder %v13983_v47, %v15763_v62  ;;  %v15831_v53 = vpack.c.bf16 %v1070_v44, %v19831_v57  ;;  %v20586_v49 = vmov 0  ;;  %vm1076_vm4 = vcmp.eq.s32.totalorder %v13983_v47, %v15807_v52 }
 0x27d   :  { %vm15800_vm0 = vmpackc.low %vm20572_vm11, %vm941_vm15  ;;  %v20588_v44 = vmov 0  ;;  %v20591_v57 = vmov 0  ;;  %v20671_v47 = vmov 0 }
 0x27e   :  { %v20574_v36 = vsel %vm15800_vm0, 4294967295, %v20573_v36  ;;  %vm20578_vm3 = vmmov %vm20572_vm11  ;;  %20581 = vst [vmem:[#allocation187_spill] sm:$0xff] %v15831_v53  ;;  %12270 = vmatprep.subr.msk.bf16.mxu1 %vm15800_vm0, %v15795_v31  ;;  %v20786_v31 = vmov 0 }
 0x27f   :  { %20575 = vst [vmem:[#allocation185_spill] sm:$0xff] %v20574_v36  ;;  %vm15826_vm15 = vmpackc.low %vm20578_vm3, %vm20577_vm5  ;;  %v20778_v36 = vld [vmem:[#allocation125_spill] sm:$0xff] }
 0x280   :  { %vm20582_vm11 = vmmov %vm20578_vm3  ;;  %vm1074_vm3 = vcmp.eq.s32.totalorder %v13978_v45, %v15807_v52  ;;  %12143 = vmatpush1.bf16.msk.msra.mxu0 %vm15826_vm15, %v15820_v27  ;;  %v20673_v45 = vld [vmem:[#allocation71_spill] sm:$0xff] }
 0x281   :  { %vm15840_vm12 = vmpackc.low %vm20582_vm11, %vm940_vm7  ;;  %vm1079_vm7 = vcmp.eq.s32.totalorder %v13990_v50, %v15763_v62  ;;  %vm1078_vm11 = vcmp.eq.s32.totalorder %v13990_v50, %v15807_v52  ;;  %v20660_v50 = vmov 0 }
 0x282   :  { %v20584_v23 = vsel %vm15840_vm12, 4294967295, %v20583_v23  ;;  %vm15844_vm5 = vmpackc.low %vm1077_vm8, %vm1075_vm10  ;;  %12273 = vmatpush1.bf16.msk.msra.mxu1 %vm15840_vm12, %v15831_v53  ;;  %vm1081_vm10 = vcmp.eq.s32.totalorder %v13993_v51, %v15763_v62  ;;  %vm1080_vm12 = vcmp.eq.s32.totalorder %v13993_v51, %v15807_v52  ;;  %v20658_v51 = vld [vmem:[#allocation57_spill] sm:$0xff]  ;;  %v20774_v53 = vmov 0 }
 0x283   :  { %20585 = vst [vmem:[#allocation188_spill] sm:$0xff] %v20584_v23  ;;  %v20587_v49 = vsel %vm15844_vm5, 4294967295, %v20586_v49  ;;  %12275 = vmatprep.subr.msk.bf16.mxu0 %vm15844_vm5, %v20247_v26  ;;  %12405 = vmatprep.subr.msk.bf16.mxu1 %vm14031_vm13, %v20247_v26  ;;  %vm15868_vm8 = vmpackc.low %vm1076_vm4, %vm1074_vm3  ;;  %vm1083_vm13 = vcmp.eq.s32.totalorder %v14013_v55, %v15763_v62  ;;  %vm1085_vm4 = vcmp.eq.s32.totalorder %v14016_v56, %v15763_v62  ;;  %vm20593_vm3 = vnez %v20107_v54  ;;  %v20756_v54 = vld [vmem:[#allocation112_spill] sm:$0xff]  ;;  %v20766_v23 = vld [vmem:[#allocation119_spill] sm:$0xff] }
 0x284   :  { %v20589_v44 = vsel %vm15868_vm8, 4294967295, %v20588_v44  ;;  %1477 = vmatmul.mubr.f32.vlgmr.msra.gmra.mrb[4].mxu0 %v15003_v61  ;;  %vm15878_vm0 = vmpackc.low %vm1081_vm10, %vm1079_vm7  ;;  %vm20597_vm10 = vnez %v20123_v63  ;;  %v20601_v63 = vmov 0 }
 0x285   :  { %20590 = vst [vmem:[#allocation189_spill] sm:$0xff] %v20589_v44  ;;  %1625 = vmatmul.mubr.f32.vlgmr.msra.gmra.mrb[4].mxu1 %v15003_v61  ;;  %v20592_v57 = vsel %vm15878_vm0, 4294967295, %v20591_v57  ;;  %12277 = vmatpush1.bf16.msk.msra.mxu0 %vm15868_vm8, %v20247_v26  ;;  %vm15894_vm7 = vmpackc.low %vm1080_vm12, %vm1078_vm11  ;;  %vm1084_vm12 = vcmp.eq.s32.totalorder %v14016_v56, %v15807_v52  ;;  %vm1087_vm11 = vcmp.eq.s32.totalorder %v14079_v0, %v15763_v62  ;;  %v20605_v56 = vmov 0 }
 0x286   :  { %1701 = vmatprep.mubr.f32.mxu0 %v14987_v21  ;;  %12407 = vmatpush1.bf16.msk.msra.mxu1 %vm20593_vm3, %v20247_v26  ;;  %v20595_v59 = vsel %vm15894_vm7, 4294967295, %v20594_v59  ;;  %vm15904_vm14 = vmpackc.low %vm1085_vm4, %vm1083_vm13  ;;  %v20598_v21 = vmov 0  ;;  %vm1082_vm3 = vcmp.eq.s32.totalorder %v14013_v55, %v15807_v52  ;;  %vm20600_vm13 = vnez %v20112_v58 }
 0x287   :  { %1850 = vmatprep.mubr.f32.mxu1 %v15018_v15  ;;  %20596 = vst [vmem:[#allocation190_spill] sm:$0xff] %v20595_v59  ;;  %12279 = vmatprep.subr.msk.bf16.mxu0 %vm15878_vm0, %v20247_v26  ;;  %v20599_v21 = vsel %vm15904_vm14, 4294967295, %v20598_v21  ;;  %vm1089_vm0 = vcmp.eq.s32.totalorder %v14082_v1, %v15763_v62  ;;  %vm15925_vm4 = vmpackc.low %vm1084_vm12, %vm1082_vm3  ;;  %vm1091_vm3 = vcmp.eq.s32.totalorder %v14132_v7, %v15763_v62  ;;  %v20612_v55 = vmov 0 }
 0x288   :  { %12409 = vmatprep.subr.msk.bf16.mxu1 %vm20597_vm10, %v20247_v26  ;;  %v20602_v63 = vsel %vm15925_vm4, 4294967295, %v20601_v63  ;;  %vm20604_vm10 = vnez %v20133_v4  ;;  %vm15932_vm8 = vmpackc.low %vm1089_vm0, %vm1087_vm11  ;;  %vm1093_vm12 = vcmp.eq.s32.totalorder %v14135_v8, %v15763_v62  ;;  %vm20607_vm0 = vnez %v20140_v9  ;;  %v20707_v9 = vld [vmem:[#allocation89_spill] sm:$0xff] }
 0x289   :  { %12281 = vmatpush1.bf16.msk.msra.mxu0 %vm15894_vm7, %v20247_v26  ;;  %20603 = vst [vmem:[#allocation191_spill] sm:$0xff] %v20602_v63  ;;  %v20606_v56 = vsel %vm15932_vm8, 4294967295, %v20605_v56  ;;  %vm19846_vm7 = vcmp.eq.s32.totalorder %v14079_v0, %v15807_v52  ;;  %v20608_v4 = vmov 0  ;;  %v20655_v0 = vmov 0 }
 0x28a   :  { %12411 = vmatpush1.bf16.msk.msra.mxu1 %vm20600_vm13, %v20247_v26  ;;  %12283 = vmatprep.subr.msk.bf16.mxu0 %vm15904_vm14, %v20247_v26  ;;  %vm19847_vm13 = vcmp.eq.s32.totalorder %v14082_v1, %v15807_v52  ;;  %v20652_v1 = vld [vmem:[#allocation61_spill] sm:$0xff]  ;;  %v20720_v58 = vmov 0 }
 0x28b   :  { %12413 = vmatprep.subr.msk.bf16.mxu1 %vm20604_vm10, %v20247_v26  ;;  %vm15959_vm11 = vmpackc.low %vm19847_vm13, %vm19846_vm7  ;;  %vm20611_vm10 = vnez %v20146_v11  ;;  %vm1095_vm7 = vcmp.eq.s32.totalorder %v14182_v13, %v15763_v62  ;;  %vm1097_vm13 = vcmp.eq.s32.totalorder %v14185_v14, %v15763_v62  ;;  %v20615_v11 = vmov 0 }
 0x28c   :  { %v20609_v4 = vsel %vm15959_vm11, 4294967295, %v20608_v4  ;;  %vm15994_vm14 = vmpackc.low %vm1097_vm13, %vm1095_vm7  ;;  %vm20621_vm7 = vnez %v20169_v25  ;;  %v20695_v25 = vld [vmem:[#allocation81_spill] sm:$0xff] }
 0x28d   :  { %12285 = vmatpush1.bf16.msk.msra.mxu0 %vm15925_vm4, %v20247_v26  ;;  %20610 = vst [vmem:[#allocation192_spill] sm:$0xff] %v20609_v4  ;;  %vm15966_vm4 = vmpackc.low %vm1093_vm12, %vm1091_vm3  ;;  %vm20614_vm3 = vnez %v20154_v16  ;;  %v20696_v16 = vld [vmem:[#allocation83_spill] sm:$0xff] }
 0x28e   :  { %12415 = vmatpush1.bf16.msk.msra.mxu1 %vm20607_vm0, %v20247_v26  ;;  %12287 = vmatprep.subr.msk.bf16.mxu0 %vm15932_vm8, %v20247_v26  ;;  %v20613_v55 = vsel %vm15966_vm4, 4294967295, %v20612_v55  ;;  %vm1090_vm0 = vcmp.eq.s32.totalorder %v14132_v7, %v15807_v52  ;;  %vm1092_vm8 = vcmp.eq.s32.totalorder %v14135_v8, %v15807_v52  ;;  %v20619_v8 = vmov 0 }
 0x28f   :  { %12417 = vmatprep.subr.msk.bf16.mxu1 %vm20611_vm10, %v20247_v26  ;;  %vm15987_vm12 = vmpackc.low %vm1092_vm8, %vm1090_vm0  ;;  %vm20618_vm10 = vnez %v20162_v20  ;;  %v20620_v8 = vsel %vm15994_vm14, 4294967295, %v20619_v8  ;;  %vm1099_vm8 = vcmp.eq.s32.totalorder %v14244_v22, %v15763_v62  ;;  %vm1101_vm0 = vcmp.eq.s32.totalorder %v14247_v24, %v15763_v62 }
 0x290   :  { %v20616_v11 = vsel %vm15987_vm12, 4294967295, %v20615_v11  ;;  %v20622_v20 = vmov 0  ;;  %v20650_v7 = vmov 0 }
 0x291   :  { %12289 = vmatpush1.bf16.msk.msra.mxu0 %vm15959_vm11, %v20247_v26  ;;  %20617 = vst [vmem:[#allocation193_spill] sm:$0xff] %v20616_v11  ;;  %vm1094_vm11 = vcmp.eq.s32.totalorder %v14182_v13, %v15807_v52  ;;  %v20641_v13 = vmov 0 }
 0x292   :  { %12419 = vmatpush1.bf16.msk.msra.mxu1 %vm20614_vm3, %v20247_v26  ;;  %12291 = vmatprep.subr.msk.bf16.mxu0 %vm15966_vm4, %v20247_v26  ;;  %vm1096_vm3 = vcmp.eq.s32.totalorder %v14185_v14, %v15807_v52  ;;  %vm16022_vm4 = vmpackc.low %vm1101_vm0, %vm1099_vm8  ;;  %v20626_v14 = vmov 0  ;;  %vm20628_vm8 = vnez %v20182_v34  ;;  %v20693_v34 = vmov 0 }
 0x293   :  { %12421 = vmatprep.subr.msk.bf16.mxu1 %vm20618_vm10, %v20247_v26  ;;  %vm16015_vm13 = vmpackc.low %vm1096_vm3, %vm1094_vm11  ;;  %vm20625_vm10 = vnez %v20175_v28  ;;  %v20627_v14 = vsel %vm16022_vm4, 4294967295, %v20626_v14  ;;  %vm1103_vm11 = vcmp.eq.s32.totalorder %v14294_v32, %v15763_v62  ;;  %vm1105_vm3 = vcmp.eq.s32.totalorder %v14297_v33, %v15763_v62 }
 0x294   :  { %v20623_v20 = vsel %vm16015_vm13, 4294967295, %v20622_v20  ;;  %v20629_v28 = vmov 0 }
 0x295   :  { %12293 = vmatpush1.bf16.msk.msra.mxu0 %vm15987_vm12, %v20247_v26  ;;  %20624 = vst [vmem:[#allocation194_spill] sm:$0xff] %v20623_v20  ;;  %vm1098_vm12 = vcmp.eq.s32.totalorder %v14244_v22, %v15807_v52  ;;  %v20639_v22 = vld [vmem:[#allocation47_spill] sm:$0xff] }
 0x296   :  { %12423 = vmatpush1.bf16.msk.msra.mxu1 %vm20621_vm7, %v20247_v26  ;;  %12295 = vmatprep.subr.msk.bf16.mxu0 %vm15994_vm14, %v20247_v26  ;;  %vm1100_vm7 = vcmp.eq.s32.totalorder %v14247_v24, %v15807_v52  ;;  %vm16050_vm14 = vmpackc.low %vm1105_vm3, %vm1103_vm11  ;;  %v20633_v24 = vmov 0  ;;  %vm20635_vm11 = vnez %v20195_v41  ;;  %v20685_v41 = vld [vmem:[#allocation78_spill] sm:$0xff] }
 0x297   :  { %12425 = vmatprep.subr.msk.bf16.mxu1 %vm20625_vm10, %v20247_v26  ;;  %vm16043_vm0 = vmpackc.low %vm1100_vm7, %vm1098_vm12  ;;  %vm20632_vm10 = vnez %v20188_v37  ;;  %v20634_v24 = vsel %vm16050_vm14, 4294967295, %v20633_v24  ;;  %vm1107_vm12 = vcmp.eq.s32.totalorder %v14344_v39, %v15763_v62  ;;  %vm1109_vm7 = vcmp.eq.s32.totalorder %v14347_v40, %v15763_v62 }
 0x298   :  { %v20630_v28 = vsel %vm16043_vm0, 4294967295, %v20629_v28  ;;  %v20636_v37 = vmov 0 }
 0x299   :  { %12297 = vmatpush1.bf16.msk.msra.mxu0 %vm16015_vm13, %v20247_v26  ;;  %20631 = vst [vmem:[#allocation195_spill] sm:$0xff] %v20630_v28  ;;  %vm19870_vm13 = vcmp.eq.s32.totalorder %v14294_v32, %v15807_v52  ;;  %v20648_v32 = vld [vmem:[#allocation53_spill] sm:$0xff] }
 0x29a   :  { %12427 = vmatpush1.bf16.msk.msra.mxu1 %vm20628_vm8, %v20247_v26  ;;  %12299 = vmatprep.subr.msk.bf16.mxu0 %vm16022_vm4, %v20247_v26  ;;  %vm19871_vm8 = vcmp.eq.s32.totalorder %v14297_v33, %v15807_v52  ;;  %v20645_v33 = vmov 0 }
 0x29b   :  { %12429 = vmatprep.subr.msk.bf16.mxu1 %vm20632_vm10, %v20247_v26  ;;  %vm16077_vm3 = vmpackc.low %vm19871_vm8, %vm19870_vm13  ;;  %vm20640_vm10 = vnez %v20639_v22  ;;  %vm1111_vm13 = vcmp.eq.s32.totalorder %v14394_v48, %v15763_v62  ;;  %vm1113_vm8 = vcmp.eq.s32.totalorder %v14397_v5, %v15763_v62  ;;  %v20643_v22 = vld [vmem:[#allocation51_spill] sm:$0xff] }
 0x29c   :  { %v20637_v37 = vsel %vm16077_vm3, 4294967295, %v20636_v37  ;;  %vm16112_vm4 = vmpackc.low %vm1113_vm8, %vm1111_vm13 }
 0x29d   :  { %12301 = vmatpush1.bf16.msk.msra.mxu0 %vm16043_vm0, %v20247_v26  ;;  %20638 = vst [vmem:[#allocation196_spill] sm:$0xff] %v20637_v37  ;;  %vm16084_vm0 = vmpackc.low %vm1109_vm7, %vm1107_vm12  ;;  %vm20644_vm12 = vnez %v20643_v22  ;;  %v20651_v7 = vsel %vm16112_vm4, 4294967295, %v20650_v7  ;;  %v20684_v22 = vld [vmem:[#allocation75_spill] sm:$0xff] }
 0x29e   :  { %12431 = vmatpush1.bf16.msk.msra.mxu1 %vm20635_vm11, %v20247_v26  ;;  %12303 = vmatprep.subr.msk.bf16.mxu0 %vm16050_vm14, %v20247_v26  ;;  %v20642_v13 = vsel %vm16084_vm0, 4294967295, %v20641_v13  ;;  %vm1106_vm11 = vcmp.eq.s32.totalorder %v14344_v39, %v15807_v52  ;;  %vm1108_vm14 = vcmp.eq.s32.totalorder %v14347_v40, %v15807_v52  ;;  %v20674_v40 = vld [vmem:[#allocation72_spill] sm:$0xff]  ;;  %v20682_v39 = vmov 0 }
 0x29f   :  { %12433 = vmatprep.subr.msk.bf16.mxu1 %vm20640_vm10, %v20247_v26  ;;  %vm16105_vm7 = vmpackc.low %vm1108_vm14, %vm1106_vm11  ;;  %vm20649_vm10 = vnez %v20648_v32  ;;  %vm1115_vm14 = vcmp.eq.s32.totalorder %v14554_v46, %v15763_v62  ;;  %vm1117_vm11 = vcmp.eq.s32.totalorder %v20652_v1, %v15763_v62  ;;  %v20653_v32 = vld [vmem:[#allocation55_spill] sm:$0xff] }
 0x2a0   :  { %v20646_v33 = vsel %vm16105_vm7, 4294967295, %v20645_v33  ;;  %vm20654_vm13 = vnez %v20653_v32  ;;  %v20763_v32 = vmov 0 }
 0x2a1   :  { %12305 = vmatpush1.bf16.msk.msra.mxu0 %vm16077_vm3, %v20247_v26  ;;  %20647 = vst [vmem:[#allocation47_spill] sm:$0xff] %v20646_v33  ;;  %vm1110_vm3 = vcmp.eq.s32.totalorder %v14394_v48, %v15807_v52  ;;  %v20663_v48 = vld [vmem:[#allocation67_spill] sm:$0xff] }
 0x2a2   :  { %12435 = vmatpush1.bf16.msk.msra.mxu1 %vm20644_vm12, %v20247_v26  ;;  %12307 = vmatprep.subr.msk.bf16.mxu0 %vm16084_vm0, %v20247_v26  ;;  %vm1112_vm12 = vcmp.eq.s32.totalorder %v14397_v5, %v15807_v52  ;;  %vm16140_vm0 = vmpackc.low %vm1117_vm11, %vm1115_vm14  ;;  %v20662_v5 = vld [vmem:[#allocation66_spill] sm:$0xff] }
 0x2a3   :  { %12437 = vmatprep.subr.msk.bf16.mxu1 %vm20649_vm10, %v20247_v26  ;;  %vm16133_vm8 = vmpackc.low %vm1112_vm12, %vm1110_vm3  ;;  %vm20659_vm10 = vnez %v20658_v51  ;;  %v20661_v50 = vsel %vm16140_vm0, 4294967295, %v20660_v50  ;;  %vm1119_vm3 = vcmp.eq.s32.totalorder %v20662_v5, %v15763_v62  ;;  %vm1121_vm12 = vcmp.eq.s32.totalorder %v20663_v48, %v15763_v62  ;;  %v20664_v51 = vld [vmem:[#allocation59_spill] sm:$0xff] }
 0x2a4   :  { %v20656_v0 = vsel %vm16133_vm8, 4294967295, %v20655_v0  ;;  %vm20665_vm14 = vnez %v20664_v51  ;;  %v20722_v51 = vld [vmem:[#allocation93_spill] sm:$0xff] }
 0x2a5   :  { %12309 = vmatpush1.bf16.msk.msra.mxu0 %vm16105_vm7, %v20247_v26  ;;  %20657 = vst [vmem:[#allocation53_spill] sm:$0xff] %v20656_v0  ;;  %vm1114_vm7 = vcmp.eq.s32.totalorder %v14554_v46, %v15807_v52  ;;  %v20669_v46 = vld [vmem:[#allocation63_spill] sm:$0xff] }
 0x2a6   :  { %12439 = vmatpush1.bf16.msk.msra.mxu1 %vm20654_vm13, %v20247_v26  ;;  %12311 = vmatprep.subr.msk.bf16.mxu0 %vm16112_vm4, %v20247_v26  ;;  %vm1116_vm13 = vcmp.eq.s32.totalorder %v20652_v1, %v15807_v52  ;;  %v20666_v1 = vmov 0  ;;  %vm16168_vm4 = vmpackc.low %vm1121_vm12, %vm1119_vm3 }
 0x2a7   :  { %12441 = vmatprep.subr.msk.bf16.mxu1 %vm20659_vm10, %v20247_v26  ;;  %vm16161_vm11 = vmpackc.low %vm1116_vm13, %vm1114_vm7  ;;  %vm20670_vm10 = vnez %v20669_v46  ;;  %v20672_v47 = vsel %vm16168_vm4, 4294967295, %v20671_v47  ;;  %vm1123_vm7 = vcmp.eq.s32.totalorder %v20673_v45, %v15763_v62  ;;  %vm1125_vm13 = vcmp.eq.s32.totalorder %v20674_v40, %v15763_v62  ;;  %v20675_v46 = vld [vmem:[#allocation65_spill] sm:$0xff] }
 0x2a8   :  { %v20667_v1 = vsel %vm16161_vm11, 4294967295, %v20666_v1  ;;  %vm20676_vm3 = vnez %v20675_v46  ;;  %v20715_v46 = vmov 0 }
 0x2a9   :  { %12313 = vmatpush1.bf16.msk.msra.mxu0 %vm16133_vm8, %v20247_v26  ;;  %20668 = vst [vmem:[#allocation57_spill] sm:$0xff] %v20667_v1  ;;  %vm1118_vm8 = vcmp.eq.s32.totalorder %v20662_v5, %v15807_v52  ;;  %v20680_v5 = vld [vmem:[#allocation69_spill] sm:$0xff] }
 0x2aa   :  { %12443 = vmatpush1.bf16.msk.msra.mxu1 %vm20665_vm14, %v20247_v26  ;;  %12315 = vmatprep.subr.msk.bf16.mxu0 %vm16140_vm0, %v20247_v26  ;;  %vm1120_vm14 = vcmp.eq.s32.totalorder %v20663_v48, %v15807_v52  ;;  %v20677_v48 = vmov 0  ;;  %vm16196_vm0 = vmpackc.low %vm1125_vm13, %vm1123_vm7 }
 0x2ab   :  { %12445 = vmatprep.subr.msk.bf16.mxu1 %vm20670_vm10, %v20247_v26  ;;  %vm16189_vm12 = vmpackc.low %vm1120_vm14, %vm1118_vm8  ;;  %vm20681_vm10 = vnez %v20680_v5  ;;  %v20683_v39 = vsel %vm16196_vm0, 4294967295, %v20682_v39  ;;  %vm1127_vm8 = vcmp.eq.s32.totalorder %v20684_v22, %v15763_v62  ;;  %vm1129_vm14 = vcmp.eq.s32.totalorder %v20685_v41, %v15763_v62  ;;  %v20686_v5 = vld [vmem:[#allocation73_spill] sm:$0xff] }
 0x2ac   :  { %v20678_v48 = vsel %vm16189_vm12, 4294967295, %v20677_v48  ;;  %vm20687_vm7 = vnez %v20686_v5  ;;  %v20704_v5 = vmov 0 }
 0x2ad   :  { %12317 = vmatpush1.bf16.msk.msra.mxu0 %vm16161_vm11, %v20247_v26  ;;  %20679 = vst [vmem:[#allocation63_spill] sm:$0xff] %v20678_v48  ;;  %vm1122_vm11 = vcmp.eq.s32.totalorder %v20673_v45, %v15807_v52  ;;  %v20691_v45 = vld [vmem:[#allocation76_spill] sm:$0xff] }
 0x2ae   :  { %12447 = vmatpush1.bf16.msk.msra.mxu1 %vm20676_vm3, %v20247_v26  ;;  %12319 = vmatprep.subr.msk.bf16.mxu0 %vm16168_vm4, %v20247_v26  ;;  %vm1124_vm3 = vcmp.eq.s32.totalorder %v20674_v40, %v15807_v52  ;;  %v20688_v40 = vmov 0  ;;  %vm16224_vm4 = vmpackc.low %vm1129_vm14, %vm1127_vm8 }
 0x2af   :  { %12449 = vmatprep.subr.msk.bf16.mxu1 %vm20681_vm10, %v20247_v26  ;;  %vm16217_vm13 = vmpackc.low %vm1124_vm3, %vm1122_vm11  ;;  %vm20692_vm10 = vnez %v20691_v45  ;;  %v20694_v34 = vsel %vm16224_vm4, 4294967295, %v20693_v34  ;;  %vm1131_vm11 = vcmp.eq.s32.totalorder %v20695_v25, %v15763_v62  ;;  %vm1133_vm3 = vcmp.eq.s32.totalorder %v20696_v16, %v15763_v62  ;;  %v20697_v45 = vld [vmem:[#allocation79_spill] sm:$0xff] }
 0x2b0   :  { %v20689_v40 = vsel %vm16217_vm13, 4294967295, %v20688_v40  ;;  %vm20698_vm8 = vnez %v20697_v45  ;;  %v20706_v45 = vld [vmem:[#allocation87_spill] sm:$0xff] }
 0x2b1   :  { %12321 = vmatpush1.bf16.msk.msra.mxu0 %vm16189_vm12, %v20247_v26  ;;  %20690 = vst [vmem:[#allocation69_spill] sm:$0xff] %v20689_v40  ;;  %vm1126_vm12 = vcmp.eq.s32.totalorder %v20684_v22, %v15807_v52  ;;  %v20702_v22 = vld [vmem:[#allocation82_spill] sm:$0xff] }
 0x2b2   :  { %12451 = vmatpush1.bf16.msk.msra.mxu1 %vm20687_vm7, %v20247_v26  ;;  %12323 = vmatprep.subr.msk.bf16.mxu0 %vm16196_vm0, %v20247_v26  ;;  %vm1128_vm7 = vcmp.eq.s32.totalorder %v20685_v41, %v15807_v52  ;;  %v20699_v41 = vmov 0  ;;  %vm16252_vm0 = vmpackc.low %vm1133_vm3, %vm1131_vm11 }
 0x2b3   :  { %12453 = vmatprep.subr.msk.bf16.mxu1 %vm20692_vm10, %v20247_v26  ;;  %vm16245_vm14 = vmpackc.low %vm1128_vm7, %vm1126_vm12  ;;  %vm20703_vm10 = vnez %v20702_v22  ;;  %v20705_v5 = vsel %vm16252_vm0, 4294967295, %v20704_v5  ;;  %vm1135_vm12 = vcmp.eq.s32.totalorder %v20706_v45, %v15763_v62  ;;  %vm1137_vm7 = vcmp.eq.s32.totalorder %v20707_v9, %v15763_v62  ;;  %v20708_v22 = vld [vmem:[#allocation85_spill] sm:$0xff] }
 0x2b4   :  { %v20700_v41 = vsel %vm16245_vm14, 4294967295, %v20699_v41  ;;  %vm20709_vm11 = vnez %v20708_v22  ;;  %v20717_v22 = vld [vmem:[#allocation95_spill] sm:$0xff] }
 0x2b5   :  { %12325 = vmatpush1.bf16.msk.msra.mxu0 %vm16217_vm13, %v20247_v26  ;;  %20701 = vst [vmem:[#allocation76_spill] sm:$0xff] %v20700_v41  ;;  %vm1130_vm13 = vcmp.eq.s32.totalorder %v20695_v25, %v15807_v52  ;;  %v20713_v25 = vld [vmem:[#allocation88_spill] sm:$0xff] }
 0x2b6   :  { %12455 = vmatpush1.bf16.msk.msra.mxu1 %vm20698_vm8, %v20247_v26  ;;  %12327 = vmatprep.subr.msk.bf16.mxu0 %vm16224_vm4, %v20247_v26  ;;  %vm1132_vm8 = vcmp.eq.s32.totalorder %v20696_v16, %v15807_v52  ;;  %v20710_v16 = vmov 0  ;;  %vm16280_vm4 = vmpackc.low %vm1137_vm7, %vm1135_vm12 }
 0x2b7   :  { %12457 = vmatprep.subr.msk.bf16.mxu1 %vm20703_vm10, %v20247_v26  ;;  %vm16273_vm3 = vmpackc.low %vm1132_vm8, %vm1130_vm13  ;;  %vm20714_vm10 = vnez %v20713_v25  ;;  %v20716_v46 = vsel %vm16280_vm4, 4294967295, %v20715_v46  ;;  %vm1139_vm13 = vcmp.eq.s32.totalorder %v14869_v30, %v15763_v62  ;;  %vm1141_vm8 = vcmp.eq.s32.totalorder %v20717_v22, %v15763_v62  ;;  %v20718_v25 = vld [vmem:[#allocation91_spill] sm:$0xff] }
 0x2b8   :  { %v20711_v16 = vsel %vm16273_vm3, 4294967295, %v20710_v16  ;;  %vm20719_vm12 = vnez %v20718_v25  ;;  %v20724_v25 = vmov 0 }
 0x2b9   :  { %12329 = vmatpush1.bf16.msk.msra.mxu0 %vm16245_vm14, %v20247_v26  ;;  %20712 = vst [vmem:[#allocation82_spill] sm:$0xff] %v20711_v16  ;;  %vm19945_vm14 = vcmp.eq.s32.totalorder %v20706_v45, %v15807_v52  ;;  %v20746_v45 = vld [vmem:[#allocation105_spill] sm:$0xff] }
 0x2ba   :  { %12459 = vmatpush1.bf16.msk.msra.mxu1 %vm20709_vm11, %v20247_v26  ;;  %12331 = vmatprep.subr.msk.bf16.mxu0 %vm16252_vm0, %v20247_v26  ;;  %vm19946_vm11 = vcmp.eq.s32.totalorder %v20707_v9, %v15807_v52  ;;  %vm1144_vm0 = vcmp.eq.s32.totalorder %v14931_v35, %v15807_v52  ;;  %v20747_v9 = vld [vmem:[#allocation106_spill] sm:$0xff] }
 0x2bb   :  { %12461 = vmatprep.subr.msk.bf16.mxu1 %vm20714_vm10, %v20247_v26  ;;  %vm16307_vm7 = vmpackc.low %vm19946_vm11, %vm19945_vm14  ;;  %vm20723_vm10 = vnez %v20722_v51  ;;  %vm1143_vm14 = vcmp.eq.s32.totalorder %v14928_v19, %v15763_v62  ;;  %v20726_v51 = vld [vmem:[#allocation96_spill] sm:$0xff] }
 0x2bc   :  { %v20721_v58 = vsel %vm16307_vm7, 4294967295, %v20720_v58 }
 0x2bd   :  { %12333 = vmatpush1.bf16.msk.msra.mxu0 %vm16273_vm3, %v20247_v26  ;;  %vm16314_vm3 = vmpackc.low %vm1141_vm8, %vm1139_vm13  ;;  %vm20727_vm13 = vnez %v20726_v51  ;;  %v20732_v51 = vmov 0 }
 0x2be   :  { %12463 = vmatpush1.bf16.msk.msra.mxu1 %vm20719_vm12, %v20247_v26  ;;  %12335 = vmatprep.subr.msk.bf16.mxu0 %vm16280_vm4, %v20247_v26  ;;  %v20725_v25 = vsel %vm16314_vm3, 4294967295, %v20724_v25  ;;  %vm1138_vm12 = vcmp.eq.s32.totalorder %v14869_v30, %v15807_v52  ;;  %vm1140_vm4 = vcmp.eq.s32.totalorder %v20717_v22, %v15807_v52  ;;  %v20728_v30 = vmov 0  ;;  %v20730_v22 = vld [vmem:[#allocation98_spill] sm:$0xff] }
 0x2bf   :  { %12465 = vmatprep.subr.msk.bf16.mxu1 %vm20723_vm10, %v20247_v26  ;;  %vm1145_vm10 = vcmp.eq.s32.totalorder %v14931_v35, %v15763_v62  ;;  %vm16335_vm8 = vmpackc.low %vm1140_vm4, %vm1138_vm12  ;;  %vm20731_vm11 = vnez %v20730_v22  ;;  %vm1147_vm4 = vcmp.eq.s32.totalorder %v14952_v17, %v15763_v62  ;;  %vm1149_vm12 = vcmp.eq.s32.totalorder %v14955_v12, %v15763_v62  ;;  %v20734_v22 = vld [vmem:[#allocation103_spill] sm:$0xff]  ;;  %v20739_v35 = vld [vmem:[#allocation109_spill] sm:$0xff] }
 0x2c0   :  { %v20729_v30 = vsel %vm16335_vm8, 4294967295, %v20728_v30  ;;  %vm16373_vm5 = vmpackc.low %vm1149_vm12, %vm1147_vm4  ;;  %vm20748_vm4 = vnez %v20747_v9  ;;  %v20755_v9 = vld [vmem:[#allocation111_spill] sm:$0xff] }
 0x2c1   :  { %12337 = vmatpush1.bf16.msk.msra.mxu0 %vm16307_vm7, %v20247_v26  ;;  %vm1142_vm7 = vcmp.eq.s32.totalorder %v14928_v19, %v15807_v52  ;;  %v20737_v19 = vmov 0 }
 0x2c2   :  { %12467 = vmatpush1.bf16.msk.msra.mxu1 %vm20727_vm13, %v20247_v26  ;;  %12339 = vmatprep.subr.msk.bf16.mxu0 %vm16314_vm3, %v20247_v26  ;;  %vm16347_vm13 = vmpackc.low %vm1145_vm10, %vm1143_vm14  ;;  %vm20736_vm14 = vnez %v20346_v60  ;;  %v20743_v60 = vld [vmem:[#allocation101_spill] sm:$0xff] }
 0x2c3   :  { %12469 = vmatprep.subr.msk.bf16.mxu1 %vm20731_vm11, %v20247_v26  ;;  %v20733_v51 = vsel %vm16347_vm13, 4294967295, %v20732_v51  ;;  %vm20735_vm11 = vcmask 1031168   ;;  %vm16364_vm10 = vmpackc.low %vm1144_vm0, %vm1142_vm7  ;;  %vm1148_vm0 = vcmp.eq.s32.totalorder %v14955_v12, %v15807_v52  ;;  %vm20744_vm7 = vnez %v20743_v60  ;;  %v20751_v12 = vld [vmem:[#allocation108_spill] sm:$0xff] }
 0x2c4   :  { %1702 = vmatmul.mubr.f32.vlgmr.msra.gmra.mrb[6].mxu0 %v14989_v43  ;;  %v20738_v19 = vsel %vm16364_vm10, 4294967295, %v20737_v19  ;;  %vm20740_vm3 = vmmov %vm20735_vm11  ;;  %v20741_v43 = vmov 0  ;;  %v20753_v60 = vmov 0 }
 0x2c5   :  { %1851 = vmatmul.mubr.f32.vlgmr.msra.gmra.mrb[6].mxu1 %v20734_v22  ;;  %12341 = vmatpush1.bf16.msk.msra.mxu0 %vm16335_vm8, %v20247_v26  ;;  %v20742_v43 = vsel %vm16373_vm5, 4294967295, %v20741_v43 }
 0x2c6   :  { %9234 = vmatprep.mubr.msk.f32.mxu0 %vm20735_vm11, %v15045_v42  ;;  %12471 = vmatpush1.bf16.msk.msra.mxu1 %vm20736_vm14, %v20247_v26  ;;  %vm1146_vm11 = vcmp.eq.s32.totalorder %v14952_v17, %v15807_v52  ;;  %v20745_v42 = vld [vmem:[#allocation102_spill] sm:$0xff]  ;;  %vm1153_vm14 = vcmp.eq.s32.totalorder %v20746_v45, %v15763_v62  ;;  %v20749_v17 = vmov 0 }
 0x2c7   :  { %9363 = vmatprep.mubr.msk.f32.mxu1 %vm20740_vm3, %v20739_v35  ;;  %12343 = vmatprep.subr.msk.bf16.mxu0 %vm16347_vm13, %v20247_v26  ;;  %vm1151_vm3 = vcmp.eq.s32.totalorder %v20745_v42, %v15763_v62  ;;  %vm16397_vm12 = vmpackc.low %vm1148_vm0, %vm1146_vm11  ;;  %vm1155_vm11 = vcmp.eq.s32.totalorder %v20755_v9, %v15763_v62  ;;  %vm1157_vm0 = vcmp.eq.s32.totalorder %v20756_v54, %v15763_v62 }
 0x2c8   :  { %12473 = vmatprep.subr.msk.bf16.mxu1 %vm20744_vm7, %v20247_v26  ;;  %v20750_v17 = vsel %vm16397_vm12, 4294967295, %v20749_v17  ;;  %vm20752_vm7 = vnez %v20751_v12  ;;  %vm16404_vm13 = vmpackc.low %vm1153_vm14, %vm1151_vm3  ;;  %v20757_v12 = vld [vmem:[#allocation114_spill] sm:$0xff] }
 0x2c9   :  { %12345 = vmatpush1.bf16.msk.msra.mxu0 %vm16364_vm10, %v20247_v26  ;;  %v20754_v60 = vsel %vm16404_vm13, 4294967295, %v20753_v60  ;;  %vm1150_vm10 = vcmp.eq.s32.totalorder %v20745_v42, %v15807_v52  ;;  %vm20758_vm3 = vnez %v20757_v12  ;;  %v20761_v42 = vld [vmem:[#allocation116_spill] sm:$0xff]  ;;  %v20765_v12 = vld [vmem:[#allocation118_spill] sm:$0xff] }
 0x2ca   :  { %12475 = vmatpush1.bf16.msk.msra.mxu1 %vm20748_vm4, %v20247_v26  ;;  %12347 = vmatprep.subr.msk.bf16.mxu0 %vm16373_vm5, %v20247_v26  ;;  %vm1152_vm4 = vcmp.eq.s32.totalorder %v20746_v45, %v15807_v52  ;;  %v20759_v45 = vmov 0  ;;  %vm16432_vm5 = vmpackc.low %vm1157_vm0, %vm1155_vm11 }
 0x2cb   :  { %12477 = vmatprep.subr.msk.bf16.mxu1 %vm20752_vm7, %v20247_v26  ;;  %vm16425_vm14 = vmpackc.low %vm1152_vm4, %vm1150_vm10  ;;  %vm20762_vm7 = vnez %v20761_v42  ;;  %v20764_v32 = vsel %vm16432_vm5, 4294967295, %v20763_v32  ;;  %vm1159_vm10 = vcmp.eq.s32.totalorder %v20765_v12, %v15763_v62  ;;  %vm1161_vm4 = vcmp.eq.s32.totalorder %v20766_v23, %v15763_v62  ;;  %v20767_v42 = vld [vmem:[#allocation120_spill] sm:$0xff] }
 0x2cc   :  { %v20760_v45 = vsel %vm16425_vm14, 4294967295, %v20759_v45  ;;  %vm20768_vm11 = vnez %v20767_v42  ;;  %v20777_v42 = vld [vmem:[#allocation124_spill] sm:$0xff] }
 0x2cd   :  { %12349 = vmatpush1.bf16.msk.msra.mxu0 %vm16397_vm12, %v20247_v26  ;;  %vm1154_vm12 = vcmp.eq.s32.totalorder %v20755_v9, %v15807_v52  ;;  %v20772_v9 = vld [vmem:[#allocation122_spill] sm:$0xff] }
 0x2ce   :  { %12479 = vmatpush1.bf16.msk.msra.mxu1 %vm20758_vm3, %v20247_v26  ;;  %12351 = vmatprep.subr.msk.bf16.mxu0 %vm16404_vm13, %v20247_v26  ;;  %vm1156_vm3 = vcmp.eq.s32.totalorder %v20756_v54, %v15807_v52  ;;  %v20769_v54 = vmov 0  ;;  %vm16460_vm13 = vmpackc.low %vm1161_vm4, %vm1159_vm10 }
 0x2cf   :  { %12481 = vmatprep.subr.msk.bf16.mxu1 %vm20762_vm7, %v20247_v26  ;;  %vm16453_vm0 = vmpackc.low %vm1156_vm3, %vm1154_vm12  ;;  %vm20773_vm7 = vnez %v20772_v9  ;;  %v20775_v53 = vsel %vm16460_vm13, 4294967295, %v20774_v53  ;;  %vm1163_vm12 = vcmp.eq.s32.totalorder %v20777_v42, %v15763_v62  ;;  %vm1165_vm3 = vcmp.eq.s32.totalorder %v20778_v36, %v15763_v62  ;;  %v20779_v9 = vld [vmem:[#allocation126_spill] sm:$0xff] }
 0x2d0   :  { %v20770_v54 = vsel %vm16453_vm0, 4294967295, %v20769_v54  ;;  %20776 = vst [vmem:[#allocation95_spill] sm:$0xff] %v20775_v53  ;;  %vm20780_vm10 = vnez %v20779_v9  ;;  %v20789_v9 = vld [vmem:[#allocation130_spill] sm:$0xff]  ;;  %v20798_v53 = vmov 0 }
 0x2d1   :  { %12353 = vmatpush1.bf16.msk.msra.mxu0 %vm16425_vm14, %v20247_v26  ;;  %20771 = vst [vmem:[#allocation88_spill] sm:$0xff] %v20770_v54  ;;  %vm1158_vm14 = vcmp.eq.s32.totalorder %v20765_v12, %v15807_v52  ;;  %v20784_v12 = vld [vmem:[#allocation128_spill] sm:$0xff]  ;;  %v21102_v54 = vld [vmem:[#allocation55_spill] sm:$0xff] }
 0x2d2   :  { %12483 = vmatpush1.bf16.msk.msra.mxu1 %vm20768_vm11, %v20247_v26  ;;  %12355 = vmatprep.subr.msk.bf16.mxu0 %vm16432_vm5, %v20247_v26  ;;  %vm1160_vm11 = vcmp.eq.s32.totalorder %v20766_v23, %v15807_v52  ;;  %v20781_v23 = vmov 0  ;;  %vm16488_vm5 = vmpackc.low %vm1165_vm3, %vm1163_vm12 }
 0x2d3   :  { %12485 = vmatprep.subr.msk.bf16.mxu1 %vm20773_vm7, %v20247_v26  ;;  %vm16481_vm4 = vmpackc.low %vm1160_vm11, %vm1158_vm14  ;;  %vm20785_vm7 = vnez %v20784_v12  ;;  %v20787_v31 = vsel %vm16488_vm5, 4294967295, %v20786_v31  ;;  %vm1167_vm14 = vcmp.eq.s32.totalorder %v20789_v9, %v15763_v62  ;;  %vm1169_vm11 = vcmp.eq.s32.totalorder %v20790_v3, %v15763_v62  ;;  %v20791_v12 = vld [vmem:[#allocation132_spill] sm:$0xff] }
 0x2d4   :  { %v20782_v23 = vsel %vm16481_vm4, 4294967295, %v20781_v23  ;;  %20788 = vst [vmem:[#allocation96_spill] sm:$0xff] %v20787_v31  ;;  %vm20792_vm12 = vnez %v20791_v12  ;;  %v20801_v12 = vld [vmem:[#allocation136_spill] sm:$0xff]  ;;  %v20802_v31 = vld [vmem:[#allocation137_spill] sm:$0xff] }
 0x2d5   :  { %12357 = vmatpush1.bf16.msk.msra.mxu0 %vm16453_vm0, %v20247_v26  ;;  %20783 = vst [vmem:[#allocation93_spill] sm:$0xff] %v20782_v23  ;;  %vm1162_vm0 = vcmp.eq.s32.totalorder %v20777_v42, %v15807_v52  ;;  %v20796_v42 = vld [vmem:[#allocation134_spill] sm:$0xff]  ;;  %v20810_v23 = vmov 0 }
 0x2d6   :  { %12487 = vmatpush1.bf16.msk.msra.mxu1 %vm20780_vm10, %v20247_v26  ;;  %12359 = vmatprep.subr.msk.bf16.mxu0 %vm16460_vm13, %v20247_v26  ;;  %vm1164_vm10 = vcmp.eq.s32.totalorder %v20778_v36, %v15807_v52  ;;  %v20793_v36 = vmov 0  ;;  %vm16516_vm13 = vmpackc.low %vm1169_vm11, %vm1167_vm14 }
 0x2d7   :  { %12489 = vmatprep.subr.msk.bf16.mxu1 %vm20785_vm7, %v20247_v26  ;;  %vm16509_vm3 = vmpackc.low %vm1164_vm10, %vm1162_vm0  ;;  %vm20797_vm7 = vnez %v20796_v42  ;;  %v20799_v53 = vsel %vm16516_vm13, 4294967295, %v20798_v53  ;;  %vm1171_vm0 = vcmp.eq.s32.totalorder %v20801_v12, %v15763_v62  ;;  %vm1173_vm10 = vcmp.eq.s32.totalorder %v20802_v31, %v15763_v62  ;;  %v20803_v42 = vld [vmem:[#allocation138_spill] sm:$0xff] }
 0x2d8   :  { %v20794_v36 = vsel %vm16509_vm3, 4294967295, %v20793_v36  ;;  %20800 = vst [vmem:[#allocation103_spill] sm:$0xff] %v20799_v53  ;;  %vm20804_vm14 = vnez %v20803_v42  ;;  %v20813_v42 = vld [vmem:[#allocation142_spill] sm:$0xff]  ;;  %v20814_v53 = vld [vmem:[#allocation143_spill] sm:$0xff] }
 0x2d9   :  { %12361 = vmatpush1.bf16.msk.msra.mxu0 %vm16481_vm4, %v20247_v26  ;;  %20795 = vst [vmem:[#allocation98_spill] sm:$0xff] %v20794_v36  ;;  %vm1166_vm4 = vcmp.eq.s32.totalorder %v20789_v9, %v15807_v52  ;;  %v20808_v9 = vld [vmem:[#allocation140_spill] sm:$0xff]  ;;  %v20822_v36 = vmov 0 }
 0x2da   :  { %12491 = vmatpush1.bf16.msk.msra.mxu1 %vm20792_vm12, %v20247_v26  ;;  %12363 = vmatprep.subr.msk.bf16.mxu0 %vm16488_vm5, %v20247_v26  ;;  %vm1168_vm12 = vcmp.eq.s32.totalorder %v20790_v3, %v15807_v52  ;;  %v20805_v3 = vmov 0  ;;  %vm16544_vm5 = vmpackc.low %vm1173_vm10, %vm1171_vm0 }
 0x2db   :  { %12493 = vmatprep.subr.msk.bf16.mxu1 %vm20797_vm7, %v20247_v26  ;;  %vm16537_vm11 = vmpackc.low %vm1168_vm12, %vm1166_vm4  ;;  %vm20809_vm7 = vnez %v20808_v9  ;;  %v20811_v23 = vsel %vm16544_vm5, 4294967295, %v20810_v23  ;;  %vm1175_vm4 = vcmp.eq.s32.totalorder %v20813_v42, %v15763_v62  ;;  %vm1177_vm12 = vcmp.eq.s32.totalorder %v20814_v53, %v15763_v62  ;;  %v20815_v9 = vld [vmem:[#allocation144_spill] sm:$0xff] }
 0x2dc   :  { %v20806_v3 = vsel %vm16537_vm11, 4294967295, %v20805_v3  ;;  %20812 = vst [vmem:[#allocation101_spill] sm:$0xff] %v20811_v23  ;;  %vm20816_vm0 = vnez %v20815_v9  ;;  %v20825_v9 = vld [vmem:[#allocation148_spill] sm:$0xff]  ;;  %v20826_v23 = vld [vmem:[#allocation149_spill] sm:$0xff] }
 0x2dd   :  { %12365 = vmatpush1.bf16.msk.msra.mxu0 %vm16509_vm3, %v20247_v26  ;;  %20807 = vst [vmem:[#allocation109_spill] sm:$0xff] %v20806_v3  ;;  %vm1170_vm3 = vcmp.eq.s32.totalorder %v20801_v12, %v15807_v52  ;;  %v20820_v12 = vld [vmem:[#allocation146_spill] sm:$0xff]  ;;  %v20834_v3 = vmov 0 }
 0x2de   :  { %12495 = vmatpush1.bf16.msk.msra.mxu1 %vm20804_vm14, %v20247_v26  ;;  %12367 = vmatprep.subr.msk.bf16.mxu0 %vm16516_vm13, %v20247_v26  ;;  %vm1172_vm14 = vcmp.eq.s32.totalorder %v20802_v31, %v15807_v52  ;;  %v20817_v31 = vmov 0  ;;  %vm16572_vm13 = vmpackc.low %vm1177_vm12, %vm1175_vm4 }
 0x2df   :  { %12497 = vmatprep.subr.msk.bf16.mxu1 %vm20809_vm7, %v20247_v26  ;;  %vm16565_vm10 = vmpackc.low %vm1172_vm14, %vm1170_vm3  ;;  %vm20821_vm7 = vnez %v20820_v12  ;;  %v20823_v36 = vsel %vm16572_vm13, 4294967295, %v20822_v36  ;;  %vm1179_vm3 = vcmp.eq.s32.totalorder %v20825_v9, %v15763_v62  ;;  %vm1181_vm14 = vcmp.eq.s32.totalorder %v20826_v23, %v15763_v62  ;;  %v20827_v12 = vld [vmem:[#allocation150_spill] sm:$0xff] }
 0x2e0   :  { %v20818_v31 = vsel %vm16565_vm10, 4294967295, %v20817_v31  ;;  %20824 = vst [vmem:[#allocation105_spill] sm:$0xff] %v20823_v36  ;;  %vm20828_vm4 = vnez %v20827_v12  ;;  %v20837_v12 = vld [vmem:[#allocation154_spill] sm:$0xff]  ;;  %v20838_v36 = vld [vmem:[#allocation155_spill] sm:$0xff] }
 0x2e1   :  { %12369 = vmatpush1.bf16.msk.msra.mxu0 %vm16537_vm11, %v20247_v26  ;;  %20819 = vst [vmem:[#allocation102_spill] sm:$0xff] %v20818_v31  ;;  %vm1174_vm11 = vcmp.eq.s32.totalorder %v20813_v42, %v15807_v52  ;;  %v20832_v42 = vld [vmem:[#allocation152_spill] sm:$0xff]  ;;  %v20846_v31 = vmov 0 }
 0x2e2   :  { %12499 = vmatpush1.bf16.msk.msra.mxu1 %vm20816_vm0, %v20247_v26  ;;  %12371 = vmatprep.subr.msk.bf16.mxu0 %vm16544_vm5, %v20247_v26  ;;  %vm1176_vm0 = vcmp.eq.s32.totalorder %v20814_v53, %v15807_v52  ;;  %v20829_v53 = vmov 0  ;;  %vm16600_vm5 = vmpackc.low %vm1181_vm14, %vm1179_vm3 }
 0x2e3   :  { %12501 = vmatprep.subr.msk.bf16.mxu1 %vm20821_vm7, %v20247_v26  ;;  %vm16593_vm12 = vmpackc.low %vm1176_vm0, %vm1174_vm11  ;;  %vm20833_vm7 = vnez %v20832_v42  ;;  %v20835_v3 = vsel %vm16600_vm5, 4294967295, %v20834_v3  ;;  %vm1183_vm11 = vcmp.eq.s32.totalorder %v20837_v12, %v15763_v62  ;;  %vm1185_vm0 = vcmp.eq.s32.totalorder %v20838_v36, %v15763_v62  ;;  %v20839_v42 = vld [vmem:[#allocation156_spill] sm:$0xff] }
 0x2e4   :  { %v20830_v53 = vsel %vm16593_vm12, 4294967295, %v20829_v53  ;;  %20836 = vst [vmem:[#allocation108_spill] sm:$0xff] %v20835_v3  ;;  %vm20840_vm3 = vnez %v20839_v42  ;;  %v20849_v42 = vld [vmem:[#allocation160_spill] sm:$0xff]  ;;  %v20850_v3 = vld [vmem:[#allocation161_spill] sm:$0xff] }
 0x2e5   :  { %12373 = vmatpush1.bf16.msk.msra.mxu0 %vm16565_vm10, %v20247_v26  ;;  %20831 = vst [vmem:[#allocation106_spill] sm:$0xff] %v20830_v53  ;;  %vm1178_vm10 = vcmp.eq.s32.totalorder %v20825_v9, %v15807_v52  ;;  %v20844_v9 = vld [vmem:[#allocation158_spill] sm:$0xff]  ;;  %v20858_v53 = vmov 0 }
 0x2e6   :  { %12503 = vmatpush1.bf16.msk.msra.mxu1 %vm20828_vm4, %v20247_v26  ;;  %12375 = vmatprep.subr.msk.bf16.mxu0 %vm16572_vm13, %v20247_v26  ;;  %vm1180_vm4 = vcmp.eq.s32.totalorder %v20826_v23, %v15807_v52  ;;  %v20841_v23 = vmov 0  ;;  %vm16628_vm13 = vmpackc.low %vm1185_vm0, %vm1183_vm11 }
 0x2e7   :  { %12505 = vmatprep.subr.msk.bf16.mxu1 %vm20833_vm7, %v20247_v26  ;;  %vm16621_vm14 = vmpackc.low %vm1180_vm4, %vm1178_vm10  ;;  %vm20845_vm7 = vnez %v20844_v9  ;;  %v20847_v31 = vsel %vm16628_vm13, 4294967295, %v20846_v31  ;;  %vm1187_vm10 = vcmp.eq.s32.totalorder %v20849_v42, %v15763_v62  ;;  %vm1189_vm4 = vcmp.eq.s32.totalorder %v20850_v3, %v15763_v62  ;;  %v20851_v9 = vld [vmem:[#allocation162_spill] sm:$0xff] }
 0x2e8   :  { %v20842_v23 = vsel %vm16621_vm14, 4294967295, %v20841_v23  ;;  %20848 = vst [vmem:[#allocation112_spill] sm:$0xff] %v20847_v31  ;;  %vm20852_vm11 = vnez %v20851_v9  ;;  %v20861_v9 = vld [vmem:[#allocation166_spill] sm:$0xff]  ;;  %v20862_v31 = vld [vmem:[#allocation167_spill] sm:$0xff] }
 0x2e9   :  { %12377 = vmatpush1.bf16.msk.msra.mxu0 %vm16593_vm12, %v20247_v26  ;;  %20843 = vst [vmem:[#allocation111_spill] sm:$0xff] %v20842_v23  ;;  %vm1182_vm12 = vcmp.eq.s32.totalorder %v20837_v12, %v15807_v52  ;;  %v20856_v12 = vld [vmem:[#allocation164_spill] sm:$0xff] }
 0x2ea   :  { %12507 = vmatpush1.bf16.msk.msra.mxu1 %vm20840_vm3, %v20247_v26  ;;  %12379 = vmatprep.subr.msk.bf16.mxu0 %vm16600_vm5, %v20247_v26  ;;  %vm1184_vm3 = vcmp.eq.s32.totalorder %v20838_v36, %v15807_v52  ;;  %v20853_v36 = vmov 0  ;;  %vm16656_vm5 = vmpackc.low %vm1189_vm4, %vm1187_vm10  ;;  %v21096_v23 = vld [vmem:[#allocation184_spill] sm:$0xff] }
 0x2eb   :  { %12509 = vmatprep.subr.msk.bf16.mxu1 %vm20845_vm7, %v20247_v26  ;;  %vm16649_vm0 = vmpackc.low %vm1184_vm3, %vm1182_vm12  ;;  %vm20857_vm7 = vnez %v20856_v12  ;;  %v20859_v53 = vsel %vm16656_vm5, 4294967295, %v20858_v53  ;;  %vm1191_vm12 = vcmp.eq.s32.totalorder %v20861_v9, %v15763_v62  ;;  %vm1193_vm3 = vcmp.eq.s32.totalorder %v20862_v31, %v15763_v62  ;;  %v20863_v12 = vld [vmem:[#allocation168_spill] sm:$0xff] }
 0x2ec   :  { %v20854_v36 = vsel %vm16649_vm0, 4294967295, %v20853_v36  ;;  %20860 = vst [vmem:[#allocation116_spill] sm:$0xff] %v20859_v53  ;;  %vm20864_vm10 = vnez %v20863_v12  ;;  %v20871_v12 = vld [vmem:[#allocation172_spill] sm:$0xff]  ;;  %v20872_v53 = vld [vmem:[#allocation173_spill] sm:$0xff] }
 0x2ed   :  { %12381 = vmatpush1.bf16.msk.msra.mxu0 %vm16621_vm14, %v20247_v26  ;;  %20855 = vst [vmem:[#allocation114_spill] sm:$0xff] %v20854_v36  ;;  %vm1186_vm14 = vcmp.eq.s32.totalorder %v20849_v42, %v15807_v52  ;;  %v20867_v42 = vld [vmem:[#allocation170_spill] sm:$0xff]  ;;  %v20873_v36 = vld [vmem:[#allocation175_spill] sm:$0xff] }
 0x2ee   :  { %12511 = vmatpush1.bf16.msk.msra.mxu1 %vm20852_vm11, %v20247_v26  ;;  %12383 = vmatprep.subr.msk.bf16.mxu0 %vm16628_vm13, %v20247_v26  ;;  %vm1188_vm11 = vcmp.eq.s32.totalorder %v20850_v3, %v15807_v52  ;;  %v20865_v3 = vmov 0  ;;  %vm16684_vm13 = vmpackc.low %vm1193_vm3, %vm1191_vm12 }
 0x2ef   :  { %12513 = vmatprep.subr.msk.bf16.mxu1 %vm20857_vm7, %v20247_v26  ;;  %vm16677_vm4 = vmpackc.low %vm1188_vm11, %vm1186_vm14  ;;  %vm20868_vm7 = vnez %v20867_v42  ;;  %vm1195_vm14 = vcmp.eq.s32.totalorder %v20871_v12, %v15763_v62  ;;  %vm1197_vm11 = vcmp.eq.s32.totalorder %v20872_v53, %v15763_v62  ;;  %v20874_v42 = vld [vmem:[#allocation174_spill] sm:$0xff] }
 0x2f0   :  { %v20866_v3 = vsel %vm16677_vm4, 4294967295, %v20865_v3  ;;  %vm20875_vm12 = vnez %v20874_v42  ;;  %vm16714_vm8 = vmpackc.low %vm1197_vm11, %vm1195_vm14 }
 0x2f1   :  { %12385 = vmatpush1.bf16.msk.msra.mxu0 %vm16649_vm0, %v20247_v26  ;;  %vm1190_vm0 = vcmp.eq.s32.totalorder %v20861_v9, %v15807_v52  ;;  %v20879_v9 = vld [vmem:[#allocation177_spill] sm:$0xff] }
 0x2f2   :  { %12515 = vmatpush1.bf16.msk.msra.mxu1 %vm20864_vm10, %v20247_v26  ;;  %12387 = vmatprep.subr.msk.bf16.mxu0 %vm16656_vm5, %v20247_v26  ;;  %vm1192_vm10 = vcmp.eq.s32.totalorder %v20862_v31, %v15807_v52  ;;  %vm1201_vm5 = vcmp.eq.s32.totalorder %v20873_v36, %v15763_v62  ;;  %v20876_v31 = vmov 0 }
 0x2f3   :  { %12517 = vmatprep.subr.msk.bf16.mxu1 %vm20868_vm7, %v20247_v26  ;;  %vm16707_vm3 = vmpackc.low %vm1192_vm10, %vm1190_vm0  ;;  %vm20880_vm7 = vnez %v20879_v9  ;;  %v1329_v42 = vsel %vm1201_vm5, 1.0, %v20560_v2  ;;  %vm1200_vm0 = vcmp.eq.s32.totalorder %v20873_v36, %v15807_v52  ;;  %vm1199_vm10 = vcmp.eq.s32.totalorder %v15685_v38, %v15763_v62  ;;  %v21108_v9 = vld [vmem:[#allocation15_spill] sm:$0xff] }
 0x2f4   :  { %v20877_v31 = vsel %vm16707_vm3, 4294967295, %v20876_v31  ;;  %v20886_v36 = vmov 1.0   ;;  %v1328_v62 = vsel %vm1200_vm0, 1.0, %v20560_v2  ;;  %vm20888_vm5 = vcmask 1045504  }
 0x2f5   :  { %12389 = vmatpush1.bf16.msk.msra.mxu0 %vm16677_vm4, %v20247_v26  ;;  %20878 = vst [vmem:[#allocation118_spill] sm:$0xff] %v20877_v31  ;;  %vm1194_vm4 = vcmp.eq.s32.totalorder %v20871_v12, %v15807_v52  ;;  %v16741_v12 = vpack.c.bf16 %v1329_v42, %v20886_v36  ;;  %vm16748_vm11 = vmpackc.low %vm20888_vm5, %vm1199_vm10  ;;  %v16758_v42 = vpack.c.bf16 %v1328_v62, %v20886_v36  ;;  %v20928_v62 = vld [vmem:[#allocation41_spill] sm:$0xff] }
 0x2f6   :  { %12519 = vmatpush1.bf16.msk.msra.mxu1 %vm20875_vm12, %v20247_v26  ;;  %12391 = vmatprep.subr.msk.bf16.mxu0 %vm16684_vm13, %v20247_v26  ;;  %vm1196_vm12 = vcmp.eq.s32.totalorder %v20872_v53, %v15807_v52  ;;  %vm20903_vm0 = vnez %v20592_v57  ;;  %v20913_v57 = vld [vmem:[#allocation27_spill] sm:$0xff]  ;;  %v21104_v53 = vld [vmem:[#allocation12_spill] sm:$0xff]  ;;  %v21113_v31 = vld [vmem:[#allocation25_spill] sm:$0xff] }
 0x2f7   :  { %12521 = vmatprep.subr.msk.bf16.mxu1 %vm20880_vm7, %v20247_v26  ;;  %vm16736_vm14 = vmpackc.low %vm1196_vm12, %vm1194_vm4  ;;  %vm20896_vm7 = vnez %v20587_v49  ;;  %vm20902_vm12 = vnez %v20901_v18  ;;  %v20904_v49 = vld [vmem:[#allocation21_spill] sm:$0xff]  ;;  %v20940_v18 = vld [vmem:[#allocation52_spill] sm:$0xff] }
 0x2f8   :  { %vm20905_vm10 = vnez %v20904_v49 }
 0x2f9   :  { %12393 = vmatpush1.bf16.msk.msra.mxu0 %vm16707_vm3, %v20247_v26 }
 0x2fa   :  { %12523 = vmatpush1.bf16.msk.msra.mxu1 %vm15695_vm9, %v20247_v26  ;;  %12395 = vmatprep.subr.msk.bf16.mxu0 %vm16714_vm8, %v20247_v26  ;;  %vm1198_vm9 = vcmp.eq.s32.totalorder %v15685_v38, %v15807_v52  ;;  %v20894_v38 = vld [vmem:[#allocation17_spill] sm:$0xff] }
 0x2fb   :  { %12525 = vmatprep.subr.msk.bf16.mxu1 %vm15727_vm6, %v20247_v26  ;;  %vm20891_vm6 = vmmov %vm20888_vm5  ;;  %vm20906_vm5 = vnez %v20595_v59 }
 0x2fc   :  { %vm16767_vm4 = vmpackc.low %vm20891_vm6, %vm1198_vm9  ;;  %vm20909_vm6 = vnez %v20599_v21  ;;  %v20922_v21 = vld [vmem:[#allocation36_spill] sm:$0xff] }
 0x2fd   :  { %12397 = vmatpush1.bf16.msk.msra.mxu0 %vm16736_vm14, %v20247_v26 }
 0x2fe   :  { %12527 = vmatpush1.bf16.msk.msra.mxu1 %vm15756_vm2, %v20247_v26  ;;  %12400 = vmatprep.subr.msk.bf16.mxu0 %vm16748_vm11, %v16741_v12  ;;  %vm20895_vm2 = vnez %v20894_v38  ;;  %v20934_v38 = vld [vmem:[#allocation46_spill] sm:$0xff] }
 0x2ff   :  { %12530 = vmatprep.subr.msk.bf16.mxu1 %vm15790_vm1, %v15784_v29  ;;  %v20898_v29 = vld [vmem:[#allocation16_spill] sm:$0xff] }
 0x300   :  { %vm20899_vm1 = vnez %v20898_v29 }
 0x301   :  { %12403 = vmatpush1.bf16.msk.msra.mxu0 %vm16767_vm4, %v16758_v42 }
 0x302   :  { %12533 = vmatpush1.bf16.msk.msra.mxu1 %vm15826_vm15, %v15820_v27  ;;  %12535 = vmatprep.subr.msk.bf16.mxu0 %vm20895_vm2, %v20247_v26  ;;  %vm20900_vm15 = vnez %v20589_v44  ;;  %v20916_v27 = vld [vmem:[#allocation31_spill] sm:$0xff] }
 0x303   :  { %12665 = vmatprep.subr.msk.bf16.mxu1 %vm20896_vm7, %v20247_v26  ;;  %vm20912_vm7 = vnez %v20602_v63 }
 0x304   :  { %1773 = vmatmul.mubr.f32.vlgmr.msra.gmra.mrb[6].mxu0 %v15003_v61  ;;  %v20907_v61 = vld [vmem:[#allocation22_spill] sm:$0xff] }
 0x305   :  { %1922 = vmatmul.mubr.f32.vlgmr.msra.gmra.mrb[6].mxu1 %v20897_v6  ;;  %12537 = vmatpush1.bf16.msk.msra.mxu0 %vm20899_vm1, %v20247_v26  ;;  %vm20908_vm9 = vnez %v20907_v61  ;;  %v20946_v61 = vld [vmem:[#allocation56_spill] sm:$0xff] }
 0x306   :  { %1992 = vmatprep.mubr.f32.mxu0 %v15018_v15  ;;  %12667 = vmatpush1.bf16.msk.msra.mxu1 %vm20900_vm15, %v20247_v26 }
 0x307   :  { %2134 = vmatprep.mubr.f32.mxu1 %v15018_v15  ;;  %12539 = vmatprep.subr.msk.bf16.mxu0 %vm20902_vm12, %v20247_v26  ;;  %v20910_v15 = vld [vmem:[#allocation26_spill] sm:$0xff]  ;;  %vm20914_vm12 = vnez %v20913_v57 }
 0x308   :  { %12669 = vmatprep.subr.msk.bf16.mxu1 %vm20903_vm0, %v20247_v26  ;;  %vm20911_vm2 = vnez %v20910_v15  ;;  %vm20915_vm0 = vnez %v20606_v56  ;;  %v20925_v56 = vld [vmem:[#allocation37_spill] sm:$0xff]  ;;  %v20952_v57 = vld [vmem:[#allocation62_spill] sm:$0xff] }
 0x309   :  { %12541 = vmatpush1.bf16.msk.msra.mxu0 %vm20905_vm10, %v20247_v26  ;;  %vm20926_vm15 = vnez %v20925_v56  ;;  %v20964_v56 = vld [vmem:[#allocation74_spill] sm:$0xff] }
 0x30a   :  { %12671 = vmatpush1.bf16.msk.msra.mxu1 %vm20906_vm5, %v20247_v26  ;;  %12543 = vmatprep.subr.msk.bf16.mxu0 %vm20908_vm9, %v20247_v26  ;;  %vm20917_vm9 = vnez %v20916_v27  ;;  %vm20920_vm5 = vnez %v20919_v10  ;;  %v20958_v10 = vld [vmem:[#allocation68_spill] sm:$0xff] }
 0x30b   :  { %12673 = vmatprep.subr.msk.bf16.mxu1 %vm20909_vm6, %v20247_v26  ;;  %vm20918_vm6 = vnez %v20609_v4 }
 0x30d   :  { %12545 = vmatpush1.bf16.msk.msra.mxu0 %vm20911_vm2, %v20247_v26 }
 0x30e   :  { %12675 = vmatpush1.bf16.msk.msra.mxu1 %vm20912_vm7, %v20247_v26  ;;  %12547 = vmatprep.subr.msk.bf16.mxu0 %vm20914_vm12, %v20247_v26  ;;  %vm20921_vm7 = vnez %v20613_v55  ;;  %vm20923_vm12 = vnez %v20922_v21  ;;  %v20931_v55 = vld [vmem:[#allocation42_spill] sm:$0xff] }
 0x30f   :  { %12677 = vmatprep.subr.msk.bf16.mxu1 %vm20915_vm0, %v20247_v26  ;;  %vm20924_vm0 = vnez %v20616_v11 }
 0x311   :  { %12549 = vmatpush1.bf16.msk.msra.mxu0 %vm20917_vm9, %v20247_v26 }
 0x312   :  { %12679 = vmatpush1.bf16.msk.msra.mxu1 %vm20918_vm6, %v20247_v26  ;;  %12551 = vmatprep.subr.msk.bf16.mxu0 %vm20920_vm5, %v20247_v26  ;;  %vm20927_vm6 = vnez %v20620_v8  ;;  %vm20929_vm5 = vnez %v20928_v62  ;;  %v20937_v8 = vld [vmem:[#allocation48_spill] sm:$0xff] }
 0x313   :  { %12681 = vmatprep.subr.msk.bf16.mxu1 %vm20921_vm7, %v20247_v26  ;;  %vm20930_vm7 = vnez %v20623_v20 }
 0x315   :  { %12553 = vmatpush1.bf16.msk.msra.mxu0 %vm20923_vm12, %v20247_v26  ;;  %vm20932_vm12 = vnez %v20931_v55  ;;  %v20970_v55 = vld [vmem:[#allocation80_spill] sm:$0xff] }
 0x316   :  { %12683 = vmatpush1.bf16.msk.msra.mxu1 %vm20924_vm0, %v20247_v26  ;;  %12555 = vmatprep.subr.msk.bf16.mxu0 %vm20926_vm15, %v20247_v26  ;;  %vm20933_vm0 = vnez %v20627_v14  ;;  %vm20935_vm15 = vnez %v20934_v38  ;;  %v20943_v14 = vld [vmem:[#allocation54_spill] sm:$0xff] }
 0x317   :  { %12685 = vmatprep.subr.msk.bf16.mxu1 %vm20927_vm6, %v20247_v26  ;;  %vm20936_vm6 = vnez %v20630_v28 }
 0x319   :  { %12557 = vmatpush1.bf16.msk.msra.mxu0 %vm20929_vm5, %v20247_v26  ;;  %vm20938_vm5 = vnez %v20937_v8  ;;  %v20976_v8 = vld [vmem:[#allocation86_spill] sm:$0xff] }
 0x31a   :  { %12687 = vmatpush1.bf16.msk.msra.mxu1 %vm20930_vm7, %v20247_v26  ;;  %12559 = vmatprep.subr.msk.bf16.mxu0 %vm20932_vm12, %v20247_v26  ;;  %vm20939_vm7 = vnez %v20634_v24  ;;  %vm20941_vm12 = vnez %v20940_v18  ;;  %v20949_v24 = vld [vmem:[#allocation58_spill] sm:$0xff] }
 0x31b   :  { %12689 = vmatprep.subr.msk.bf16.mxu1 %vm20933_vm0, %v20247_v26  ;;  %vm20942_vm0 = vnez %v20637_v37 }
 0x31d   :  { %12561 = vmatpush1.bf16.msk.msra.mxu0 %vm20935_vm15, %v20247_v26  ;;  %vm20944_vm15 = vnez %v20943_v14  ;;  %v20982_v14 = vld [vmem:[#allocation92_spill] sm:$0xff] }
 0x31e   :  { %12691 = vmatpush1.bf16.msk.msra.mxu1 %vm20936_vm6, %v20247_v26  ;;  %12563 = vmatprep.subr.msk.bf16.mxu0 %vm20938_vm5, %v20247_v26  ;;  %vm20945_vm6 = vnez %v20642_v13  ;;  %vm20947_vm5 = vnez %v20946_v61  ;;  %v20955_v13 = vld [vmem:[#allocation64_spill] sm:$0xff] }
 0x31f   :  { %12693 = vmatprep.subr.msk.bf16.mxu1 %vm20939_vm7, %v20247_v26  ;;  %vm20948_vm7 = vnez %v20646_v33  ;;  %vm20956_vm9 = vnez %v20955_v13 }
 0x321   :  { %12565 = vmatpush1.bf16.msk.msra.mxu0 %vm20941_vm12, %v20247_v26  ;;  %vm20950_vm12 = vnez %v20949_v24  ;;  %v20988_v24 = vld [vmem:[#allocation97_spill] sm:$0xff] }
 0x322   :  { %12695 = vmatpush1.bf16.msk.msra.mxu1 %vm20942_vm0, %v20247_v26  ;;  %12567 = vmatprep.subr.msk.bf16.mxu0 %vm20944_vm15, %v20247_v26  ;;  %vm20951_vm0 = vnez %v20651_v7  ;;  %vm20953_vm15 = vnez %v20952_v57  ;;  %v20961_v7 = vld [vmem:[#allocation70_spill] sm:$0xff] }
 0x323   :  { %12697 = vmatprep.subr.msk.bf16.mxu1 %vm20945_vm6, %v20247_v26  ;;  %vm20954_vm6 = vnez %v20656_v0  ;;  %vm20962_vm2 = vnez %v20961_v7  ;;  %v21026_v7 = vld [vmem:[#allocation95_spill] sm:$0xff] }
 0x325   :  { %12569 = vmatpush1.bf16.msk.msra.mxu0 %vm20947_vm5, %v20247_v26 }
 0x326   :  { %12699 = vmatpush1.bf16.msk.msra.mxu1 %vm20948_vm7, %v20247_v26  ;;  %12571 = vmatprep.subr.msk.bf16.mxu0 %vm20950_vm12, %v20247_v26  ;;  %vm20957_vm7 = vnez %v20661_v50  ;;  %vm20959_vm12 = vnez %v20958_v10  ;;  %v20967_v50 = vld [vmem:[#allocation77_spill] sm:$0xff] }
 0x327   :  { %12701 = vmatprep.subr.msk.bf16.mxu1 %vm20951_vm0, %v20247_v26  ;;  %vm20960_vm0 = vnez %v20667_v1 }
 0x329   :  { %12573 = vmatpush1.bf16.msk.msra.mxu0 %vm20953_vm15, %v20247_v26 }
 0x32a   :  { %12703 = vmatpush1.bf16.msk.msra.mxu1 %vm20954_vm6, %v20247_v26  ;;  %12575 = vmatprep.subr.msk.bf16.mxu0 %vm20956_vm9, %v20247_v26  ;;  %vm20963_vm6 = vnez %v20672_v47  ;;  %vm20965_vm9 = vnez %v20964_v56  ;;  %v20973_v47 = vld [vmem:[#allocation84_spill] sm:$0xff] }
 0x32b   :  { %12705 = vmatprep.subr.msk.bf16.mxu1 %vm20957_vm7, %v20247_v26  ;;  %vm20966_vm7 = vnez %v20678_v48 }
 0x32d   :  { %12577 = vmatpush1.bf16.msk.msra.mxu0 %vm20959_vm12, %v20247_v26  ;;  %vm20968_vm12 = vnez %v20967_v50 }
 0x32e   :  { %12707 = vmatpush1.bf16.msk.msra.mxu1 %vm20960_vm0, %v20247_v26  ;;  %12579 = vmatprep.subr.msk.bf16.mxu0 %vm20962_vm2, %v20247_v26  ;;  %vm20969_vm0 = vnez %v20683_v39  ;;  %vm20971_vm2 = vnez %v20970_v55  ;;  %v20979_v39 = vld [vmem:[#allocation90_spill] sm:$0xff] }
 0x32f   :  { %12709 = vmatprep.subr.msk.bf16.mxu1 %vm20963_vm6, %v20247_v26  ;;  %vm20972_vm6 = vnez %v20689_v40 }
 0x331   :  { %12581 = vmatpush1.bf16.msk.msra.mxu0 %vm20965_vm9, %v20247_v26  ;;  %vm20974_vm9 = vnez %v20973_v47 }
 0x332   :  { %12711 = vmatpush1.bf16.msk.msra.mxu1 %vm20966_vm7, %v20247_v26  ;;  %12583 = vmatprep.subr.msk.bf16.mxu0 %vm20968_vm12, %v20247_v26  ;;  %vm20975_vm7 = vnez %v20694_v34  ;;  %vm20977_vm12 = vnez %v20976_v8  ;;  %v20985_v34 = vld [vmem:[#allocation94_spill] sm:$0xff] }
 0x333   :  { %12713 = vmatprep.subr.msk.bf16.mxu1 %vm20969_vm0, %v20247_v26  ;;  %vm20978_vm0 = vnez %v20700_v41 }
 0x335   :  { %12585 = vmatpush1.bf16.msk.msra.mxu0 %vm20971_vm2, %v20247_v26  ;;  %vm20980_vm2 = vnez %v20979_v39 }
 0x336   :  { %12715 = vmatpush1.bf16.msk.msra.mxu1 %vm20972_vm6, %v20247_v26  ;;  %12587 = vmatprep.subr.msk.bf16.mxu0 %vm20974_vm9, %v20247_v26  ;;  %vm20981_vm6 = vnez %v20705_v5  ;;  %vm20983_vm9 = vnez %v20982_v14  ;;  %v20991_v5 = vld [vmem:[#allocation99_spill] sm:$0xff] }
 0x337   :  { %12717 = vmatprep.subr.msk.bf16.mxu1 %vm20975_vm7, %v20247_v26  ;;  %vm20984_vm7 = vnez %v20711_v16 }
 0x339   :  { %12589 = vmatpush1.bf16.msk.msra.mxu0 %vm20977_vm12, %v20247_v26  ;;  %vm20986_vm12 = vnez %v20985_v34  ;;  %v21028_v34 = vld [vmem:[#allocation133_spill] sm:$0xff] }
 0x33a   :  { %12719 = vmatpush1.bf16.msk.msra.mxu1 %vm20978_vm0, %v20247_v26  ;;  %12591 = vmatprep.subr.msk.bf16.mxu0 %vm20980_vm2, %v20247_v26  ;;  %vm20987_vm0 = vnez %v20716_v46  ;;  %vm20989_vm2 = vnez %v20988_v24  ;;  %v20994_v46 = vld [vmem:[#allocation100_spill] sm:$0xff]  ;;  %v21030_v24 = vld [vmem:[#allocation93_spill] sm:$0xff] }
 0x33b   :  { %12721 = vmatprep.subr.msk.bf16.mxu1 %vm20981_vm6, %v20247_v26  ;;  %vm20990_vm6 = vnez %v20721_v58  ;;  %v20999_v58 = vld [vmem:[#allocation104_spill] sm:$0xff] }
 0x33d   :  { %12593 = vmatpush1.bf16.msk.msra.mxu0 %vm20983_vm9, %v20247_v26  ;;  %vm20992_vm9 = vnez %v20991_v5  ;;  %v21032_v5 = vld [vmem:[#allocation135_spill] sm:$0xff] }
 0x33e   :  { %12723 = vmatpush1.bf16.msk.msra.mxu1 %vm20984_vm7, %v20247_v26  ;;  %12595 = vmatprep.subr.msk.bf16.mxu0 %vm20986_vm12, %v20247_v26  ;;  %vm20993_vm7 = vnez %v20725_v25  ;;  %vm20995_vm12 = vnez %v20994_v46  ;;  %v21002_v25 = vld [vmem:[#allocation107_spill] sm:$0xff]  ;;  %v21034_v46 = vld [vmem:[#allocation96_spill] sm:$0xff] }
 0x33f   :  { %12725 = vmatprep.subr.msk.bf16.mxu1 %vm20987_vm0, %v20247_v26  ;;  %vm20996_vm0 = vcmask 1031168  }
 0x341   :  { %12597 = vmatpush1.bf16.msk.msra.mxu0 %vm20989_vm2, %v20247_v26  ;;  %vm20997_vm2 = vnez %v20729_v30  ;;  %v21005_v30 = vld [vmem:[#allocation110_spill] sm:$0xff] }
 0x342   :  { %12727 = vmatpush1.bf16.msk.msra.mxu1 %vm20990_vm6, %v20247_v26  ;;  %12599 = vmatprep.subr.msk.bf16.mxu0 %vm20992_vm9, %v20247_v26  ;;  %vm20998_vm9 = vmmov %vm20996_vm0  ;;  %vm21001_vm6 = vnez %v20733_v51  ;;  %v21011_v51 = vld [vmem:[#allocation117_spill] sm:$0xff] }
 0x343   :  { %12729 = vmatprep.subr.msk.bf16.mxu1 %vm20993_vm7, %v20247_v26  ;;  %vm21000_vm7 = vnez %v20999_v58  ;;  %v21036_v58 = vld [vmem:[#allocation139_spill] sm:$0xff] }
 0x344   :  { %1993 = vmatmul.mubr.f32.vlgmr.msra.gmra.mrb[8].mxu0 %v20734_v22 }
 0x345   :  { %2135 = vmatmul.mubr.f32.vlgmr.msra.gmra.mrb[8].mxu1 %v20734_v22  ;;  %12601 = vmatpush1.bf16.msk.msra.mxu0 %vm20995_vm12, %v20247_v26  ;;  %vm21003_vm12 = vnez %v21002_v25  ;;  %v21008_v22 = vld [vmem:[#allocation115_spill] sm:$0xff]  ;;  %v21038_v25 = vld [vmem:[#allocation98_spill] sm:$0xff] }
 0x346   :  { %9492 = vmatprep.mubr.msk.f32.mxu0 %vm20996_vm0, %v20739_v35  ;;  %12731 = vmatpush1.bf16.msk.msra.mxu1 %vm20997_vm2, %v20247_v26  ;;  %vm21004_vm0 = vnez %v20738_v19  ;;  %vm21006_vm2 = vnez %v21005_v30  ;;  %v21014_v19 = vld [vmem:[#allocation121_spill] sm:$0xff] }
 0x347   :  { %9621 = vmatprep.mubr.msk.f32.mxu1 %vm20998_vm9, %v20739_v35  ;;  %12603 = vmatprep.subr.msk.bf16.mxu0 %vm21000_vm7, %v20247_v26  ;;  %vm21007_vm9 = vnez %v20742_v43  ;;  %vm21009_vm7 = vnez %v21008_v22  ;;  %v21017_v35 = vld [vmem:[#allocation123_spill] sm:$0xff]  ;;  %v21040_v30 = vld [vmem:[#allocation141_spill] sm:$0xff] }
 0x348   :  { %12733 = vmatprep.subr.msk.bf16.mxu1 %vm21001_vm6, %v20247_v26  ;;  %vm21010_vm6 = vnez %v20750_v17  ;;  %v21020_v43 = vld [vmem:[#allocation127_spill] sm:$0xff]  ;;  %v21022_v17 = vld [vmem:[#allocation88_spill] sm:$0xff] }
 0x349   :  { %12605 = vmatpush1.bf16.msk.msra.mxu0 %vm21003_vm12, %v20247_v26  ;;  %vm21012_vm12 = vnez %v21011_v51  ;;  %v21042_v22 = vld [vmem:[#allocation103_spill] sm:$0xff]  ;;  %v21044_v51 = vld [vmem:[#allocation145_spill] sm:$0xff] }
 0x34a   :  { %12735 = vmatpush1.bf16.msk.msra.mxu1 %vm21004_vm0, %v20247_v26  ;;  %12607 = vmatprep.subr.msk.bf16.mxu0 %vm21006_vm2, %v20247_v26  ;;  %vm21013_vm0 = vnez %v20754_v60  ;;  %vm21015_vm2 = vnez %v21014_v19  ;;  %v21024_v60 = vld [vmem:[#allocation129_spill] sm:$0xff] }
 0x34b   :  { %12737 = vmatprep.subr.msk.bf16.mxu1 %vm21007_vm9, %v20247_v26  ;;  %vm21016_vm9 = vnez %v20760_v45  ;;  %v21046_v19 = vld [vmem:[#allocation109_spill] sm:$0xff] }
 0x34d   :  { %12609 = vmatpush1.bf16.msk.msra.mxu0 %vm21009_vm7, %v20247_v26  ;;  %vm21018_vm7 = vnez %v21017_v35  ;;  %v21048_v35 = vld [vmem:[#allocation147_spill] sm:$0xff] }
 0x34e   :  { %12739 = vmatpush1.bf16.msk.msra.mxu1 %vm21010_vm6, %v20247_v26  ;;  %12611 = vmatprep.subr.msk.bf16.mxu0 %vm21012_vm12, %v20247_v26  ;;  %vm21019_vm6 = vnez %v20764_v32  ;;  %vm21021_vm12 = vnez %v21020_v43  ;;  %v21050_v43 = vld [vmem:[#allocation101_spill] sm:$0xff] }
 0x34f   :  { %12741 = vmatprep.subr.msk.bf16.mxu1 %vm21013_vm0, %v20247_v26  ;;  %vm21023_vm0 = vnez %v21022_v17  ;;  %v21052_v17 = vld [vmem:[#allocation151_spill] sm:$0xff] }
 0x351   :  { %12613 = vmatpush1.bf16.msk.msra.mxu0 %vm21015_vm2, %v20247_v26  ;;  %vm21025_vm2 = vnez %v21024_v60  ;;  %v21054_v60 = vld [vmem:[#allocation102_spill] sm:$0xff] }
 0x352   :  { %12743 = vmatpush1.bf16.msk.msra.mxu1 %vm21016_vm9, %v20247_v26  ;;  %12615 = vmatprep.subr.msk.bf16.mxu0 %vm21018_vm7, %v20247_v26  ;;  %vm21027_vm9 = vnez %v21026_v7  ;;  %vm21029_vm7 = vnez %v21028_v34  ;;  %v21056_v7 = vld [vmem:[#allocation153_spill] sm:$0xff] }
 0x353   :  { %12745 = vmatprep.subr.msk.bf16.mxu1 %vm21019_vm6, %v20247_v26  ;;  %vm21031_vm6 = vnez %v21030_v24  ;;  %v21058_v34 = vld [vmem:[#allocation105_spill] sm:$0xff] }
 0x354   :  { %v21060_v24 = vld [vmem:[#allocation157_spill] sm:$0xff] }
 0x355   :  { %12617 = vmatpush1.bf16.msk.msra.mxu0 %vm21021_vm12, %v20247_v26  ;;  %vm21033_vm12 = vnez %v21032_v5  ;;  %v21062_v5 = vld [vmem:[#allocation106_spill] sm:$0xff] }
 0x356   :  { %12747 = vmatpush1.bf16.msk.msra.mxu1 %vm21023_vm0, %v20247_v26  ;;  %12619 = vmatprep.subr.msk.bf16.mxu0 %vm21025_vm2, %v20247_v26  ;;  %vm21035_vm0 = vnez %v21034_v46  ;;  %vm21037_vm2 = vnez %v21036_v58  ;;  %v21064_v46 = vld [vmem:[#allocation159_spill] sm:$0xff]  ;;  %v21066_v58 = vld [vmem:[#allocation108_spill] sm:$0xff] }
 0x357   :  { %v17045_v45 = vpop.f32.mrb[4].mxu0  ;;  %12749 = vmatprep.subr.msk.bf16.mxu1 %vm21027_vm9, %v20247_v26  ;;  %vm21039_vm9 = vnez %v21038_v25  ;;  %v21068_v25 = vld [vmem:[#allocation163_spill] sm:$0xff] }
 0x358   :  { %v17047_v13 = vpop.f32.mrb[4].mxu1  ;;  %v17054_v50 = vpop.f32.mrb[5].mxu0 }
 0x359   :  { %v1779_v32 = vmax.f32 %v17045_v45, %v17047_v13  ;;  %v17056_v47 = vpop.f32.mrb[5].mxu1  ;;  %12621 = vmatpush1.bf16.msk.msra.mxu0 %vm21029_vm7, %v20247_v26  ;;  %vm21041_vm7 = vnez %v21040_v30  ;;  %v21070_v30 = vld [vmem:[#allocation111_spill] sm:$0xff]  ;;  %v17339_v45 = vld [vmem:[%s19439_s5] sm:$0xff] }
 0x35a   :  { %12751 = vmatpush1.bf16.msk.msra.mxu1 %vm21031_vm6, %v20247_v26  ;;  %12623 = vmatprep.subr.msk.bf16.mxu0 %vm21033_vm12, %v20247_v26  ;;  %vm21043_vm6 = vnez %v21042_v22  ;;  %vm21045_vm12 = vnez %v21044_v51  ;;  %v21072_v22 = vld [vmem:[#allocation165_spill] sm:$0xff]  ;;  %v21074_v51 = vld [vmem:[#allocation112_spill] sm:$0xff]  ;;  %21162 = vst [vmem:[#allocation122_spill] sm:$0xff] %v17339_v45 }
 0x35b   :  { %12753 = vmatprep.subr.msk.bf16.mxu1 %vm21035_vm0, %v20247_v26  ;;  %vm21047_vm0 = vnez %v21046_v19  ;;  %v21076_v19 = vld [vmem:[#allocation169_spill] sm:$0xff]  ;;  %2724 = vrot.lane.b32.xlu0 %v17339_v45, %s13793_s2 }
 0x35d   :  { %12625 = vmatpush1.bf16.msk.msra.mxu0 %vm21037_vm2, %v20247_v26  ;;  %vm21049_vm2 = vnez %v21048_v35  ;;  %v21078_v35 = vld [vmem:[#allocation114_spill] sm:$0xff] }
 0x35e   :  { %12755 = vmatpush1.bf16.msk.msra.mxu1 %vm21039_vm9, %v20247_v26  ;;  %12627 = vmatprep.subr.msk.bf16.mxu0 %vm21041_vm7, %v20247_v26  ;;  %vm21051_vm9 = vnez %v21050_v43  ;;  %vm21053_vm7 = vnez %v21052_v17  ;;  %v21080_v43 = vld [vmem:[#allocation171_spill] sm:$0xff]  ;;  %v21082_v17 = vld [vmem:[#allocation116_spill] sm:$0xff] }
 0x35f   :  { %12757 = vmatprep.subr.msk.bf16.mxu1 %vm21043_vm6, %v20247_v26  ;;  %vm21055_vm6 = vnez %v21054_v60  ;;  %v21084_v60 = vld [vmem:[#allocation176_spill] sm:$0xff] }
 0x361   :  { %12629 = vmatpush1.bf16.msk.msra.mxu0 %vm21045_vm12, %v20247_v26  ;;  %vm21057_vm12 = vnez %v21056_v7  ;;  %v21087_v7 = vld [vmem:[#allocation178_spill] sm:$0xff] }
 0x362   :  { %12759 = vmatpush1.bf16.msk.msra.mxu1 %vm21047_vm0, %v20247_v26  ;;  %12631 = vmatprep.subr.msk.bf16.mxu0 %vm21049_vm2, %v20247_v26  ;;  %vm21059_vm0 = vnez %v21058_v34  ;;  %vm21061_vm2 = vnez %v21060_v24  ;;  %v21089_v34 = vld [vmem:[#allocation180_spill] sm:$0xff]  ;;  %v21139_v24 = vld [vmem:[#allocation91_spill] sm:$0xff] }
 0x363   :  { %12761 = vmatprep.subr.msk.bf16.mxu1 %vm21051_vm9, %v20247_v26  ;;  %vm21063_vm9 = vnez %v21062_v5  ;;  %v21092_v5 = vld [vmem:[#allocation182_spill] sm:$0xff] }
 0x365   :  { %12633 = vmatpush1.bf16.msk.msra.mxu0 %vm21053_vm7, %v20247_v26  ;;  %vm21065_vm7 = vnez %v21064_v46  ;;  %v21097_v46 = vld [vmem:[#allocation185_spill] sm:$0xff] }
 0x366   :  { %12763 = vmatpush1.bf16.msk.msra.mxu1 %vm21055_vm6, %v20247_v26  ;;  %12635 = vmatprep.subr.msk.bf16.mxu0 %vm21057_vm12, %v20247_v26  ;;  %vm21067_vm6 = vnez %v21066_v58  ;;  %vm21069_vm12 = vnez %v21068_v25  ;;  %v21099_v58 = vld [vmem:[#allocation187_spill] sm:$0xff]  ;;  %v21100_v25 = vld [vmem:[#allocation188_spill] sm:$0xff] }
 0x367   :  { %12765 = vmatprep.subr.msk.bf16.mxu1 %vm21059_vm0, %v20247_v26  ;;  %vm21071_vm0 = vnez %v21070_v30  ;;  %v21119_v30 = vld [vmem:[#allocation30_spill] sm:$0xff] }
 0x369   :  { %12637 = vmatpush1.bf16.msk.msra.mxu0 %vm21061_vm2, %v20247_v26  ;;  %vm21073_vm2 = vnez %v21072_v22  ;;  %v21122_v22 = vld [vmem:[#allocation79_spill] sm:$0xff] }
 0x36a   :  { %12767 = vmatpush1.bf16.msk.msra.mxu1 %vm21063_vm9, %v20247_v26  ;;  %12639 = vmatprep.subr.msk.bf16.mxu0 %vm21065_vm7, %v20247_v26  ;;  %vm21075_vm9 = vnez %v21074_v51  ;;  %vm21077_vm7 = vnez %v21076_v19  ;;  %v21125_v51 = vld [vmem:[#allocation35_spill] sm:$0xff]  ;;  %v21128_v19 = vld [vmem:[#allocation85_spill] sm:$0xff] }
 0x36b   :  { %12769 = vmatprep.subr.msk.bf16.mxu1 %vm21067_vm6, %v20247_v26  ;;  %vm21079_vm6 = vnez %v21078_v35  ;;  %v21130_v35 = vld [vmem:[#allocation89_spill] sm:$0xff] }
 0x36d   :  { %12641 = vmatpush1.bf16.msk.msra.mxu0 %vm21069_vm12, %v20247_v26  ;;  %vm21081_vm12 = vnez %v21080_v43  ;;  %v21131_v43 = vld [vmem:[#allocation8_spill] sm:$0xff] }
 0x36e   :  { %12771 = vmatpush1.bf16.msk.msra.mxu1 %vm21071_vm0, %v20247_v26  ;;  %12643 = vmatprep.subr.msk.bf16.mxu0 %vm21073_vm2, %v20247_v26  ;;  %vm21083_vm0 = vnez %v21082_v17  ;;  %vm21085_vm2 = vnez %v21084_v60  ;;  %v21134_v60 = vld [vmem:[#allocation11_spill] sm:$0xff] }
 0x36f   :  { %12773 = vmatprep.subr.msk.bf16.mxu1 %vm21075_vm9, %v20247_v26  ;;  %vm21086_vm9 = vnez %v20866_v3  ;;  %v21094_v3 = vld [vmem:[#allocation183_spill] sm:$0xff] }
 0x371   :  { %12645 = vmatpush1.bf16.msk.msra.mxu0 %vm21077_vm7, %v20247_v26  ;;  %vm21088_vm7 = vnez %v21087_v7 }
 0x372   :  { %12775 = vmatpush1.bf16.msk.msra.mxu1 %vm21079_vm6, %v20247_v26  ;;  %12647 = vmatprep.subr.msk.bf16.mxu0 %vm21081_vm12, %v20247_v26  ;;  %vm21090_vm6 = vnez %v21089_v34  ;;  %vm21093_vm12 = vnez %v21092_v5  ;;  %v21136_v34 = vld [vmem:[#allocation40_spill] sm:$0xff] }
 0x373   :  { %12777 = vmatprep.subr.msk.bf16.mxu1 %vm21083_vm0, %v20247_v26  ;;  %vm21095_vm0 = vnez %v21094_v3  ;;  %v21143_v3 = vld [vmem:[#allocation87_spill] sm:$0xff] }
 0x375   :  { %12649 = vmatpush1.bf16.msk.msra.mxu0 %vm21085_vm2, %v20247_v26 }
 0x376   :  { %12779 = vmatpush1.bf16.msk.msra.mxu1 %vm21086_vm9, %v20247_v26  ;;  %12651 = vmatprep.subr.msk.bf16.mxu0 %vm21088_vm7, %v20247_v26  ;;  %vm21112_vm9 = vnez %v20958_v10  ;;  %vm21114_vm7 = vnez %v21113_v31  ;;  %v17347_v31 = vpop.permute.xlu1 %2498 }
 0x377   :  { %12781 = vmatprep.subr.msk.bf16.mxu1 %vm16684_vm13, %v20247_v26  ;;  %vm21098_vm13 = vnez %v21097_v46  ;;  %21163 = vst [vmem:[#allocation124_spill] sm:$0xff] %v17347_v31 }
 0x379   :  { %12653 = vmatpush1.bf16.msk.msra.mxu0 %vm21090_vm6, %v20247_v26  ;;  %vm21115_vm6 = vnez %v20910_v15 }
 0x37a   :  { %12783 = vmatpush1.bf16.msk.msra.mxu1 %vm16707_vm3, %v20247_v26  ;;  %12655 = vmatprep.subr.msk.bf16.mxu0 %vm21093_vm12, %v20247_v26  ;;  %vm21101_vm3 = vnez %v21100_v25  ;;  %v21153_v25 = vld [vmem:[#allocation45_spill] sm:$0xff] }
 0x37b   :  { %12785 = vmatprep.subr.msk.bf16.mxu1 %vm16714_vm8, %v20247_v26  ;;  %vm21103_vm8 = vnez %v21102_v54  ;;  %v21269_v54 = vld [vmem:[#allocation38_spill] sm:$0xff] }
 0x37d   :  { %12657 = vmatpush1.bf16.msk.msra.mxu0 %vm21095_vm0, %v20247_v26  ;;  %vm21118_vm0 = vnez %v20964_v56 }
 0x37e   :  { %12787 = vmatpush1.bf16.msk.msra.mxu1 %vm16736_vm14, %v20247_v26  ;;  %12660 = vmatprep.subr.msk.bf16.mxu0 %vm21098_vm13, %v21096_v23  ;;  %vm21105_vm14 = vnez %v21104_v53  ;;  %vm21120_vm13 = vnez %v21119_v30  ;;  %v21146_v23 = vmov 0  ;;  %v21266_v53 = vmov 0 }
 0x37f   :  { %12790 = vmatprep.subr.msk.bf16.mxu1 %vm16748_vm11, %v16741_v12  ;;  %v21106_v12 = vld [vmem:[#allocation59_spill] sm:$0xff] }
 0x380   :  { %vm21107_vm11 = vnez %v21106_v12 }
 0x381   :  { %12663 = vmatpush1.bf16.msk.msra.mxu0 %vm21101_vm3, %v21099_v58  ;;  %vm21121_vm3 = vnez %v20916_v27  ;;  %v21151_v58 = vmov 0 }
 0x382   :  { %12793 = vmatpush1.bf16.msk.msra.mxu1 %vm16767_vm4, %v16758_v42  ;;  %12795 = vmatprep.subr.msk.bf16.mxu0 %vm21103_vm8, %v20247_v26  ;;  %vm21109_vm4 = vnez %v21108_v9  ;;  %v21110_v42 = vld [vmem:[#allocation65_spill] sm:$0xff]  ;;  %vm21142_vm8 = vnez %v20982_v14  ;;  %v21260_v9 = vld [vmem:[#allocation34_spill] sm:$0xff] }
 0x383   :  { %12828 = vmatprep.subr.msk.bf16.mxu1 %vm20947_vm5, %v20247_v26  ;;  %vm21111_vm2 = vnez %v21110_v42  ;;  %v21259_v42 = vld [vmem:[#allocation33_spill] sm:$0xff] }
 0x384   :  { %2064 = vmatmul.mubr.f32.vlgmr.msra.gmra.mrb[8].mxu0 %v20897_v6 }
 0x385   :  { %2206 = vmatmul.mubr.f32.vlgmr.msra.gmra.mrb[8].mxu1 %v20897_v6  ;;  %12797 = vmatpush3.bf16.msk.msra.mxu0 %vm21105_vm14, %v20247_v26  ;;  %v21116_v6 = vld [vmem:[#allocation73_spill] sm:$0xff]  ;;  %vm21137_vm14 = vnez %v21136_v34 }
 0x386   :  { %12830 = vmatpush3.bf16.msk.msra.mxu1 %vm20899_vm1, %v20247_v26  ;;  %12799 = vmatprep.subr.msk.bf16.mxu0 %vm21107_vm11, %v20247_v26  ;;  %vm21117_vm12 = vnez %v21116_v6  ;;  %vm21133_vm11 = vnez %v20976_v8 }
 0x387   :  { %12832 = vmatprep.subr.msk.bf16.mxu1 %vm20953_vm15, %v20247_v26 }
 0x389   :  { %12801 = vmatpush3.bf16.msk.msra.mxu0 %vm21109_vm4, %v20247_v26  ;;  %vm21127_vm4 = vnez %v20922_v21 }
 0x38a   :  { %12834 = vmatpush3.bf16.msk.msra.mxu1 %vm20905_vm10, %v20247_v26  ;;  %12803 = vmatprep.subr.msk.bf16.mxu0 %vm21111_vm2, %v20247_v26  ;;  %vm21124_vm2 = vnez %v20970_v55 }
 0x38b   :  { %12836 = vmatprep.subr.msk.bf16.mxu1 %vm21112_vm9, %v20247_v26 }
 0x38d   :  { %12805 = vmatpush3.bf16.msk.msra.mxu0 %vm21114_vm7, %v20247_v26  ;;  %vm21123_vm7 = vnez %v21122_v22 }
 0x38e   :  { %12838 = vmatpush3.bf16.msk.msra.mxu1 %vm21115_vm6, %v20247_v26  ;;  %12807 = vmatprep.subr.msk.bf16.mxu0 %vm21117_vm12, %v20247_v26  ;;  %vm21126_vm12 = vnez %v21125_v51 }
 0x38f   :  { %12840 = vmatprep.subr.msk.bf16.mxu1 %vm21118_vm0, %v20247_v26  ;;  %vm21203_vm0 = vcmask 1043456  }
 0x391   :  { %12809 = vmatpush3.bf16.msk.msra.mxu0 %vm21120_vm13, %v20247_v26  ;;  %vm21129_vm13 = vnez %v21128_v19 }
 0x392   :  { %12842 = vmatpush3.bf16.msk.msra.mxu1 %vm21121_vm3, %v20247_v26  ;;  %12811 = vmatprep.subr.msk.bf16.mxu0 %vm21123_vm7, %v20247_v26  ;;  %vm21132_vm7 = vcmp.eq.s32.totalorder %v21130_v35, %v21131_v43 }
 0x393   :  { %12844 = vmatprep.subr.msk.bf16.mxu1 %vm21124_vm2, %v20247_v26  ;;  %v748_v17 = vsel %vm21132_vm7, 1.0, %v20560_v2  ;;  %vm21140_vm7 = vnez %v21139_v24 }
 0x394   :  { %v17272_v5 = vpack.c.bf16 %v748_v17, %v20886_v36  ;;  %v21156_v17 = vld [vmem:[#allocation51_spill] sm:$0xff] }
 0x395   :  { %12813 = vmatpush3.bf16.msk.msra.mxu0 %vm21126_vm12, %v20247_v26  ;;  %vm21135_vm12 = vcmp.eq.s32.totalorder %v21130_v35, %v21134_v60 }
 0x396   :  { %12846 = vmatpush3.bf16.msk.msra.mxu1 %vm21127_vm4, %v20247_v26  ;;  %12815 = vmatprep.subr.msk.bf16.mxu0 %vm21129_vm13, %v20247_v26  ;;  %v1006_v7 = vsel %vm21135_vm12, 1.0, %v20560_v2  ;;  %vm21138_vm13 = vnez %v20928_v62  ;;  %21141 = vst [vmem:[#allocation119_spill] sm:$0xff] %v17272_v5  ;;  %vm21144_vm12 = vcmp.eq.s32.totalorder %v21143_v3, %v21131_v43 }
 0x397   :  { %12848 = vmatprep.subr.msk.bf16.mxu1 %vm21133_vm11, %v20247_v26  ;;  %vm21145_vm11 = vcmask 1045504   ;;  %v17286_v46 = vpack.c.bf16 %v1006_v7, %v20886_v36 }
 0x399   :  { %12817 = vmatpush3.bf16.msk.msra.mxu0 %vm21137_vm14, %v20247_v26  ;;  %vm17281_vm14 = vmpackc.low %vm21145_vm11, %vm21144_vm12  ;;  %vm21160_vm12 = vcmask 1031168  }
 0x39a   :  { %12850 = vmatpush3.bf16.msk.msra.mxu1 %vm21138_vm13, %v20247_v26  ;;  %12819 = vmatprep.subr.msk.bf16.mxu0 %vm21140_vm7, %v20247_v26  ;;  %v21147_v23 = vsel %vm17281_vm14, 4294967295, %v21146_v23  ;;  %vm21149_vm7 = vcmp.eq.s32.totalorder %v21143_v3, %v21134_v60  ;;  %vm21150_vm13 = vmmov %vm21145_vm11  ;;  %vm21155_vm11 = vnez %v20934_v38 }
 0x39b   :  { %12852 = vmatprep.subr.msk.bf16.mxu1 %vm21142_vm8, %v20247_v26  ;;  %21148 = vst [vmem:[#allocation120_spill] sm:$0xff] %v21147_v23  ;;  %vm17292_vm4 = vmpackc.low %vm21150_vm13, %vm21149_vm7  ;;  %vm21154_vm8 = vnez %v21153_v25  ;;  %vm21157_vm13 = vnez %v21156_v17  ;;  %vm21158_vm7 = vnez %v20940_v18  ;;  %v21159_v17 = vmax.f32 %v17054_v50, %v17056_v47 }
 0x39c   :  { %v21152_v58 = vsel %vm17292_vm4, 4294967295, %v21151_v58 }
 0x39d   :  { %12821 = vmatpush3.bf16.msk.msra.mxu0 %vm21154_vm8, %v20247_v26  ;;  %vm21166_vm8 = vnez %v20646_v33  ;;  %v21250_v33 = vld [vmem:[#allocation29_spill] sm:$0xff] }
 0x39e   :  { %12854 = vmatpush3.bf16.msk.msra.mxu1 %vm21155_vm11, %v20247_v26  ;;  %12824 = vmatprep.subr.msk.bf16.mxu0 %vm17281_vm14, %v17272_v5  ;;  %vm20006_vm14 = vmmov 0   ;;  %vm21176_vm11 = vnez %v20689_v40  ;;  %v21230_v40 = vld [vmem:[#allocation19_spill] sm:$0xff] }
 0x39f   :  { %12857 = vmatprep.subr.msk.bf16.mxu1 %vm17292_vm4, %v17286_v46  ;;  %vm21168_vm4 = vcmask 1031168  }
 0x3a1   :  { %12826 = vmatpush3.bf16.msk.msra.mxu0 %vm21157_vm13, %v20247_v26  ;;  %vm21161_vm13 = vmmov %vm21160_vm12 }
 0x3a2   :  { %12859 = vmatpush3.bf16.msk.msra.mxu1 %vm21158_vm7, %v20247_v26  ;;  %11130 = vmatprep.subr.mxu0 %v20560_v2  ;;  %vm21167_vm7 = vnez %v20589_v44  ;;  %v21249_v44 = vld [vmem:[#allocation28_spill] sm:$0xff] }
 0x3a3   :  { %11135 = vmatprep.subr.mxu1 %v20560_v2 }
 0x3d7   :  { %v1774_v7 = vpop.f32.mrb[6].mxu0 }
 0x3d8   :  { %v17319_v39 = vmax.f32 %v1779_v32, %v1774_v7  ;;  %v1923_v60 = vpop.f32.mrb[6].mxu1  ;;  %v1776_v23 = vpop.f32.mrb[7].mxu0 }
 0x3d9   :  { %v17324_v5 = vmax.f32 %v21159_v17, %v1776_v23  ;;  %v1925_v25 = vpop.f32.mrb[7].mxu1 }
 0x3db   :  { %9654 = vmatprep.mubr.msk.f32.mxu0 %vm21160_vm12, %v17324_v5  ;;  %9687 = vmatprep.mubr.msk.f32.mxu1 %vm21161_vm13, %v17324_v5  ;;  %vm20009_vm13 = vcmask 31744   ;;  %vm21164_vm12 = vcmask 1043456  }
 0x3dc   :  { %2419 = vmatmul.mubr.f32.vlgmr.msra.gmra.mrb[10].mxu0 %v17319_v39  ;;  %2492 = vmatmul.mubr.f32.vlgmr.msra.gmra.mrb[10].mxu1 %v17319_v39 }
 0x3dd   :  { %11132 = vmatprep.mubr.msk.f32.mxu0 %vm20006_vm14, %v20560_v2  ;;  %11137 = vmatprep.mubr.msk.f32.mxu1 %vm20006_vm14, %v20560_v2  ;;  %vm21165_vm14 = vmmov %vm21164_vm12 }
 0x457   :  { %v2065_v13 = vpop.f32.mrb[8].mxu0 }
 0x458   :  { %v2212_v32 = vmax.f32 %v1923_v60, %v2065_v13  ;;  %v2207_v50 = vpop.f32.mrb[8].mxu1  ;;  %v2067_v47 = vpop.f32.mrb[9].mxu0  ;;  %v17430_v13 = vadd.s32 3, %v21131_v43 }
 0x459   :  { %v2213_v23 = vmax.f32 %v1925_v25, %v2067_v47  ;;  %v2209_v17 = vpop.f32.mrb[9].mxu1 }
 0x45a   :  { %v17343_v7 = vmax.f32 %v2212_v32, %v2207_v50  ;;  %v21190_v32 = vld [vmem:[#allocation43_spill] sm:$0xff]  ;;  %v21191_v50 = vld [vmem:[#allocation44_spill] sm:$0xff] }
 0x45b   :  { %v17345_v24 = vmax.f32 %v2213_v23, %v2209_v17  ;;  %v21192_v23 = vld [vmem:[#allocation5_spill] sm:$0xff]  ;;  %v21193_v17 = vld [vmem:[#allocation7_spill] sm:$0xff] }
 0x4af   :  { %v10396_v34 = vpop.f32.mrb[10].mxu0  ;;  %v10431_v19 = vpop.f32.mrb[10].mxu1 }
 0x4b0   :  { %v10397_v51 = vpop.f32.mrb[11].mxu0  ;;  %v10432_v22 = vpop.f32.mrb[11].mxu1 }
 0x4b1   :  { %v10398_v30 = vadd.f32 %v10397_v51, %v10396_v34  ;;  %v10433_v6 = vadd.f32 %v10432_v22, %v10431_v19  ;;  %v21185_v22 = vmov 0 }
 0x4b3   :  { %11131 = vmatpush3.msk.msra.mxu0 %vm21164_vm12, %v10433_v6  ;;  %11136 = vmatpush3.msk.msra.mxu1 %vm21165_vm14, %v10398_v30  ;;  %vm21169_vm14 = vnez %v20656_v0  ;;  %vm21170_vm12 = vmmov 0   ;;  %v21246_v0 = vmov 0 }
 0x4b4   :  { %11133 = vmatmul.mubr.msk.f32.vlgmr.msra.gmra.mrb[12].mxu0 %vm20009_vm13, %v17347_v31  ;;  %12861 = vmatprep.subr.msk.bf16.mxu0 %vm21166_vm8, %v20247_v26  ;;  %vm21171_vm8 = vnez %v20595_v59  ;;  %v21243_v59 = vmov 0  ;;  %v21256_v31 = vmov 0 }
 0x4b5   :  { %11138 = vmatmul.mubr.msk.f32.vlgmr.msra.gmra.mrb[12].mxu1 %vm20009_vm13, %v17339_v45  ;;  %12863 = vmatpush3.bf16.msk.msra.mxu0 %vm21167_vm7, %v20247_v26  ;;  %vm21172_vm13 = vnez %v20667_v1  ;;  %vm21175_vm7 = vnez %v20609_v4  ;;  %v21233_v4 = vmov 0  ;;  %v21240_v1 = vld [vmem:[#allocation24_spill] sm:$0xff]  ;;  %v21253_v45 = vmov 0 }
 0x4b6   :  { %9724 = vmatprep.mubr.msk.f32.mxu0 %vm21168_vm4, %v17324_v5  ;;  %12865 = vmatprep.subr.msk.bf16.mxu0 %vm21169_vm14, %v20247_v26  ;;  %vm21173_vm4 = vnez %v20602_v63  ;;  %vm21174_vm14 = vnez %v20678_v48  ;;  %v21236_v48 = vmov 0  ;;  %v21239_v63 = vld [vmem:[#allocation23_spill] sm:$0xff] }
 0x4b7   :  { %11140 = vmatprep.subr.mxu1 %v20560_v2  ;;  %11142 = vmatprep.mubr.msk.f32.mxu1 %vm21170_vm12, %v20560_v2 }
 0x4b9   :  { %12867 = vmatpush3.bf16.msk.msra.mxu0 %vm21171_vm8, %v20247_v26  ;;  %vm21177_vm8 = vnez %v20616_v11  ;;  %v21229_v11 = vld [vmem:[#allocation18_spill] sm:$0xff] }
 0x4ba   :  { %12869 = vmatprep.subr.msk.bf16.mxu0 %vm21172_vm13, %v20247_v26  ;;  %vm21178_vm13 = vnez %v20700_v41  ;;  %v21226_v41 = vmov 0 }
 0x4bd   :  { %12871 = vmatpush3.bf16.msk.msra.mxu0 %vm21173_vm4, %v20247_v26 }
 0x4be   :  { %12873 = vmatprep.subr.msk.bf16.mxu0 %vm21174_vm14, %v20247_v26  ;;  %vm21179_vm14 = vcmp.eq.s32.totalorder %v21130_v35, %v15807_v52 }
 0x4bf   :  { %v1264_v6 = vsel %vm21179_vm14, 1.0, %v20560_v2  ;;  %vm21188_vm14 = vnez %v20630_v28  ;;  %v21219_v28 = vld [vmem:[#allocation13_spill] sm:$0xff] }
 0x4c0   :  { %v17404_v30 = vpack.c.bf16 %v1264_v6, %v20886_v36 }
 0x4c1   :  { %12875 = vmatpush3.bf16.msk.msra.mxu0 %vm21175_vm7, %v20247_v26  ;;  %vm21180_vm7 = vnez %v20623_v20  ;;  %v21223_v20 = vmov 0 }
 0x4c2   :  { %12877 = vmatprep.subr.msk.bf16.mxu0 %vm21176_vm11, %v20247_v26  ;;  %vm21181_vm11 = vnez %v20711_v16  ;;  %21182 = vst [vmem:[#allocation125_spill] sm:$0xff] %v17404_v30  ;;  %v21221_v16 = vld [vmem:[#allocation66_spill] sm:$0xff] }
 0x4c5   :  { %12879 = vmatpush3.bf16.msk.msra.mxu0 %vm21177_vm8, %v20247_v26  ;;  %vm21183_vm8 = vcmp.eq.s32.totalorder %v21143_v3, %v15807_v52  ;;  %v21197_v52 = vmov 0 }
 0x4c6   :  { %12881 = vmatprep.subr.msk.bf16.mxu0 %vm21178_vm13, %v20247_v26  ;;  %vm21184_vm13 = vcmask 1045504  }
 0x4c7   :  { %vm17410_vm4 = vmpackc.low %vm21184_vm13, %vm21183_vm8  ;;  %vm2235_vm8 = vcmp.eq.s32.totalorder %v21190_v32, %v17430_v13  ;;  %vm2236_vm13 = vcmp.eq.s32.totalorder %v21191_v50, %v17430_v13 }
 0x4c8   :  { %v21186_v22 = vsel %vm17410_vm4, 4294967295, %v21185_v22  ;;  %vm17446_vm2 = vmpackc.low %vm2236_vm13, %vm2235_vm8  ;;  %vm21209_vm8 = vcmask 31744   ;;  %vm2223_vm13 = vcmp.eq.s32.totalorder %v21219_v28, %v17430_v13 }
 0x4c9   :  { %12883 = vmatpush3.bf16.msk.msra.mxu0 %vm21180_vm7, %v20247_v26  ;;  %21187 = vst [vmem:[#allocation126_spill] sm:$0xff] %v21186_v22  ;;  %v21198_v52 = vsel %vm17446_vm2, 4294967295, %v21197_v52  ;;  %v21204_v22 = vmov 0 }
 0x4ca   :  { %12885 = vmatprep.subr.msk.bf16.mxu0 %vm21181_vm11, %v20247_v26  ;;  %vm21189_vm11 = vnez %v20637_v37  ;;  %21199 = vst [vmem:[#allocation130_spill] sm:$0xff] %v21198_v52  ;;  %v21200_v37 = vmov 0  ;;  %v21213_v52 = vmov 0 }
 0x4cd   :  { %12887 = vmatpush3.bf16.msk.msra.mxu0 %vm21188_vm14, %v20247_v26 }
 0x4ce   :  { %12890 = vmatprep.subr.msk.bf16.mxu0 %vm17410_vm4, %v17404_v30  ;;  %vm2220_vm4 = vcmp.eq.s32.totalorder %v21193_v17, %v17430_v13  ;;  %v21207_v30 = vld [vmem:[#allocation9_spill] sm:$0xff] }
 0x4cf   :  { %vm2221_vm9 = vcmp.eq.s32.totalorder %v21207_v30, %v17430_v13 }
 0x4d1   :  { %12892 = vmatpush3.bf16.msk.msra.mxu0 %vm21189_vm11, %v20247_v26  ;;  %vm2219_vm11 = vcmp.eq.s32.totalorder %v21192_v23, %v17430_v13 }
 0x4d2   :  { %11145 = vmatprep.subr.mxu0 %v20560_v2  ;;  %vm17450_vm3 = vmpackc.low %vm2220_vm4, %vm2219_vm11 }
 0x4d3   :  { %v21201_v37 = vsel %vm17450_vm3, 4294967295, %v21200_v37 }
 0x4d4   :  { %2719 = vmatmul.mubr.f32.vlgmr.msra.gmra.mrb[14].mxu0 %v17319_v39  ;;  %21202 = vst [vmem:[#allocation131_spill] sm:$0xff] %v21201_v37  ;;  %v21220_v37 = vld [vmem:[#allocation14_spill] sm:$0xff] }
 0x4d5   :  { %11147 = vmatprep.mubr.msk.f32.mxu0 %vm21170_vm12, %v20560_v2 }
 0x587   :  { %v2572_v51 = vpop.f32.mrb[12].mxu0 }
 0x588   :  { %v11134_v19 = vpop.f32.mrb[13].mxu0  ;;  %v2647_v60 = vpop.f32.mrb[12].mxu1 }
 0x589   :  { %v17427_v34 = vadd.f32 %v2647_v60, %v2572_v51  ;;  %v11139_v25 = vpop.f32.mrb[13].mxu1  ;;  %v21194_v51 = vld [vmem:[#allocation49_spill] sm:$0xff]  ;;  %v21195_v19 = vld [vmem:[#allocation50_spill] sm:$0xff] }
 0x58a   :  { %vm2237_vm14 = vcmp.eq.s32.totalorder %v21194_v51, %v17430_v13  ;;  %vm2238_vm7 = vcmp.eq.s32.totalorder %v21195_v19, %v17430_v13  ;;  %v17444_v25 = vpop.permute.xlu0 %2724 }
 0x58b   :  { %21196 = vst [vmem:[#allocation128_spill] sm:$0xff] %v17444_v25  ;;  %vm17455_vm6 = vmpackc.low %vm2238_vm7, %vm2237_vm14  ;;  %vm21212_vm7 = vcmask 1031168  }
 0x58c   :  { %v21205_v22 = vsel %vm17455_vm6, 4294967295, %v21204_v22 }
 0x58d   :  { %21206 = vst [vmem:[#allocation132_spill] sm:$0xff] %v21205_v22  ;;  %v21222_v22 = vld [vmem:[#allocation67_spill] sm:$0xff] }
 0x5a7   :  { %v10470_v47 = vpop.f32.mrb[14].mxu0 }
 0x5a8   :  { %v10471_v6 = vpop.f32.mrb[15].mxu0 }
 0x5a9   :  { %v10472_v60 = vadd.f32 %v10471_v6, %v10470_v47  ;;  %v21208_v47 = vld [vmem:[#allocation10_spill] sm:$0xff]  ;;  %v21210_v6 = vld [vmem:[#allocation60_spill] sm:$0xff] }
 0x5aa   :  { %vm2222_vm10 = vcmp.eq.s32.totalorder %v21208_v47, %v17430_v13 }
 0x5ab   :  { %11141 = vmatpush3.msk.msra.mxu1 %vm21203_vm0, %v10472_v60  ;;  %vm2239_vm0 = vcmp.eq.s32.totalorder %v21210_v6, %v17430_v13  ;;  %v21211_v60 = vld [vmem:[#allocation61_spill] sm:$0xff]  ;;  %vm17480_vm4 = vmpackc.low %vm2222_vm10, %vm2221_vm9 }
 0x5ac   :  { %11143 = vmatmul.mubr.msk.f32.vlgmr.msra.gmra.mrb[14].mxu1 %vm21209_vm8, %v17444_v25  ;;  %12894 = vmatprep.subr.msk.bf16.mxu1 %vm17446_vm2, %v20247_v26  ;;  %vm2240_vm11 = vcmp.eq.s32.totalorder %v21211_v60, %v17430_v13  ;;  %v21214_v52 = vsel %vm17480_vm4, 4294967295, %v21213_v52  ;;  %v21216_v25 = vmov 0  ;;  %vm2224_vm8 = vcmp.eq.s32.totalorder %v21220_v37, %v17430_v13 }
 0x5ad   :  { %12896 = vmatpush3.bf16.msk.msra.mxu1 %vm17450_vm3, %v20247_v26  ;;  %9759 = vmatprep.mubr.msk.f32.mxu1 %vm21212_vm7, %v17324_v5  ;;  %21215 = vst [vmem:[#allocation134_spill] sm:$0xff] %v21214_v52  ;;  %vm17484_vm14 = vmpackc.low %vm2240_vm11, %vm2239_vm0  ;;  %vm2241_vm7 = vcmp.eq.s32.totalorder %v21221_v16, %v17430_v13  ;;  %vm2225_vm0 = vcmp.eq.s32.totalorder %v21229_v11, %v17430_v13  ;;  %v21231_v52 = vld [vmem:[#allocation71_spill] sm:$0xff] }
 0x5ae   :  { %12898 = vmatprep.subr.msk.bf16.mxu1 %vm17455_vm6, %v20247_v26  ;;  %v21217_v25 = vsel %vm17484_vm14, 4294967295, %v21216_v25  ;;  %vm2242_vm6 = vcmp.eq.s32.totalorder %v21222_v22, %v17430_v13  ;;  %vm17502_vm10 = vmpackc.low %vm2224_vm8, %vm2223_vm13  ;;  %vm2226_vm11 = vcmp.eq.s32.totalorder %v21230_v40, %v17430_v13  ;;  %vm2227_vm8 = vcmp.eq.s32.totalorder %v21239_v63, %v17430_v13 }
 0x5af   :  { %21218 = vst [vmem:[#allocation136_spill] sm:$0xff] %v21217_v25  ;;  %v21224_v20 = vsel %vm17502_vm10, 4294967295, %v21223_v20  ;;  %vm17506_vm9 = vmpackc.low %vm2242_vm6, %vm2241_vm7  ;;  %v21232_v25 = vld [vmem:[#allocation72_spill] sm:$0xff]  ;;  %vm2228_vm7 = vcmp.eq.s32.totalorder %v21240_v1, %v17430_v13  ;;  %vm2232_vm3 = vcmp.eq.s32.totalorder %v21260_v9, %v17430_v13 }
 0x5b0   :  { %21225 = vst [vmem:[#allocation137_spill] sm:$0xff] %v21224_v20  ;;  %v21227_v41 = vsel %vm17506_vm9, 4294967295, %v21226_v41  ;;  %vm17524_vm6 = vmpackc.low %vm2226_vm11, %vm2225_vm0  ;;  %v21241_v20 = vld [vmem:[#allocation75_spill] sm:$0xff]  ;;  %vm2229_vm0 = vcmp.eq.s32.totalorder %v21249_v44, %v17430_v13  ;;  %vm2230_vm11 = vcmp.eq.s32.totalorder %v21250_v33, %v17430_v13 }
 0x5b1   :  { %12900 = vmatpush3.bf16.msk.msra.mxu1 %vm17480_vm4, %v20247_v26  ;;  %21228 = vst [vmem:[#allocation138_spill] sm:$0xff] %v21227_v41  ;;  %vm2243_vm4 = vcmp.eq.s32.totalorder %v21231_v52, %v17430_v13  ;;  %v21234_v4 = vsel %vm17524_vm6, 4294967295, %v21233_v4  ;;  %v21242_v41 = vld [vmem:[#allocation78_spill] sm:$0xff] }
 0x5b2   :  { %12902 = vmatprep.subr.msk.bf16.mxu1 %vm17484_vm14, %v20247_v26  ;;  %vm2244_vm14 = vcmp.eq.s32.totalorder %v21232_v25, %v17430_v13  ;;  %21235 = vst [vmem:[#allocation140_spill] sm:$0xff] %v21234_v4  ;;  %v21251_v4 = vld [vmem:[#allocation81_spill] sm:$0xff] }
 0x5b3   :  { %vm17528_vm13 = vmpackc.low %vm2244_vm14, %vm2243_vm4 }
 0x5b4   :  { %v21237_v48 = vsel %vm17528_vm13, 4294967295, %v21236_v48  ;;  %vm17546_vm4 = vmpackc.low %vm2228_vm7, %vm2227_vm8  ;;  %vm2250_vm8 = vcmp.eq.s32.totalorder %v21130_v35, %v17430_v13  ;;  %vm2231_vm7 = vcmp.eq.s32.totalorder %v21259_v42, %v17430_v13 }
 0x5b5   :  { %12904 = vmatpush3.bf16.msk.msra.mxu1 %vm17502_vm10, %v20247_v26  ;;  %21238 = vst [vmem:[#allocation142_spill] sm:$0xff] %v21237_v48  ;;  %vm2245_vm10 = vcmp.eq.s32.totalorder %v21241_v20, %v17430_v13  ;;  %v21244_v59 = vsel %vm17546_vm4, 4294967295, %v21243_v59  ;;  %v21252_v48 = vld [vmem:[#allocation83_spill] sm:$0xff] }
 0x5b6   :  { %12906 = vmatprep.subr.msk.bf16.mxu1 %vm17506_vm9, %v20247_v26  ;;  %vm2246_vm9 = vcmp.eq.s32.totalorder %v21242_v41, %v17430_v13  ;;  %21245 = vst [vmem:[#allocation143_spill] sm:$0xff] %v21244_v59  ;;  %v2282_v59 = vsel %vm2250_vm8, 1.0, %v20560_v2 }
 0x5b7   :  { %vm17550_vm14 = vmpackc.low %vm2246_vm9, %vm2245_vm10  ;;  %v17596_v12 = vpack.c.bf16 %v2282_v59, %v20886_v36  ;;  %v21271_v59 = vmov 0 }
 0x5b8   :  { %v21247_v0 = vsel %vm17550_vm14, 4294967295, %v21246_v0  ;;  %vm17570_vm10 = vmpackc.low %vm2230_vm11, %vm2229_vm0  ;;  %vm2233_vm11 = vcmp.eq.s32.totalorder %v21269_v54, %v17430_v13 }
 0x5b9   :  { %12908 = vmatpush3.bf16.msk.msra.mxu1 %vm17524_vm6, %v20247_v26  ;;  %21248 = vst [vmem:[#allocation144_spill] sm:$0xff] %v21247_v0  ;;  %vm2247_vm6 = vcmp.eq.s32.totalorder %v21251_v4, %v17430_v13  ;;  %v21254_v45 = vsel %vm17570_vm10, 4294967295, %v21253_v45  ;;  %v21261_v0 = vmov 0  ;;  %21264 = vst [vmem:[#allocation150_spill] sm:$0xff] %v17596_v12 }
 0x5ba   :  { %12910 = vmatprep.subr.msk.bf16.mxu1 %vm17528_vm13, %v20247_v26  ;;  %vm2248_vm13 = vcmp.eq.s32.totalorder %v21252_v48, %v17430_v13  ;;  %21255 = vst [vmem:[#allocation146_spill] sm:$0xff] %v21254_v45  ;;  %v21270_v45 = vld [vmem:[#allocation39_spill] sm:$0xff] }
 0x5bb   :  { %vm17574_vm9 = vmpackc.low %vm2248_vm13, %vm2247_vm6  ;;  %vm21265_vm13 = vcmask 1045504   ;;  %vm2234_vm8 = vcmp.eq.s32.totalorder %v21270_v45, %v17430_v13 }
 0x5bc   :  { %v21257_v31 = vsel %vm17574_vm9, 4294967295, %v21256_v31  ;;  %vm17591_vm6 = vmpackc.low %vm2232_vm3, %vm2231_vm7 }
 0x5bd   :  { %12912 = vmatpush3.bf16.msk.msra.mxu1 %vm17546_vm4, %v20247_v26  ;;  %21258 = vst [vmem:[#allocation148_spill] sm:$0xff] %v21257_v31  ;;  %vm2249_vm4 = vcmp.eq.s32.totalorder %v21143_v3, %v17430_v13  ;;  %v21262_v0 = vsel %vm17591_vm6, 4294967295, %v21261_v0  ;;  %vm17613_vm3 = vmpackc.low %vm2234_vm8, %vm2233_vm11 }
 0x5be   :  { %12914 = vmatprep.subr.msk.bf16.mxu1 %vm17550_vm14, %v20247_v26  ;;  %21263 = vst [vmem:[#allocation149_spill] sm:$0xff] %v21262_v0  ;;  %vm17599_vm0 = vmpackc.low %vm21265_vm13, %vm2249_vm4  ;;  %v21272_v59 = vsel %vm17613_vm3, 4294967295, %v21271_v59 }
 0x5bf   :  { %v21267_v53 = vsel %vm17599_vm0, 4294967295, %v21266_v53  ;;  %21273 = vst [vmem:[#allocation154_spill] sm:$0xff] %v21272_v59 }
 0x5c0   :  { %21268 = vst [vmem:[#allocation152_spill] sm:$0xff] %v21267_v53 }
 0x5c1   :  { %12916 = vmatpush3.bf16.msk.msra.mxu1 %vm17570_vm10, %v20247_v26 }
 0x5c2   :  { %12918 = vmatprep.subr.msk.bf16.mxu1 %vm17574_vm9, %v20247_v26  ;;  %vm21278_vm9 = vcmask 1043456  }
 0x5c5   :  { %12920 = vmatpush3.bf16.msk.msra.mxu1 %vm17591_vm6, %v20247_v26 }
 0x5c6   :  { %12923 = vmatprep.subr.msk.bf16.mxu1 %vm17599_vm0, %v17596_v12  ;;  %v17628_v12 = vadd.s32 4, %v21131_v43 }
 0x5c8   :  { %vm2300_vm4 = vcmp.eq.s32.totalorder %v21190_v32, %v17628_v12  ;;  %vm2301_vm7 = vcmp.eq.s32.totalorder %v21191_v50, %v17628_v12  ;;  %vm2284_vm13 = vcmp.eq.s32.totalorder %v21192_v23, %v17628_v12  ;;  %vm2285_vm11 = vcmp.eq.s32.totalorder %v21193_v17, %v17628_v12  ;;  %v17650_v50 = vpop.permute.xlu1 %2875 }
 0x5c9   :  { %12925 = vmatpush3.bf16.msk.msra.mxu1 %vm17613_vm3, %v20247_v26  ;;  %vm2302_vm8 = vcmp.eq.s32.totalorder %v21194_v51, %v17628_v12  ;;  %vm2303_vm3 = vcmp.eq.s32.totalorder %v21195_v19, %v17628_v12  ;;  %vm17642_vm0 = vmpackc.low %vm2301_vm7, %vm2300_vm4  ;;  %v21276_v32 = vmov 0  ;;  %vm2286_vm14 = vcmp.eq.s32.totalorder %v21207_v30, %v17628_v12  ;;  %v21349_v19 = vld [vmem:[#allocation40_spill] sm:$0xff] }
 0x5ca   :  { %11150 = vmatprep.subr.mxu1 %v20560_v2  ;;  %vm17646_vm6 = vmpackc.low %vm2285_vm11, %vm2284_vm13  ;;  %vm2287_vm4 = vcmp.eq.s32.totalorder %v21208_v47, %v17628_v12  ;;  %vm21281_vm7 = vcmask 31744   ;;  %vm21282_vm13 = vcmask 1031168   ;;  %v21285_v51 = vmov 0 }
 0x5cb   :  { %v21277_v32 = vsel %vm17646_vm6, 4294967295, %v21276_v32  ;;  %vm17653_vm10 = vmpackc.low %vm2303_vm3, %vm2302_vm8  ;;  %vm2305_vm3 = vcmp.eq.s32.totalorder %v21211_v60, %v17628_v12  ;;  %v21355_v60 = vld [vmem:[#allocation119_spill] sm:$0xff] }
 0x5cc   :  { %2870 = vmatmul.mubr.f32.vlgmr.msra.gmra.mrb[16].mxu1 %v17319_v39  ;;  %vm17678_vm11 = vmpackc.low %vm2287_vm4, %vm2286_vm14 }
 0x5cd   :  { %11152 = vmatprep.mubr.msk.f32.mxu1 %vm21170_vm12, %v20560_v2 }
 0x67f   :  { %v2797_v13 = vpop.f32.mrb[14].mxu1 }
 0x680   :  { %v17625_v0 = vadd.f32 %v2797_v13, %v17427_v34  ;;  %v11144_v53 = vpop.f32.mrb[15].mxu1  ;;  %v21274_v34 = vmov 0  ;;  %v21279_v13 = vmov 0 }
 0x681   :  { %v21275_v34 = vsel %vm17642_vm0, 4294967295, %v21274_v34  ;;  %v21280_v13 = vsel %vm17653_vm10, 4294967295, %v21279_v13 }
 0x69f   :  { %v10507_v59 = vpop.f32.mrb[16].mxu1 }
 0x6a0   :  { %v10508_v31 = vpop.f32.mrb[17].mxu1 }
 0x6a1   :  { %v10509_v53 = vadd.f32 %v10508_v31, %v10507_v59  ;;  %v21283_v31 = vmov 0  ;;  %v21356_v59 = vld [vmem:[#allocation120_spill] sm:$0xff] }
 0x6a2   :  { %v21284_v31 = vsel %vm17678_vm11, 4294967295, %v21283_v31 }
 0x6a3   :  { %11146 = vmatpush3.msk.msra.mxu0 %vm21278_vm9, %v10509_v53  ;;  %vm2304_vm9 = vcmp.eq.s32.totalorder %v21210_v6, %v17628_v12  ;;  %v21353_v6 = vld [vmem:[#allocation45_spill] sm:$0xff] }
 0x6a4   :  { %11148 = vmatmul.mubr.msk.f32.vlgmr.msra.gmra.mrb[16].mxu0 %vm21281_vm7, %v17650_v50  ;;  %12927 = vmatprep.subr.msk.bf16.mxu0 %vm17642_vm0, %v20247_v26  ;;  %vm17682_vm8 = vmpackc.low %vm2305_vm3, %vm2304_vm9  ;;  %vm2288_vm7 = vcmp.eq.s32.totalorder %v21219_v28, %v17628_v12  ;;  %v21289_v28 = vmov 0  ;;  %vm2290_vm9 = vcmp.eq.s32.totalorder %v21229_v11, %v17628_v12  ;;  %vm2291_vm3 = vcmp.eq.s32.totalorder %v21230_v40, %v17628_v12 }
 0x6a5   :  { %12929 = vmatpush3.bf16.msk.msra.mxu0 %vm17646_vm6, %v20247_v26  ;;  %9794 = vmatprep.mubr.msk.f32.mxu0 %vm21282_vm13, %v17324_v5  ;;  %v21286_v51 = vsel %vm17682_vm8, 4294967295, %v21285_v51  ;;  %vm2289_vm6 = vcmp.eq.s32.totalorder %v21220_v37, %v17628_v12  ;;  %vm2306_vm13 = vcmp.eq.s32.totalorder %v21221_v16, %v17628_v12  ;;  %v21287_v5 = vmov 0 }
 0x6a6   :  { %12931 = vmatprep.subr.msk.bf16.mxu0 %vm17653_vm10, %v20247_v26  ;;  %vm2307_vm10 = vcmp.eq.s32.totalorder %v21222_v22, %v17628_v12  ;;  %vm17700_vm14 = vmpackc.low %vm2289_vm6, %vm2288_vm7  ;;  %v21291_v16 = vmov 0  ;;  %v21293_v37 = vmov 0  ;;  %vm2292_vm7 = vcmp.eq.s32.totalorder %v21239_v63, %v17628_v12  ;;  %v21347_v22 = vld [vmem:[#allocation85_spill] sm:$0xff] }
 0x6a7   :  { %v21288_v5 = vsel %vm17700_vm14, 4294967295, %v21287_v5  ;;  %vm17704_vm4 = vmpackc.low %vm2307_vm10, %vm2306_vm13  ;;  %vm2293_vm13 = vcmp.eq.s32.totalorder %v21240_v1, %v17628_v12  ;;  %vm2297_vm0 = vcmp.eq.s32.totalorder %v21260_v9, %v17628_v12  ;;  %v21335_v9 = vld [vmem:[#allocation65_spill] sm:$0xff] }
 0x6a8   :  { %v21290_v28 = vsel %vm17704_vm4, 4294967295, %v21289_v28  ;;  %vm17722_vm10 = vmpackc.low %vm2291_vm3, %vm2290_vm9  ;;  %vm2294_vm9 = vcmp.eq.s32.totalorder %v21249_v44, %v17628_v12  ;;  %vm2295_vm3 = vcmp.eq.s32.totalorder %v21250_v33, %v17628_v12 }
 0x6a9   :  { %12933 = vmatpush3.bf16.msk.msra.mxu0 %vm17678_vm11, %v20247_v26  ;;  %vm2308_vm11 = vcmp.eq.s32.totalorder %v21231_v52, %v17628_v12  ;;  %v21292_v16 = vsel %vm17722_vm10, 4294967295, %v21291_v16  ;;  %v21295_v52 = vmov 0 }
 0x6aa   :  { %12935 = vmatprep.subr.msk.bf16.mxu0 %vm17682_vm8, %v20247_v26  ;;  %vm2309_vm8 = vcmp.eq.s32.totalorder %v21232_v25, %v17628_v12  ;;  %v21351_v25 = vld [vmem:[#allocation91_spill] sm:$0xff] }
 0x6ab   :  { %vm17726_vm6 = vmpackc.low %vm2309_vm8, %vm2308_vm11 }
 0x6ac   :  { %v21294_v37 = vsel %vm17726_vm6, 4294967295, %v21293_v37  ;;  %vm17744_vm11 = vmpackc.low %vm2293_vm13, %vm2292_vm7  ;;  %vm2315_vm7 = vcmp.eq.s32.totalorder %v21130_v35, %v17628_v12  ;;  %vm2296_vm13 = vcmp.eq.s32.totalorder %v21259_v42, %v17628_v12  ;;  %v21337_v42 = vld [vmem:[#allocation25_spill] sm:$0xff] }
 0x6ad   :  { %12937 = vmatpush3.bf16.msk.msra.mxu0 %vm17700_vm14, %v20247_v26  ;;  %vm2310_vm14 = vcmp.eq.s32.totalorder %v21241_v20, %v17628_v12  ;;  %v21296_v52 = vsel %vm17744_vm11, 4294967295, %v21295_v52  ;;  %v21339_v35 = vld [vmem:[#allocation73_spill] sm:$0xff] }
 0x6ae   :  { %12939 = vmatprep.subr.msk.bf16.mxu0 %vm17704_vm4, %v20247_v26  ;;  %vm2311_vm4 = vcmp.eq.s32.totalorder %v21242_v41, %v17628_v12 }
 0x6af   :  { %vm17748_vm8 = vmpackc.low %vm2311_vm4, %vm2310_vm14 }
 0x6b0   :  { %vm17768_vm14 = vmpackc.low %vm2295_vm3, %vm2294_vm9  ;;  %vm2298_vm3 = vcmp.eq.s32.totalorder %v21269_v54, %v17628_v12 }
 0x6b1   :  { %12941 = vmatpush3.bf16.msk.msra.mxu0 %vm17722_vm10, %v20247_v26  ;;  %vm2312_vm10 = vcmp.eq.s32.totalorder %v21251_v4, %v17628_v12 }
 0x6b2   :  { %12943 = vmatprep.subr.msk.bf16.mxu0 %vm17726_vm6, %v20247_v26  ;;  %vm2313_vm6 = vcmp.eq.s32.totalorder %v21252_v48, %v17628_v12  ;;  %v2347_v48 = vsel %vm2315_vm7, 1.0, %v20560_v2  ;;  %vm2299_vm7 = vcmp.eq.s32.totalorder %v21270_v45, %v17628_v12 }
 0x6b3   :  { %vm17772_vm4 = vmpackc.low %vm2313_vm6, %vm2312_vm10  ;;  %v17794_v63 = vpack.c.bf16 %v2347_v48, %v20886_v36  ;;  %vm21305_vm6 = vcmask 1045504  }
 0x6b4   :  { %vm17789_vm10 = vmpackc.low %vm2297_vm0, %vm2296_vm13  ;;  %vm21311_vm13 = vnez %v20904_v49 }
 0x6b5   :  { %12945 = vmatpush3.bf16.msk.msra.mxu0 %vm17744_vm11, %v20247_v26  ;;  %vm2314_vm11 = vcmp.eq.s32.totalorder %v21143_v3, %v17628_v12  ;;  %vm17811_vm0 = vmpackc.low %vm2299_vm7, %vm2298_vm3  ;;  %vm21314_vm3 = vnez %v20964_v56  ;;  %vm21315_vm7 = vnez %v20916_v27  ;;  %v21333_v12 = vld [vmem:[#allocation15_spill] sm:$0xff]  ;;  %v21341_v3 = vld [vmem:[#allocation30_spill] sm:$0xff] }
 0x6b6   :  { %12947 = vmatprep.subr.msk.bf16.mxu0 %vm17748_vm8, %v20247_v26  ;;  %vm17797_vm9 = vmpackc.low %vm21305_vm6, %vm2314_vm11  ;;  %vm21310_vm11 = vcmask 1031168   ;;  %vm21313_vm6 = vnez %v20910_v15 }
 0x6b9   :  { %12949 = vmatpush3.bf16.msk.msra.mxu0 %vm17768_vm14, %v20247_v26 }
 0x6ba   :  { %12951 = vmatprep.subr.msk.bf16.mxu0 %vm17772_vm4, %v20247_v26 }
 0x6bd   :  { %12953 = vmatpush3.bf16.msk.msra.mxu0 %vm17789_vm10, %v20247_v26 }
 0x6be   :  { %12956 = vmatprep.subr.msk.bf16.mxu0 %vm17797_vm9, %v17794_v63 }
 0x6c1   :  { %12958 = vmatpush3.bf16.msk.msra.mxu0 %vm17811_vm0, %v20247_v26 }
 0x6c2   :  { %12993 = vmatprep.subr.msk.bf16.mxu0 %vm20947_vm5, %v20247_v26  ;;  %vm21312_vm5 = vnez %v20958_v10 }
 0x6c4   :  { %3021 = vmatmul.mubr.f32.vlgmr.msra.gmra.mrb[18].mxu0 %v17319_v39  ;;  %v21328_v39 = vld [vmem:[#allocation12_spill] sm:$0xff] }
 0x6c5   :  { %12995 = vmatpush3.bf16.msk.msra.mxu0 %vm20899_vm1, %v20247_v26  ;;  %9862 = vmatprep.mubr.msk.f32.mxu0 %vm21310_vm11, %v17345_v24  ;;  %vm21317_vm11 = vnez %v20922_v21 }
 0x6c6   :  { %12997 = vmatprep.subr.msk.bf16.mxu0 %vm20953_vm15, %v20247_v26  ;;  %vm21316_vm15 = vnez %v20970_v55 }
 0x6c9   :  { %12999 = vmatpush3.bf16.msk.msra.mxu0 %vm21311_vm13, %v20247_v26  ;;  %vm21340_vm13 = vnez %v21339_v35 }
 0x6ca   :  { %13001 = vmatprep.subr.msk.bf16.mxu0 %vm21312_vm5, %v20247_v26  ;;  %vm21318_vm5 = vnez %v20976_v8 }
 0x6cd   :  { %13003 = vmatpush3.bf16.msk.msra.mxu0 %vm21313_vm6, %v20247_v26  ;;  %vm21319_vm6 = vnez %v20928_v62 }
 0x6ce   :  { %13005 = vmatprep.subr.msk.bf16.mxu0 %vm21314_vm3, %v20247_v26  ;;  %vm21320_vm3 = vnez %v20982_v14  ;;  %v17874_v14 = vpop.permute.xlu1 %3026 }
 0x6d1   :  { %13007 = vmatpush3.bf16.msk.msra.mxu0 %vm21315_vm7, %v20247_v26  ;;  %vm21321_vm7 = vnez %v20934_v38 }
 0x6d2   :  { %13009 = vmatprep.subr.msk.bf16.mxu0 %vm21316_vm15, %v20247_v26  ;;  %vm21322_vm15 = vnez %v21152_v58  ;;  %v21345_v58 = vld [vmem:[#allocation35_spill] sm:$0xff] }
 0x6d5   :  { %13011 = vmatpush3.bf16.msk.msra.mxu0 %vm21317_vm11, %v20247_v26  ;;  %vm21323_vm11 = vnez %v20940_v18  ;;  %v21326_v18 = vld [vmem:[#allocation55_spill] sm:$0xff] }
 0x6d6   :  { %13013 = vmatprep.subr.msk.bf16.mxu0 %vm21318_vm5, %v20247_v26  ;;  %vm21324_vm5 = vcmask 1043456  }
 0x6d9   :  { %13015 = vmatpush3.bf16.msk.msra.mxu0 %vm21319_vm6, %v20247_v26 }
 0x6da   :  { %13017 = vmatprep.subr.msk.bf16.mxu0 %vm21320_vm3, %v20247_v26  ;;  %vm21327_vm3 = vnez %v21326_v18 }
 0x6dd   :  { %13019 = vmatpush3.bf16.msk.msra.mxu0 %vm21321_vm7, %v20247_v26  ;;  %vm21330_vm7 = vcmask 1031168  }
 0x6de   :  { %13022 = vmatprep.subr.msk.bf16.mxu0 %vm21322_vm15, %v17286_v46  ;;  %vm21329_vm15 = vnez %v21328_v39  ;;  %v21343_v46 = vld [vmem:[#allocation79_spill] sm:$0xff] }
 0x6e1   :  { %13024 = vmatpush3.bf16.msk.msra.mxu0 %vm21323_vm11, %v20247_v26  ;;  %vm21325_vm11 = vcmask 31744  }
 0x6e2   :  { %11165 = vmatprep.subr.mxu0 %v20560_v2 }
 0x6e4   :  { %3248 = vmatmul.mubr.f32.vlgmr.msra.gmra.mrb[20].mxu0 %v17343_v7 }
 0x6e5   :  { %11167 = vmatprep.mubr.msk.f32.mxu0 %vm21170_vm12, %v20560_v2 }
 0x777   :  { %v2948_v61 = vpop.f32.mrb[16].mxu0 }
 0x778   :  { %v2952_v57 = vadd.f32 %v2948_v61, %v17625_v0  ;;  %v11149_v10 = vpop.f32.mrb[17].mxu0  ;;  %v21331_v0 = vld [vmem:[#allocation59_spill] sm:$0xff] }
 0x779   :  { %vm21332_vm6 = vnez %v21331_v0  ;;  %v21358_v10 = vld [vmem:[#allocation51_spill] sm:$0xff]  ;;  %v17939_v0 = vpop.permute.xlu1 %3106 }
 0x797   :  { %v10544_v56 = vpop.f32.mrb[18].mxu0 }
 0x798   :  { %v10545_v55 = vpop.f32.mrb[19].mxu0 }
 0x799   :  { %v10546_v8 = vadd.f32 %v10545_v55, %v10544_v56  ;;  %v21361_v56 = vld [vmem:[#allocation124_spill] sm:$0xff] }
 0x79b   :  { %11151 = vmatpush3.msk.msra.mxu1 %vm21324_vm5, %v10546_v8  ;;  %vm21334_vm5 = vnez %v21333_v12 }
 0x79c   :  { %11153 = vmatmul.mubr.msk.f32.vlgmr.msra.gmra.mrb[18].mxu1 %vm21325_vm11, %v17874_v14  ;;  %12960 = vmatprep.subr.msk.bf16.mxu1 %vm21327_vm3, %v20247_v26  ;;  %vm21336_vm11 = vnez %v21335_v9  ;;  %vm21338_vm3 = vnez %v21337_v42 }
 0x79d   :  { %12962 = vmatpush3.bf16.msk.msra.mxu1 %vm21329_vm15, %v20247_v26  ;;  %9829 = vmatprep.mubr.msk.f32.mxu1 %vm21330_vm7, %v17345_v24  ;;  %vm21342_vm7 = vnez %v21341_v3 }
 0x79e   :  { %12964 = vmatprep.subr.msk.bf16.mxu1 %vm21332_vm6, %v20247_v26  ;;  %vm21344_vm6 = vnez %v21343_v46 }
 0x7a1   :  { %12966 = vmatpush3.bf16.msk.msra.mxu1 %vm21334_vm5, %v20247_v26  ;;  %vm21346_vm5 = vnez %v21345_v58 }
 0x7a2   :  { %12968 = vmatprep.subr.msk.bf16.mxu1 %vm21336_vm11, %v20247_v26  ;;  %vm21348_vm11 = vnez %v21347_v22 }
 0x7a5   :  { %12970 = vmatpush3.bf16.msk.msra.mxu1 %vm21338_vm3, %v20247_v26  ;;  %vm21350_vm3 = vnez %v21349_v19 }
 0x7a6   :  { %12972 = vmatprep.subr.msk.bf16.mxu1 %vm21340_vm13, %v20247_v26  ;;  %vm21352_vm13 = vnez %v21351_v25 }
 0x7a9   :  { %12974 = vmatpush3.bf16.msk.msra.mxu1 %vm21342_vm7, %v20247_v26  ;;  %vm21354_vm7 = vnez %v21353_v6 }
 0x7aa   :  { %12976 = vmatprep.subr.msk.bf16.mxu1 %vm21344_vm6, %v20247_v26  ;;  %vm21357_vm6 = vnez %v21356_v59 }
 0x7ad   :  { %12978 = vmatpush3.bf16.msk.msra.mxu1 %vm21346_vm5, %v20247_v26 }
 0x7ae   :  { %12980 = vmatprep.subr.msk.bf16.mxu1 %vm21348_vm11, %v20247_v26  ;;  %vm21359_vm11 = vnez %v21358_v10  ;;  %v21371_v10 = vld [vmem:[#allocation190_spill] sm:$0xff] }
 0x7b1   :  { %12982 = vmatpush3.bf16.msk.msra.mxu1 %vm21350_vm3, %v20247_v26 }
 0x7b2   :  { %12984 = vmatprep.subr.msk.bf16.mxu1 %vm21352_vm13, %v20247_v26  ;;  %vm21360_vm13 = vcmask 1043456  }
 0x7b5   :  { %12986 = vmatpush3.bf16.msk.msra.mxu1 %vm21354_vm7, %v20247_v26 }
 0x7b6   :  { %12989 = vmatprep.subr.msk.bf16.mxu1 %vm21357_vm6, %v21355_v60  ;;  %vm21362_vm6 = vcmask 31744  }
 0x7b7   :  { %v10616_v53 = vpop.f32.mrb[20].mxu0 }
 0x7b8   :  { %v10617_v48 = vpop.f32.mrb[21].mxu0 }
 0x7b9   :  { %v10618_v61 = vadd.f32 %v10617_v48, %v10616_v53  ;;  %12991 = vmatpush3.bf16.msk.msra.mxu1 %vm21359_vm11, %v20247_v26  ;;  %vm20083_vm11 = vcmask 1022976   ;;  %v21363_v53 = vld [vmem:[#allocation122_spill] sm:$0xff]  ;;  %v21366_v48 = vld [vmem:[#allocation189_spill] sm:$0xff] }
 0x7ba   :  { %11155 = vmatprep.subr.mxu1 %v20560_v2  ;;  %vm21367_vm3 = vnez %v21366_v48 }
 0x7bc   :  { %3178 = vmatmul.mubr.f32.vlgmr.msra.gmra.mrb[20].mxu1 %v17343_v7 }
 0x7bd   :  { %11156 = vmatpush3.msk.msra.mxu1 %vm21360_vm13, %v10618_v61  ;;  %11157 = vmatprep.mubr.msk.f32.mxu1 %vm21170_vm12, %v20560_v2  ;;  %v21369_v61 = vld [vmem:[#allocation53_spill] sm:$0xff] }
 0x7be   :  { %11160 = vmatprep.subr.mxu1 %v20560_v2  ;;  %vm21370_vm5 = vnez %v21369_v61  ;;  %v21394_v61 = vld [vmem:[#allocation126_spill] sm:$0xff] }
 0x7c0   :  { %11158 = vmatmul.mubr.msk.f32.vlgmr.msra.gmra.mrb[22].mxu1 %vm21362_vm6, %v21361_v56  ;;  %v21373_v56 = vld [vmem:[#allocation57_spill] sm:$0xff] }
 0x7c1   :  { %11162 = vmatprep.mubr.msk.f32.mxu1 %vm21170_vm12, %v20560_v2 }
 0x86f   :  { %v3099_v55 = vpop.f32.mrb[18].mxu1 }
 0x870   :  { %v3103_v8 = vadd.f32 %v3099_v55, %v2952_v57  ;;  %v11154_v18 = vpop.f32.mrb[19].mxu1  ;;  %v21364_v57 = vld [vmem:[#allocation47_spill] sm:$0xff] }
 0x871   :  { %vm21365_vm7 = vnez %v21364_v57  ;;  %v21375_v55 = vld [vmem:[#allocation191_spill] sm:$0xff]  ;;  %v21379_v18 = vld [vmem:[#allocation192_spill] sm:$0xff]  ;;  %v21393_v57 = vld [vmem:[#allocation125_spill] sm:$0xff] }
 0x872   :  { %v17942_v9 = vadd.f32 %v17939_v0, %v3103_v8  ;;  %v21377_v8 = vld [vmem:[#allocation63_spill] sm:$0xff] }
 0x874   :  { %v3835_v35 = vsel %vm20083_vm11, %v17942_v9, 0.0  ;;  %vm21368_vm11 = vcmask 1031168  }
 0x875   :  { %3836 = vadd.xlane.f32.xlu1 %v3835_v35  ;;  %v21381_v35 = vld [vmem:[#allocation69_spill] sm:$0xff] }
 0x88f   :  { %v10581_v46 = vpop.f32.mrb[20].mxu1 }
 0x890   :  { %v10582_v22 = vpop.f32.mrb[21].mxu1 }
 0x891   :  { %v10583_v25 = vadd.f32 %v10582_v22, %v10581_v46  ;;  %v21383_v46 = vld [vmem:[#allocation193_spill] sm:$0xff]  ;;  %v21385_v22 = vld [vmem:[#allocation76_spill] sm:$0xff] }
 0x893   :  { %v3322_v60 = vpop.f32.mrb[22].mxu1  ;;  %11161 = vmatpush3.msk.msra.mxu1 %vm21360_vm13, %v10583_v25  ;;  %vm21372_vm13 = vnez %v21371_v10  ;;  %v21387_v25 = vld [vmem:[#allocation194_spill] sm:$0xff] }
 0x894   :  { %v11159_v59 = vpop.f32.mrb[23].mxu1  ;;  %11163 = vmatmul.mubr.msk.f32.vlgmr.msra.gmra.mrb[24].mxu1 %vm21362_vm6, %v21363_v53  ;;  %13026 = vmatprep.subr.msk.bf16.mxu1 %vm21365_vm7, %v20247_v26  ;;  %vm21374_vm6 = vnez %v21373_v56  ;;  %vm21376_vm7 = vnez %v21375_v55  ;;  %v21391_v53 = vld [vmem:[#allocation195_spill] sm:$0xff]  ;;  %v21396_v56 = vld [vmem:[#allocation196_spill] sm:$0xff] }
 0x895   :  { %13028 = vmatpush3.bf16.msk.msra.mxu1 %vm21367_vm3, %v20247_v26  ;;  %9899 = vmatprep.mubr.msk.f32.mxu1 %vm21368_vm11, %v17345_v24  ;;  %vm21378_vm3 = vnez %v21377_v8  ;;  %vm21380_vm11 = vnez %v21379_v18  ;;  %v21389_v59 = vld [vmem:[#allocation82_spill] sm:$0xff] }
 0x896   :  { %13030 = vmatprep.subr.msk.bf16.mxu1 %vm21370_vm5, %v20247_v26  ;;  %vm21382_vm5 = vnez %v21381_v35 }
 0x899   :  { %13032 = vmatpush3.bf16.msk.msra.mxu1 %vm21372_vm13, %v20247_v26  ;;  %vm21384_vm13 = vnez %v21383_v46 }
 0x89a   :  { %13034 = vmatprep.subr.msk.bf16.mxu1 %vm21374_vm6, %v20247_v26  ;;  %vm21386_vm6 = vnez %v21385_v22 }
 0x89d   :  { %13036 = vmatpush3.bf16.msk.msra.mxu1 %vm21376_vm7, %v20247_v26  ;;  %vm21388_vm7 = vnez %v21387_v25 }
 0x89e   :  { %13038 = vmatprep.subr.msk.bf16.mxu1 %vm21378_vm3, %v20247_v26  ;;  %vm21390_vm3 = vnez %v21389_v59 }
 0x8a1   :  { %13040 = vmatpush3.bf16.msk.msra.mxu1 %vm21380_vm11, %v20247_v26  ;;  %vm21392_vm11 = vnez %v21391_v53 }
 0x8a2   :  { %13042 = vmatprep.subr.msk.bf16.mxu1 %vm21382_vm5, %v20247_v26  ;;  %vm21395_vm5 = vnez %v21394_v61  ;;  %v21419_v61 = vld [vmem:[#allocation143_spill] sm:$0xff] }
 0x8a5   :  { %13044 = vmatpush3.bf16.msk.msra.mxu1 %vm21384_vm13, %v20247_v26  ;;  %vm21397_vm13 = vnez %v21396_v56  ;;  %v21402_v56 = vld [vmem:[#allocation131_spill] sm:$0xff] }
 0x8a6   :  { %13046 = vmatprep.subr.msk.bf16.mxu1 %vm21386_vm6, %v20247_v26  ;;  %vm21398_vm6 = vcmask 1043456  }
 0x8a9   :  { %13048 = vmatpush3.bf16.msk.msra.mxu1 %vm21388_vm7, %v20247_v26 }
 0x8aa   :  { %13050 = vmatprep.subr.msk.bf16.mxu1 %vm21390_vm3, %v20247_v26  ;;  %vm21400_vm3 = vcmask 31744  }
 0x8ad   :  { %13052 = vmatpush3.bf16.msk.msra.mxu1 %vm21392_vm11, %v20247_v26 }
 0x8ae   :  { %13055 = vmatprep.subr.msk.bf16.mxu1 %vm21395_vm5, %v21393_v57  ;;  %v21399_v57 = vld [vmem:[#allocation128_spill] sm:$0xff]  ;;  %vm21404_vm5 = vcmask 1031168  }
 0x8b1   :  { %13057 = vmatpush3.bf16.msk.msra.mxu1 %vm21397_vm13, %v20247_v26  ;;  %vm21403_vm13 = vnez %v21402_v56  ;;  %v21421_v56 = vld [vmem:[#allocation144_spill] sm:$0xff] }
 0x8b2   :  { %11170 = vmatprep.subr.mxu1 %v20560_v2 }
 0x8b4   :  { %3464 = vmatmul.mubr.f32.vlgmr.msra.gmra.mrb[26].mxu1 %v17343_v7 }
 0x8b5   :  { %11172 = vmatprep.mubr.msk.f32.mxu1 %vm21170_vm12, %v20560_v2 }
 0x967   :  { %v3395_v8 = vpop.f32.mrb[24].mxu1 }
 0x968   :  { %v3396_v35 = vadd.f32 %v3395_v8, %v3322_v60  ;;  %v11164_v22 = vpop.f32.mrb[25].mxu1  ;;  %v21405_v60 = vld [vmem:[#allocation132_spill] sm:$0xff]  ;;  %v21411_v8 = vld [vmem:[#allocation137_spill] sm:$0xff] }
 0x969   :  { %vm21406_vm11 = vnez %v21405_v60  ;;  %v21413_v22 = vld [vmem:[#allocation138_spill] sm:$0xff] }
 0x96a   :  { %v21423_v60 = vld [vmem:[#allocation146_spill] sm:$0xff] }
 0x987   :  { %v10655_v59 = vpop.f32.mrb[26].mxu1 }
 0x988   :  { %v10656_v30 = vpop.f32.mrb[27].mxu1 }
 0x989   :  { %v10657_v47 = vadd.f32 %v10656_v30, %v10655_v59  ;;  %v21407_v30 = vld [vmem:[#allocation134_spill] sm:$0xff]  ;;  %v21415_v59 = vld [vmem:[#allocation140_spill] sm:$0xff] }
 0x98b   :  { %11166 = vmatpush3.msk.msra.mxu0 %vm21398_vm6, %v10657_v47  ;;  %vm21408_vm6 = vnez %v21407_v30  ;;  %v21409_v47 = vld [vmem:[#allocation136_spill] sm:$0xff] }
 0x98c   :  { %11168 = vmatmul.mubr.msk.f32.vlgmr.msra.gmra.mrb[22].mxu0 %vm21400_vm3, %v21399_v57  ;;  %13059 = vmatprep.subr.msk.bf16.mxu0 %vm17446_vm2, %v20247_v26  ;;  %vm21410_vm3 = vnez %v21409_v47  ;;  %vm21412_vm2 = vnez %v21411_v8  ;;  %v21417_v57 = vld [vmem:[#allocation142_spill] sm:$0xff]  ;;  %v21425_v30 = vld [vmem:[#allocation148_spill] sm:$0xff]  ;;  %v21427_v47 = vld [vmem:[#allocation149_spill] sm:$0xff] }
 0x98d   :  { %13061 = vmatpush3.bf16.msk.msra.mxu0 %vm21403_vm13, %v20247_v26  ;;  %9934 = vmatprep.mubr.msk.f32.mxu0 %vm21404_vm5, %v17345_v24  ;;  %vm21414_vm13 = vnez %v21413_v22  ;;  %vm21416_vm5 = vnez %v21415_v59  ;;  %v21429_v8 = vld [vmem:[#allocation150_spill] sm:$0xff]  ;;  %v21430_v22 = vld [vmem:[#allocation152_spill] sm:$0xff] }
 0x98e   :  { %13063 = vmatprep.subr.msk.bf16.mxu0 %vm21406_vm11, %v20247_v26  ;;  %vm21418_vm11 = vnez %v21417_v57  ;;  %v21432_v59 = vld [vmem:[#allocation154_spill] sm:$0xff] }
 0x991   :  { %13065 = vmatpush3.bf16.msk.msra.mxu0 %vm21408_vm6, %v20247_v26  ;;  %vm21420_vm6 = vnez %v21419_v61 }
 0x992   :  { %13067 = vmatprep.subr.msk.bf16.mxu0 %vm21410_vm3, %v20247_v26  ;;  %vm21422_vm3 = vnez %v21421_v56 }
 0x995   :  { %13069 = vmatpush3.bf16.msk.msra.mxu0 %vm21412_vm2, %v20247_v26  ;;  %vm21424_vm2 = vnez %v21423_v60 }
 0x996   :  { %13071 = vmatprep.subr.msk.bf16.mxu0 %vm21414_vm13, %v20247_v26  ;;  %vm21426_vm13 = vnez %v21425_v30 }
 0x999   :  { %13073 = vmatpush3.bf16.msk.msra.mxu0 %vm21416_vm5, %v20247_v26  ;;  %vm21428_vm5 = vnez %v21427_v47 }
 0x99a   :  { %13075 = vmatprep.subr.msk.bf16.mxu0 %vm21418_vm11, %v20247_v26  ;;  %vm21431_vm11 = vnez %v21430_v22  ;;  %v4313_v22 = vld [vmem:[%s19444_s10] sm:$0xff] }
 0x99d   :  { %13077 = vmatpush3.bf16.msk.msra.mxu0 %vm21420_vm6, %v20247_v26  ;;  %vm21433_vm6 = vnez %v21432_v59  ;;  %v5195_v59 = vld [vmem:[%s19446_s12] sm:$0xff] }
 0x99e   :  { %13079 = vmatprep.subr.msk.bf16.mxu0 %vm21422_vm3, %v20247_v26  ;;  %vm21434_vm3 = vcmask 1043456  }
 0x9a1   :  { %13081 = vmatpush3.bf16.msk.msra.mxu0 %vm21424_vm2, %v20247_v26  ;;  %vm21435_vm2 = vcmask 31744  }
 0x9a2   :  { %13083 = vmatprep.subr.msk.bf16.mxu0 %vm21426_vm13, %v20247_v26  ;;  %vm21436_vm13 = vnez %v21275_v34 }
 0x9a5   :  { %13085 = vmatpush3.bf16.msk.msra.mxu0 %vm21428_vm5, %v20247_v26  ;;  %vm21437_vm5 = vnez %v21277_v32 }
 0x9a6   :  { %13088 = vmatprep.subr.msk.bf16.mxu0 %vm21431_vm11, %v21429_v8  ;;  %vm21438_vm11 = vcmask 1031168   ;;  %v3833_v8 = vld [vmem:[%s19442_s8] sm:$0xff] }
 0x9a9   :  { %13090 = vmatpush3.bf16.msk.msra.mxu0 %vm21433_vm6, %v20247_v26  ;;  %vm21439_vm6 = vnez %v21280_v13 }
 0x9aa   :  { %11175 = vmatprep.subr.mxu0 %v20560_v2 }
 0x9ac   :  { %3608 = vmatmul.mubr.f32.vlgmr.msra.gmra.mrb[24].mxu0 %v17343_v7 }
 0x9ad   :  { %11177 = vmatprep.mubr.msk.f32.mxu0 %vm21170_vm12, %v20560_v2 }
 0xa5f   :  { %v3538_v57 = vpop.f32.mrb[22].mxu0 }
 0xa60   :  { %v3542_v61 = vadd.f32 %v3538_v57, %v3396_v35  ;;  %v11169_v56 = vpop.f32.mrb[23].mxu0  ;;  %v3832_v35 = vld [vmem:[%s19441_s7] sm:$0xff]  ;;  %v5196_v57 = vld [vmem:[%s19446_s12 + $0x8] sm:$0xff] }
 0xa61   :  { %v21465_v56 = vld [vmem:[#allocation11_spill] sm:$0xff] }
 0xa7f   :  { %v10692_v60 = vpop.f32.mrb[24].mxu0 }
 0xa80   :  { %v10693_v30 = vpop.f32.mrb[25].mxu0 }
 0xa81   :  { %v10694_v47 = vadd.f32 %v10693_v30, %v10692_v60  ;;  %v5369_v30 = vld [vmem:[%s19448_s14] sm:$0xff] }
 0xa83   :  { %11171 = vmatpush3.msk.msra.mxu1 %vm21434_vm3, %v10694_v47  ;;  %vm21440_vm3 = vnez %v21284_v31  ;;  %v5370_v47 = vld [vmem:[%s19448_s14 + $0x8] sm:$0xff]  ;;  %s13796_s14 = smov [#allocation2]  }
 0xa84   :  { %11173 = vmatmul.mubr.msk.f32.vlgmr.msra.gmra.mrb[28].mxu1 %vm21435_vm2, %v17650_v50  ;;  %13092 = vmatprep.subr.msk.bf16.mxu1 %vm21436_vm13, %v20247_v26  ;;  %vm21441_vm2 = vnez %v21286_v51  ;;  %vm21442_vm13 = vnez %v21288_v5 }
 0xa85   :  { %13094 = vmatpush3.bf16.msk.msra.mxu1 %vm21437_vm5, %v20247_v26  ;;  %9969 = vmatprep.mubr.msk.f32.mxu1 %vm21438_vm11, %v17345_v24  ;;  %vm21443_vm5 = vnez %v21290_v28  ;;  %vm21444_vm11 = vnez %v21292_v16 }
 0xa86   :  { %13096 = vmatprep.subr.msk.bf16.mxu1 %vm21439_vm6, %v20247_v26  ;;  %vm21445_vm6 = vnez %v21294_v37  ;;  %v13794_v37 = vmov 0.0|0.0  }
 0xa89   :  { %13098 = vmatpush3.bf16.msk.msra.mxu1 %vm21440_vm3, %v20247_v26  ;;  %vm21446_vm3 = vnez %v21296_v52  ;;  %v3837_v52 = vpop.xlane.xlu1 %3836 }
 0xa8a   :  { %13100 = vmatprep.subr.msk.bf16.mxu1 %vm21441_vm2, %v20247_v26  ;;  %vm21453_vm2 = vnez %v20910_v15 }
 0xa8d   :  { %13102 = vmatpush3.bf16.msk.msra.mxu1 %vm21442_vm13, %v20247_v26  ;;  %vm21454_vm13 = vnez %v21341_v3  ;;  %v21482_v3 = vld [vmem:[#allocation186_spill] sm:$0xff] }
 0xa8e   :  { %13104 = vmatprep.subr.msk.bf16.mxu1 %vm21443_vm5, %v20247_v26  ;;  %vm21455_vm5 = vnez %v20916_v27 }
 0xa91   :  { %13106 = vmatpush3.bf16.msk.msra.mxu1 %vm21444_vm11, %v20247_v26  ;;  %vm21456_vm11 = vnez %v21345_v58 }
 0xa92   :  { %13108 = vmatprep.subr.msk.bf16.mxu1 %vm21445_vm6, %v20247_v26  ;;  %vm21457_vm6 = vnez %v20922_v21 }
 0xa95   :  { %13110 = vmatpush3.bf16.msk.msra.mxu1 %vm21446_vm3, %v20247_v26  ;;  %vm21458_vm3 = vnez %v21349_v19 }
 0xa96   :  { %13112 = vmatprep.subr.msk.bf16.mxu1 %vm17748_vm8, %v20247_v26  ;;  %vm21447_vm8 = vcmask 1043456  }
 0xa99   :  { %13114 = vmatpush3.bf16.msk.msra.mxu1 %vm17768_vm14, %v20247_v26  ;;  %vm21448_vm14 = vcmask 31744  }
 0xa9a   :  { %13116 = vmatprep.subr.msk.bf16.mxu1 %vm17772_vm4, %v20247_v26  ;;  %vm21449_vm4 = vcmask 1022976  }
 0xa9d   :  { %13118 = vmatpush3.bf16.msk.msra.mxu1 %vm17789_vm10, %v20247_v26  ;;  %vm21450_vm10 = vnez %v21333_v12 }
 0xa9e   :  { %13121 = vmatprep.subr.msk.bf16.mxu1 %vm17797_vm9, %v17794_v63  ;;  %vm21451_vm9 = vnez %v20904_v49 }
 0xaa1   :  { %13123 = vmatpush3.bf16.msk.msra.mxu1 %vm17811_vm0, %v20247_v26  ;;  %vm21452_vm0 = vnez %v21337_v42 }
 0xaa2   :  { %13149 = vmatprep.subr.bf16.mxu1 %v13794_v37 }
 0xaa4   :  { %3752 = vmatmul.mubr.f32.vlgmr.msra.gmra.mrb[30].mxu1 %v17343_v7 }
 0xaa5   :  { %11247 = vmatprep.mubr.msk.f32.mxu1 %vm21170_vm12, %v20560_v2  ;;  %13151 = vmatpush3.bf16.msk.msra.mxu1 %vm20899_vm1, %v20247_v26 }
 0xaa6   :  { %13152 = vmatprep.subr.bf16.mxu1 %v13794_v37 }
 0xaa9   :  { %13154 = vmatpush3.bf16.msk.msra.mxu1 %vm21451_vm9, %v20247_v26 }
 0xaaa   :  { %13155 = vmatprep.subr.bf16.mxu1 %v13794_v37 }
 0xaad   :  { %13157 = vmatpush3.bf16.msk.msra.mxu1 %vm21453_vm2, %v20247_v26 }
 0xaae   :  { %13158 = vmatprep.subr.bf16.mxu1 %v13794_v37 }
 0xab1   :  { %13160 = vmatpush3.bf16.msk.msra.mxu1 %vm21455_vm5, %v20247_v26  ;;  %vm21471_vm5 = vcmp.eq.s32.totalorder %v21269_v54, %v21465_v56 }
 0xab2   :  { %13161 = vmatprep.subr.bf16.mxu1 %v13794_v37 }
 0xab5   :  { %13163 = vmatpush3.bf16.msk.msra.mxu1 %vm21457_vm6, %v20247_v26 }
 0xab6   :  { %13164 = vmatprep.subr.bf16.mxu1 %v13794_v37 }
 0xb57   :  { %v3682_v24 = vpop.f32.mrb[28].mxu1 }
 0xb58   :  { %v3686_v34 = vadd.f32 %v3682_v24, %v3542_v61  ;;  %v11174_v32 = vpop.f32.mrb[29].mxu1 }
 0xb77   :  { %v10729_v50 = vpop.f32.mrb[30].mxu1 }
 0xb78   :  { %v10730_v13 = vpop.f32.mrb[31].mxu1 }
 0xb79   :  { %v10731_v31 = vadd.f32 %v10730_v13, %v10729_v50 }
 0xb7b   :  { %11176 = vmatpush3.msk.msra.mxu0 %vm21447_vm8, %v10731_v31  ;;  %vm21459_vm8 = vnez %v20928_v62 }
 0xb7c   :  { %11178 = vmatmul.mubr.msk.f32.vlgmr.msra.gmra.mrb[26].mxu0 %vm21448_vm14, %v17874_v14  ;;  %13124 = vmatprep.subr.bf16.mxu0 %v13794_v37  ;;  %vm21460_vm14 = vnez %v21353_v6 }
 0xb7d   :  { %11212 = vmatprep.mubr.msk.f32.mxu0 %vm21170_vm12, %v20560_v2  ;;  %13126 = vmatpush3.bf16.msk.msra.mxu0 %vm21329_vm15, %v20247_v26 }
 0xb7e   :  { %13127 = vmatprep.subr.bf16.mxu0 %v13794_v37  ;;  %13166 = vmatpush3.bf16.msk.msra.mxu1 %vm21459_vm8, %v20247_v26  ;;  %vm21462_vm8 = vcmask 1022976  }
 0xb7f   :  { %13167 = vmatprep.subr.bf16.mxu1 %v13794_v37  ;;  %vm21463_vm6 = vmmov %vm21462_vm8 }
 0xb81   :  { %13129 = vmatpush3.bf16.msk.msra.mxu0 %vm21450_vm10, %v20247_v26 }
 0xb82   :  { %13130 = vmatprep.subr.bf16.mxu0 %v13794_v37 }
 0xb85   :  { %13132 = vmatpush3.bf16.msk.msra.mxu0 %vm21452_vm0, %v20247_v26 }
 0xb86   :  { %13133 = vmatprep.subr.bf16.mxu0 %v13794_v37 }
 0xb89   :  { %13135 = vmatpush3.bf16.msk.msra.mxu0 %vm21454_vm13, %v20247_v26 }
 0xb8a   :  { %13136 = vmatprep.subr.bf16.mxu0 %v13794_v37 }
 0xb8d   :  { %13138 = vmatpush3.bf16.msk.msra.mxu0 %vm21456_vm11, %v20247_v26 }
 0xb8e   :  { %13139 = vmatprep.subr.bf16.mxu0 %v13794_v37 }
 0xb91   :  { %13141 = vmatpush3.bf16.msk.msra.mxu0 %vm21458_vm3, %v20247_v26 }
 0xb92   :  { %13142 = vmatprep.subr.bf16.mxu0 %v13794_v37 }
 0xb95   :  { %13144 = vmatpush3.bf16.msk.msra.mxu0 %vm21460_vm14, %v20247_v26 }
 0xb96   :  { %13145 = vmatprep.subr.bf16.mxu0 %v13794_v37 }
 0xc4f   :  { %v3826_v51 = vpop.f32.mrb[26].mxu0 }
 0xc50   :  { %v3830_v5 = vadd.f32 %v3826_v51, %v3686_v34  ;;  %v11179_v7 = vpop.f32.mrb[27].mxu0 }
 0xc52   :  { %v3831_v28 = vadd.f32 %v3830_v5, %v17939_v0 }
 0xc54   :  { %v3838_v16 = vsel %vm21449_vm4, %v3831_v28, 0.0  ;;  %vm21461_vm4 = vnez %v20934_v38 }
 0xc55   :  { %3839 = vadd.xlane.f32.xlu0 %v3838_v16  ;;  %13169 = vmatpush3.bf16.msk.msra.mxu1 %vm21461_vm4, %v20247_v26 }
 0xc56   :  { %13170 = vmatprep.subr.bf16.mxu1 %v13794_v37 }
 0xce2   :  { %v3840_v1 = vpop.xlane.xlu0 %3839 }
 0xce3   :  { %v3841_v41 = vadd.f32 %v3840_v1, %v3837_v52 }
 0xce5   :  { %v3842_v33 = vmul.f32 0.004, %v3841_v41 }
 0xce7   :  { %v3843_v44 = vsub.f32 %v17942_v9, %v3842_v33  ;;  %v18182_v63 = vsub.f32 %v3831_v28, %v3842_v33  ;;  %v18194_v9 = vld [vmem:[%s19443_s9] sm:$0xff] }
 0xce9   :  { %v3849_v4 = vmul.f32 %v18182_v63, %v18182_v63  ;;  %v3844_v20 = vmul.f32 %v3843_v44, %v3843_v44 }
 0xceb   :  { %v3850_v14 = vsel %vm21462_vm8, %v3849_v4, 0.0  ;;  %v3845_v0 = vsel %vm21463_vm6, %v3844_v20, 0.0  ;;  %vm21464_vm6 = vcmp.eq.s32.totalorder %v21270_v45, %v21131_v43  ;;  %vm21466_vm8 = vcmp.eq.s32.totalorder %v21270_v45, %v21465_v56 }
 0xcec   :  { %3851 = vadd.xlane.f32.xlu0 %v3850_v14  ;;  %3846 = vadd.xlane.f32.xlu1 %v3845_v0  ;;  %v716_v61 = vsel %vm21464_vm6, 1.0, %v20560_v2  ;;  %v974_v60 = vsel %vm21466_vm8, 1.0, %v20560_v2  ;;  %vm21467_vm6 = vcmp.eq.s32.totalorder %v21269_v54, %v21131_v43  ;;  %vm21468_vm8 = vcmask 1044480  }
 0xced   :  { %v13146_v24 = vpack.c.bf16 %v716_v61, %v20886_v36  ;;  %v18228_v34 = vpack.c.bf16 %v974_v60, %v20886_v36  ;;  %vm18234_vm4 = vmpackc.low %vm21468_vm8, %vm21467_vm6  ;;  %vm21477_vm6 = vnez %v21366_v48 }
 0xcee   :  { %vm21472_vm2 = vmmov %vm21468_vm8  ;;  %vm21478_vm8 = vnez %v21371_v10 }
 0xcef   :  { %13148 = vmatpush3.bf16.msk.msra.mxu0 %vm18234_vm4, %v13146_v24  ;;  %vm18244_vm9 = vmpackc.low %vm21472_vm2, %vm21471_vm5  ;;  %vm21475_vm2 = vcmask 1022976  }
 0xcf0   :  { %13173 = vmatpush3.bf16.msk.msra.mxu1 %vm18244_vm9, %v18228_v34  ;;  %13174 = vmatprep.subr.bf16.mxu0 %v13794_v37  ;;  %vm21476_vm5 = vmmov %vm21475_vm2 }
 0xcf1   :  { %13199 = vmatprep.subr.bf16.mxu1 %v13794_v37 }
 0xcfd   :  { %3860 = vperm.xlu1 %13755, %v3832_v35  }
 0xd01   :  { %4465 = vrot.lane.b32.xlu1 %v18194_v9, %s13793_s2 }
 0xd02   :  { %3866 = vperm.xlu0 %13754, %v3833_v8  }
 0xd05   :  { %4685 = vrot.lane.b32.xlu1 %v18194_v9, %s13790_s30  ;;  %s8824_s30 = sshll.u32 %s13796_s14, 4  ;;  %s8825_s30 = int_to_ptr.vmem [resolvable:$true] %s8824_s30 }
 0xd06   :  { %4762 = vperm.xlu0 %13754, %v4313_v22   ;;  %p13766_p1 = scmp.lt.s32.totalorder %s8825_s30, %s8825_s30 }
 0xd09   :  { %5199 = vperm.xlu1 %13755, %v5195_v59  }
 0xd0a   :  { %5204 = vperm.xlu0 %13754, %v5196_v57  }
 0xd0d   :  { %5373 = vperm.xlu1 %13755, %v5369_v30  }
 0xd0e   :  { %5378 = vperm.xlu0 %13754, %v5370_v47  }
 0xd79   :  { %v3852_v13 = vpop.xlane.xlu0 %3851  ;;  %v3847_v31 = vpop.xlane.xlu1 %3846 }
 0xd7a   :  { %v3853_v51 = vadd.f32 %v3852_v13, %v3847_v31 }
 0xd7c   :  { %v3854_v5 = vmul.f32 0.004, %v3853_v51 }
 0xd7d   :  { %v3861_v52 = vpop.permute.xlu1 %3860 }
 0xd7e   :  { %v3855_v7 = vadd.f32 1e-05, %v3854_v5 }
 0xd80   :  { %13758 = vrsqrt.f32 %v3855_v7 }
 0xd81   :  { %v3867_v41 = vpop.permute.xlu0 %3866  ;;  %v18477_v30 = vpop.permute.xlu1 %4465 }
 0xd85   :  { %v4686_v5 = vpop.permute.xlu1 %4685  ;;  %v4763_v10 = vpop.permute.xlu0 %4762 }
 0xd8a   :  { %v13759_v28 = vpop.eup %13758 }
 0xd8b   :  { %v3857_v16 = vmul.f32 %v13759_v28, %v3843_v44  ;;  %v3870_v58 = vmul.f32 %v13759_v28, %v18182_v63 }
 0xd8d   :  { %v3863_v1 = vmul.f32 %v3861_v52, %v3857_v16  ;;  %v3871_v19 = vmul.f32 %v3870_v58, %v3861_v52 }
 0xd8f   :  { %v3869_v33 = vadd.f32 %v3867_v41, %v3863_v1  ;;  %v3872_v6 = vadd.f32 %v3871_v19, %v3867_v41 }
 0xd91   :  { %11213 = vmatmul.mubr.msk.f32.vlgmr.msra.gmra.mrb[28].mxu0 %vm21475_vm2, %v3869_v33  ;;  %11248 = vmatmul.mubr.msk.f32.vlgmr.msra.gmra.mrb[32].mxu1 %vm21476_vm5, %v3869_v33  ;;  %vm21479_vm2 = vnez %v21375_v55  ;;  %vm21480_vm5 = vnez %v21379_v18  ;;  %v5193_v55 = vld [vmem:[%s19445_s11] sm:$0xff] }
 0xd92   :  { %13176 = vmatpush3.bf16.msk.msra.mxu0 %vm21477_vm6, %v20247_v26  ;;  %13201 = vmatpush3.bf16.msk.msra.mxu1 %vm21329_vm15, %v20247_v26 }
 0xd93   :  { %13177 = vmatprep.subr.bf16.mxu0 %v13794_v37  ;;  %13202 = vmatprep.subr.bf16.mxu1 %v13794_v37 }
 0xd94   :  { %11282 = vmatprep.mubr.msk.f32.mxu0 %vm21170_vm12, %v20560_v2  ;;  %11317 = vmatprep.mubr.msk.f32.mxu1 %vm21170_vm12, %v20560_v2 }
 0xd96   :  { %13179 = vmatpush3.bf16.msk.msra.mxu0 %vm21478_vm8, %v20247_v26  ;;  %13204 = vmatpush3.bf16.msk.msra.mxu1 %vm21450_vm10, %v20247_v26  ;;  %vm21481_vm10 = vnez %v21383_v46 }
 0xd97   :  { %13180 = vmatprep.subr.bf16.mxu0 %v13794_v37  ;;  %13205 = vmatprep.subr.bf16.mxu1 %v13794_v37 }
 0xd9a   :  { %13182 = vmatpush3.bf16.msk.msra.mxu0 %vm21479_vm2, %v20247_v26  ;;  %13207 = vmatpush3.bf16.msk.msra.mxu1 %vm21452_vm0, %v20247_v26 }
 0xd9b   :  { %13183 = vmatprep.subr.bf16.mxu0 %v13794_v37  ;;  %13208 = vmatprep.subr.bf16.mxu1 %v13794_v37 }
 0xd9e   :  { %13185 = vmatpush3.bf16.msk.msra.mxu0 %vm21480_vm5, %v20247_v26  ;;  %13210 = vmatpush3.bf16.msk.msra.mxu1 %vm21454_vm13, %v20247_v26  ;;  %vm21483_vm13 = vcmp.eq.s32.totalorder %v21270_v45, %v21482_v3  ;;  %v5194_v45 = vld [vmem:[%s19445_s11 + $0x8] sm:$0xff] }
 0xd9f   :  { %13186 = vmatprep.subr.bf16.mxu0 %v13794_v37  ;;  %13211 = vmatprep.subr.bf16.mxu1 %v13794_v37  ;;  %v1232_v44 = vsel %vm21483_vm13, 1.0, %v20560_v2  ;;  %vm21486_vm13 = vcmask 1044480  }
 0xda0   :  { %v13196_v4 = vpack.c.bf16 %v1232_v44, %v20886_v36 }
 0xda2   :  { %13188 = vmatpush3.bf16.msk.msra.mxu0 %vm21481_vm10, %v20247_v26  ;;  %13213 = vmatpush3.bf16.msk.msra.mxu1 %vm21456_vm11, %v20247_v26  ;;  %vm21484_vm11 = vnez %v21391_v53 }
 0xda3   :  { %13189 = vmatprep.subr.bf16.mxu0 %v13794_v37  ;;  %13214 = vmatprep.subr.bf16.mxu1 %v13794_v37 }
 0xda6   :  { %13191 = vmatpush3.bf16.msk.msra.mxu0 %vm21388_vm7, %v20247_v26  ;;  %13216 = vmatpush3.bf16.msk.msra.mxu1 %vm21458_vm3, %v20247_v26  ;;  %vm21485_vm3 = vcmp.eq.s32.totalorder %v21269_v54, %v21482_v3  ;;  %v5205_v54 = vpop.permute.xlu0 %5204 }
 0xda7   :  { %13192 = vmatprep.subr.bf16.mxu0 %v13794_v37  ;;  %13217 = vmatprep.subr.bf16.mxu1 %v13794_v37  ;;  %vm18325_vm0 = vmpackc.low %vm21486_vm13, %vm21485_vm3  ;;  %vm21493_vm3 = vnez %v20916_v27  ;;  %vm21494_vm13 = vnez %v20922_v21 }
 0xdaa   :  { %13194 = vmatpush3.bf16.msk.msra.mxu0 %vm21484_vm11, %v20247_v26  ;;  %13219 = vmatpush3.bf16.msk.msra.mxu1 %vm21460_vm14, %v20247_v26  ;;  %vm21489_vm14 = vcmask 1022976  }
 0xdab   :  { %13195 = vmatprep.subr.bf16.mxu0 %v13794_v37  ;;  %13220 = vmatprep.subr.bf16.mxu1 %v13794_v37  ;;  %vm21490_vm15 = vmmov %vm21489_vm14 }
 0xdae   :  { %13198 = vmatpush3.bf16.msk.msra.mxu0 %vm18325_vm0, %v13196_v4  ;;  %13223 = vmatpush3.bf16.msk.msra.mxu1 %vm18234_vm4, %v13146_v24  ;;  %vm21492_vm4 = vnez %v20910_v15 }
 0xdaf   :  { %13224 = vmatprep.subr.bf16.mxu0 %v13794_v37  ;;  %13249 = vmatprep.subr.bf16.mxu1 %v13794_v37 }
 0xdb1   :  { %11283 = vmatmul.mubr.msk.f32.vlgmr.msra.gmra.mrb[30].mxu0 %vm21489_vm14, %v3869_v33  ;;  %11318 = vmatmul.mubr.msk.f32.vlgmr.msra.gmra.mrb[34].mxu1 %vm21490_vm15, %v3872_v6  ;;  %vm21491_vm15 = vnez %v20904_v49  ;;  %vm21495_vm14 = vnez %v20928_v62 }
 0xdb2   :  { %13226 = vmatpush3.bf16.msk.msra.mxu0 %vm20899_vm1, %v20247_v26  ;;  %13251 = vmatpush3.bf16.msk.msra.mxu1 %vm21477_vm6, %v20247_v26 }
 0xdb3   :  { %13227 = vmatprep.subr.bf16.mxu0 %v13794_v37  ;;  %13252 = vmatprep.subr.bf16.mxu1 %v13794_v37 }
 0xdb4   :  { %11352 = vmatprep.mubr.msk.f32.mxu0 %vm21170_vm12, %v20560_v2  ;;  %11387 = vmatprep.mubr.msk.f32.mxu1 %vm21170_vm12, %v20560_v2 }
 0xdb6   :  { %13229 = vmatpush3.bf16.msk.msra.mxu0 %vm21491_vm15, %v20247_v26  ;;  %13254 = vmatpush3.bf16.msk.msra.mxu1 %vm21478_vm8, %v20247_v26 }
 0xdb7   :  { %13230 = vmatprep.subr.bf16.mxu0 %v13794_v37  ;;  %13255 = vmatprep.subr.bf16.mxu1 %v13794_v37 }
 0xdba   :  { %13232 = vmatpush3.bf16.msk.msra.mxu0 %vm21492_vm4, %v20247_v26  ;;  %13257 = vmatpush3.bf16.msk.msra.mxu1 %vm21479_vm2, %v20247_v26 }
 0xdbb   :  { %13233 = vmatprep.subr.bf16.mxu0 %v13794_v37  ;;  %13258 = vmatprep.subr.bf16.mxu1 %v13794_v37 }
 0xdbe   :  { %13235 = vmatpush3.bf16.msk.msra.mxu0 %vm21493_vm3, %v20247_v26  ;;  %13260 = vmatpush3.bf16.msk.msra.mxu1 %vm21480_vm5, %v20247_v26  ;;  %vm21496_vm5 = vnez %v20934_v38  ;;  %vm21502_vm3 = vcmp.eq.s32.totalorder %v21230_v40, %v21131_v43 }
 0xdbf   :  { %13236 = vmatprep.subr.bf16.mxu0 %v13794_v37  ;;  %13261 = vmatprep.subr.bf16.mxu1 %v13794_v37  ;;  %v700_v27 = vsel %vm21502_vm3, 1.0, %v20560_v2 }
 0xdc0   :  { %v18443_v62 = vpack.c.bf16 %v700_v27, %v20886_v36 }
 0xdc2   :  { %13238 = vmatpush3.bf16.msk.msra.mxu0 %vm21494_vm13, %v20247_v26  ;;  %13263 = vmatpush3.bf16.msk.msra.mxu1 %vm21481_vm10, %v20247_v26  ;;  %vm21503_vm13 = vcmp.eq.s32.totalorder %v21230_v40, %v21465_v56 }
 0xdc3   :  { %13239 = vmatprep.subr.bf16.mxu0 %v13794_v37  ;;  %13264 = vmatprep.subr.bf16.mxu1 %v13794_v37  ;;  %v958_v21 = vsel %vm21503_vm13, 1.0, %v20560_v2 }
 0xdc4   :  { %v13297_v38 = vpack.c.bf16 %v958_v21, %v20886_v36 }
 0xdc6   :  { %13241 = vmatpush3.bf16.msk.msra.mxu0 %vm21495_vm14, %v20247_v26  ;;  %13266 = vmatpush3.bf16.msk.msra.mxu1 %vm21388_vm7, %v20247_v26  ;;  %vm21497_vm7 = vcmask 1022976   ;;  %vm21504_vm14 = vcmp.eq.s32.totalorder %v21229_v11, %v21131_v43 }
 0xdc7   :  { %13242 = vmatprep.subr.bf16.mxu0 %v13794_v37  ;;  %13267 = vmatprep.subr.bf16.mxu1 %v13794_v37  ;;  %vm21498_vm10 = vmmov %vm21497_vm7 }
 0xdca   :  { %13244 = vmatpush3.bf16.msk.msra.mxu0 %vm21496_vm5, %v20247_v26  ;;  %13269 = vmatpush3.bf16.msk.msra.mxu1 %vm21484_vm11, %v20247_v26  ;;  %vm21499_vm11 = vnez %v21328_v39  ;;  %vm21505_vm5 = vcmask 1045504  }
 0xdcb   :  { %13245 = vmatprep.subr.bf16.mxu0 %v13794_v37  ;;  %13270 = vmatprep.subr.bf16.mxu1 %v13794_v37  ;;  %vm21509_vm3 = vmmov %vm21505_vm5 }
 0xdce   :  { %13248 = vmatpush3.bf16.msk.msra.mxu0 %vm18244_vm9, %v18228_v34  ;;  %13273 = vmatpush3.bf16.msk.msra.mxu1 %vm18325_vm0, %v13196_v4  ;;  %vm21500_vm9 = vnez %v21333_v12  ;;  %vm21501_vm0 = vnez %v21337_v42 }
 0xdcf   :  { %13274 = vmatprep.subr.bf16.mxu0 %v13794_v37  ;;  %13287 = vmatprep.subr.bf16.mxu1 %v13794_v37 }
 0xdd1   :  { %11353 = vmatmul.mubr.msk.f32.vlgmr.msra.gmra.mrb[32].mxu0 %vm21497_vm7, %v3872_v6  ;;  %11388 = vmatmul.mubr.msk.f32.vlgmr.msra.gmra.mrb[36].mxu1 %vm21498_vm10, %v3872_v6  ;;  %vm18450_vm7 = vmpackc.low %vm21505_vm5, %vm21504_vm14  ;;  %vm21508_vm10 = vcmp.eq.s32.totalorder %v21229_v11, %v21465_v56  ;;  %vm20090_vm14 = vcmask 506880   ;;  %vm20089_vm5 = vcmask 64512   ;;  %v5367_v6 = vld [vmem:[%s19447_s13] sm:$0xff] }
 0xdd2   :  { %13276 = vmatpush3.bf16.msk.msra.mxu0 %vm21499_vm11, %v20247_v26  ;;  %13289 = vmatpush3.bf16.msk.msra.mxu1 %vm20899_vm1, %v20247_v26  ;;  %vm18461_vm13 = vmpackc.low %vm21509_vm3, %vm21508_vm10  ;;  %vm21512_vm10 = vcmp.eq.s32.totalorder %v21230_v40, %v21482_v3  ;;  %vm21513_vm3 = vcmp.eq.s32.totalorder %v21229_v11, %v21482_v3 }
 0xdd3   :  { %13277 = vmatprep.subr.bf16.mxu0 %v13794_v37  ;;  %13290 = vmatprep.subr.bf16.mxu1 %v13794_v37  ;;  %v1216_v50 = vsel %vm21512_vm10, 1.0, %v20560_v2  ;;  %vm21517_vm10 = vcmask 506880  }
 0xdd4   :  { %11406 = vmatprep.mubr.msk.f32.mxu0 %vm21170_vm12, %v20560_v2  ;;  %11425 = vmatprep.mubr.msk.f32.mxu1 %vm21170_vm12, %v20560_v2  ;;  %v18502_v13 = vpack.c.bf16 %v1216_v50, %v20886_v36 }
 0xdd6   :  { %13279 = vmatpush3.bf16.msk.msra.mxu0 %vm21500_vm9, %v20247_v26  ;;  %13292 = vmatpush3.bf16.msk.msra.mxu1 %vm21491_vm15, %v20247_v26 }
 0xdd7   :  { %13280 = vmatprep.subr.bf16.mxu0 %v13794_v37  ;;  %13293 = vmatprep.subr.bf16.mxu1 %v13794_v37 }
 0xdda   :  { %13282 = vmatpush3.bf16.msk.msra.mxu0 %vm21501_vm0, %v20247_v26  ;;  %13295 = vmatpush3.bf16.msk.msra.mxu1 %vm21492_vm4, %v20247_v26 }
 0xddb   :  { %13283 = vmatprep.subr.bf16.mxu0 %v13794_v37  ;;  %13296 = vmatprep.subr.bf16.mxu1 %v13794_v37 }
 0xdde   :  { %13286 = vmatpush3.bf16.msk.msra.mxu0 %vm18450_vm7, %v18443_v62  ;;  %13299 = vmatpush3.bf16.msk.msra.mxu1 %vm18461_vm13, %v13297_v38 }
 0xddf   :  { %11428 = vmatprep.subr.mxu0 %v20560_v2  ;;  %11457 = vmatprep.subr.mxu1 %v20560_v2 }
 0xe64   :  { %v3945_v43 = vpop.f32.mrb[28].mxu0  ;;  %v4018_v46 = vpop.f32.mrb[32].mxu1 }
 0xe65   :  { %v4095_v25 = vmax.f32 %v3945_v43, %v4018_v46  ;;  %v11214_v53 = vpop.f32.mrb[29].mxu0  ;;  %v11249_v63 = vpop.f32.mrb[33].mxu1 }
 0xe66   :  { %v5200_v43 = vpop.permute.xlu1 %5199 }
 0xe84   :  { %v4091_v20 = vpop.f32.mrb[30].mxu0  ;;  %v4166_v14 = vpop.f32.mrb[34].mxu1 }
 0xe85   :  { %v4096_v0 = vmax.f32 %v4095_v25, %v4091_v20  ;;  %v11284_v35 = vpop.f32.mrb[31].mxu0  ;;  %v11319_v8 = vpop.f32.mrb[35].mxu1 }
 0xe86   :  { %v5368_v35 = vld [vmem:[%s19447_s13 + $0x8] sm:$0xff] }
 0xe87   :  { %11407 = vmatmul.mubr.msk.f32.vlgmr.msra.gmra.mrb[34].mxu0 %vm20090_vm14, %v4096_v0  ;;  %11426 = vmatmul.mubr.msk.f32.vlgmr.msra.gmra.mrb[38].mxu1 %vm20090_vm14, %v4096_v0  ;;  %v21529_v8 = vld [vmem:[#allocation6_spill] sm:$0xff] }
 0xe88   :  { %11430 = vmatprep.mubr.msk.f32.mxu0 %vm21170_vm12, %v20560_v2  ;;  %11459 = vmatprep.mubr.msk.f32.mxu1 %vm21170_vm12, %v20560_v2 }
 0xea4   :  { %v4236_v22 = vpop.f32.mrb[32].mxu0  ;;  %v4306_v59 = vpop.f32.mrb[36].mxu1 }
 0xea5   :  { %v4310_v57 = vmax.f32 %v4166_v14, %v4236_v22  ;;  %v11354_v61 = vpop.f32.mrb[33].mxu0  ;;  %v11389_v56 = vpop.f32.mrb[37].mxu1 }
 0xea6   :  { %v21533_v61 = vld [vmem:[#allocation9_spill] sm:$0xff] }
 0xea7   :  { %v18475_v60 = vmax.f32 %v4310_v57, %v4306_v59  ;;  %v21532_v59 = vld [vmem:[#allocation10_spill] sm:$0xff] }
 0xf5a   :  { %v4387_v47 = vpop.f32.mrb[34].mxu0  ;;  %v4460_v24 = vpop.f32.mrb[38].mxu1 }
 0xf5b   :  { %v11408_v34 = vpop.f32.mrb[35].mxu0  ;;  %v11427_v32 = vpop.f32.mrb[39].mxu1  ;;  %11429 = vmatpush3.msra.mxu0 %v4460_v24 }
 0xf5c   :  { %11431 = vmatmul.mubr.msk.f32.vlgmr.msra.gmra.mrb[36].mxu0 %vm20089_vm5, %v18477_v30  ;;  %11433 = vmatprep.subr.mxu0 %v20560_v2  ;;  %v5550_v34 = vadd.s32 1, %v21529_v8 }
 0xf5d   :  { %11434 = vmatpush3.msra.mxu0 %v4387_v47  ;;  %11435 = vmatprep.mubr.msk.f32.mxu0 %vm21170_vm12, %v20560_v2 }
 0xf5e   :  { %13300 = vmatprep.subr.bf16.mxu0 %v13794_v37 }
 0xf60   :  { %11436 = vmatmul.mubr.msk.f32.vlgmr.msra.gmra.mrb[38].mxu0 %vm20089_vm5, %v18194_v9  ;;  %vm21514_vm5 = vcmask 1045504  }
 0xf61   :  { %13302 = vmatpush3.bf16.msk.msra.mxu0 %vm21477_vm6, %v20247_v26  ;;  %11454 = vmatprep.mubr.msk.f32.mxu0 %vm21170_vm12, %v20560_v2  ;;  %vm18512_vm14 = vmpackc.low %vm21514_vm5, %vm21513_vm3  ;;  %vm5542_vm5 = vcmp.eq.s32.totalorder %v21192_v23, %v21529_v8  ;;  %vm5543_vm3 = vcmp.eq.s32.totalorder %v21193_v17, %v21529_v8 }
 0xf62   :  { %13303 = vmatprep.subr.bf16.mxu0 %v13794_v37 }
 0xf65   :  { %13305 = vmatpush3.bf16.msk.msra.mxu0 %vm21478_vm8, %v20247_v26 }
 0xf66   :  { %13306 = vmatprep.subr.bf16.mxu0 %v13794_v37 }
 0xf69   :  { %13308 = vmatpush3.bf16.msk.msra.mxu0 %vm21479_vm2, %v20247_v26 }
 0xf6a   :  { %13309 = vmatprep.subr.bf16.mxu0 %v13794_v37 }
 0xf6d   :  { %13312 = vmatpush3.bf16.msk.msra.mxu0 %vm18512_vm14, %v18502_v13 }
 0xf6e   :  { %13326 = vmatprep.subr.bf16.mxu0 %v13794_v37 }
 0xf70   :  { %11455 = vmatmul.mubr.msk.f32.vlgmr.msra.gmra.mrb[40].mxu0 %vm21517_vm10, %v4096_v0 }
 0xf71   :  { %13328 = vmatpush3.bf16.msk.msra.mxu0 %vm20899_vm1, %v20247_v26  ;;  %11497 = vmatprep.mubr.msk.f32.mxu0 %vm21170_vm12, %v20560_v2  ;;  %vm21518_vm1 = vmmov %vm21517_vm10 }
 0xf72   :  { %13329 = vmatprep.subr.bf16.mxu0 %v13794_v37  ;;  %vm18617_vm10 = vmpackc.low %vm5543_vm3, %vm5542_vm5  ;;  %vm5553_vm3 = vcmp.eq.s32.totalorder %v21533_v61, %v5550_v34 }
 0xf75   :  { %13331 = vmatpush3.bf16.msk.msra.mxu0 %vm21491_vm15, %v20247_v26  ;;  %vm21519_vm15 = vcmask 64512  }
 0xf76   :  { %13332 = vmatprep.subr.bf16.mxu0 %v13794_v37 }
 0xf79   :  { %13334 = vmatpush3.bf16.msk.msra.mxu0 %vm21492_vm4, %v20247_v26  ;;  %vm21520_vm4 = vmmov %vm21518_vm1 }
 0xf7a   :  { %13335 = vmatprep.subr.bf16.mxu0 %v13794_v37 }
 0xf7d   :  { %13338 = vmatpush3.bf16.msk.msra.mxu0 %vm18461_vm13, %v13297_v38  ;;  %vm5381_vm13 = vcmask 130048  }
 0xf7e   :  { %11529 = vmatprep.subr.mxu0 %v20560_v2 }
 0xf80   :  { %11498 = vmatmul.mubr.msk.f32.vlgmr.msra.gmra.mrb[42].mxu0 %vm21518_vm1, %v18475_v60 }
 0xf81   :  { %11531 = vmatprep.mubr.msk.f32.mxu0 %vm21170_vm12, %v20560_v2 }
0x102f   :  { %v4536_v40 = vpop.f32.mrb[36].mxu0 }
0x1030   :  { %v11432_v11 = vpop.f32.mrb[37].mxu0 }
0x1033   :  { %v4608_v29 = vpop.f32.mrb[38].mxu0 }
0x1034   :  { %v4609_v49 = vadd.f32 %v4608_v29, %v4536_v40  ;;  %v11437_v51 = vpop.f32.mrb[39].mxu0  ;;  %v5379_v29 = vpop.permute.xlu0 %5378 }
0x1043   :  { %v4681_v15 = vpop.f32.mrb[40].mxu0 }
0x1044   :  { %v11456_v7 = vpop.f32.mrb[41].mxu0  ;;  %11458 = vmatpush3.msra.mxu1 %v4681_v15  ;;  %v5374_v15 = vpop.permute.xlu1 %5373 }
0x1045   :  { %11460 = vmatmul.mubr.msk.f32.vlgmr.msra.gmra.mrb[40].mxu1 %vm21519_vm15, %v4686_v5  ;;  %13313 = vmatprep.subr.bf16.mxu1 %v13794_v37 }
0x1046   :  { %13315 = vmatpush3.bf16.msk.msra.mxu1 %vm21499_vm11, %v20247_v26  ;;  %11478 = vmatprep.mubr.msk.f32.mxu1 %vm21170_vm12, %v20560_v2  ;;  %vm21521_vm11 = vmmov %vm21519_vm15  ;;  %vm5544_vm15 = vcmp.eq.s32.totalorder %v21533_v61, %v21529_v8 }
0x1047   :  { %13316 = vmatprep.subr.bf16.mxu1 %v13794_v37 }
0x104a   :  { %13318 = vmatpush3.bf16.msk.msra.mxu1 %vm21500_vm9, %v20247_v26  ;;  %vm21522_vm9 = vmmov %vm21521_vm11 }
0x104b   :  { %13319 = vmatprep.subr.bf16.mxu1 %v13794_v37 }
0x104e   :  { %13321 = vmatpush3.bf16.msk.msra.mxu1 %vm21501_vm0, %v20247_v26 }
0x104f   :  { %13322 = vmatprep.subr.bf16.mxu1 %v13794_v37 }
0x1052   :  { %13325 = vmatpush3.bf16.msk.msra.mxu1 %vm18450_vm7, %v18443_v62 }
0x1053   :  { %v4906_v39 = vpop.f32.mrb[42].mxu0  ;;  %11500 = vmatprep.subr.mxu1 %v20560_v2 }
0x1054   :  { %v11499_v28 = vpop.f32.mrb[43].mxu0 }
0x1055   :  { %11479 = vmatmul.mubr.msk.f32.vlgmr.msra.gmra.mrb[42].mxu1 %vm21520_vm4, %v18475_v60  ;;  %vm21534_vm4 = vcmask 1045504  }
0x1056   :  { %11501 = vmatpush3.msra.mxu1 %v4906_v39  ;;  %11502 = vmatprep.mubr.msk.f32.mxu1 %vm21170_vm12, %v20560_v2 }
0x1057   :  { %11505 = vmatprep.subr.mxu1 %v20560_v2 }
0x1059   :  { %11503 = vmatmul.mubr.msk.f32.vlgmr.msra.gmra.mrb[44].mxu1 %vm21521_vm11, %v18477_v30  ;;  %vm18634_vm11 = vmpackc.low %vm21534_vm4, %vm5544_vm15  ;;  %v5559_v30 = vadd.s32 2, %v21529_v8 }
0x105a   :  { %11507 = vmatprep.mubr.msk.f32.mxu1 %vm21170_vm12, %v20560_v2 }
0x105b   :  { %vm5562_vm15 = vcmp.eq.s32.totalorder %v21533_v61, %v5559_v30  ;;  %v10189_v61 = vld [vmem:[%s19449_s15 + $0x58] sm:$0xf] }
0x1118   :  { %v4755_v12 = vpop.f32.mrb[40].mxu1 }
0x1119   :  { %v4759_v42 = vadd.f32 %v4755_v12, %v4609_v49  ;;  %v11461_v16 = vpop.f32.mrb[41].mxu1 }
0x111b   :  { %v4765_v44 = vadd.f32 %v4763_v10, %v4759_v42 }
0x111d   :  { %v4766_v58 = vmax.f32 %v4765_v44, 0.0 }
0x1128   :  { %v4836_v52 = vpop.f32.mrb[42].mxu1 }
0x1129   :  { %v11480_v1 = vpop.f32.mrb[43].mxu1  ;;  %11506 = vmatpush3.msra.mxu1 %v4836_v52 }
0x112a   :  { %11508 = vmatmul.mubr.msk.f32.vlgmr.msra.gmra.mrb[46].mxu1 %vm21522_vm9, %v18194_v9  ;;  %13339 = vmatprep.subr.bf16.mxu1 %v13794_v37  ;;  %v18916_v1 = vld [vmem:[%s19449_s15 + $0xd0] sm:$0xff] }
0x112b   :  { %13341 = vmatpush3.bf16.msk.msra.mxu1 %vm21477_vm6, %v20247_v26  ;;  %11526 = vmatprep.mubr.msk.f32.mxu1 %vm21170_vm12, %v20560_v2  ;;  %vm21523_vm6 = vmmov %vm21518_vm1  ;;  %vm5545_vm1 = vcmp.eq.s32.totalorder %v21532_v59, %v21529_v8  ;;  %v10187_v8 = vld [vmem:[%s19449_s15 + $0x48] sm:$0xff] }
0x112c   :  { %v4976_v41 = vpop.f32.mrb[44].mxu1  ;;  %13342 = vmatprep.subr.bf16.mxu1 %v13794_v37  ;;  %v5549_v57 = vsel %vm5545_vm1, 1.0, %v20560_v2  ;;  %vm5568_vm1 = vcmask 244736  }
0x112d   :  { %v11504_v33 = vpop.f32.mrb[45].mxu1  ;;  %v13364_v56 = vpack.c.bf16 %v5549_v57, %v20886_v36  ;;  %v18812_v57 = vld [vmem:[%s19449_s15 + $0x50] sm:$0xff] }
0x112f   :  { %13344 = vmatpush3.bf16.msk.msra.mxu1 %vm21478_vm8, %v20247_v26  ;;  %vm21524_vm8 = vmmov %vm21522_vm9  ;;  %vm5560_vm9 = vcmp.eq.s32.totalorder %v21192_v23, %v5559_v30 }
0x1130   :  { %13345 = vmatprep.subr.bf16.mxu1 %v13794_v37 }
0x1133   :  { %13347 = vmatpush3.bf16.msk.msra.mxu1 %vm21479_vm2, %v20247_v26  ;;  %vm21525_vm2 = vmmov %vm21524_vm8 }
0x1134   :  { %13348 = vmatprep.subr.bf16.mxu1 %v13794_v37  ;;  %vm21526_vm0 = vmmov %vm21525_vm2 }
0x1135   :  { %vm21527_vm7 = vmmov %vm21526_vm0 }
0x1137   :  { %13351 = vmatpush3.bf16.msk.msra.mxu1 %vm18512_vm14, %v18502_v13  ;;  %vm21528_vm14 = vmmov %vm21526_vm0 }
0x113a   :  { %11527 = vmatmul.mubr.msk.f32.vlgmr.msra.gmra.mrb[48].mxu1 %vm21523_vm6, %v18475_v60  ;;  %vm5561_vm6 = vcmp.eq.s32.totalorder %v21193_v17, %v5559_v30  ;;  %v10192_v60 = vld [vmem:[%s19449_s15 + $0x60] sm:$0xff] }
0x113b   :  { %11555 = vmatprep.mubr.msk.f32.mxu1 %vm5381_vm13, %v5367_v6 }
0x11fd   :  { %v5046_v48 = vpop.f32.mrb[46].mxu1 }
0x11fe   :  { %v5047_v9 = vadd.f32 %v5046_v48, %v4976_v41  ;;  %v11509_v3 = vpop.f32.mrb[47].mxu1  ;;  %v6058_v48 = vld [vmem:[%s19449_s15] sm:$0xff] }
0x120d   :  { %v5116_v4 = vpop.f32.mrb[48].mxu1 }
0x120e   :  { %v11528_v19 = vpop.f32.mrb[49].mxu1  ;;  %11530 = vmatpush3.msra.mxu0 %v5116_v4 }
0x120f   :  { %11532 = vmatmul.mubr.msk.f32.vlgmr.msra.gmra.mrb[44].mxu0 %vm21524_vm8, %v4686_v5  ;;  %11534 = vmatprep.subr.mxu0 %v4766_v58  ;;  %vm18645_vm8 = vmpackc.low %vm5561_vm6, %vm5560_vm9  ;;  %v18736_v19 = vld [vmem:[%s19449_s15 + $0x10] sm:$0xff] }
0x1210   :  { %11535 = vmatpush3.msra.mxu0 %v4766_v58  ;;  %11536 = vmatprep.mubr.msk.f32.mxu0 %vm21525_vm2, %v5193_v55  ;;  %vm5551_vm2 = vcmp.eq.s32.totalorder %v21192_v23, %v5550_v34  ;;  %vm18671_vm9 = vmpackc.low %vm21534_vm4, %vm5553_vm3 }
0x1211   :  { %vm21543_vm6 = vmmov %vm21534_vm4 }
0x1213   :  { %11537 = vmatmul.mubr.msk.f32.vlgmr.msra.gmra.mrb[46].mxu0 %vm21526_vm0, %v5194_v45  ;;  %vm5552_vm0 = vcmp.eq.s32.totalorder %v21193_v17, %v5550_v34 }
0x1214   :  { %11541 = vmatprep.mubr.msk.f32.mxu0 %vm21527_vm7, %v5193_v55  ;;  %vm5554_vm7 = vcmp.eq.s32.totalorder %v21532_v59, %v5550_v34  ;;  %vm18657_vm5 = vmpackc.low %vm5552_vm0, %vm5551_vm2  ;;  %v18838_v34 = vld [vmem:[%s19449_s15 + $0x70] sm:$0xff]  ;;  %vm7371_vm0 = vcmask 523264  }
0x1215   :  { %v5558_v23 = vsel %vm5554_vm7, 1.0, %v20560_v2  ;;  %vm18681_vm2 = vmpackc.low %vm21543_vm6, %vm5562_vm15  ;;  %vm7445_vm7 = vcmask 73728  }
0x1216   :  { %v13374_v42 = vpack.c.bf16 %v5558_v23, %v20886_v36  ;;  %v18890_v23 = vld [vmem:[%s19449_s15 + $0xb0] sm:$0xff] }
0x12e2   :  { %v5186_v27 = vpop.f32.mrb[44].mxu0 }
0x12e3   :  { %v5190_v21 = vadd.f32 %v5186_v27, %v5047_v9  ;;  %v11533_v62 = vpop.f32.mrb[45].mxu0  ;;  %v6059_v9 = vld [vmem:[%s19449_s15 + $0x8] sm:$0xff] }
0x12e4   :  { %v18731_v4 = vpack.c.bf16 %v6059_v9, %v6058_v48  ;;  %v10217_v48 = vld [vmem:[%s19449_s15 + $0xe8] sm:$0xff] }
0x12e5   :  { %v5191_v38 = vadd.f32 %v5190_v21, %v4763_v10 }
0x12e6   :  { %v11538_v18 = vpop.f32.mrb[46].mxu0 }
0x12e7   :  { %v5192_v46 = vmax.f32 %v5191_v38, 0.0  ;;  %v5285_v25 = vadd.f32 %v11538_v18, %v5205_v54  ;;  %v5279_v53 = vpop.f32.mrb[47].mxu0 }
0x12e8   :  { %v5280_v63 = vadd.f32 %v5279_v53, %v5200_v43 }
0x12e9   :  { %v5289_v20 = vmax.f32 %v5285_v25, 0.0  ;;  %11539 = vmatprep.subr.mxu0 %v5192_v46 }
0x12ea   :  { %v5288_v14 = vmax.f32 %v5280_v63, 0.0  ;;  %11540 = vmatpush3.msra.mxu0 %v5192_v46 }
0x12eb   :  { %11542 = vmatmul.mubr.msk.f32.vlgmr.msra.gmra.mrb[48].mxu0 %vm21528_vm14, %v5194_v45  ;;  %vm5563_vm14 = vcmp.eq.s32.totalorder %v21532_v59, %v5559_v30  ;;  %v6061_v45 = vld [vmem:[%s19449_s15 + $0x18] sm:$0xf]  ;;  %v10193_v30 = vld [vmem:[%s19449_s15 + $0x68] sm:$0xff] }
0x12ec   :  { %v13352_v0 = vpack.c.bf16 %v5289_v20, %v5288_v14  ;;  %11548 = vmatprep.mubr.msk.f32.mxu0 %vm5381_vm13, %v5367_v6  ;;  %v5567_v17 = vsel %vm5563_vm14, 1.0, %v20560_v2  ;;  %v13424_v27 = vpack.c.bf16 %v6061_v45, %v18736_v19  ;;  %v18781_v20 = vld [vmem:[%s19449_s15 + $0x30] sm:$0xff]  ;;  %v10183_v14 = vld [vmem:[%s19449_s15 + $0x38] sm:$0xf]  ;;  %v18831_v47 = vpack.c.bf16 %v10193_v30, %v10192_v60  ;;  %v10223_v45 = vld [vmem:[%s19449_s15 + $0x108] sm:$0xff] }
0x12ed   :  { %v13384_v52 = vpack.c.bf16 %v5567_v17, %v20886_v36  ;;  %v10207_v17 = vld [vmem:[%s19449_s15 + $0xb8] sm:$0xf]  ;;  %v10240_v30 = vld [vmem:[%s19449_s15 + $0x160] sm:$0xff] }
0x12ee   :  { %13353 = vmatprep.subr.bf16.mxu0 %v13352_v0 }
0x12ef   :  { %13355 = vmatpush3.bf16.msra.mxu0 %v13352_v0  ;;  %v13431_v0 = vpack.c.bf16 %v10183_v14, %v18781_v20 }
0x12f0   :  { %13361 = vmatprep.subr.msk.bf16.mxu0 %vm18617_vm10, %v20247_v26 }
0x12f2   :  { %11549 = vmatmul.mubr.msk.f32.vlgmr.msra.gmra.mrb[50].mxu0 %vm5381_vm13, %v5368_v35 }
0x12f3   :  { %13363 = vmatpush3.bf16.msk.msra.mxu0 %vm18617_vm10, %v20247_v26 }
0x12f4   :  { %13366 = vmatprep.subr.msk.bf16.mxu0 %vm18634_vm11, %v13364_v56 }
0x12f7   :  { %13369 = vmatpush3.bf16.msk.msra.mxu0 %vm18634_vm11, %v13364_v56 }
0x12f8   :  { %13381 = vmatprep.subr.msk.bf16.mxu0 %vm18645_vm8, %v20247_v26 }
0x13be   :  { %v11543_v24 = vpop.f32.mrb[48].mxu0 }
0x13bf   :  { %v5362_v32 = vadd.f32 %v11543_v24, %v5205_v54  ;;  %v5356_v50 = vpop.f32.mrb[49].mxu0  ;;  %v10181_v54 = vld [vmem:[%s19449_s15 + $0x28] sm:$0xff] }
0x13c0   :  { %v5357_v13 = vadd.f32 %v5356_v50, %v5200_v43 }
0x13c1   :  { %v5366_v31 = vmax.f32 %v5362_v32, 0.0  ;;  %v10195_v32 = vld [vmem:[%s19449_s15 + $0x78] sm:$0xf] }
0x13c2   :  { %v5365_v40 = vmax.f32 %v5357_v13, 0.0  ;;  %v13445_v50 = vpack.c.bf16 %v10195_v32, %v18838_v34  ;;  %v10198_v13 = vld [vmem:[%s19449_s15 + $0x80] sm:$0xff] }
0x13c4   :  { %v13356_v11 = vpack.c.bf16 %v5366_v31, %v5365_v40  ;;  %v10199_v31 = vld [vmem:[%s19449_s15 + $0x88] sm:$0xff] }
0x13c5   :  { %v11550_v49 = vpop.f32.mrb[50].mxu0  ;;  %v18857_v40 = vpack.c.bf16 %v10199_v31, %v10198_v13  ;;  %v19046_v13 = vld [vmem:[%s19449_s15 + $0x170] sm:$0xff]  ;;  %v10243_v31 = vld [vmem:[%s19449_s15 + $0x178] sm:$0xf] }
0x13c6   :  { %v5460_v5 = vadd.f32 %v11550_v49, %v5379_v29  ;;  %v5454_v7 = vpop.f32.mrb[51].mxu0  ;;  %13357 = vmatprep.subr.bf16.mxu1 %v13356_v11  ;;  %v10201_v49 = vld [vmem:[%s19449_s15 + $0x98] sm:$0xf] }
0x13c7   :  { %v5455_v39 = vadd.f32 %v5454_v7, %v5374_v15  ;;  %13359 = vmatpush3.bf16.msra.mxu1 %v13356_v11 }
0x13c8   :  { %13371 = vmatprep.subr.msk.bf16.mxu1 %vm18657_vm5, %v20247_v26  ;;  %v5464_v12 = vmax.f32 %v5460_v5, 0.0  ;;  %v10205_v5 = vld [vmem:[%s19449_s15 + $0xa8] sm:$0xff] }
0x13c9   :  { %v5463_v28 = vmax.f32 %v5455_v39, 0.0 }
0x13ca   :  { %11556 = vmatmul.mubr.msk.f32.vlgmr.msra.gmra.mrb[50].mxu1 %vm5381_vm13, %v5368_v35  ;;  %vm13795_vm13 = vmmov 1   ;;  %v10186_v35 = vld [vmem:[%s19449_s15 + $0x40] sm:$0xff] }
0x13cb   :  { %11566 = vmatprep.mubr.msk.f32.mxu0 %vm5568_vm1, %v5463_v28  ;;  %13373 = vmatpush3.bf16.msk.msra.mxu1 %vm18657_vm5, %v20247_v26  ;;  %v18805_v22 = vpack.c.bf16 %v10187_v8, %v10186_v35  ;;  %v10235_v35 = vld [vmem:[%s19449_s15 + $0x148] sm:$0xff] }
0x13cc   :  { %11577 = vmatprep.mubr.msk.f32.mxu1 %vm5568_vm1, %v5463_v28  ;;  %11567 = vmatmul.mubr.msk.f32.vlgmr.msra.gmra.mrb[52].mxu0 %vm5568_vm1, %v5464_v12 }
0x13cd   :  { %13383 = vmatpush3.bf16.msk.msra.mxu0 %vm18645_vm8, %v20247_v26  ;;  %11588 = vmatprep.mubr.msk.f32.mxu0 %vm5568_vm1, %v5463_v28  ;;  %v13459_v28 = vpack.c.bf16 %v10207_v17, %v18890_v23  ;;  %v6051_v17 = vld [vmem:[%s19451_s17 + $0x10] sm:$0xff] }
0x13ce   :  { %13376 = vmatprep.subr.msk.bf16.mxu1 %vm18671_vm9, %v13374_v42  ;;  %13386 = vmatprep.subr.msk.bf16.mxu0 %vm18681_vm2, %v13384_v52 }
0x13cf   :  { %13379 = vmatpush3.bf16.msk.msra.mxu1 %vm18671_vm9, %v13374_v42 }
0x13d0   :  { %13391 = vmatprep.subr.msk.bf16.mxu1 %vm18617_vm10, %v20247_v26 }
0x13d1   :  { %13389 = vmatpush3.bf16.msk.msra.mxu0 %vm18681_vm2, %v13384_v52 }
0x13d2   :  { %11578 = vmatmul.mubr.msk.f32.vlgmr.msra.gmra.mrb[52].mxu1 %vm5568_vm1, %v5464_v12  ;;  %13401 = vmatprep.subr.msk.bf16.mxu0 %vm18657_vm5, %v20247_v26 }
0x13d3   :  { %13393 = vmatpush3.bf16.msk.msra.mxu1 %vm18617_vm10, %v20247_v26  ;;  %vm21546_vm10 = vcmask 1043456  }
0x13d4   :  { %11589 = vmatmul.mubr.msk.f32.vlgmr.msra.gmra.mrb[54].mxu0 %vm5568_vm1, %v5464_v12  ;;  %13396 = vmatprep.subr.msk.bf16.mxu1 %vm18634_vm11, %v13364_v56  ;;  %v10210_v12 = vld [vmem:[%s19449_s15 + $0xc0] sm:$0xff] }
0x13d5   :  { %13403 = vmatpush3.bf16.msk.msra.mxu0 %vm18657_vm5, %v20247_v26 }
0x13d6   :  { %13406 = vmatprep.subr.msk.bf16.mxu0 %vm18671_vm9, %v13374_v42 }
0x13d7   :  { %13399 = vmatpush3.bf16.msk.msra.mxu1 %vm18634_vm11, %v13364_v56  ;;  %vm18754_vm11 = vmpackc.low %vm21546_vm10, %vm13795_vm13  ;;  %v13438_v56 = vpack.c.bf16 %v10189_v61, %v18812_v57  ;;  %v19020_v61 = vld [vmem:[%s19449_s15 + $0x150] sm:$0xff] }
0x13d8   :  { %13411 = vmatprep.subr.msk.bf16.mxu1 %vm18645_vm8, %v20247_v26 }
0x13d9   :  { %13409 = vmatpush3.bf16.msk.msra.mxu0 %vm18671_vm9, %v13374_v42  ;;  %v10211_v42 = vld [vmem:[%s19449_s15 + $0xc8] sm:$0xff] }
0x13da   :  { %13420 = vmatprep.subr.bf16.mxu0 %v13794_v37  ;;  %v18909_v16 = vpack.c.bf16 %v10211_v42, %v10210_v12  ;;  %v19081_v12 = vld [vmem:[%s19449_s15 + $0x190] sm:$0xff]  ;;  %v10249_v42 = vld [vmem:[%s19449_s15 + $0x198] sm:$0xf] }
0x149d   :  { %v11557_v36 = vpop.f32.mrb[50].mxu1 }
0x149e   :  { %v5537_v41 = vadd.f32 %v11557_v36, %v5379_v29  ;;  %v5531_v33 = vpop.f32.mrb[51].mxu1  ;;  %v18864_v29 = vld [vmem:[%s19449_s15 + $0x90] sm:$0xff]  ;;  %v10213_v36 = vld [vmem:[%s19449_s15 + $0xd8] sm:$0xf] }
0x149f   :  { %v5532_v3 = vadd.f32 %v5531_v33, %v5374_v15  ;;  %v11568_v10 = vpop.f32.mrb[52].mxu0  ;;  %v13452_v51 = vpack.c.bf16 %v10201_v49, %v18864_v29  ;;  %v10204_v15 = vld [vmem:[%s19449_s15 + $0xa0] sm:$0xff] }
0x14a0   :  { %v5644_v44 = vpop.f32.mrb[53].mxu0  ;;  %v5541_v55 = vmax.f32 %v5537_v41, 0.0  ;;  %v18883_v7 = vpack.c.bf16 %v10205_v5, %v10204_v15  ;;  %v13466_v41 = vpack.c.bf16 %v10213_v36, %v18916_v1  ;;  %v10216_v33 = vld [vmem:[%s19449_s15 + $0xe0] sm:$0xff]  ;;  %v6052_v36 = vld [vmem:[%s19451_s17 + $0x18] sm:$0xff] }
0x14a1   :  { %v5540_v58 = vmax.f32 %v5532_v3, 0.0  ;;  %v18935_v9 = vpack.c.bf16 %v10217_v48, %v10216_v33  ;;  %v10246_v49 = vld [vmem:[%s19449_s15 + $0x180] sm:$0xff]  ;;  %v13508_v33 = vpack.c.bf16 %v10249_v42, %v19081_v12 }
0x14a2   :  { %v6049_v5 = vld [vmem:[%s19451_s17] sm:$0xff] }
0x14a3   :  { %11599 = vmatprep.mubr.msk.f32.mxu1 %vm5568_vm1, %v5540_v58  ;;  %11610 = vmatprep.mubr.msk.f32.mxu0 %vm5568_vm1, %v5540_v58  ;;  %v6053_v48 = vld [vmem:[%s19451_s17 + $0x20] sm:$0xff] }
0x14a4   :  { %11600 = vmatmul.mubr.msk.f32.vlgmr.msra.gmra.mrb[54].mxu1 %vm5568_vm1, %v5541_v55  ;;  %11611 = vmatmul.mubr.msk.f32.vlgmr.msra.gmra.mrb[56].mxu0 %vm5568_vm1, %v5541_v55 }
0x14a5   :  { %13413 = vmatpush3.bf16.msk.msra.mxu1 %vm18645_vm8, %v20247_v26  ;;  %13422 = vmatpush3.bf16.msra.mxu0 %v18731_v4  ;;  %v11579_v6 = vpop.f32.mrb[52].mxu1  ;;  %v10180_v26 = vld [vmem:[%s19449_s15 + $0x20] sm:$0xff]  ;;  %vm6062_vm8 = vcmask 228352  }
0x14a6   :  { %v5810_v21 = vmax.f32 %v11568_v10, %v11579_v6  ;;  %11621 = vmatprep.mubr.msk.f32.mxu1 %vm5568_vm1, %v5540_v58  ;;  %v5722_v62 = vpop.f32.mrb[53].mxu1  ;;  %13416 = vmatprep.subr.msk.bf16.mxu1 %vm18681_vm2, %v13384_v52  ;;  %v18775_v63 = vpack.c.bf16 %v10181_v54, %v10180_v26  ;;  %v18942_v10 = vld [vmem:[%s19449_s15 + $0xf0] sm:$0xff]  ;;  %v10228_v54 = vld [vmem:[%s19449_s15 + $0x120] sm:$0xff] }
0x14a7   :  { %v5809_v18 = vmax.f32 %v5644_v44, %v5722_v62  ;;  %v11590_v43 = vpop.f32.mrb[54].mxu0  ;;  %13423 = vmatprep.subr.bf16.mxu0 %v13794_v37  ;;  %11632 = vmatprep.mubr.msk.f32.mxu0 %vm21170_vm12, %v20560_v2  ;;  %v10219_v44 = vld [vmem:[%s19449_s15 + $0xf8] sm:$0xf] }
0x14a8   :  { %v18767_v46 = vmax.f32 %v5810_v21, %v11590_v43  ;;  %v5800_v25 = vpop.f32.mrb[55].mxu0  ;;  %v13473_v58 = vpack.c.bf16 %v10219_v44, %v18942_v10  ;;  %v18968_v21 = vld [vmem:[%s19449_s15 + $0x110] sm:$0xff]  ;;  %v10225_v62 = vld [vmem:[%s19449_s15 + $0x118] sm:$0xf]  ;;  %v10252_v44 = vld [vmem:[%s19449_s15 + $0x1a0] sm:$0xff] }
0x14a9   :  { %v18769_v53 = vmax.f32 %v5809_v18, %v5800_v25  ;;  %13419 = vmatpush3.bf16.msk.msra.mxu1 %vm18681_vm2, %v13384_v52  ;;  %13426 = vmatpush3.bf16.msk.msra.mxu0 %vm18754_vm11, %v13424_v27  ;;  %v13480_v26 = vpack.c.bf16 %v10225_v62, %v18968_v21  ;;  %v10229_v18 = vld [vmem:[%s19449_s15 + $0x128] sm:$0xff]  ;;  %v18993_v25 = vld [vmem:[%s19449_s15 + $0x130] sm:$0xff] }
0x14aa   :  { %13427 = vmatprep.subr.bf16.mxu0 %v13794_v37  ;;  %13532 = vmatprep.subr.bf16.mxu1 %v13794_v37  ;;  %v18987_v43 = vpack.c.bf16 %v10229_v18, %v10228_v54  ;;  %v19118_v62 = vld [vmem:[%s19449_s15 + $0x1b0] sm:$0xff]  ;;  %v10258_v18 = vld [vmem:[%s19449_s15 + $0x1c0] sm:$0xff] }
0x14ab   :  { %v6145_v59 = vrot.slane %v18769_v53, 1  ;;  %v6227_v24 = vrot.slane %v18769_v53, 2  ;;  %v6309_v11 = vrot.slane %v18769_v53, 3  ;;  %v6391_v39 = vrot.slane %v18769_v53, 4 }
0x14ac   :  { %11622 = vmatmul.mubr.msk.f32.vlgmr.msra.gmra.mrb[56].mxu1 %vm5568_vm1, %v5541_v55  ;;  %11633 = vmatmul.mubr.msk.f32.vlgmr.msra.gmra.mrb[58].mxu0 %vm6062_vm8, %v18769_v53  ;;  %v6473_v52 = vrot.slane %v18769_v53, 5  ;;  %v6555_v3 = vrot.slane %v18769_v53, 6  ;;  %v10222_v55 = vld [vmem:[%s19449_s15 + $0x100] sm:$0xff]  ;;  %v6637_v27 = vrot.slane %v18769_v53, 7  ;;  %v10231_v53 = vld [vmem:[%s19449_s15 + $0x138] sm:$0xf] }
0x14ad   :  { %13429 = vmatpush3.bf16.msra.mxu0 %v18775_v63  ;;  %11643 = vmatprep.mubr.msk.f32.mxu0 %vm21170_vm12, %v20560_v2  ;;  %v18961_v6 = vpack.c.bf16 %v10223_v45, %v10222_v55  ;;  %v13487_v14 = vpack.c.bf16 %v10231_v53, %v18993_v25  ;;  %v10259_v53 = vld [vmem:[%s19449_s15 + $0x1c8] sm:$0xff] }
0x14ae   :  { %13430 = vmatprep.subr.bf16.mxu0 %v13794_v37  ;;  %11816 = vmatprep.mubr.msk.f32.mxu1 %vm21170_vm12, %v20560_v2 }
0x14b1   :  { %13433 = vmatpush3.bf16.msk.msra.mxu0 %vm18754_vm11, %v13431_v0  ;;  %v10234_v0 = vld [vmem:[%s19449_s15 + $0x140] sm:$0xff] }
0x14b2   :  { %13434 = vmatprep.subr.bf16.mxu0 %v13794_v37  ;;  %v19013_v8 = vpack.c.bf16 %v10235_v35, %v10234_v0  ;;  %v7129_v0 = vrot.slane %v18767_v46, 5  ;;  %v19145_v35 = vld [vmem:[%s19449_s15 + $0x1d0] sm:$0xff] }
0x14b4   :  { %11644 = vmatmul.mubr.msk.f32.vlgmr.msra.gmra.mrb[58].mxu0 %vm6062_vm8, %v6145_v59  ;;  %v6801_v59 = vrot.slane %v18767_v46, 1 }
0x14b5   :  { %13436 = vmatpush3.bf16.msra.mxu0 %v18805_v22  ;;  %11654 = vmatprep.mubr.msk.f32.mxu0 %vm21170_vm12, %v20560_v2 }
0x14b6   :  { %13437 = vmatprep.subr.bf16.mxu0 %v13794_v37 }
0x14b9   :  { %13440 = vmatpush3.bf16.msk.msra.mxu0 %vm18754_vm11, %v13438_v56  ;;  %v10237_v56 = vld [vmem:[%s19449_s15 + $0x158] sm:$0xf] }
0x14ba   :  { %13441 = vmatprep.subr.bf16.mxu0 %v13794_v37  ;;  %v13494_v60 = vpack.c.bf16 %v10237_v56, %v19020_v61 }
0x14bc   :  { %11655 = vmatmul.mubr.msk.f32.vlgmr.msra.gmra.mrb[58].mxu0 %vm6062_vm8, %v6227_v24  ;;  %v10241_v24 = vld [vmem:[%s19449_s15 + $0x168] sm:$0xff] }
0x14bd   :  { %13443 = vmatpush3.bf16.msra.mxu0 %v18831_v47  ;;  %11665 = vmatprep.mubr.msk.f32.mxu0 %vm21170_vm12, %v20560_v2  ;;  %v19039_v32 = vpack.c.bf16 %v10241_v24, %v10240_v30  ;;  %v10265_v30 = vld [vmem:[%s19449_s15 + $0x1e8] sm:$0xff] }
0x14be   :  { %13444 = vmatprep.subr.bf16.mxu0 %v13794_v37 }
0x14c1   :  { %13447 = vmatpush3.bf16.msk.msra.mxu0 %vm18754_vm11, %v13445_v50  ;;  %v6883_v50 = vrot.slane %v18767_v46, 2 }
0x14c2   :  { %13448 = vmatprep.subr.bf16.mxu0 %v13794_v37 }
0x14c4   :  { %11666 = vmatmul.mubr.msk.f32.vlgmr.msra.gmra.mrb[58].mxu0 %vm6062_vm8, %v6309_v11  ;;  %v13501_v11 = vpack.c.bf16 %v10243_v31, %v19046_v13  ;;  %v19171_v31 = vld [vmem:[%s19449_s15 + $0x1f0] sm:$0xff] }
0x14c5   :  { %13450 = vmatpush3.bf16.msra.mxu0 %v18857_v40  ;;  %11676 = vmatprep.mubr.msk.f32.mxu0 %vm21170_vm12, %v20560_v2 }
0x14c6   :  { %13451 = vmatprep.subr.bf16.mxu0 %v13794_v37 }
0x14c9   :  { %13454 = vmatpush3.bf16.msk.msra.mxu0 %vm18754_vm11, %v13452_v51  ;;  %v10247_v51 = vld [vmem:[%s19449_s15 + $0x188] sm:$0xff] }
0x14ca   :  { %13455 = vmatprep.subr.bf16.mxu0 %v13794_v37  ;;  %v19065_v15 = vpack.c.bf16 %v10247_v51, %v10246_v49  ;;  %v7293_v51 = vrot.slane %v18767_v46, 7 }
0x14cc   :  { %11677 = vmatmul.mubr.msk.f32.vlgmr.msra.gmra.mrb[58].mxu0 %vm6062_vm8, %v6391_v39  ;;  %v6050_v39 = vld [vmem:[%s19451_s17 + $0x8] sm:$0xff] }
0x14cd   :  { %13457 = vmatpush3.bf16.msra.mxu0 %v18883_v7  ;;  %11687 = vmatprep.mubr.msk.f32.mxu0 %vm21170_vm12, %v20560_v2 }
0x14ce   :  { %13458 = vmatprep.subr.bf16.mxu0 %v13794_v37 }
0x14d1   :  { %13461 = vmatpush3.bf16.msk.msra.mxu0 %vm18754_vm11, %v13459_v28  ;;  %v6965_v28 = vrot.slane %v18767_v46, 3 }
0x14d2   :  { %13462 = vmatprep.subr.bf16.mxu0 %v13794_v37 }
0x14d4   :  { %11688 = vmatmul.mubr.msk.f32.vlgmr.msra.gmra.mrb[58].mxu0 %vm6062_vm8, %v6473_v52  ;;  %v13533_v52 = vpack.c.bf16 %v6050_v39, %v6049_v5 }
0x14d5   :  { %13464 = vmatpush3.bf16.msra.mxu0 %v18909_v16  ;;  %11698 = vmatprep.mubr.msk.f32.mxu0 %vm21170_vm12, %v20560_v2 }
0x14d6   :  { %13465 = vmatprep.subr.bf16.mxu0 %v13794_v37  ;;  %13534 = vmatpush3.bf16.msra.mxu1 %v13533_v52 }
0x14d7   :  { %13535 = vmatprep.subr.bf16.mxu1 %v13794_v37 }
0x14d9   :  { %13468 = vmatpush3.bf16.msk.msra.mxu0 %vm18754_vm11, %v13466_v41  ;;  %v13536_v41 = vpack.c.bf16 %v6052_v36, %v6051_v17  ;;  %v6056_v17 = vld [vmem:[%s19451_s17 + $0x38] sm:$0xff] }
0x14da   :  { %13469 = vmatprep.subr.bf16.mxu0 %v13794_v37 }
0x14db   :  { %13537 = vmatpush3.bf16.msra.mxu1 %v13536_v41 }
0x14dc   :  { %11699 = vmatmul.mubr.msk.f32.vlgmr.msra.gmra.mrb[58].mxu0 %vm6062_vm8, %v6555_v3  ;;  %v6054_v3 = vld [vmem:[%s19451_s17 + $0x28] sm:$0xff]  ;;  %13538 = vmatprep.subr.bf16.mxu1 %v13794_v37 }
0x14dd   :  { %13471 = vmatpush3.bf16.msra.mxu0 %v18935_v9  ;;  %11709 = vmatprep.mubr.msk.f32.mxu0 %vm21170_vm12, %v20560_v2  ;;  %v13539_v55 = vpack.c.bf16 %v6054_v3, %v6053_v48 }
0x14de   :  { %13472 = vmatprep.subr.bf16.mxu0 %v13794_v37 }
0x14df   :  { %13540 = vmatpush3.bf16.msra.mxu1 %v13539_v55 }
0x14e0   :  { %13541 = vmatprep.subr.bf16.mxu1 %v13794_v37 }
0x14e1   :  { %13475 = vmatpush3.bf16.msk.msra.mxu0 %vm18754_vm11, %v13473_v58  ;;  %v10253_v58 = vld [vmem:[%s19449_s15 + $0x1a8] sm:$0xff] }
0x14e2   :  { %13476 = vmatprep.subr.bf16.mxu0 %v13794_v37  ;;  %v19110_v45 = vpack.c.bf16 %v10253_v58, %v10252_v44  ;;  %v19206_v58 = vld [vmem:[%s19450_s16] sm:$0x1] }
0x14e4   :  { %11710 = vmatmul.mubr.msk.f32.vlgmr.msra.gmra.mrb[58].mxu0 %vm6062_vm8, %v6637_v27  ;;  %v7047_v27 = vrot.slane %v18767_v46, 4 }
0x14e5   :  { %13478 = vmatpush3.bf16.msra.mxu0 %v18961_v6  ;;  %11720 = vmatprep.mubr.msk.f32.mxu0 %vm21170_vm12, %v20560_v2 }
0x14e6   :  { %13479 = vmatprep.subr.bf16.mxu0 %v13794_v37 }
0x14e9   :  { %13482 = vmatpush3.bf16.msk.msra.mxu0 %vm18754_vm11, %v13480_v26  ;;  %v10255_v26 = vld [vmem:[%s19449_s15 + $0x1b8] sm:$0xf] }
0x14ea   :  { %13483 = vmatprep.subr.bf16.mxu0 %v13794_v37  ;;  %v13515_v54 = vpack.c.bf16 %v10255_v26, %v19118_v62 }
0x14ec   :  { %11721 = vmatmul.mubr.msk.f32.vlgmr.msra.gmra.mrb[58].mxu0 %vm6062_vm8, %v18767_v46 }
0x14ed   :  { %13485 = vmatpush3.bf16.msra.mxu0 %v18987_v43  ;;  %11731 = vmatprep.mubr.msk.f32.mxu0 %vm21170_vm12, %v20560_v2 }
0x14ee   :  { %13486 = vmatprep.subr.bf16.mxu0 %v13794_v37 }
0x14f1   :  { %13489 = vmatpush3.bf16.msk.msra.mxu0 %vm18754_vm11, %v13487_v14  ;;  %v19138_v14 = vpack.c.bf16 %v10259_v53, %v10258_v18  ;;  %v7450_v18 = vld [vmem:[%s19449_s15 + $0x18] sm:$0xf] }
0x14f2   :  { %13490 = vmatprep.subr.bf16.mxu0 %v13794_v37  ;;  %v13548_v53 = vpack.c.bf16 %v7450_v18, %v18736_v19 }
0x14f4   :  { %11732 = vmatmul.mubr.msk.f32.vlgmr.msra.gmra.mrb[58].mxu0 %vm6062_vm8, %v6801_v59  ;;  %v10261_v59 = vld [vmem:[%s19449_s15 + $0x1d8] sm:$0xf] }
0x14f5   :  { %13492 = vmatpush3.bf16.msra.mxu0 %v19013_v8  ;;  %11742 = vmatprep.mubr.msk.f32.mxu0 %vm21170_vm12, %v20560_v2  ;;  %v13522_v56 = vpack.c.bf16 %v10261_v59, %v19145_v35  ;;  %v10282_v59 = vld [vmem:[%s19449_s15 + $0x58] sm:$0xf] }
0x14f6   :  { %13493 = vmatprep.subr.bf16.mxu0 %v13794_v37 }
0x14f9   :  { %13496 = vmatpush3.bf16.msk.msra.mxu0 %vm18754_vm11, %v13494_v60  ;;  %v10264_v60 = vld [vmem:[%s19449_s15 + $0x1e0] sm:$0xff] }
0x14fa   :  { %13497 = vmatprep.subr.bf16.mxu0 %v13794_v37  ;;  %v19164_v24 = vpack.c.bf16 %v10265_v30, %v10264_v60  ;;  %v10294_v60 = vld [vmem:[%s19449_s15 + $0x98] sm:$0xf] }
0x14fb   :  { %v10300_v30 = vld [vmem:[%s19449_s15 + $0xb8] sm:$0xf] }
0x14fc   :  { %11743 = vmatmul.mubr.msk.f32.vlgmr.msra.gmra.mrb[58].mxu0 %vm6062_vm8, %v6883_v50  ;;  %v7211_v50 = vrot.slane %v18767_v46, 6  ;;  %v6055_v46 = vld [vmem:[%s19451_s17 + $0x30] sm:$0xff] }
0x14fd   :  { %13499 = vmatpush3.bf16.msra.mxu0 %v19039_v32  ;;  %11753 = vmatprep.mubr.msk.f32.mxu0 %vm21170_vm12, %v20560_v2  ;;  %v13542_v36 = vpack.c.bf16 %v6056_v17, %v6055_v46  ;;  %v10348_v46 = vld [vmem:[%s19449_s15 + $0x1b8] sm:$0xf] }
0x14fe   :  { %13500 = vmatprep.subr.bf16.mxu0 %v13794_v37  ;;  %v10354_v17 = vld [vmem:[%s19449_s15 + $0x1d8] sm:$0xf] }
0x14ff   :  { %13543 = vmatpush3.bf16.msra.mxu1 %v13542_v36 }
0x1500   :  { %13544 = vmatprep.subr.bf16.mxu1 %v13794_v37 }
0x1501   :  { %13503 = vmatpush3.bf16.msk.msra.mxu0 %vm18754_vm11, %v13501_v11  ;;  %v10267_v11 = vld [vmem:[%s19449_s15 + $0x1f8] sm:$0xf] }
0x1502   :  { %13504 = vmatprep.subr.bf16.mxu0 %v13794_v37  ;;  %v13529_v49 = vpack.c.bf16 %v10267_v11, %v19171_v31  ;;  %v10312_v11 = vld [vmem:[%s19449_s15 + $0xf8] sm:$0xf] }
0x1504   :  { %11754 = vmatmul.mubr.msk.f32.vlgmr.msra.gmra.mrb[58].mxu0 %vm6062_vm8, %v6965_v28 }
0x1505   :  { %13506 = vmatpush3.bf16.msra.mxu0 %v19065_v15  ;;  %11764 = vmatprep.mubr.msk.f32.mxu0 %vm21170_vm12, %v20560_v2 }
0x1506   :  { %13507 = vmatprep.subr.bf16.mxu0 %v13794_v37 }
0x1509   :  { %13510 = vmatpush3.bf16.msk.msra.mxu0 %vm18754_vm11, %v13508_v33 }
0x150a   :  { %13511 = vmatprep.subr.bf16.mxu0 %v13794_v37 }
0x150c   :  { %11765 = vmatmul.mubr.msk.f32.vlgmr.msra.gmra.mrb[58].mxu0 %vm6062_vm8, %v7047_v27 }
0x150d   :  { %13513 = vmatpush3.bf16.msra.mxu0 %v19110_v45  ;;  %11775 = vmatprep.mubr.msk.f32.mxu0 %vm21170_vm12, %v20560_v2 }
0x150e   :  { %13514 = vmatprep.subr.bf16.mxu0 %v13794_v37 }
0x1511   :  { %13517 = vmatpush3.bf16.msk.msra.mxu0 %vm18754_vm11, %v13515_v54 }
0x1512   :  { %13518 = vmatprep.subr.bf16.mxu0 %v13794_v37 }
0x1514   :  { %11776 = vmatmul.mubr.msk.f32.vlgmr.msra.gmra.mrb[58].mxu0 %vm6062_vm8, %v7129_v0  ;;  %v10276_v0 = vld [vmem:[%s19449_s15 + $0x38] sm:$0xf] }
0x1515   :  { %13520 = vmatpush3.bf16.msra.mxu0 %v19138_v14  ;;  %11786 = vmatprep.mubr.msk.f32.mxu0 %vm21170_vm12, %v20560_v2 }
0x1516   :  { %13521 = vmatprep.subr.bf16.mxu0 %v13794_v37 }
0x1519   :  { %13524 = vmatpush3.bf16.msk.msra.mxu0 %vm18754_vm11, %v13522_v56  ;;  %v10288_v56 = vld [vmem:[%s19449_s15 + $0x78] sm:$0xf] }
0x151a   :  { %13525 = vmatprep.subr.bf16.mxu0 %v13794_v37 }
0x151c   :  { %11787 = vmatmul.mubr.msk.f32.vlgmr.msra.gmra.mrb[58].mxu0 %vm6062_vm8, %v7211_v50  ;;  %v10306_v50 = vld [vmem:[%s19449_s15 + $0xd8] sm:$0xf] }
0x151d   :  { %13527 = vmatpush3.bf16.msra.mxu0 %v19164_v24  ;;  %11797 = vmatprep.mubr.msk.f32.mxu0 %vm21170_vm12, %v20560_v2 }
0x151e   :  { %13528 = vmatprep.subr.bf16.mxu0 %v13794_v37 }
0x1521   :  { %13531 = vmatpush3.bf16.msk.msra.mxu0 %vm18754_vm11, %v13529_v49  ;;  %v10318_v49 = vld [vmem:[%s19449_s15 + $0x118] sm:$0xf] }
0x1522   :  { %13656 = vmatprep.subr.bf16.mxu0 %v13794_v37 }
0x1524   :  { %11798 = vmatmul.mubr.msk.f32.vlgmr.msra.gmra.mrb[58].mxu0 %vm6062_vm8, %v7293_v51  ;;  %v10330_v51 = vld [vmem:[%s19449_s15 + $0x158] sm:$0xf] }
0x1525   :  { %13658 = vmatpush3.bf16.msra.mxu0 %v13533_v52  ;;  %12011 = vmatprep.mubr.msk.f32.mxu0 %vm21170_vm12, %v20560_v2 }
0x1526   :  { %13659 = vmatprep.subr.bf16.mxu0 %v13794_v37 }
0x1529   :  { %13661 = vmatpush3.bf16.msra.mxu0 %v13536_v41 }
0x152a   :  { %13662 = vmatprep.subr.bf16.mxu0 %v13794_v37 }
0x152d   :  { %13664 = vmatpush3.bf16.msra.mxu0 %v13539_v55 }
0x152e   :  { %13665 = vmatprep.subr.bf16.mxu0 %v13794_v37 }
0x1531   :  { %13667 = vmatpush3.bf16.msra.mxu0 %v13542_v36 }
0x1577   :  { %v11601_v5 = vpop.f32.mrb[54].mxu1  ;;  %v11612_v39 = vpop.f32.mrb[56].mxu0 }
0x1578   :  { %v6045_v28 = vmax.f32 %v11601_v5, %v11612_v39  ;;  %v5885_v42 = vpop.f32.mrb[55].mxu1  ;;  %v5960_v52 = vpop.f32.mrb[57].mxu0  ;;  %v10336_v5 = vld [vmem:[%s19449_s15 + $0x178] sm:$0xf] }
0x1579   :  { %v6044_v41 = vmax.f32 %v5885_v42, %v5960_v52  ;;  %v10342_v39 = vld [vmem:[%s19449_s15 + $0x198] sm:$0xf]  ;;  %v6057_v42 = vld [vmem:[%s19452_s18] sm:$0x1]  ;;  %s13761_s18 = scalar_lea.vmem %s8825_s30, 32 }
0x157a   :  { %p13762_p0 = scmp.ne.s32.totalorder %s8825_s30, %s13761_s18  ;;  %p13767_p2 = scmp.lt.s32.totalorder %s13761_s18, %s13761_s18 }
0x157c   :  { %p13768_p3 = por %p13767_p2, %p13766_p1 }
0x157e   :  { %p13769_p4 = pnand %p13768_p3, %p13762_p0 }
0x157f   :  { %v11623_v33 = vpop.f32.mrb[56].mxu1 }
0x1580   :  { %v19199_v48 = vmax.f32 %v6045_v28, %v11623_v33  ;;  %v6035_v3 = vpop.f32.mrb[57].mxu1  ;;  %v10360_v28 = vld [vmem:[%s19449_s15 + $0x1f8] sm:$0xf] }
0x1581   :  { %v19201_v44 = vmax.f32 %v6044_v41, %v6035_v3 }
0x1583   :  { %v7532_v19 = vrot.slane %v19201_v44, 1 }
0x15f7   :  { %v7365_v55 = vpop.f32.mrb[58].mxu0 }
0x15f8   :  { %v13668_v27 = vadd.f32 %v7365_v55, %v19206_v58  ;;  %v11799_v26 = vpop.f32.mrb[59].mxu0 }
0x15fa   :  { %v7370_v54 = vmax.f32 %v13668_v27, 0.0 }
0x15fc   :  { %11817 = vmatmul.mubr.msk.f32.vlgmr.msra.gmra.mrb[58].mxu1 %vm7371_vm0, %v7370_v54 }
0x15fd   :  { %13546 = vmatpush3.bf16.msra.mxu1 %v18731_v4  ;;  %11827 = vmatprep.mubr.msk.f32.mxu1 %vm21170_vm12, %v20560_v2  ;;  %v13555_v4 = vpack.c.bf16 %v10276_v0, %v18781_v20  ;;  %v7613_v20 = vrot.slane %v19201_v44, 2 }
0x15fe   :  { %13547 = vmatprep.subr.bf16.mxu1 %v13794_v37 }
0x1601   :  { %13550 = vmatpush3.bf16.msk.msra.mxu1 %vm18754_vm11, %v13548_v53 }
0x1602   :  { %13551 = vmatprep.subr.bf16.mxu1 %v13794_v37 }
0x1604   :  { %11828 = vmatmul.mubr.msk.f32.vlgmr.msra.gmra.mrb[60].mxu1 %vm6062_vm8, %v19201_v44 }
0x1605   :  { %13553 = vmatpush3.bf16.msra.mxu1 %v18775_v63  ;;  %11838 = vmatprep.mubr.msk.f32.mxu1 %vm21170_vm12, %v20560_v2  ;;  %v13562_v63 = vpack.c.bf16 %v10282_v59, %v18812_v57  ;;  %v7694_v57 = vrot.slane %v19201_v44, 3 }
0x1606   :  { %13554 = vmatprep.subr.bf16.mxu1 %v13794_v37 }
0x1609   :  { %13557 = vmatpush3.bf16.msk.msra.mxu1 %vm18754_vm11, %v13555_v4 }
0x160a   :  { %13558 = vmatprep.subr.bf16.mxu1 %v13794_v37 }
0x160c   :  { %11839 = vmatmul.mubr.msk.f32.vlgmr.msra.gmra.mrb[60].mxu1 %vm6062_vm8, %v7532_v19 }
0x160d   :  { %13560 = vmatpush3.bf16.msra.mxu1 %v18805_v22  ;;  %11849 = vmatprep.mubr.msk.f32.mxu1 %vm21170_vm12, %v20560_v2  ;;  %v13569_v22 = vpack.c.bf16 %v10288_v56, %v18838_v34  ;;  %v7775_v34 = vrot.slane %v19201_v44, 4 }
0x160e   :  { %13561 = vmatprep.subr.bf16.mxu1 %v13794_v37 }
0x1611   :  { %13564 = vmatpush3.bf16.msk.msra.mxu1 %vm18754_vm11, %v13562_v63 }
0x1612   :  { %13565 = vmatprep.subr.bf16.mxu1 %v13794_v37 }
0x1614   :  { %11850 = vmatmul.mubr.msk.f32.vlgmr.msra.gmra.mrb[60].mxu1 %vm6062_vm8, %v7613_v20 }
0x1615   :  { %13567 = vmatpush3.bf16.msra.mxu1 %v18831_v47  ;;  %11860 = vmatprep.mubr.msk.f32.mxu1 %vm21170_vm12, %v20560_v2  ;;  %v13576_v47 = vpack.c.bf16 %v10294_v60, %v18864_v29  ;;  %v7856_v29 = vrot.slane %v19201_v44, 5 }
0x1616   :  { %13568 = vmatprep.subr.bf16.mxu1 %v13794_v37 }
0x1619   :  { %13571 = vmatpush3.bf16.msk.msra.mxu1 %vm18754_vm11, %v13569_v22 }
0x161a   :  { %13572 = vmatprep.subr.bf16.mxu1 %v13794_v37 }
0x161c   :  { %11861 = vmatmul.mubr.msk.f32.vlgmr.msra.gmra.mrb[60].mxu1 %vm6062_vm8, %v7694_v57 }
0x161d   :  { %13574 = vmatpush3.bf16.msra.mxu1 %v18857_v40  ;;  %11871 = vmatprep.mubr.msk.f32.mxu1 %vm21170_vm12, %v20560_v2  ;;  %v13583_v40 = vpack.c.bf16 %v10300_v30, %v18890_v23  ;;  %v7937_v23 = vrot.slane %v19201_v44, 6 }
0x161e   :  { %13575 = vmatprep.subr.bf16.mxu1 %v13794_v37 }
0x1621   :  { %13578 = vmatpush3.bf16.msk.msra.mxu1 %vm18754_vm11, %v13576_v47 }
0x1622   :  { %13579 = vmatprep.subr.bf16.mxu1 %v13794_v37 }
0x1624   :  { %11872 = vmatmul.mubr.msk.f32.vlgmr.msra.gmra.mrb[60].mxu1 %vm6062_vm8, %v7775_v34 }
0x1625   :  { %13581 = vmatpush3.bf16.msra.mxu1 %v18883_v7  ;;  %11882 = vmatprep.mubr.msk.f32.mxu1 %vm21170_vm12, %v20560_v2  ;;  %v13590_v7 = vpack.c.bf16 %v10306_v50, %v18916_v1  ;;  %v8018_v1 = vrot.slane %v19201_v44, 7 }
0x1626   :  { %13582 = vmatprep.subr.bf16.mxu1 %v13794_v37 }
0x1629   :  { %13585 = vmatpush3.bf16.msk.msra.mxu1 %vm18754_vm11, %v13583_v40 }
0x162a   :  { %13586 = vmatprep.subr.bf16.mxu1 %v13794_v37 }
0x162c   :  { %11883 = vmatmul.mubr.msk.f32.vlgmr.msra.gmra.mrb[60].mxu1 %vm6062_vm8, %v7856_v29 }
0x162d   :  { %13588 = vmatpush3.bf16.msra.mxu1 %v18909_v16  ;;  %11893 = vmatprep.mubr.msk.f32.mxu1 %vm21170_vm12, %v20560_v2  ;;  %v13597_v16 = vpack.c.bf16 %v10312_v11, %v18942_v10  ;;  %v10324_v10 = vld [vmem:[%s19449_s15 + $0x138] sm:$0xf] }
0x162e   :  { %13589 = vmatprep.subr.bf16.mxu1 %v13794_v37 }
0x1631   :  { %13592 = vmatpush3.bf16.msk.msra.mxu1 %vm18754_vm11, %v13590_v7 }
0x1632   :  { %13593 = vmatprep.subr.bf16.mxu1 %v13794_v37 }
0x1634   :  { %11894 = vmatmul.mubr.msk.f32.vlgmr.msra.gmra.mrb[60].mxu1 %vm6062_vm8, %v7937_v23 }
0x1635   :  { %13595 = vmatpush3.bf16.msra.mxu1 %v18935_v9  ;;  %11904 = vmatprep.mubr.msk.f32.mxu1 %vm21170_vm12, %v20560_v2  ;;  %v13604_v9 = vpack.c.bf16 %v10318_v49, %v18968_v21  ;;  %v8180_v21 = vrot.slane %v19199_v48, 1 }
0x1636   :  { %13596 = vmatprep.subr.bf16.mxu1 %v13794_v37 }
0x1639   :  { %13599 = vmatpush3.bf16.msk.msra.mxu1 %vm18754_vm11, %v13597_v16 }
0x163a   :  { %13600 = vmatprep.subr.bf16.mxu1 %v13794_v37 }
0x163c   :  { %11905 = vmatmul.mubr.msk.f32.vlgmr.msra.gmra.mrb[60].mxu1 %vm6062_vm8, %v8018_v1 }
0x163d   :  { %13602 = vmatpush3.bf16.msra.mxu1 %v18961_v6  ;;  %11915 = vmatprep.mubr.msk.f32.mxu1 %vm21170_vm12, %v20560_v2  ;;  %v13611_v6 = vpack.c.bf16 %v10324_v10, %v18993_v25  ;;  %v8261_v25 = vrot.slane %v19199_v48, 2 }
0x163e   :  { %13603 = vmatprep.subr.bf16.mxu1 %v13794_v37 }
0x1641   :  { %13606 = vmatpush3.bf16.msk.msra.mxu1 %vm18754_vm11, %v13604_v9 }
0x1642   :  { %13607 = vmatprep.subr.bf16.mxu1 %v13794_v37 }
0x1644   :  { %11916 = vmatmul.mubr.msk.f32.vlgmr.msra.gmra.mrb[60].mxu1 %vm6062_vm8, %v19199_v48 }
0x1645   :  { %13609 = vmatpush3.bf16.msra.mxu1 %v18987_v43  ;;  %11926 = vmatprep.mubr.msk.f32.mxu1 %vm21170_vm12, %v20560_v2  ;;  %v13618_v43 = vpack.c.bf16 %v10330_v51, %v19020_v61  ;;  %v8342_v61 = vrot.slane %v19199_v48, 3 }
0x1646   :  { %13610 = vmatprep.subr.bf16.mxu1 %v13794_v37 }
0x1649   :  { %13613 = vmatpush3.bf16.msk.msra.mxu1 %vm18754_vm11, %v13611_v6 }
0x164a   :  { %13614 = vmatprep.subr.bf16.mxu1 %v13794_v37 }
0x164c   :  { %11927 = vmatmul.mubr.msk.f32.vlgmr.msra.gmra.mrb[60].mxu1 %vm6062_vm8, %v8180_v21 }
0x164d   :  { %13616 = vmatpush3.bf16.msra.mxu1 %v19013_v8  ;;  %11937 = vmatprep.mubr.msk.f32.mxu1 %vm21170_vm12, %v20560_v2  ;;  %v13625_v8 = vpack.c.bf16 %v10336_v5, %v19046_v13  ;;  %v8423_v13 = vrot.slane %v19199_v48, 4 }
0x164e   :  { %13617 = vmatprep.subr.bf16.mxu1 %v13794_v37 }
0x1651   :  { %13620 = vmatpush3.bf16.msk.msra.mxu1 %vm18754_vm11, %v13618_v43 }
0x1652   :  { %13621 = vmatprep.subr.bf16.mxu1 %v13794_v37 }
0x1654   :  { %11938 = vmatmul.mubr.msk.f32.vlgmr.msra.gmra.mrb[60].mxu1 %vm6062_vm8, %v8261_v25 }
0x1655   :  { %13623 = vmatpush3.bf16.msra.mxu1 %v19039_v32  ;;  %11948 = vmatprep.mubr.msk.f32.mxu1 %vm21170_vm12, %v20560_v2  ;;  %v13632_v32 = vpack.c.bf16 %v10342_v39, %v19081_v12  ;;  %v8504_v12 = vrot.slane %v19199_v48, 5 }
0x1656   :  { %13624 = vmatprep.subr.bf16.mxu1 %v13794_v37 }
0x1659   :  { %13627 = vmatpush3.bf16.msk.msra.mxu1 %vm18754_vm11, %v13625_v8 }
0x165a   :  { %13628 = vmatprep.subr.bf16.mxu1 %v13794_v37 }
0x165c   :  { %11949 = vmatmul.mubr.msk.f32.vlgmr.msra.gmra.mrb[60].mxu1 %vm6062_vm8, %v8342_v61 }
0x165d   :  { %13630 = vmatpush3.bf16.msra.mxu1 %v19065_v15  ;;  %11959 = vmatprep.mubr.msk.f32.mxu1 %vm21170_vm12, %v20560_v2  ;;  %v13639_v15 = vpack.c.bf16 %v10348_v46, %v19118_v62  ;;  %v8585_v62 = vrot.slane %v19199_v48, 6 }
0x165e   :  { %13631 = vmatprep.subr.bf16.mxu1 %v13794_v37 }
0x1661   :  { %13634 = vmatpush3.bf16.msk.msra.mxu1 %vm18754_vm11, %v13632_v32 }
0x1662   :  { %13635 = vmatprep.subr.bf16.mxu1 %v13794_v37 }
0x1664   :  { %11960 = vmatmul.mubr.msk.f32.vlgmr.msra.gmra.mrb[60].mxu1 %vm6062_vm8, %v8423_v13 }
0x1665   :  { %13637 = vmatpush3.bf16.msra.mxu1 %v19110_v45  ;;  %11970 = vmatprep.mubr.msk.f32.mxu1 %vm21170_vm12, %v20560_v2  ;;  %v13646_v45 = vpack.c.bf16 %v10354_v17, %v19145_v35  ;;  %v8666_v35 = vrot.slane %v19199_v48, 7 }
0x1666   :  { %13638 = vmatprep.subr.bf16.mxu1 %v13794_v37 }
0x1669   :  { %13641 = vmatpush3.bf16.msk.msra.mxu1 %vm18754_vm11, %v13639_v15 }
0x166a   :  { %13642 = vmatprep.subr.bf16.mxu1 %v13794_v37 }
0x166c   :  { %11971 = vmatmul.mubr.msk.f32.vlgmr.msra.gmra.mrb[60].mxu1 %vm6062_vm8, %v8504_v12 }
0x166d   :  { %13644 = vmatpush3.bf16.msra.mxu1 %v19138_v14  ;;  %11981 = vmatprep.mubr.msk.f32.mxu1 %vm21170_vm12, %v20560_v2  ;;  %v13653_v14 = vpack.c.bf16 %v10360_v28, %v19171_v31 }
0x166e   :  { %13645 = vmatprep.subr.bf16.mxu1 %v13794_v37 }
0x1671   :  { %13648 = vmatpush3.bf16.msk.msra.mxu1 %vm18754_vm11, %v13646_v45 }
0x1672   :  { %13649 = vmatprep.subr.bf16.mxu1 %v13794_v37 }
0x1674   :  { %11982 = vmatmul.mubr.msk.f32.vlgmr.msra.gmra.mrb[60].mxu1 %vm6062_vm8, %v8585_v62 }
0x1675   :  { %13651 = vmatpush3.bf16.msra.mxu1 %v19164_v24  ;;  %11992 = vmatprep.mubr.msk.f32.mxu1 %vm21170_vm12, %v20560_v2 }
0x1676   :  { %13652 = vmatprep.subr.bf16.mxu1 %v13794_v37 }
0x1679   :  { %13655 = vmatpush3.bf16.msk.msra.mxu1 %vm18754_vm11, %v13653_v14 }
0x167c   :  { %11993 = vmatmul.mubr.msk.f32.vlgmr.msra.gmra.mrb[60].mxu1 %vm6062_vm8, %v8666_v35 }
0x16cf   :  { %v7441_v52 = vpop.f32.mrb[58].mxu1 }
0x16d0   :  { %v7442_v24 = vadd.f32 %v7441_v52, %v6057_v42  ;;  %v11818_v31 = vpop.f32.mrb[59].mxu1 }
0x16d2   :  { %7446 = vst.msk [vmem:[#allocation2] sm:$0x1] %vm7445_vm7, %v7442_v24 }
0x174f   :  { %v8738_v36 = vpop.f32.mrb[60].mxu1 }
0x1750   :  { %v13669_v2 = vadd.f32 %v8738_v36, %v19206_v58  ;;  %v11994_v37 = vpop.f32.mrb[61].mxu1 }
0x1752   :  { %v8743_v41 = vmax.f32 %v13669_v2, 0.0 }
0x1754   :  { %12012 = vmatmul.mubr.msk.f32.vlgmr.msra.gmra.mrb[60].mxu0 %vm7371_vm0, %v8743_v41 }
0x1827   :  { %v8813_v38 = vpop.f32.mrb[60].mxu0 }
0x1828   :  { %v8814_v33 = vadd.f32 %v8813_v38, %v6057_v42  ;;  %v12013_v48 = vpop.f32.mrb[61].mxu0 }
0x182a   :  { %8817 = vst.msk [vmem:[#allocation2 + $0x1] sm:$0x1] %vm7445_vm7, %v8814_v33 }
0x182b   :  { %13772 = shalt.err (!%p13769_p4)
}
0x182c   :  { %s13773_s6 = scalar_lea.hbm %s19453_s19, 32 }
0x182d   :  { %p13774_p5 = scmp.ne.s32.totalorder %s19453_s19, %s13773_s6  ;;  %p13777_p6 = scmp.lt.u32.totalorder %s13773_s6, %s19453_s19 }
0x182f   :  { %p13779_p7 = pnand %p13777_p6, %p13774_p5 }
0x1831   :  { %13782 = shalt.err (!%p13779_p7)
}
0x1832   :  { %8827 = dma.vmem_to_hbm [thread:$0]  %s8825_s30, 32, %s19453_s19, [#allocation3]  }
0x1833   :  { %13783 = dma.done.wait [#allocation3], 32  }
0x1834   :  { %13784 = vsyncadd [#allocation3], 4294967264 }
0x1835   :  { %8831 = vsyncpa [#allocation3], 1 }

</bundles_post_ra>
